<compile_context>
chip_gen: v5e
topology: v5e:2x2
jax: 0.10.0
libtpu: 0.0.40
codegen_flags: <defaults>
</compile_context>

<pallas_src>
import jax
import jax.numpy as jnp
from jax.experimental import pallas as pl
from jax.experimental.pallas import tpu as pltpu


# ------------------------- static model geometry -------------------------
CP = 128          # conv Cout/Cin padded to 128 -> lane-dense MXU tiles and stores
K1 = 32           # conv1 im2col contraction (9 taps * 3 cin = 27, zero-padded to 32)
PAD_COL = 8       # column offset of the conv2 interior inside the padded scratch
H1, W1, CIN1 = 32, 32, 3     # conv1 input
H2, W2 = 16, 16              # conv2 input (after pool1), channels carried 128-padded
HO, WO, C_FEAT = 8, 8, 64    # final pooled spatial size and real channel count (fc1 K = 4096)


# ------------------------- fused conv block kernel -------------------------
def _conv_block_kernel(c1_ref, w1_ref, b1_ref, w2_ref, b2_ref, o_ref,
                       acc1_ref, hp1_ref, xp2_ref, acc2_ref, hp2_ref):
    # ---- conv1: single MXU dot over the prebuilt im2col block, bias+ReLU fused into the store
    y1 = jnp.dot(c1_ref[...], w1_ref[...], preferred_element_type=jnp.float32)   # (1024, 128)
    acc1_ref[...] = jnp.maximum(y1 + b1_ref[...], 0.0).reshape(H1, W1, CP)

    # ---- pool1: 2x2/s2 max-pool via strided VMEM reads (rows on the leading dim, cols on sublanes)
    hp1_ref[...] = jnp.maximum(acc1_ref[pl.ds(0, H1 // 2, stride=2), :, :],
                               acc1_ref[pl.ds(1, H1 // 2, stride=2), :, :])
    pooled1 = jnp.maximum(hp1_ref[:, pl.ds(0, W1 // 2, stride=2), :],
                          hp1_ref[:, pl.ds(1, W1 // 2, stride=2), :])             # (16,16,128) f32

    # ---- zero-pad conv2 input in VMEM (bf16).  Re-zeroed every step on purpose: with "parallel"
    # grid semantics each TensorCore has its own scratch and only one core sees program_id == 0,
    # so a "zero once" guard would leave the other core's border uninitialized.
    xp2_ref[...] = jnp.zeros_like(xp2_ref)
    xp2_ref[pl.ds(1, H2), pl.ds(PAD_COL, W2), :] = pooled1.astype(xp2_ref.dtype)

    # ---- conv2: 9 taps of (256,128)@(128,128) bf16 dots, accumulated in registers (32 vregs)
    acc2 = jnp.zeros((H2 * W2, CP), jnp.float32)
    for k in range(9):                                   # static unroll over the 3x3 taps
        kh, kw = divmod(k, 3)
        patch = xp2_ref[pl.ds(kh, H2), pl.ds(PAD_COL - 1 + kw, W2), :]            # (16,16,128) bf16
        acc2 = acc2 + jnp.dot(patch.reshape(H2 * W2, CP), w2_ref[k],
                              preferred_element_type=jnp.float32)
    acc2_ref[...] = jnp.maximum(acc2 + b2_ref[...], 0.0).reshape(H2, W2, CP)      # single store

    # ---- pool2
    hp2_ref[...] = jnp.maximum(acc2_ref[pl.ds(0, HO, stride=2), :, :],
                               acc2_ref[pl.ds(1, HO, stride=2), :, :])
    pooled2 = jnp.maximum(hp2_ref[:, pl.ds(0, WO, stride=2), :],
                          hp2_ref[:, pl.ds(1, WO, stride=2), :])                  # (8,8,128)

    # rows = h*8+w, lanes = channel -> matches the flatten order folded into fc1_w (no transpose)
    o_ref[...] = pooled2[:, :, :C_FEAT].reshape(HO * WO, C_FEAT).astype(o_ref.dtype)


def conv_block(cols1, w1, b1, w2, b2):
    B = cols1.shape[0]
    return pl.pallas_call(
        _conv_block_kernel,
        out_shape=jax.ShapeDtypeStruct((B, HO * WO, C_FEAT), jnp.bfloat16),
        grid=(B,),
        in_specs=[
            pl.BlockSpec((None, H1 * W1, K1), lambda b: (b, 0, 0)),   # im2col block, one image/step
            pl.BlockSpec((K1, CP), lambda b: (0, 0)),                 # conv1 weight (bf16, resident)
            pl.BlockSpec((1, CP), lambda b: (0, 0)),                  # conv1 bias
            pl.BlockSpec((9, CP, CP), lambda b: (0, 0, 0)),           # conv2 weight (bf16, resident)
            pl.BlockSpec((1, CP), lambda b: (0, 0)),                  # conv2 bias
        ],
        out_specs=pl.BlockSpec((None, HO * WO, C_FEAT), lambda b: (b, 0, 0)),
        scratch_shapes=[
            pltpu.VMEM((H1, W1, CP), jnp.float32),                    # conv1 output (written once)
            pltpu.VMEM((H1 // 2, W1, CP), jnp.float32),               # conv1 row-pooled intermediate
            pltpu.VMEM((H2 + 2, PAD_COL + W2 + 8, CP), jnp.bfloat16), # padded conv2 input (bf16)
            pltpu.VMEM((H2, W2, CP), jnp.float32),                    # conv2 output (written once)
            pltpu.VMEM((H2 // 2, W2, CP), jnp.float32),               # conv2 row-pooled intermediate
        ],
        compiler_params=pltpu.CompilerParams(
            dimension_semantics=("parallel",),
        ),
    )(cols1, w1, b1, w2, b2)


# ------------------------- fused fc1 + ReLU + fc2 kernel (K-tiled) -------------------------
def _fc_kernel(x_ref, w1_ref, b1_ref, w2_ref, b2_ref, o_ref, h_ref):
    k = pl.program_id(0)

    @pl.when(k == 0)
    def _init():
        h_ref[...] = jnp.zeros_like(h_ref)

    # bf16 activations x bf16 weight tile, f32 accumulation in VMEM scratch
    h_ref[...] += jnp.dot(x_ref[...], w1_ref[...], preferred_element_type=jnp.float32)

    @pl.when(k == pl.num_programs(0) - 1)
    def _finalize():
        h = jnp.maximum(h_ref[...] + b1_ref[...], 0.0)
        o_ref[...] = (jnp.dot(h, w2_ref[...], preferred_element_type=jnp.float32)
                      + b2_ref[...]).astype(o_ref.dtype)


def fc_block(x, w1, b1, w2, b2, *, kt=512):
    B, K = x.shape
    N1 = w1.shape[1]
    NC = w2.shape[1]
    assert K % kt == 0
    return pl.pallas_call(
        _fc_kernel,
        out_shape=jax.ShapeDtypeStruct((B, NC), jnp.float32),
        grid=(K // kt,),
        in_specs=[
            pl.BlockSpec((B, kt), lambda k: (0, k)),       # activation K-slice
            pl.BlockSpec((kt, N1), lambda k: (k, 0)),      # fc1 weight K-tile (bf16, double-buffered)
            pl.BlockSpec((1, N1), lambda k: (0, 0)),
            pl.BlockSpec((N1, NC), lambda k: (0, 0)),
            pl.BlockSpec((1, NC), lambda k: (0, 0)),
        ],
        out_specs=pl.BlockSpec((B, NC), lambda k: (0, 0)),
        scratch_shapes=[pltpu.VMEM((B, N1), jnp.float32)],  # fc1 accumulator
        compiler_params=pltpu.CompilerParams(
            dimension_semantics=("arbitrary",),
        ),
    )(x, w1, b1, w2, b2)


# ------------------------- parameters -------------------------
def init_params(key, num_classes=10):
    """Raw parameters in PyTorch layouts (conv: OIHW, fc weights: (in, out) == torch weight.T)."""
    ks = jax.random.split(key, 8)
    p = {}
    p["conv1_w"] = jax.random.normal(ks[0], (32, 3, 3, 3), jnp.float32) * 0.05
    p["conv1_b"] = jax.random.normal(ks[1], (32,), jnp.float32) * 0.05
    p["conv2_w"] = jax.random.normal(ks[2], (64, 32, 3, 3), jnp.float32) * 0.05
    p["conv2_b"] = jax.random.normal(ks[3], (64,), jnp.float32) * 0.05
    p["fc1_w"] = jax.random.normal(ks[4], (64 * 8 * 8, 512), jnp.float32) * 0.02
    p["fc1_b"] = jax.random.normal(ks[5], (512,), jnp.float32) * 0.02
    p["fc2_w"] = jax.random.normal(ks[6], (512, num_classes), jnp.float32) * 0.02
    p["fc2_b"] = jax.random.normal(ks[7], (num_classes,), jnp.float32) * 0.02
    return p


def prepare_params(p):
    """One-time conversion from PyTorch layouts to kernel layouts (done at init, not per step)."""
    def taps(w_oihw):                       # OIHW -> (kh, kw, cin, cout)
        return jnp.transpose(w_oihw, (2, 3, 1, 0))

    q = {}
    # conv1 as an im2col matmul weight: rows ordered (kh, kw, cin), K padded 27->32, Cout -> 128
    w1 = taps(p["conv1_w"]).reshape(9 * CIN1, 32)
    q["conv1_w"] = jnp.pad(w1, ((0, K1 - 9 * CIN1), (0, CP - 32))).astype(jnp.bfloat16)
    q["conv1_b"] = jnp.pad(p["conv1_b"], (0, CP - 32)).reshape(1, CP)
    # conv2 per-tap weight (9, cin->128, cout->128), bf16
    w2 = taps(p["conv2_w"]).reshape(9, 32, 64)
    q["conv2_w"] = jnp.pad(w2, ((0, 0), (0, CP - 32), (0, CP - 64))).astype(jnp.bfloat16)
    q["conv2_b"] = jnp.pad(p["conv2_b"], (0, CP - 64)).reshape(1, CP)
    # fold torch's view(-1, 64*8*8) flatten order (c, h, w) into (h, w, c) row order so the NHWC
    # feature rows feed fc1 directly; store in bf16 (this layer is HBM-bandwidth bound).
    w1f = p["fc1_w"].reshape(C_FEAT, HO, WO, -1)
    w1f = jnp.transpose(w1f, (1, 2, 0, 3)).reshape(HO * WO * C_FEAT, -1)
    q["fc1_w"] = w1f.astype(jnp.bfloat16)
    q["fc1_b"] = p["fc1_b"].reshape(1, -1)
    q["fc2_w"] = p["fc2_w"]
    q["fc2_b"] = p["fc2_b"].reshape(1, -1)
    return q


# ------------------------- model forward -------------------------
def _im2col_3x3_same(x_nhwc):
    """(B,H,W,C) -> (B, H*W, 9*C) for a 3x3 / stride-1 / pad-1 conv, tap order (kh, kw, c).

    Pure layout plumbing on a tiny tensor (64 KB/image), kept in the wrapper so the conv kernel
    runs one dense MXU dot with zero per-tap accumulator traffic."""
    B, H, W, C = x_nhwc.shape
    xp = jnp.pad(x_nhwc, ((0, 0), (1, 1), (1, 1), (0, 0)))
    cols = [xp[:, kh:kh + H, kw:kw + W, :].reshape(B, H * W, C)
            for kh in range(3) for kw in range(3)]
    return jnp.concatenate(cols, axis=-1)


def simple_cnn_forward(params, x_nchw):
    B = x_nchw.shape[0]
    x = jnp.transpose(x_nchw, (0, 2, 3, 1)).astype(jnp.bfloat16)          # NCHW -> NHWC, bf16
    cols1 = _im2col_3x3_same(x)                                           # (B, 1024, 27)
    cols1 = jnp.pad(cols1, ((0, 0), (0, 0), (0, K1 - cols1.shape[-1])))   # K 27 -> 32 (zeros)
    feat = conv_block(cols1, params["conv1_w"], params["conv1_b"],
                      params["conv2_w"], params["conv2_b"])               # (B, 64, 64) bf16
    feat = feat.reshape(B, HO * WO * C_FEAT)                              # free contiguous reshape
    return fc_block(feat, params["fc1_w"], params["fc1_b"],
                    params["fc2_w"], params["fc2_b"])                     # (B, num_classes) f32


# ------------------------- pure-XLA reference (for the numeric check) -------------------------
def reference_forward(raw, x_nchw):
    x = jnp.transpose(x_nchw, (0, 2, 3, 1))

    def conv(x, w_oihw, b):
        w = jnp.transpose(w_oihw, (2, 3, 1, 0))                           # HWIO
        y = jax.lax.conv_general_dilated(
            x, w, window_strides=(1, 1), padding="SAME",
            dimension_numbers=("NHWC", "HWIO", "NHWC"))
        return jax.nn.relu(y + b)

    def pool(x):
        return jax.lax.reduce_window(x, -jnp.inf, jax.lax.max,
                                     (1, 2, 2, 1), (1, 2, 2, 1), "VALID")

    x = pool(conv(x, raw["conv1_w"], raw["conv1_b"]))
    x = pool(conv(x, raw["conv2_w"], raw["conv2_b"]))
    B = x.shape[0]
    x = jnp.transpose(x, (0, 3, 1, 2)).reshape(B, -1)                     # torch flatten order
    x = jax.nn.relu(x @ raw["fc1_w"] + raw["fc1_b"])
    return x @ raw["fc2_w"] + raw["fc2_b"]


if __name__ == "__main__":
    key = jax.random.PRNGKey(0)
    k_param, k_x = jax.random.split(key)
    raw = init_params(k_param, num_classes=10)
    params = prepare_params(raw)
    # spatial must be 32x32 so that after two 2x2 pools fc1 sees 64*8*8 features
    x = jax.random.normal(k_x, (2, 3, 32, 32), dtype=jnp.float32)

    fwd = jax.jit(simple_cnn_forward)
    out = jax.block_until_ready(fwd(params, x))
    assert out.shape == (2, 10), out.shape
    assert out.dtype == jnp.float32

    # numeric parity vs pure-XLA f32 reference (loose tol: conv/fc1 run with bf16 operands)
    ref = jax.block_until_ready(jax.jit(reference_forward)(raw, x))
    assert jnp.allclose(out, ref, rtol=5e-2, atol=5e-2), (out, ref)
    print("KERNEL_OK")
</pallas_src>

<mosaic_0001>
module attributes {stable_mosaic.version = 11 : i64} {
  func.func @_conv_block_kernel(%arg0: i32, %arg1: memref<1x1024x32xbf16, #tpu.memory_space<vmem>>, %arg2: memref<32x128xbf16, #tpu.memory_space<vmem>>, %arg3: memref<1x128xf32, #tpu.memory_space<vmem>>, %arg4: memref<9x128x128xbf16, #tpu.memory_space<vmem>>, %arg5: memref<1x128xf32, #tpu.memory_space<vmem>>, %arg6: memref<1x64x64xbf16, #tpu.memory_space<vmem>>, %arg7: memref<32x32x128xf32, #tpu.memory_space<vmem>>, %arg8: memref<16x32x128xf32, #tpu.memory_space<vmem>>, %arg9: memref<18x32x128xbf16, #tpu.memory_space<vmem>>, %arg10: memref<16x16x128xf32, #tpu.memory_space<vmem>>, %arg11: memref<8x16x128xf32, #tpu.memory_space<vmem>>) attributes {dimension_semantics = [#tpu.dimension_semantics<parallel>], iteration_bounds = array<i64: 2>, scalar_prefetch = 0 : i64, scratch_operands = 5 : i64, tpu.core_type = #tpu.core_type<tc>, window_params = [{transform_indices = @transform_0, window_bounds = array<i64: 1, 1024, 32>}, {pipeline_mode = #tpu.pipeline_mode<synchronous>, transform_indices = @transform_1, window_bounds = array<i64: 32, 128>}, {pipeline_mode = #tpu.pipeline_mode<synchronous>, transform_indices = @transform_2, window_bounds = array<i64: 1, 128>}, {pipeline_mode = #tpu.pipeline_mode<synchronous>, transform_indices = @transform_3, window_bounds = array<i64: 9, 128, 128>}, {pipeline_mode = #tpu.pipeline_mode<synchronous>, transform_indices = @transform_4, window_bounds = array<i64: 1, 128>}, {transform_indices = @transform_5, window_bounds = array<i64: 1, 64, 64>}]} {
    %c0 = arith.constant 0 : index
    %c0_0 = arith.constant 0 : index
    %c0_1 = arith.constant 0 : index
    %0 = vector.load %arg1[%c0, %c0_0, %c0_1] : memref<1x1024x32xbf16, #tpu.memory_space<vmem>>, vector<1x1024x32xbf16>
    %1 = vector.shape_cast %0 : vector<1x1024x32xbf16> to vector<1024x32xbf16>
    %c0_2 = arith.constant 0 : index
    %c0_3 = arith.constant 0 : index
    %2 = vector.load %arg2[%c0_2, %c0_3] : memref<32x128xbf16, #tpu.memory_space<vmem>>, vector<32x128xbf16>
    %cst = arith.constant dense<0.000000e+00> : vector<1024x128xf32>
    %3 = tpu.matmul %1, %2, %cst {dimension_numbers = #tpu.dot_dimension_numbers<[1], [0], [0], [1], [0, 0, 1, 1], [], []>} : vector<1024x32xbf16>, vector<32x128xbf16>, vector<1024x128xf32> -> vector<1024x128xf32>
    %c0_4 = arith.constant 0 : index
    %c0_5 = arith.constant 0 : index
    %4 = vector.load %arg3[%c0_4, %c0_5] : memref<1x128xf32, #tpu.memory_space<vmem>>, vector<1x128xf32>
    %5 = vector.broadcast %4 : vector<1x128xf32> to vector<1024x128xf32>
    %6 = arith.addf %3, %5 : vector<1024x128xf32>
    %cst_6 = arith.constant 0.000000e+00 : f32
    %7 = vector.broadcast %cst_6 : f32 to vector<1024x128xf32>
    %8 = arith.maximumf %6, %7 : vector<1024x128xf32>
    %9 = vector.shape_cast %8 : vector<1024x128xf32> to vector<32x32x128xf32>
    %c0_7 = arith.constant 0 : index
    %c0_8 = arith.constant 0 : index
    %c0_9 = arith.constant 0 : index
    %10 = vector.load %arg7[%c0_7, %c0_8, %c0_9] : memref<32x32x128xf32, #tpu.memory_space<vmem>>, vector<32x32x128xf32>
    tpu.vector_store %arg7[%c0_7, %c0_8, %c0_9], %9 {strides = array<i32>} : memref<32x32x128xf32, #tpu.memory_space<vmem>>, vector<32x32x128xf32>,
    %c0_10 = arith.constant 0 : index
    %c0_11 = arith.constant 0 : index
    %c0_12 = arith.constant 0 : index
    %11 = tpu.strided_load %arg7[%c0_10, %c0_11, %c0_12] {strides = array<i32: 2, 1, 1>} : memref<32x32x128xf32, #tpu.memory_space<vmem>>, vector<16x32x128xf32>
    %c1 = arith.constant 1 : index
    %c0_13 = arith.constant 0 : index
    %c0_14 = arith.constant 0 : index
    %12 = tpu.strided_load %arg7[%c1, %c0_13, %c0_14] {strides = array<i32: 2, 1, 1>} : memref<32x32x128xf32, #tpu.memory_space<vmem>>, vector<16x32x128xf32>
    %13 = arith.maximumf %11, %12 : vector<16x32x128xf32>
    %c0_15 = arith.constant 0 : index
    %c0_16 = arith.constant 0 : index
    %c0_17 = arith.constant 0 : index
    %14 = vector.load %arg8[%c0_15, %c0_16, %c0_17] : memref<16x32x128xf32, #tpu.memory_space<vmem>>, vector<16x32x128xf32>
    tpu.vector_store %arg8[%c0_15, %c0_16, %c0_17], %13 {strides = array<i32>} : memref<16x32x128xf32, #tpu.memory_space<vmem>>, vector<16x32x128xf32>,
    %c0_18 = arith.constant 0 : index
    %c0_19 = arith.constant 0 : index
    %c0_20 = arith.constant 0 : index
    %15 = tpu.strided_load %arg8[%c0_18, %c0_19, %c0_20] {strides = array<i32: 1, 2, 1>} : memref<16x32x128xf32, #tpu.memory_space<vmem>>, vector<16x16x128xf32>
    %c0_21 = arith.constant 0 : index
    %c1_22 = arith.constant 1 : index
    %c0_23 = arith.constant 0 : index
    %16 = tpu.strided_load %arg8[%c0_21, %c1_22, %c0_23] {strides = array<i32: 1, 2, 1>} : memref<16x32x128xf32, #tpu.memory_space<vmem>>, vector<16x16x128xf32>
    %17 = arith.maximumf %15, %16 : vector<16x16x128xf32>
    %cst_24 = arith.constant 0.000000e+00 : bf16
    %18 = vector.broadcast %cst_24 : bf16 to vector<18x32x128xbf16>
    %c0_25 = arith.constant 0 : index
    %c0_26 = arith.constant 0 : index
    %c0_27 = arith.constant 0 : index
    %19 = vector.load %arg9[%c0_25, %c0_26, %c0_27] : memref<18x32x128xbf16, #tpu.memory_space<vmem>>, vector<18x32x128xbf16>
    tpu.vector_store %arg9[%c0_25, %c0_26, %c0_27], %18 {strides = array<i32>} : memref<18x32x128xbf16, #tpu.memory_space<vmem>>, vector<18x32x128xbf16>,
    %20 = arith.truncf %17 : vector<16x16x128xf32> to vector<16x16x128xbf16>
    %c1_28 = arith.constant 1 : index
    %c8 = arith.constant 8 : index
    %c0_29 = arith.constant 0 : index
    %21 = vector.load %arg9[%c1_28, %c8, %c0_29] : memref<18x32x128xbf16, #tpu.memory_space<vmem>>, vector<16x16x128xbf16>
    tpu.vector_store %arg9[%c1_28, %c8, %c0_29], %20 {strides = array<i32>} : memref<18x32x128xbf16, #tpu.memory_space<vmem>>, vector<16x16x128xbf16>,
    %cst_30 = arith.constant 0.000000e+00 : f32
    %22 = vector.broadcast %cst_30 : f32 to vector<256x128xf32>
    %c0_31 = arith.constant 0 : index
    %c7 = arith.constant 7 : index
    %c0_32 = arith.constant 0 : index
    %23 = vector.load %arg9[%c0_31, %c7, %c0_32] : memref<18x32x128xbf16, #tpu.memory_space<vmem>>, vector<16x16x128xbf16>
    %24 = vector.shape_cast %23 : vector<16x16x128xbf16> to vector<256x128xbf16>
    %c0_33 = arith.constant 0 : index
    %c0_34 = arith.constant 0 : index
    %c0_35 = arith.constant 0 : index
    %25 = vector.load %arg4[%c0_33, %c0_34, %c0_35] : memref<9x128x128xbf16, #tpu.memory_space<vmem>>, vector<1x128x128xbf16>
    %26 = vector.shape_cast %25 : vector<1x128x128xbf16> to vector<128x128xbf16>
    %cst_36 = arith.constant dense<0.000000e+00> : vector<256x128xf32>
    %27 = tpu.matmul %24, %26, %cst_36 {dimension_numbers = #tpu.dot_dimension_numbers<[1], [0], [0], [1], [0, 0, 1, 1], [], []>} : vector<256x128xbf16>, vector<128x128xbf16>, vector<256x128xf32> -> vector<256x128xf32>
    %28 = arith.addf %22, %27 : vector<256x128xf32>
    %c0_37 = arith.constant 0 : index
    %c8_38 = arith.constant 8 : index
    %c0_39 = arith.constant 0 : index
    %29 = vector.load %arg9[%c0_37, %c8_38, %c0_39] : memref<18x32x128xbf16, #tpu.memory_space<vmem>>, vector<16x16x128xbf16>
    %30 = vector.shape_cast %29 : vector<16x16x128xbf16> to vector<256x128xbf16>
    %c1_40 = arith.constant 1 : index
    %c0_41 = arith.constant 0 : index
    %c0_42 = arith.constant 0 : index
    %31 = vector.load %arg4[%c1_40, %c0_41, %c0_42] : memref<9x128x128xbf16, #tpu.memory_space<vmem>>, vector<1x128x128xbf16>
    %32 = vector.shape_cast %31 : vector<1x128x128xbf16> to vector<128x128xbf16>
    %cst_43 = arith.constant dense<0.000000e+00> : vector<256x128xf32>
    %33 = tpu.matmul %30, %32, %cst_43 {dimension_numbers = #tpu.dot_dimension_numbers<[1], [0], [0], [1], [0, 0, 1, 1], [], []>} : vector<256x128xbf16>, vector<128x128xbf16>, vector<256x128xf32> -> vector<256x128xf32>
    %34 = arith.addf %28, %33 : vector<256x128xf32>
    %c0_44 = arith.constant 0 : index
    %c9 = arith.constant 9 : index
    %c0_45 = arith.constant 0 : index
    %35 = vector.load %arg9[%c0_44, %c9, %c0_45] : memref<18x32x128xbf16, #tpu.memory_space<vmem>>, vector<16x16x128xbf16>
    %36 = vector.shape_cast %35 : vector<16x16x128xbf16> to vector<256x128xbf16>
    %c2 = arith.constant 2 : index
    %c0_46 = arith.constant 0 : index
    %c0_47 = arith.constant 0 : index
    %37 = vector.load %arg4[%c2, %c0_46, %c0_47] : memref<9x128x128xbf16, #tpu.memory_space<vmem>>, vector<1x128x128xbf16>
    %38 = vector.shape_cast %37 : vector<1x128x128xbf16> to vector<128x128xbf16>
    %cst_48 = arith.constant dense<0.000000e+00> : vector<256x128xf32>
    %39 = tpu.matmul %36, %38, %cst_48 {dimension_numbers = #tpu.dot_dimension_numbers<[1], [0], [0], [1], [0, 0, 1, 1], [], []>} : vector<256x128xbf16>, vector<128x128xbf16>, vector<256x128xf32> -> vector<256x128xf32>
    %40 = arith.addf %34, %39 : vector<256x128xf32>
    %c1_49 = arith.constant 1 : index
    %c7_50 = arith.constant 7 : index
    %c0_51 = arith.constant 0 : index
    %41 = vector.load %arg9[%c1_49, %c7_50, %c0_51] : memref<18x32x128xbf16, #tpu.memory_space<vmem>>, vector<16x16x128xbf16>
    %42 = vector.shape_cast %41 : vector<16x16x128xbf16> to vector<256x128xbf16>
    %c3 = arith.constant 3 : index
    %c0_52 = arith.constant 0 : index
    %c0_53 = arith.constant 0 : index
    %43 = vector.load %arg4[%c3, %c0_52, %c0_53] : memref<9x128x128xbf16, #tpu.memory_space<vmem>>, vector<1x128x128xbf16>
    %44 = vector.shape_cast %43 : vector<1x128x128xbf16> to vector<128x128xbf16>
    %cst_54 = arith.constant dense<0.000000e+00> : vector<256x128xf32>
    %45 = tpu.matmul %42, %44, %cst_54 {dimension_numbers = #tpu.dot_dimension_numbers<[1], [0], [0], [1], [0, 0, 1, 1], [], []>} : vector<256x128xbf16>, vector<128x128xbf16>, vector<256x128xf32> -> vector<256x128xf32>
    %46 = arith.addf %40, %45 : vector<256x128xf32>
    %c1_55 = arith.constant 1 : index
    %c8_56 = arith.constant 8 : index
    %c0_57 = arith.constant 0 : index
    %47 = vector.load %arg9[%c1_55, %c8_56, %c0_57] : memref<18x32x128xbf16, #tpu.memory_space<vmem>>, vector<16x16x128xbf16>
    %48 = vector.shape_cast %47 : vector<16x16x128xbf16> to vector<256x128xbf16>
    %c4 = arith.constant 4 : index
    %c0_58 = arith.constant 0 : index
    %c0_59 = arith.constant 0 : index
    %49 = vector.load %arg4[%c4, %c0_58, %c0_59] : memref<9x128x128xbf16, #tpu.memory_space<vmem>>, vector<1x128x128xbf16>
    %50 = vector.shape_cast %49 : vector<1x128x128xbf16> to vector<128x128xbf16>
    %cst_60 = arith.constant dense<0.000000e+00> : vector<256x128xf32>
    %51 = tpu.matmul %48, %50, %cst_60 {dimension_numbers = #tpu.dot_dimension_numbers<[1], [0], [0], [1], [0, 0, 1, 1], [], []>} : vector<256x128xbf16>, vector<128x128xbf16>, vector<256x128xf32> -> vector<256x128xf32>
    %52 = arith.addf %46, %51 : vector<256x128xf32>
    %c1_61 = arith.constant 1 : index
    %c9_62 = arith.constant 9 : index
    %c0_63 = arith.constant 0 : index
    %53 = vector.load %arg9[%c1_61, %c9_62, %c0_63] : memref<18x32x128xbf16, #tpu.memory_space<vmem>>, vector<16x16x128xbf16>
    %54 = vector.shape_cast %53 : vector<16x16x128xbf16> to vector<256x128xbf16>
    %c5 = arith.constant 5 : index
    %c0_64 = arith.constant 0 : index
    %c0_65 = arith.constant 0 : index
    %55 = vector.load %arg4[%c5, %c0_64, %c0_65] : memref<9x128x128xbf16, #tpu.memory_space<vmem>>, vector<1x128x128xbf16>
    %56 = vector.shape_cast %55 : vector<1x128x128xbf16> to vector<128x128xbf16>
    %cst_66 = arith.constant dense<0.000000e+00> : vector<256x128xf32>
    %57 = tpu.matmul %54, %56, %cst_66 {dimension_numbers = #tpu.dot_dimension_numbers<[1], [0], [0], [1], [0, 0, 1, 1], [], []>} : vector<256x128xbf16>, vector<128x128xbf16>, vector<256x128xf32> -> vector<256x128xf32>
    %58 = arith.addf %52, %57 : vector<256x128xf32>
    %c2_67 = arith.constant 2 : index
    %c7_68 = arith.constant 7 : index
    %c0_69 = arith.constant 0 : index
    %59 = vector.load %arg9[%c2_67, %c7_68, %c0_69] : memref<18x32x128xbf16, #tpu.memory_space<vmem>>, vector<16x16x128xbf16>
    %60 = vector.shape_cast %59 : vector<16x16x128xbf16> to vector<256x128xbf16>
    %c6 = arith.constant 6 : index
    %c0_70 = arith.constant 0 : index
    %c0_71 = arith.constant 0 : index
    %61 = vector.load %arg4[%c6, %c0_70, %c0_71] : memref<9x128x128xbf16, #tpu.memory_space<vmem>>, vector<1x128x128xbf16>
    %62 = vector.shape_cast %61 : vector<1x128x128xbf16> to vector<128x128xbf16>
    %cst_72 = arith.constant dense<0.000000e+00> : vector<256x128xf32>
    %63 = tpu.matmul %60, %62, %cst_72 {dimension_numbers = #tpu.dot_dimension_numbers<[1], [0], [0], [1], [0, 0, 1, 1], [], []>} : vector<256x128xbf16>, vector<128x128xbf16>, vector<256x128xf32> -> vector<256x128xf32>
    %64 = arith.addf %58, %63 : vector<256x128xf32>
    %c2_73 = arith.constant 2 : index
    %c8_74 = arith.constant 8 : index
    %c0_75 = arith.constant 0 : index
    %65 = vector.load %arg9[%c2_73, %c8_74, %c0_75] : memref<18x32x128xbf16, #tpu.memory_space<vmem>>, vector<16x16x128xbf16>
    %66 = vector.shape_cast %65 : vector<16x16x128xbf16> to vector<256x128xbf16>
    %c7_76 = arith.constant 7 : index
    %c0_77 = arith.constant 0 : index
    %c0_78 = arith.constant 0 : index
    %67 = vector.load %arg4[%c7_76, %c0_77, %c0_78] : memref<9x128x128xbf16, #tpu.memory_space<vmem>>, vector<1x128x128xbf16>
    %68 = vector.shape_cast %67 : vector<1x128x128xbf16> to vector<128x128xbf16>
    %cst_79 = arith.constant dense<0.000000e+00> : vector<256x128xf32>
    %69 = tpu.matmul %66, %68, %cst_79 {dimension_numbers = #tpu.dot_dimension_numbers<[1], [0], [0], [1], [0, 0, 1, 1], [], []>} : vector<256x128xbf16>, vector<128x128xbf16>, vector<256x128xf32> -> vector<256x128xf32>
    %70 = arith.addf %64, %69 : vector<256x128xf32>
    %c2_80 = arith.constant 2 : index
    %c9_81 = arith.constant 9 : index
    %c0_82 = arith.constant 0 : index
    %71 = vector.load %arg9[%c2_80, %c9_81, %c0_82] : memref<18x32x128xbf16, #tpu.memory_space<vmem>>, vector<16x16x128xbf16>
    %72 = vector.shape_cast %71 : vector<16x16x128xbf16> to vector<256x128xbf16>
    %c8_83 = arith.constant 8 : index
    %c0_84 = arith.constant 0 : index
    %c0_85 = arith.constant 0 : index
    %73 = vector.load %arg4[%c8_83, %c0_84, %c0_85] : memref<9x128x128xbf16, #tpu.memory_space<vmem>>, vector<1x128x128xbf16>
    %74 = vector.shape_cast %73 : vector<1x128x128xbf16> to vector<128x128xbf16>
    %cst_86 = arith.constant dense<0.000000e+00> : vector<256x128xf32>
    %75 = tpu.matmul %72, %74, %cst_86 {dimension_numbers = #tpu.dot_dimension_numbers<[1], [0], [0], [1], [0, 0, 1, 1], [], []>} : vector<256x128xbf16>, vector<128x128xbf16>, vector<256x128xf32> -> vector<256x128xf32>
    %76 = arith.addf %70, %75 : vector<256x128xf32>
    %c0_87 = arith.constant 0 : index
    %c0_88 = arith.constant 0 : index
    %77 = vector.load %arg5[%c0_87, %c0_88] : memref<1x128xf32, #tpu.memory_space<vmem>>, vector<1x128xf32>
    %78 = vector.broadcast %77 : vector<1x128xf32> to vector<256x128xf32>
    %79 = arith.addf %76, %78 : vector<256x128xf32>
    %cst_89 = arith.constant 0.000000e+00 : f32
    %80 = vector.broadcast %cst_89 : f32 to vector<256x128xf32>
    %81 = arith.maximumf %79, %80 : vector<256x128xf32>
    %82 = vector.shape_cast %81 : vector<256x128xf32> to vector<16x16x128xf32>
    %c0_90 = arith.constant 0 : index
    %c0_91 = arith.constant 0 : index
    %c0_92 = arith.constant 0 : index
    %83 = vector.load %arg10[%c0_90, %c0_91, %c0_92] : memref<16x16x128xf32, #tpu.memory_space<vmem>>, vector<16x16x128xf32>
    tpu.vector_store %arg10[%c0_90, %c0_91, %c0_92], %82 {strides = array<i32>} : memref<16x16x128xf32, #tpu.memory_space<vmem>>, vector<16x16x128xf32>,
    %c0_93 = arith.constant 0 : index
    %c0_94 = arith.constant 0 : index
    %c0_95 = arith.constant 0 : index
    %84 = tpu.strided_load %arg10[%c0_93, %c0_94, %c0_95] {strides = array<i32: 2, 1, 1>} : memref<16x16x128xf32, #tpu.memory_space<vmem>>, vector<8x16x128xf32>
    %c1_96 = arith.constant 1 : index
    %c0_97 = arith.constant 0 : index
    %c0_98 = arith.constant 0 : index
    %85 = tpu.strided_load %arg10[%c1_96, %c0_97, %c0_98] {strides = array<i32: 2, 1, 1>} : memref<16x16x128xf32, #tpu.memory_space<vmem>>, vector<8x16x128xf32>
    %86 = arith.maximumf %84, %85 : vector<8x16x128xf32>
    %c0_99 = arith.constant 0 : index
    %c0_100 = arith.constant 0 : index
    %c0_101 = arith.constant 0 : index
    %87 = vector.load %arg11[%c0_99, %c0_100, %c0_101] : memref<8x16x128xf32, #tpu.memory_space<vmem>>, vector<8x16x128xf32>
    tpu.vector_store %arg11[%c0_99, %c0_100, %c0_101], %86 {strides = array<i32>} : memref<8x16x128xf32, #tpu.memory_space<vmem>>, vector<8x16x128xf32>,
    %c0_102 = arith.constant 0 : index
    %c0_103 = arith.constant 0 : index
    %c0_104 = arith.constant 0 : index
    %88 = tpu.strided_load %arg11[%c0_102, %c0_103, %c0_104] {strides = array<i32: 1, 2, 1>} : memref<8x16x128xf32, #tpu.memory_space<vmem>>, vector<8x8x128xf32>
    %c0_105 = arith.constant 0 : index
    %c1_106 = arith.constant 1 : index
    %c0_107 = arith.constant 0 : index
    %89 = tpu.strided_load %arg11[%c0_105, %c1_106, %c0_107] {strides = array<i32: 1, 2, 1>} : memref<8x16x128xf32, #tpu.memory_space<vmem>>, vector<8x8x128xf32>
    %90 = arith.maximumf %88, %89 : vector<8x8x128xf32>
    %91 = vector.extract_strided_slice %90 {offsets = [0, 0, 0], sizes = [8, 8, 64], strides = [1, 1, 1]} : vector<8x8x128xf32> to vector<8x8x64xf32>
    %92 = vector.shape_cast %91 : vector<8x8x64xf32> to vector<64x64xf32>
    %93 = arith.truncf %92 : vector<64x64xf32> to vector<64x64xbf16>
    %c0_108 = arith.constant 0 : index
    %c0_109 = arith.constant 0 : index
    %c0_110 = arith.constant 0 : index
    %94 = vector.load %arg6[%c0_108, %c0_109, %c0_110] : memref<1x64x64xbf16, #tpu.memory_space<vmem>>, vector<1x64x64xbf16>
    %95 = vector.shape_cast %94 : vector<1x64x64xbf16> to vector<64x64xbf16>
    %96 = vector.shape_cast %93 : vector<64x64xbf16> to vector<1x64x64xbf16>
    tpu.vector_store %arg6[%c0_108, %c0_109, %c0_110], %96 {strides = array<i32>} : memref<1x64x64xbf16, #tpu.memory_space<vmem>>, vector<1x64x64xbf16>,
    return
  }
  func.func @transform_0(%arg0: i32) -> (i32, i32, i32) {
    %c0_i32 = arith.constant 0 : i32
    %c0_i32_0 = arith.constant 0 : i32
    %c0_i32_1 = arith.constant 0 : i32
    return %arg0, %c0_i32, %c0_i32_0 : i32, i32, i32
  }
  func.func @transform_1(%arg0: i32) -> (i32, i32) {
    %c0_i32 = arith.constant 0 : i32
    %c0_i32_0 = arith.constant 0 : i32
    %c0_i32_1 = arith.constant 0 : i32
    return %c0_i32, %c0_i32_0 : i32, i32
  }
  func.func @transform_2(%arg0: i32) -> (i32, i32) {
    %c0_i32 = arith.constant 0 : i32
    %c0_i32_0 = arith.constant 0 : i32
    %c0_i32_1 = arith.constant 0 : i32
    return %c0_i32, %c0_i32_0 : i32, i32
  }
  func.func @transform_3(%arg0: i32) -> (i32, i32, i32) {
    %c0_i32 = arith.constant 0 : i32
    %c0_i32_0 = arith.constant 0 : i32
    %c0_i32_1 = arith.constant 0 : i32
    %c0_i32_2 = arith.constant 0 : i32
    return %c0_i32, %c0_i32_0, %c0_i32_1 : i32, i32, i32
  }
  func.func @transform_4(%arg0: i32) -> (i32, i32) {
    %c0_i32 = arith.constant 0 : i32
    %c0_i32_0 = arith.constant 0 : i32
    %c0_i32_1 = arith.constant 0 : i32
    return %c0_i32, %c0_i32_0 : i32, i32
  }
  func.func @transform_5(%arg0: i32) -> (i32, i32, i32) {
    %c0_i32 = arith.constant 0 : i32
    %c0_i32_0 = arith.constant 0 : i32
    %c0_i32_1 = arith.constant 0 : i32
    return %arg0, %c0_i32, %c0_i32_0 : i32, i32, i32
  }
}

module attributes {stable_mosaic.version = 11 : i64} {
  func.func @_fc_kernel(%arg0: i32, %arg1: memref<2x512xbf16, #tpu.memory_space<vmem>>, %arg2: memref<512x512xbf16, #tpu.memory_space<vmem>>, %arg3: memref<1x512xf32, #tpu.memory_space<vmem>>, %arg4: memref<512x10xf32, #tpu.memory_space<vmem>>, %arg5: memref<1x10xf32, #tpu.memory_space<vmem>>, %arg6: memref<2x10xf32, #tpu.memory_space<vmem>>, %arg7: memref<2x512xf32, #tpu.memory_space<vmem>>) attributes {dimension_semantics = [#tpu.dimension_semantics<arbitrary>], iteration_bounds = array<i64: 8>, scalar_prefetch = 0 : i64, scratch_operands = 1 : i64, tpu.core_type = #tpu.core_type<tc>, window_params = [{transform_indices = @transform_0, window_bounds = array<i64: 2, 512>}, {transform_indices = @transform_1, window_bounds = array<i64: 512, 512>}, {pipeline_mode = #tpu.pipeline_mode<synchronous>, transform_indices = @transform_2, window_bounds = array<i64: 1, 512>}, {pipeline_mode = #tpu.pipeline_mode<synchronous>, transform_indices = @transform_3, window_bounds = array<i64: 512, 10>}, {pipeline_mode = #tpu.pipeline_mode<synchronous>, transform_indices = @transform_4, window_bounds = array<i64: 1, 10>}, {pipeline_mode = #tpu.pipeline_mode<synchronous>, transform_indices = @transform_5, window_bounds = array<i64: 2, 10>}]} {
    %c0_i32 = arith.constant 0 : i32
    %0 = arith.cmpi eq, %arg0, %c0_i32 : i32
    %1 = arith.extui %0 : i1 to i32
    %c0_i32_0 = arith.constant 0 : i32
    %2 = arith.cmpi ne, %1, %c0_i32_0 : i32
    scf.if %2 {
      %cst_9 = arith.constant 0.000000e+00 : f32
      %12 = vector.broadcast %cst_9 : f32 to vector<2x512xf32>
      %c0_10 = arith.constant 0 : index
      %c0_11 = arith.constant 0 : index
      %13 = vector.load %arg7[%c0_10, %c0_11] : memref<2x512xf32, #tpu.memory_space<vmem>>, vector<2x512xf32>
      tpu.vector_store %arg7[%c0_10, %c0_11], %12 {strides = array<i32>} : memref<2x512xf32, #tpu.memory_space<vmem>>, vector<2x512xf32>,
    } else {
    }
    %c0 = arith.constant 0 : index
    %c0_1 = arith.constant 0 : index
    %3 = vector.load %arg7[%c0, %c0_1] : memref<2x512xf32, #tpu.memory_space<vmem>>, vector<2x512xf32>
    %c0_2 = arith.constant 0 : index
    %c0_3 = arith.constant 0 : index
    %4 = vector.load %arg1[%c0_2, %c0_3] : memref<2x512xbf16, #tpu.memory_space<vmem>>, vector<2x512xbf16>
    %c0_4 = arith.constant 0 : index
    %c0_5 = arith.constant 0 : index
    %5 = vector.load %arg2[%c0_4, %c0_5] : memref<512x512xbf16, #tpu.memory_space<vmem>>, vector<512x512xbf16>
    %cst = arith.constant dense<0.000000e+00> : vector<2x512xf32>
    %6 = tpu.matmul %4, %5, %cst {dimension_numbers = #tpu.dot_dimension_numbers<[1], [0], [0], [1], [0, 0, 1, 1], [], []>} : vector<2x512xbf16>, vector<512x512xbf16>, vector<2x512xf32> -> vector<2x512xf32>
    %7 = arith.addf %3, %6 : vector<2x512xf32>
    %c0_6 = arith.constant 0 : index
    %c0_7 = arith.constant 0 : index
    %8 = vector.load %arg7[%c0_6, %c0_7] : memref<2x512xf32, #tpu.memory_space<vmem>>, vector<2x512xf32>
    tpu.vector_store %arg7[%c0_6, %c0_7], %7 {strides = array<i32>} : memref<2x512xf32, #tpu.memory_space<vmem>>, vector<2x512xf32>,
    %c7_i32 = arith.constant 7 : i32
    %9 = arith.cmpi eq, %arg0, %c7_i32 : i32
    %10 = arith.extui %9 : i1 to i32
    %c0_i32_8 = arith.constant 0 : i32
    %11 = arith.cmpi ne, %10, %c0_i32_8 : i32
    scf.if %11 {
      %c0_9 = arith.constant 0 : index
      %c0_10 = arith.constant 0 : index
      %12 = vector.load %arg7[%c0_9, %c0_10] : memref<2x512xf32, #tpu.memory_space<vmem>>, vector<2x512xf32>
      %c0_11 = arith.constant 0 : index
      %c0_12 = arith.constant 0 : index
      %13 = vector.load %arg3[%c0_11, %c0_12] : memref<1x512xf32, #tpu.memory_space<vmem>>, vector<1x512xf32>
      %14 = vector.broadcast %13 : vector<1x512xf32> to vector<2x512xf32>
      %15 = arith.addf %12, %14 : vector<2x512xf32>
      %cst_13 = arith.constant 0.000000e+00 : f32
      %16 = vector.broadcast %cst_13 : f32 to vector<2x512xf32>
      %17 = arith.maximumf %15, %16 : vector<2x512xf32>
      %c0_14 = arith.constant 0 : index
      %c0_15 = arith.constant 0 : index
      %18 = vector.load %arg4[%c0_14, %c0_15] : memref<512x10xf32, #tpu.memory_space<vmem>>, vector<512x10xf32>
      %cst_16 = arith.constant dense<0.000000e+00> : vector<2x10xf32>
      %19 = tpu.matmul %17, %18, %cst_16 {dimension_numbers = #tpu.dot_dimension_numbers<[1], [0], [0], [1], [0, 0, 1, 1], [], []>} : vector<2x512xf32>, vector<512x10xf32>, vector<2x10xf32> -> vector<2x10xf32>
      %c0_17 = arith.constant 0 : index
      %c0_18 = arith.constant 0 : index
      %20 = vector.load %arg5[%c0_17, %c0_18] : memref<1x10xf32, #tpu.memory_space<vmem>>, vector<1x10xf32>
      %21 = vector.broadcast %20 : vector<1x10xf32> to vector<2x10xf32>
      %22 = arith.addf %19, %21 : vector<2x10xf32>
      %c0_19 = arith.constant 0 : index
      %c0_20 = arith.constant 0 : index
      %23 = vector.load %arg6[%c0_19, %c0_20] : memref<2x10xf32, #tpu.memory_space<vmem>>, vector<2x10xf32>
      tpu.vector_store %arg6[%c0_19, %c0_20], %22 {strides = array<i32>} : memref<2x10xf32, #tpu.memory_space<vmem>>, vector<2x10xf32>,
    } else {
    }
    return
  }
  func.func @transform_0(%arg0: i32) -> (i32, i32) {
    %c0_i32 = arith.constant 0 : i32
    %c0_i32_0 = arith.constant 0 : i32
    return %c0_i32, %arg0 : i32, i32
  }
  func.func @transform_1(%arg0: i32) -> (i32, i32) {
    %c0_i32 = arith.constant 0 : i32
    %c0_i32_0 = arith.constant 0 : i32
    return %arg0, %c0_i32 : i32, i32
  }
  func.func @transform_2(%arg0: i32) -> (i32, i32) {
    %c0_i32 = arith.constant 0 : i32
    %c0_i32_0 = arith.constant 0 : i32
    %c0_i32_1 = arith.constant 0 : i32
    return %c0_i32, %c0_i32_0 : i32, i32
  }
  func.func @transform_3(%arg0: i32) -> (i32, i32) {
    %c0_i32 = arith.constant 0 : i32
    %c0_i32_0 = arith.constant 0 : i32
    %c0_i32_1 = arith.constant 0 : i32
    return %c0_i32, %c0_i32_0 : i32, i32
  }
  func.func @transform_4(%arg0: i32) -> (i32, i32) {
    %c0_i32 = arith.constant 0 : i32
    %c0_i32_0 = arith.constant 0 : i32
    %c0_i32_1 = arith.constant 0 : i32
    return %c0_i32, %c0_i32_0 : i32, i32
  }
  func.func @transform_5(%arg0: i32) -> (i32, i32) {
    %c0_i32 = arith.constant 0 : i32
    %c0_i32_0 = arith.constant 0 : i32
    %c0_i32_1 = arith.constant 0 : i32
    return %c0_i32, %c0_i32_0 : i32, i32
  }
}

</mosaic_0001>

<bundles_post_ra>
// kernel: simple_cnn_forward.3
= control target key start
LH: loop header
LB: loop body
LE: loop exit
PB: predicated region body
PF: predicated region fallthrough
CT: control target
= control target key end

     0   :  { %10 = vsyncpa [#allocation4], 0  ;;  %s3097_s0 = inlined_call_operand.vmem [shape: bf16[2,4096], index: 0, kind: input, shape index: {}]   ;;  %s3098_s1 = inlined_call_operand.hbm [shape: bf16[4096,512], index: 1, kind: input, shape index: {}]   ;;  %s3099_s2 = inlined_call_operand.hbm [shape: f32[1,512], index: 2, kind: input, shape index: {}]   ;;  %s3100_s3 = inlined_call_operand.vmem [shape: f32[512,10], index: 3, kind: input, shape index: {}]   ;;  %s3101_s4 = inlined_call_operand.hbm [shape: f32[1,10], index: 4, kind: input, shape index: {}]   ;;  %s3102_s5 = inlined_call_operand.hbm [shape: f32[2,10], index: 5, kind: output, shape index: {}]  }
   0x1   :  { %12 = vsyncpa [#allocation4 + $0x1], 0 }
   0x2   :  { %13 = vsyncpa [#allocation7], 0 }
   0x3   :  { %14 = vsyncpa [#allocation5], 0  ;;  %s2490_s18 = smov 0   ;;  %s2492_s19 = smov 0  }
   0x4   :  { %s2494_s20 = smov 0   ;;  %s2496_s21 = smov 0  }
   0x5 LB: > { %s2509_s22 = sadd.s32 4294967295, %s2452_s21   ;;  %s2512_s23 = sadd.s32 1, %s2452_s21   ;;  %s2452_s21 = sphi %s2496_s21, %s3110_s21   ;;  %s2448_s20 = sphi %s2494_s20, %s3109_s20   ;;  %s2444_s19 = sphi %s2492_s19, %s3108_s19   ;;  %s2440_s18 = sphi %s2490_s18, %s3107_s18  }
   0x6   : > { %s50_s24 = ssub.s32 %s2452_s21, %s2512_s23  ;;  %s53_s25 = sadd.s32 1, %s2448_s20 }
   0x7   : > { %p51_p0 = scmp.eq.s32.totalorder %s50_s24, 0  ;;  %p60_p1 = scmp.ne.s32.totalorder %s2448_s20, %s2444_s19 }
   0x8   : > { %p61_p2 = scmp.eq.s32.totalorder %s2452_s21, 0  ;;  %p66_p3 = scmp.ne.s32.totalorder %s2444_s19, %s2440_s18 }
   0x9   : > { %s2522_s26 = scalar_select %p51_p0, %s2448_s20, %s53_s25  }
   0xa   : > { %p2524_p4 = por %p61_p2, %p60_p1  ;;  %p67_p5 = scmp.eq.s32.totalorder %s2509_s22, 0 }
   0xb   : > { %p1560_p6 = scmp.ge.s32.totalorder %s2452_s21, 1  ;;  %p161_p7 = scmp.lt.s32.totalorder %s2452_s21, 9 }
   0xc   : > { %p2533_p8 = por %p67_p5, %p66_p3  ;;  %p1561_p9 = scmp.ne.s32.totalorder %s2509_s22, 0 }
   0xd   : > { %p2538_p10 = pnand %p1560_p6, %p161_p7  ;;  %s173_s7 = sshll.u32 %s3099_s2, 4  ;;  %s174_s7 = int_to_ptr.hbm [resolvable:$true] %s173_s7 }
   0xe   : > { %s2454_s8 = smov [#allocation6]   ;;  %p2248_p13 = scmp.lt.s32.totalorder %s2452_s21, 8 }
   0xf   : > { %p2235_p11 = pneg %p2538_p10  ;;  %s175_s9 = sshll.u32 %s2454_s8, 4  ;;  %s176_s9 = int_to_ptr.vmem [resolvable:$true] %s175_s9 }
  0x10   : > { %s188_s12 = sshll.u32 %s3101_s4, 4  ;;  %p2555_p0 = pnand %p2248_p13, %p2524_p4  ;;  %s189_s12 = int_to_ptr.hbm [resolvable:$true] %s188_s12 }
  0x11   : > { %p2236_p12 = pnand %p2235_p11, %p67_p5  ;;  %s2455_s14 = smov [#allocation8]  }
  0x12   : > { %s190_s15 = sshll.u32 %s2455_s14, 4  ;;  %s209_s16 = sand.u32 1, %s2448_s20   ;;  %s191_s15 = int_to_ptr.vmem [resolvable:$true] %s190_s15 }
  0x13   : > { %2238 = dma.hbm_to_vmem [thread:$0]  (!%p2236_p12), %s174_s7, 64, %s176_s9, [#allocation7]  }
  0x14   : > { %2241 = dma.hbm_to_vmem [thread:$0]  (!%p2236_p12), %s189_s12, 16, %s191_s15, [#allocation7]  }
  0x15   : > { %s1564_s17 = sshll.u32 %s209_s16, 10  ;;  %s2092_s18 = sshll.u32 %s2452_s21, 10 }
  0x16   : > { %s219_s30 = scalar_lea.hbm %s3098_s1, %s2092_s18  ;;  %s213_s27 = scalar_lea.vmem [#allocation3], %s1564_s17 }
  0x17   : > { %s220_s6 = sshll.u32 %s219_s30, 4  ;;  %s222_s8 = sshll.u32 %s213_s27, 4  ;;  %s221_s6 = int_to_ptr.hbm [resolvable:$true] %s220_s6  ;;  %s223_s8 = int_to_ptr.vmem [resolvable:$true] %s222_s8 }
  0x18   : > { %s210_s10 = scalar_lea.sflag [#allocation4], %s209_s16  ;;  %s2352_s7 = sshra.s32 %s221_s6, 4  ;;  %s2353_s7 = int_to_ptr.hbm [resolvable:$true] %s2352_s7 }
  0x19   : > { %s2354_s9 = scalar_lea.hbm %s2353_s7, 1024  ;;  %p2356_p2 = pneg %p2555_p0 }
  0x1a   : > { %p2355_p1 = scmp.ne.s32.totalorder %s2353_s7, %s2354_s9  ;;  %s2359_s12 = scalar_lea.hbm %s3098_s1, 8192 }
  0x1b   : > { %p2360_p6 = scmp.lt.s32.totalorder %s2353_s7, %s3098_s1  ;;  %p2361_p7 = scmp.lt.s32.totalorder %s2359_s12, %s2354_s9 }
  0x1c   : > { %p2357_p3 = pnand %p2356_p2, %p2355_p1 }
  0x1d   : > { %p2362_p11 = por %p2361_p7, %p2360_p6 }
  0x1e   : > { %p2358_p4 = pneg %p2357_p3 }
  0x20   : > { %p2363_p12 = pnand %p2362_p11, %p2358_p4 }
  0x22   : > { %2366 = shalt.err (!%p2363_p12)
}
  0x23   : > { %s2456_s16 = smov 256   ;;  %s2457_s17 = smov 16  }
  0x24   : > { %2245 = dma.hbm_to_vmem [thread:$0]  (!%p2555_p0), %s221_s6, 16384, %s223_s8, %s210_s10, %s2456_s16, %s2456_s16, %s2457_s17  }
  0x25   : > { %234 = sbr.rel (%p2538_p10) target bundleno = 503 (0x1f7), region = 40  ;;  %s236_s18 = sand.u32 (!%p2538_p10), 1, %s2444_s19  }
  0x26   : > { %s1569_s24 = sshll.u32 (!%p2538_p10), %s236_s18, 10  ;;  %s237_s25 = scalar_lea.sflag (!%p2538_p10), [#allocation4], %s236_s18 }
  0x27   : > { %s2577_s30 = scalar_lea.vmem (!%p2538_p10), [#allocation3], %s1569_s24 }
  0x2a   : > { %2427 = dma.done.wait (%p2533_p8), %s237_s25, 16384  }
  0x2b   : > { %2429 = vsyncadd (%p2533_p8), %s237_s25, 4294950912 }
  0x2c   : > { %2431 = dma.done.wait (%p67_p5), [#allocation7], 80  }
  0x2d   : > { %2433 = vsyncadd (%p67_p5), [#allocation7], 4294967216  ;;  %s1572_s29 = sshll.u32 %s2509_s22, 2  ;;  %286 = sbr.rel (%p1561_p9) target bundleno = 52 (0x34), region = 56 }
  0x2e   : > { %p278_p10 = scmp.lt.s32.totalorder %s1572_s29, 31 }
  0x30   : > { %s3112_s29 = smov (!%p278_p10, %s1572_s29), 31 }
  0x31   : > { %s280_s27 = scalar_lea.vmem %s3097_s0, %s3112_s29 }
  0x32   : > { %v2458_v0 = vmov 0.0  }
  0x33   : > { %287 = vst [vmem:[#allocation2] sm:$0xff] %v2458_v0 }
  0x34 PF: > { %v1688_v1 = vld [vmem:[%s2577_s30 + $0xe0] sm:$0xf]  ;;  %v2123_v2 = vld [vmem:[%s2577_s30 + $0xec] sm:$0xf0]  ;;  %vm1283_vm0 = vcmask 1041408   ;;  %vm1285_vm1 = vcmask 1045508  }
  0x35   : > { %v1816_v3 = vld [vmem:[%s2577_s30 + $0x1e0] sm:$0xf]  ;;  %v1689_v4 = vor.u32 %v2123_v2, %v1688_v1  ;;  %v2155_v5 = vld [vmem:[%s2577_s30 + $0x1ec] sm:$0xf0]  ;;  %vm1287_vm2 = vcmask 1043456   ;;  %p2086_p5 = scmp.ne.s32.totalorder %s2509_s22, 7 }
  0x36   : > { %v1944_v6 = vld [vmem:[%s2577_s30 + $0x2e0] sm:$0xf]  ;;  %v2187_v7 = vld [vmem:[%s2577_s30 + $0x2ec] sm:$0xf0]  ;;  %v1817_v8 = vor.u32 %v2155_v5, %v1816_v3 }
  0x37   : > { %v1945_v9 = vor.u32 %v2187_v7, %v1944_v6  ;;  %v2072_v10 = vld [vmem:[%s2577_s30 + $0x3e0] sm:$0xf]  ;;  %v2219_v11 = vld [vmem:[%s2577_s30 + $0x3ec] sm:$0xf0]  ;;  %1068 = vmatpush.bf16.msra.mxu0 %v1689_v4 }
  0x38   : > { %v1672_v12 = vld [vmem:[%s2577_s30 + $0xc0] sm:$0xf]  ;;  %v2073_v13 = vor.u32 %v2219_v11, %v2072_v10  ;;  %v2119_v14 = vld [vmem:[%s2577_s30 + $0xcc] sm:$0xf0]  ;;  %1081 = vmatpush.bf16.msra.mxu1 %v1817_v8 }
  0x39   : > { %v1800_v15 = vld [vmem:[%s2577_s30 + $0x1c0] sm:$0xf]  ;;  %v2151_v16 = vld [vmem:[%s2577_s30 + $0x1cc] sm:$0xf0]  ;;  %1094 = vmatpush.bf16.msra.mxu2 %v1945_v9  ;;  %v1673_v17 = vor.u32 %v2119_v14, %v1672_v12 }
  0x3a   : > { %v1801_v18 = vor.u32 %v2151_v16, %v1800_v15  ;;  %v1928_v19 = vld [vmem:[%s2577_s30 + $0x2c0] sm:$0xf]  ;;  %v2183_v20 = vld [vmem:[%s2577_s30 + $0x2cc] sm:$0xf0]  ;;  %1107 = vmatpush.bf16.msra.mxu3 %v2073_v13 }
  0x3b   : > { %v2056_v21 = vld [vmem:[%s2577_s30 + $0x3c0] sm:$0xf]  ;;  %v1929_v22 = vor.u32 %v2183_v20, %v1928_v19  ;;  %v2215_v23 = vld [vmem:[%s2577_s30 + $0x3cc] sm:$0xf0]  ;;  %1069 = vmatpush.bf16.msra.mxu0 %v1673_v17 }
  0x3c   : > { %v1656_v24 = vld [vmem:[%s2577_s30 + $0xa0] sm:$0xf]  ;;  %v2115_v25 = vld [vmem:[%s2577_s30 + $0xac] sm:$0xf0]  ;;  %v2057_v26 = vor.u32 %v2215_v23, %v2056_v21  ;;  %1082 = vmatpush.bf16.msra.mxu1 %v1801_v18 }
  0x3d   : > { %v1784_v27 = vld [vmem:[%s2577_s30 + $0x1a0] sm:$0xf]  ;;  %v2147_v28 = vld [vmem:[%s2577_s30 + $0x1ac] sm:$0xf0]  ;;  %v1657_v30 = vor.u32 %v2115_v25, %v1656_v24  ;;  %1095 = vmatpush.bf16.msra.mxu2 %v1929_v22 }
  0x3e   : > { %v1912_v29 = vld [vmem:[%s2577_s30 + $0x2a0] sm:$0xf]  ;;  %v2179_v31 = vld [vmem:[%s2577_s30 + $0x2ac] sm:$0xf0]  ;;  %v1785_v34 = vor.u32 %v2147_v28, %v1784_v27  ;;  %1108 = vmatpush.bf16.msra.mxu3 %v2057_v26 }
  0x3f   : > { %v2040_v32 = vld [vmem:[%s2577_s30 + $0x3a0] sm:$0xf]  ;;  %v2211_v33 = vld [vmem:[%s2577_s30 + $0x3ac] sm:$0xf0]  ;;  %v1913_v35 = vor.u32 %v2179_v31, %v1912_v29  ;;  %1070 = vmatpush.bf16.msra.mxu0 %v1657_v30  ;;  %v2121_v29 = vld [vmem:[%s2577_s30 + $0xe4] sm:$0xf] }
  0x40   : > { %v1640_v36 = vld [vmem:[%s2577_s30 + $0x80] sm:$0xf]  ;;  %v2111_v37 = vld [vmem:[%s2577_s30 + $0x8c] sm:$0xf0]  ;;  %v2041_v39 = vor.u32 %v2211_v33, %v2040_v32  ;;  %1083 = vmatpush.bf16.msra.mxu1 %v1785_v34  ;;  %v1690_v30 = vld [vmem:[%s2577_s30 + $0xf0] sm:$0xf0] }
  0x41   : > { %v1768_v38 = vld [vmem:[%s2577_s30 + $0x180] sm:$0xf]  ;;  %v2143_v40 = vld [vmem:[%s2577_s30 + $0x18c] sm:$0xf0]  ;;  %v1641_v45 = vor.u32 %v2111_v37, %v1640_v36  ;;  %1096 = vmatpush.bf16.msra.mxu2 %v1913_v35  ;;  %v2153_v31 = vld [vmem:[%s2577_s30 + $0x1e4] sm:$0xf] }
  0x42   : > { %v1896_v41 = vld [vmem:[%s2577_s30 + $0x280] sm:$0xf]  ;;  %v2175_v42 = vld [vmem:[%s2577_s30 + $0x28c] sm:$0xf0]  ;;  %v1769_v46 = vor.u32 %v2143_v40, %v1768_v38  ;;  %1109 = vmatpush.bf16.msra.mxu3 %v2041_v39  ;;  %v1818_v33 = vld [vmem:[%s2577_s30 + $0x1f0] sm:$0xf0] }
  0x43   : > { %v2024_v43 = vld [vmem:[%s2577_s30 + $0x380] sm:$0xf]  ;;  %v2207_v44 = vld [vmem:[%s2577_s30 + $0x38c] sm:$0xf0]  ;;  %v1897_v47 = vor.u32 %v2175_v42, %v1896_v41  ;;  %1071 = vmatpush.bf16.msra.mxu0 %v1641_v45  ;;  %v2185_v34 = vld [vmem:[%s2577_s30 + $0x2e4] sm:$0xf]  ;;  %v1693_v41 = vor.u32 %v2121_v29, %v1690_v30  ;;  %v1821_v42 = vor.u32 %v2153_v31, %v1818_v33 }
  0x44   : > { %v1624_v48 = vld [vmem:[%s2577_s30 + $0x60] sm:$0xf]  ;;  %v2107_v49 = vld [vmem:[%s2577_s30 + $0x6c] sm:$0xf0]  ;;  %v2025_v51 = vor.u32 %v2207_v44, %v2024_v43  ;;  %1084 = vmatpush.bf16.msra.mxu1 %v1769_v46  ;;  %v1946_v35 = vld [vmem:[%s2577_s30 + $0x2f0] sm:$0xf0] }
  0x45   : > { %v1752_v50 = vld [vmem:[%s2577_s30 + $0x160] sm:$0xf]  ;;  %v2139_v52 = vld [vmem:[%s2577_s30 + $0x16c] sm:$0xf0]  ;;  %v1625_v57 = vor.u32 %v2107_v49, %v1624_v48  ;;  %1097 = vmatpush.bf16.msra.mxu2 %v1897_v47  ;;  %v2217_v38 = vld [vmem:[%s2577_s30 + $0x3e4] sm:$0xf]  ;;  %v1949_v43 = vor.u32 %v2185_v34, %v1946_v35 }
  0x46   : > { %v1880_v53 = vld [vmem:[%s2577_s30 + $0x260] sm:$0xf]  ;;  %v2171_v54 = vld [vmem:[%s2577_s30 + $0x26c] sm:$0xf0]  ;;  %v1753_v58 = vor.u32 %v2139_v52, %v1752_v50  ;;  %1110 = vmatpush.bf16.msra.mxu3 %v2025_v51  ;;  %v2074_v39 = vld [vmem:[%s2577_s30 + $0x3f0] sm:$0xf0] }
  0x47   : > { %v2008_v55 = vld [vmem:[%s2577_s30 + $0x360] sm:$0xf]  ;;  %v2203_v56 = vld [vmem:[%s2577_s30 + $0x36c] sm:$0xf0]  ;;  %v1881_v59 = vor.u32 %v2171_v54, %v1880_v53  ;;  %1072 = vmatpush.bf16.msra.mxu0 %v1625_v57  ;;  %v2117_v44 = vld [vmem:[%s2577_s30 + $0xc4] sm:$0xf]  ;;  %v2077_v47 = vor.u32 %v2217_v38, %v2074_v39 }
  0x48   : > { %v1608_v60 = vld [vmem:[%s2577_s30 + $0x40] sm:$0xf]  ;;  %v2103_v61 = vld [vmem:[%s2577_s30 + $0x4c] sm:$0xf0]  ;;  %v2009_v63 = vor.u32 %v2203_v56, %v2008_v55  ;;  %1085 = vmatpush.bf16.msra.mxu1 %v1753_v58  ;;  %v1674_v45 = vld [vmem:[%s2577_s30 + $0xd0] sm:$0xf0] }
  0x49   : > { %v1736_v62 = vld [vmem:[%s2577_s30 + $0x140] sm:$0xf]  ;;  %v2135_v0 = vld [vmem:[%s2577_s30 + $0x14c] sm:$0xf0]  ;;  %v1609_v5 = vor.u32 %v2103_v61, %v1608_v60  ;;  %1098 = vmatpush.bf16.msra.mxu2 %v1881_v59  ;;  %v2149_v46 = vld [vmem:[%s2577_s30 + $0x1c4] sm:$0xf]  ;;  %v1677_v54 = vor.u32 %v2117_v44, %v1674_v45 }
  0x4a   : > { %v1864_v1 = vld [vmem:[%s2577_s30 + $0x240] sm:$0xf]  ;;  %v2167_v2 = vld [vmem:[%s2577_s30 + $0x24c] sm:$0xf0]  ;;  %v1737_v6 = vor.u32 %v2135_v0, %v1736_v62  ;;  %1111 = vmatpush.bf16.msra.mxu3 %v2009_v63  ;;  %v1802_v48 = vld [vmem:[%s2577_s30 + $0x1d0] sm:$0xf0] }
  0x4b   : > { %v1992_v3 = vld [vmem:[%s2577_s30 + $0x340] sm:$0xf]  ;;  %v2199_v4 = vld [vmem:[%s2577_s30 + $0x34c] sm:$0xf0]  ;;  %v1865_v7 = vor.u32 %v2167_v2, %v1864_v1  ;;  %1073 = vmatpush.bf16.msra.mxu0 %v1609_v5  ;;  %v2181_v49 = vld [vmem:[%s2577_s30 + $0x2c4] sm:$0xf]  ;;  %v1805_v55 = vor.u32 %v2149_v46, %v1802_v48 }
  0x4c   : > { %v1592_v8 = vld [vmem:[%s2577_s30 + $0x20] sm:$0xf]  ;;  %v2099_v9 = vld [vmem:[%s2577_s30 + $0x2c] sm:$0xf0]  ;;  %v1993_v11 = vor.u32 %v2199_v4, %v1992_v3  ;;  %1086 = vmatpush.bf16.msra.mxu1 %v1737_v6  ;;  %v1930_v50 = vld [vmem:[%s2577_s30 + $0x2d0] sm:$0xf0] }
  0x4d   : > { %v1720_v10 = vld [vmem:[%s2577_s30 + $0x120] sm:$0xf]  ;;  %v2131_v12 = vld [vmem:[%s2577_s30 + $0x12c] sm:$0xf0]  ;;  %v1593_v17 = vor.u32 %v2099_v9, %v1592_v8  ;;  %1099 = vmatpush.bf16.msra.mxu2 %v1865_v7  ;;  %v2213_v51 = vld [vmem:[%s2577_s30 + $0x3c4] sm:$0xf]  ;;  %v1933_v56 = vor.u32 %v2181_v49, %v1930_v50 }
  0x4e   : > { %v1848_v13 = vld [vmem:[%s2577_s30 + $0x220] sm:$0xf]  ;;  %v2163_v14 = vld [vmem:[%s2577_s30 + $0x22c] sm:$0xf0]  ;;  %v1721_v20 = vor.u32 %v2131_v12, %v1720_v10  ;;  %1112 = vmatpush.bf16.msra.mxu3 %v1993_v11  ;;  %v2058_v52 = vld [vmem:[%s2577_s30 + $0x3d0] sm:$0xf0] }
  0x4f   : > { %v1976_v15 = vld [vmem:[%s2577_s30 + $0x320] sm:$0xf]  ;;  %v2195_v16 = vld [vmem:[%s2577_s30 + $0x32c] sm:$0xf0]  ;;  %v1849_v21 = vor.u32 %v2163_v14, %v1848_v13  ;;  %1074 = vmatpush.bf16.msra.mxu0 %v1593_v17  ;;  %v2113_v57 = vld [vmem:[%s2577_s30 + $0xa4] sm:$0xf]  ;;  %v2061_v60 = vor.u32 %v2213_v51, %v2058_v52 }
  0x50   : > { %v1576_v18 = vld [vmem:[%s2577_s30] sm:$0xf]  ;;  %v2095_v19 = vld [vmem:[%s2577_s30 + $0xc] sm:$0xf0]  ;;  %v1977_v25 = vor.u32 %v2195_v16, %v1976_v15  ;;  %1087 = vmatpush.bf16.msra.mxu1 %v1721_v20  ;;  %v1658_v58 = vld [vmem:[%s2577_s30 + $0xb0] sm:$0xf0] }
  0x51   : > { %v1704_v22 = vld [vmem:[%s2577_s30 + $0x100] sm:$0xf]  ;;  %v2127_v23 = vld [vmem:[%s2577_s30 + $0x10c] sm:$0xf0]  ;;  %v1577_v32 = vor.u32 %v2095_v19, %v1576_v18  ;;  %1100 = vmatpush.bf16.msra.mxu2 %v1849_v21  ;;  %v2145_v59 = vld [vmem:[%s2577_s30 + $0x1a4] sm:$0xf]  ;;  %v1661_v2 = vor.u32 %v2113_v57, %v1658_v58 }
  0x52   : > { %v1832_v24 = vld [vmem:[%s2577_s30 + $0x200] sm:$0xf]  ;;  %v2159_v26 = vld [vmem:[%s2577_s30 + $0x20c] sm:$0xf0]  ;;  %v1705_v36 = vor.u32 %v2127_v23, %v1704_v22  ;;  %1113 = vmatpush.bf16.msra.mxu3 %v1977_v25  ;;  %v1786_v61 = vld [vmem:[%s2577_s30 + $0x1b0] sm:$0xf0] }
  0x53   : > { %v1960_v27 = vld [vmem:[%s2577_s30 + $0x300] sm:$0xf]  ;;  %v2191_v28 = vld [vmem:[%s2577_s30 + $0x30c] sm:$0xf0]  ;;  %v1833_v37 = vor.u32 %v2159_v26, %v1832_v24  ;;  %1075 = vmatpush.bf16.msra.mxu0 %v1577_v32  ;;  %v2177_v62 = vld [vmem:[%s2577_s30 + $0x2a4] sm:$0xf]  ;;  %v1789_v4 = vor.u32 %v2145_v59, %v1786_v61 }
  0x54   : > { %v1961_v40 = vor.u32 %v2191_v28, %v1960_v27  ;;  %1088 = vmatpush.bf16.msra.mxu1 %v1705_v36  ;;  %v289_v53 = vld [vmem:[%s280_s27] sm:$0xf]  ;;  %v1914_v63 = vld [vmem:[%s2577_s30 + $0x2b0] sm:$0xf0]  ;;  %v2209_v0 = vld [vmem:[%s2577_s30 + $0x3a4] sm:$0xf] }
  0x55   : > { %1101 = vmatpush.bf16.msra.mxu2 %v1833_v37  ;;  %419 = vst [vmem:[#allocation1] ss:$9 sm:$0xff] %v289_v53  ;;  %v2042_v1 = vld [vmem:[%s2577_s30 + $0x3b0] sm:$0xf0]  ;;  %v2109_v3 = vld [vmem:[%s2577_s30 + $0x84] sm:$0xf]  ;;  %v1917_v5 = vor.u32 %v2177_v62, %v1914_v63 }
  0x56   : > { %1114 = vmatpush.bf16.msra.mxu3 %v1961_v40  ;;  %v1642_v6 = vld [vmem:[%s2577_s30 + $0x90] sm:$0xf0]  ;;  %v2141_v7 = vld [vmem:[%s2577_s30 + $0x184] sm:$0xf]  ;;  %v2045_v9 = vor.u32 %v2209_v0, %v2042_v1 }
  0x57   : > { %1120 = vmatpush.bf16.msrb.mxu0 %v1693_v41  ;;  %v1770_v8 = vld [vmem:[%s2577_s30 + $0x190] sm:$0xf0]  ;;  %v2173_v10 = vld [vmem:[%s2577_s30 + $0x284] sm:$0xf]  ;;  %v1645_v16 = vor.u32 %v2109_v3, %v1642_v6  ;;  %v2124_v3 = vld [vmem:[%s2577_s30 + $0xf4] sm:$0xf0] }
  0x58   : > { %1133 = vmatpush.bf16.msrb.mxu1 %v1821_v42  ;;  %v1898_v11 = vld [vmem:[%s2577_s30 + $0x290] sm:$0xf0]  ;;  %v2205_v12 = vld [vmem:[%s2577_s30 + $0x384] sm:$0xf]  ;;  %v1773_v19 = vor.u32 %v2141_v7, %v1770_v8  ;;  %v2156_v6 = vld [vmem:[%s2577_s30 + $0x1f4] sm:$0xf0] }
  0x59   : > { %1146 = vmatpush.bf16.msrb.mxu2 %v1949_v43  ;;  %v2026_v13 = vld [vmem:[%s2577_s30 + $0x390] sm:$0xf0]  ;;  %v1901_v20 = vor.u32 %v2173_v10, %v1898_v11  ;;  %v2105_v21 = vld [vmem:[%s2577_s30 + $0x64] sm:$0xf]  ;;  %v1952_v7 = vld [vmem:[%s2577_s30 + $0x2e8] sm:$0xf] }
  0x5a   : > { %1159 = vmatpush.bf16.msrb.mxu3 %v2077_v47  ;;  %v1626_v22 = vld [vmem:[%s2577_s30 + $0x70] sm:$0xf0]  ;;  %v2137_v23 = vld [vmem:[%s2577_s30 + $0x164] sm:$0xf]  ;;  %v2029_v24 = vor.u32 %v2205_v12, %v2026_v13  ;;  %v2188_v8 = vld [vmem:[%s2577_s30 + $0x2f4] sm:$0xf0] }
  0x5b   : > { %1121 = vmatpush.bf16.msrb.mxu0 %v1677_v54  ;;  %v1754_v25 = vld [vmem:[%s2577_s30 + $0x170] sm:$0xf0]  ;;  %v2169_v26 = vld [vmem:[%s2577_s30 + $0x264] sm:$0xf]  ;;  %v1629_v30 = vor.u32 %v2105_v21, %v1626_v22  ;;  %v2080_v11 = vld [vmem:[%s2577_s30 + $0x3e8] sm:$0xf] }
  0x5c   : > { %1134 = vmatpush.bf16.msrb.mxu1 %v1805_v55  ;;  %v2697_v14 = vld [vmem:[#allocation1 + $0x12] sm:$0xff]  ;;  %v2699_v15 = vld [vmem:[#allocation1] sm:$0xff]  ;;  %v2704_v18 = vld [vmem:[#allocation1 + $0x9] sm:$0xff]  ;;  %v1757_v31 = vor.u32 %v2137_v23, %v1754_v25 }
  0x5d   : > { %1147 = vmatpush.bf16.msrb.mxu2 %v1933_v56  ;;  %v2702_v17 = vld [vmem:[#allocation1 + $0x1b] sm:$0xff]  ;;  %v1882_v27 = vld [vmem:[%s2577_s30 + $0x270] sm:$0xf0]  ;;  %1076 = vmatmul.bf16.vlgmr.msra.gmra.mxu0 %v2699_v15  ;;  %v2201_v28 = vld [vmem:[%s2577_s30 + $0x364] sm:$0xf] }
  0x5e   : > { %1160 = vmatpush.bf16.msrb.mxu3 %v2061_v60  ;;  %1102 = vmatmul.bf16.vlgmr.msra.gmra.mxu2 %v2697_v14  ;;  %v2010_v29 = vld [vmem:[%s2577_s30 + $0x370] sm:$0xf0]  ;;  %v1885_v32 = vor.u32 %v2169_v26, %v1882_v27  ;;  %v2101_v33 = vld [vmem:[%s2577_s30 + $0x44] sm:$0xf]  ;;  %v2220_v12 = vld [vmem:[%s2577_s30 + $0x3f4] sm:$0xf0] }
  0x5f   : > { %1122 = vmatpush.bf16.msrb.mxu0 %v1661_v2  ;;  %1115 = vmatmul.bf16.vlgmr.msra.gmra.mxu3 %v2702_v17  ;;  %v1610_v34 = vld [vmem:[%s2577_s30 + $0x50] sm:$0xf0]  ;;  %v2133_v35 = vld [vmem:[%s2577_s30 + $0x144] sm:$0xf]  ;;  %v2013_v36 = vor.u32 %v2201_v28, %v2010_v29  ;;  %v1696_v2 = vld [vmem:[%s2577_s30 + $0xe8] sm:$0xf] }
  0x60   : > { %1135 = vmatpush.bf16.msrb.mxu1 %v1789_v4  ;;  %v1738_v37 = vld [vmem:[%s2577_s30 + $0x150] sm:$0xf0]  ;;  %v2165_v38 = vld [vmem:[%s2577_s30 + $0x244] sm:$0xf]  ;;  %v1613_v42 = vor.u32 %v2101_v33, %v1610_v34  ;;  %v1824_v4 = vld [vmem:[%s2577_s30 + $0x1e8] sm:$0xf] }
  0x61   : > { %1148 = vmatpush.bf16.msrb.mxu2 %v1917_v5  ;;  %1089 = vmatmul.bf16.vlgmr.msra.gmra.mxu1 %v2704_v18  ;;  %v1866_v39 = vld [vmem:[%s2577_s30 + $0x250] sm:$0xf0]  ;;  %v2197_v40 = vld [vmem:[%s2577_s30 + $0x344] sm:$0xf]  ;;  %v1741_v43 = vor.u32 %v2133_v35, %v1738_v37  ;;  %v1680_v21 = vld [vmem:[%s2577_s30 + $0xc8] sm:$0xf] }
  0x62   : > { %1161 = vmatpush.bf16.msrb.mxu3 %v2045_v9  ;;  %v1994_v41 = vld [vmem:[%s2577_s30 + $0x350] sm:$0xf0]  ;;  %v1869_v44 = vor.u32 %v2165_v38, %v1866_v39  ;;  %v2097_v45 = vld [vmem:[%s2577_s30 + $0x24] sm:$0xf]  ;;  %v2120_v22 = vld [vmem:[%s2577_s30 + $0xd4] sm:$0xf0] }
  0x63   : > { %1123 = vmatpush.bf16.msrb.mxu0 %v1645_v16  ;;  %v1594_v46 = vld [vmem:[%s2577_s30 + $0x30] sm:$0xf0]  ;;  %v2129_v47 = vld [vmem:[%s2577_s30 + $0x124] sm:$0xf]  ;;  %v1997_v48 = vor.u32 %v2197_v40, %v1994_v41  ;;  %v1697_v16 = vor.u32 %v2124_v3, %v1696_v2  ;;  %v1808_v23 = vld [vmem:[%s2577_s30 + $0x1c8] sm:$0xf] }
  0x64   : > { %1136 = vmatpush.bf16.msrb.mxu1 %v1773_v19  ;;  %v1722_v49 = vld [vmem:[%s2577_s30 + $0x130] sm:$0xf0]  ;;  %v2161_v50 = vld [vmem:[%s2577_s30 + $0x224] sm:$0xf]  ;;  %v1597_v54 = vor.u32 %v2097_v45, %v1594_v46  ;;  %v1825_v19 = vor.u32 %v2156_v6, %v1824_v4  ;;  %v2152_v25 = vld [vmem:[%s2577_s30 + $0x1d4] sm:$0xf0] }
  0x65   : > { %1149 = vmatpush.bf16.msrb.mxu2 %v1901_v20  ;;  %v1850_v51 = vld [vmem:[%s2577_s30 + $0x230] sm:$0xf0]  ;;  %v2193_v52 = vld [vmem:[%s2577_s30 + $0x324] sm:$0xf]  ;;  %v1725_v57 = vor.u32 %v2129_v47, %v1722_v49  ;;  %v1953_v20 = vor.u32 %v2188_v8, %v1952_v7  ;;  %v1936_v26 = vld [vmem:[%s2577_s30 + $0x2c8] sm:$0xf] }
  0x66   : > { %1162 = vmatpush.bf16.msrb.mxu3 %v2029_v24  ;;  %v1978_v53 = vld [vmem:[%s2577_s30 + $0x330] sm:$0xf0]  ;;  %v2093_v55 = vld [vmem:[%s2577_s30 + $0x4] sm:$0xf]  ;;  %v1853_v58 = vor.u32 %v2161_v50, %v1850_v51  ;;  %v2081_v24 = vor.u32 %v2220_v12, %v2080_v11  ;;  %v2184_v27 = vld [vmem:[%s2577_s30 + $0x2d4] sm:$0xf0] }
  0x67   : > { %1124 = vmatpush.bf16.msrb.mxu0 %v1629_v30  ;;  %v1578_v56 = vld [vmem:[%s2577_s30 + $0x10] sm:$0xf0]  ;;  %v2125_v59 = vld [vmem:[%s2577_s30 + $0x104] sm:$0xf]  ;;  %v1981_v62 = vor.u32 %v2193_v52, %v1978_v53  ;;  %v2064_v28 = vld [vmem:[%s2577_s30 + $0x3c8] sm:$0xf]  ;;  %v1681_v30 = vor.u32 %v2120_v22, %v1680_v21 }
  0x68   : > { %1137 = vmatpush.bf16.msrb.mxu1 %v1757_v31  ;;  %v1706_v60 = vld [vmem:[%s2577_s30 + $0x110] sm:$0xf0]  ;;  %v2157_v61 = vld [vmem:[%s2577_s30 + $0x204] sm:$0xf]  ;;  %v1581_v5 = vor.u32 %v2093_v55, %v1578_v56  ;;  %v2216_v29 = vld [vmem:[%s2577_s30 + $0x3d4] sm:$0xf0]  ;;  %v1809_v31 = vor.u32 %v2152_v25, %v1808_v23 }
  0x69   : > { %1150 = vmatpush.bf16.msrb.mxu2 %v1885_v32  ;;  %v1834_v63 = vld [vmem:[%s2577_s30 + $0x210] sm:$0xf0]  ;;  %v2189_v0 = vld [vmem:[%s2577_s30 + $0x304] sm:$0xf]  ;;  %v1709_v9 = vor.u32 %v2125_v59, %v1706_v60  ;;  %v1937_v32 = vor.u32 %v2184_v27, %v1936_v26  ;;  %v1664_v33 = vld [vmem:[%s2577_s30 + $0xa8] sm:$0xf] }
  0x6a   : > { %1163 = vmatpush.bf16.msrb.mxu3 %v2013_v36  ;;  %v1962_v1 = vld [vmem:[%s2577_s30 + $0x310] sm:$0xf0]  ;;  %v1837_v10 = vor.u32 %v2157_v61, %v1834_v63  ;;  %v2116_v34 = vld [vmem:[%s2577_s30 + $0xb4] sm:$0xf0]  ;;  %v1792_v35 = vld [vmem:[%s2577_s30 + $0x1a8] sm:$0xf]  ;;  %v2065_v36 = vor.u32 %v2216_v29, %v2064_v28 }
  0x6b   : > { %1125 = vmatpush.bf16.msrb.mxu0 %v1613_v42  ;;  %v1965_v13 = vor.u32 %v2189_v0, %v1962_v1  ;;  %v2148_v37 = vld [vmem:[%s2577_s30 + $0x1b4] sm:$0xf0]  ;;  %v1920_v38 = vld [vmem:[%s2577_s30 + $0x2a8] sm:$0xf]  ;;  %v1665_v42 = vor.u32 %v2116_v34, %v1664_v33 }
  0x6c   : > { %1138 = vmatpush.bf16.msrb.mxu1 %v1741_v43  ;;  %v2180_v39 = vld [vmem:[%s2577_s30 + $0x2b4] sm:$0xf0]  ;;  %v2048_v40 = vld [vmem:[%s2577_s30 + $0x3a8] sm:$0xf]  ;;  %v1793_v43 = vor.u32 %v2148_v37, %v1792_v35 }
  0x6d   : > { %1151 = vmatpush.bf16.msrb.mxu2 %v1869_v44  ;;  %v2212_v41 = vld [vmem:[%s2577_s30 + $0x3b4] sm:$0xf0]  ;;  %v1921_v44 = vor.u32 %v2180_v39, %v1920_v38  ;;  %v1648_v45 = vld [vmem:[%s2577_s30 + $0x88] sm:$0xf] }
  0x6e   : > { %1164 = vmatpush.bf16.msrb.mxu3 %v1997_v48  ;;  %v2112_v46 = vld [vmem:[%s2577_s30 + $0x94] sm:$0xf0]  ;;  %v1776_v47 = vld [vmem:[%s2577_s30 + $0x188] sm:$0xf]  ;;  %v2049_v48 = vor.u32 %v2212_v41, %v2048_v40 }
  0x6f   : > { %1126 = vmatpush.bf16.msrb.mxu0 %v1597_v54  ;;  %v2144_v49 = vld [vmem:[%s2577_s30 + $0x194] sm:$0xf0]  ;;  %v1904_v50 = vld [vmem:[%s2577_s30 + $0x288] sm:$0xf]  ;;  %v1649_v54 = vor.u32 %v2112_v46, %v1648_v45  ;;  %v1826_v46 = vld [vmem:[%s2577_s30 + $0x1f8] sm:$0xf0] }
  0x70   : > { %1139 = vmatpush.bf16.msrb.mxu1 %v1725_v57  ;;  %v2176_v51 = vld [vmem:[%s2577_s30 + $0x294] sm:$0xf0]  ;;  %v2032_v52 = vld [vmem:[%s2577_s30 + $0x388] sm:$0xf]  ;;  %v1777_v55 = vor.u32 %v2144_v49, %v1776_v47  ;;  %v2186_v47 = vld [vmem:[%s2577_s30 + $0x2ec] sm:$0xf] }
  0x71   : > { %1152 = vmatpush.bf16.msrb.mxu2 %v1853_v58  ;;  %v2208_v53 = vld [vmem:[%s2577_s30 + $0x394] sm:$0xf0]  ;;  %v1905_v56 = vor.u32 %v2176_v51, %v1904_v50  ;;  %v1632_v57 = vld [vmem:[%s2577_s30 + $0x68] sm:$0xf]  ;;  %v2218_v51 = vld [vmem:[%s2577_s30 + $0x3ec] sm:$0xf] }
  0x72   : > { %1165 = vmatpush.bf16.msrb.mxu3 %v1981_v62  ;;  %v2108_v58 = vld [vmem:[%s2577_s30 + $0x74] sm:$0xf0]  ;;  %v1760_v59 = vld [vmem:[%s2577_s30 + $0x168] sm:$0xf]  ;;  %v2033_v60 = vor.u32 %v2208_v53, %v2032_v52  ;;  %v2082_v52 = vld [vmem:[%s2577_s30 + $0x3f8] sm:$0xf0] }
  0x73   : > { %1127 = vmatpush.bf16.msrb.mxu0 %v1581_v5  ;;  %v2140_v61 = vld [vmem:[%s2577_s30 + $0x174] sm:$0xf0]  ;;  %v1888_v62 = vld [vmem:[%s2577_s30 + $0x268] sm:$0xf]  ;;  %v1633_v2 = vor.u32 %v2108_v58, %v1632_v57  ;;  %v2118_v57 = vld [vmem:[%s2577_s30 + $0xcc] sm:$0xf] }
  0x74   : > { %1140 = vmatpush.bf16.msrb.mxu1 %v1709_v9  ;;  %v2172_v63 = vld [vmem:[%s2577_s30 + $0x274] sm:$0xf0]  ;;  %v2016_v0 = vld [vmem:[%s2577_s30 + $0x368] sm:$0xf]  ;;  %v1761_v3 = vor.u32 %v2140_v61, %v1760_v59  ;;  %v1682_v58 = vld [vmem:[%s2577_s30 + $0xd8] sm:$0xf0] }
  0x75   : > { %1153 = vmatpush.bf16.msrb.mxu2 %v1837_v10  ;;  %v2204_v1 = vld [vmem:[%s2577_s30 + $0x374] sm:$0xf0]  ;;  %v1889_v4 = vor.u32 %v2172_v63, %v1888_v62  ;;  %v1616_v5 = vld [vmem:[%s2577_s30 + $0x48] sm:$0xf]  ;;  %v2150_v59 = vld [vmem:[%s2577_s30 + $0x1cc] sm:$0xf] }
  0x76   : > { %1166 = vmatpush.bf16.msrb.mxu3 %v1965_v13  ;;  %1128 = vmatmul.bf16.vlgmr.msrb.gmra.mxu0 %v2699_v15  ;;  %v2104_v6 = vld [vmem:[%s2577_s30 + $0x54] sm:$0xf0]  ;;  %v1744_v7 = vld [vmem:[%s2577_s30 + $0x148] sm:$0xf]  ;;  %v2017_v8 = vor.u32 %v2204_v1, %v2016_v0  ;;  %v1810_v61 = vld [vmem:[%s2577_s30 + $0x1d8] sm:$0xf0] }
  0x77   : > { %1172 = vmatpush.bf16.msra.mxu0 %v1697_v16  ;;  %1141 = vmatmul.bf16.vlgmr.msrb.gmra.mxu1 %v2704_v18  ;;  %v2136_v9 = vld [vmem:[%s2577_s30 + $0x154] sm:$0xf0]  ;;  %v1872_v10 = vld [vmem:[%s2577_s30 + $0x248] sm:$0xf]  ;;  %v1617_v16 = vor.u32 %v2104_v6, %v1616_v5  ;;  %v2182_v62 = vld [vmem:[%s2577_s30 + $0x2cc] sm:$0xf] }
  0x78   : > { %1185 = vmatpush.bf16.msra.mxu1 %v1825_v19  ;;  %1154 = vmatmul.bf16.vlgmr.msrb.gmra.mxu2 %v2697_v14  ;;  %v2168_v11 = vld [vmem:[%s2577_s30 + $0x254] sm:$0xf0]  ;;  %v2000_v12 = vld [vmem:[%s2577_s30 + $0x348] sm:$0xf]  ;;  %v1745_v19 = vor.u32 %v2136_v9, %v1744_v7  ;;  %v1938_v63 = vld [vmem:[%s2577_s30 + $0x2d8] sm:$0xf0] }
  0x79   : > { %1198 = vmatpush.bf16.msra.mxu2 %v1953_v20  ;;  %1167 = vmatmul.bf16.vlgmr.msrb.gmra.mxu3 %v2702_v17  ;;  %v2200_v13 = vld [vmem:[%s2577_s30 + $0x354] sm:$0xf0]  ;;  %v1873_v20 = vor.u32 %v2168_v11, %v1872_v10  ;;  %v1600_v21 = vld [vmem:[%s2577_s30 + $0x28] sm:$0xf]  ;;  %v2214_v0 = vld [vmem:[%s2577_s30 + $0x3cc] sm:$0xf] }
  0x7a   : > { %1211 = vmatpush.bf16.msra.mxu3 %v2081_v24  ;;  %v2100_v22 = vld [vmem:[%s2577_s30 + $0x34] sm:$0xf0]  ;;  %v1728_v23 = vld [vmem:[%s2577_s30 + $0x128] sm:$0xf]  ;;  %v2001_v24 = vor.u32 %v2200_v13, %v2000_v12  ;;  %v2066_v1 = vld [vmem:[%s2577_s30 + $0x3d8] sm:$0xf0] }
  0x7b   : > { %1173 = vmatpush.bf16.msra.mxu0 %v1681_v30  ;;  %v2132_v25 = vld [vmem:[%s2577_s30 + $0x134] sm:$0xf0]  ;;  %v1856_v26 = vld [vmem:[%s2577_s30 + $0x228] sm:$0xf]  ;;  %v1601_v30 = vor.u32 %v2100_v22, %v1600_v21  ;;  %v2114_v5 = vld [vmem:[%s2577_s30 + $0xac] sm:$0xf] }
  0x7c   : > { %1186 = vmatpush.bf16.msra.mxu1 %v1809_v31  ;;  %v2164_v27 = vld [vmem:[%s2577_s30 + $0x234] sm:$0xf0]  ;;  %v1984_v28 = vld [vmem:[%s2577_s30 + $0x328] sm:$0xf]  ;;  %v1729_v33 = vor.u32 %v2132_v25, %v1728_v23  ;;  %v1666_v6 = vld [vmem:[%s2577_s30 + $0xb8] sm:$0xf0] }
  0x7d   : > { %1199 = vmatpush.bf16.msra.mxu2 %v1937_v32  ;;  %v2196_v29 = vld [vmem:[%s2577_s30 + $0x334] sm:$0xf0]  ;;  %v1584_v31 = vld [vmem:[%s2577_s30 + $0x8] sm:$0xf]  ;;  %v1857_v34 = vor.u32 %v2164_v27, %v1856_v26  ;;  %v2146_v7 = vld [vmem:[%s2577_s30 + $0x1ac] sm:$0xf] }
  0x7e   : > { %1212 = vmatpush.bf16.msra.mxu3 %v2065_v36  ;;  %v2096_v32 = vld [vmem:[%s2577_s30 + $0x14] sm:$0xf0]  ;;  %v1712_v35 = vld [vmem:[%s2577_s30 + $0x108] sm:$0xf]  ;;  %v1985_v38 = vor.u32 %v2196_v29, %v1984_v28  ;;  %v1794_v9 = vld [vmem:[%s2577_s30 + $0x1b8] sm:$0xf0] }
  0x7f   : > { %1174 = vmatpush.bf16.msra.mxu0 %v1665_v42  ;;  %v2128_v36 = vld [vmem:[%s2577_s30 + $0x114] sm:$0xf0]  ;;  %v1840_v37 = vld [vmem:[%s2577_s30 + $0x208] sm:$0xf]  ;;  %v2122_v42 = vld [vmem:[%s2577_s30 + $0xec] sm:$0xf]  ;;  %v1585_v45 = vor.u32 %v2096_v32, %v1584_v31 }
  0x80   : > { %1187 = vmatpush.bf16.msra.mxu1 %v1793_v43  ;;  %v2160_v39 = vld [vmem:[%s2577_s30 + $0x214] sm:$0xf0]  ;;  %v1968_v40 = vld [vmem:[%s2577_s30 + $0x308] sm:$0xf]  ;;  %v1698_v43 = vld [vmem:[%s2577_s30 + $0xf8] sm:$0xf0]  ;;  %v1713_v49 = vor.u32 %v2128_v36, %v1712_v35 }
  0x81   : > { %1200 = vmatpush.bf16.msra.mxu2 %v1921_v44  ;;  %v2192_v41 = vld [vmem:[%s2577_s30 + $0x314] sm:$0xf0]  ;;  %v2154_v44 = vld [vmem:[%s2577_s30 + $0x1ec] sm:$0xf]  ;;  %v1841_v50 = vor.u32 %v2160_v39, %v1840_v37  ;;  %v1922_v11 = vld [vmem:[%s2577_s30 + $0x2b8] sm:$0xf0] }
  0x82   : > { %1213 = vmatpush.bf16.msra.mxu3 %v2049_v48  ;;  %v1954_v48 = vld [vmem:[%s2577_s30 + $0x2f8] sm:$0xf0]  ;;  %v1969_v53 = vor.u32 %v2192_v41, %v1968_v40  ;;  %v2178_v10 = vld [vmem:[%s2577_s30 + $0x2ac] sm:$0xf] }
  0x83   : > { %1175 = vmatpush.bf16.msra.mxu0 %v1649_v54  ;;  %v1701_v54 = vor.u32 %v2122_v42, %v1698_v43  ;;  %v2210_v12 = vld [vmem:[%s2577_s30 + $0x3ac] sm:$0xf]  ;;  %v2050_v13 = vld [vmem:[%s2577_s30 + $0x3b8] sm:$0xf0] }
  0x84   : > { %1188 = vmatpush.bf16.msra.mxu1 %v1777_v55  ;;  %v1829_v55 = vor.u32 %v2154_v44, %v1826_v46  ;;  %v2110_v21 = vld [vmem:[%s2577_s30 + $0x8c] sm:$0xf]  ;;  %v1650_v22 = vld [vmem:[%s2577_s30 + $0x98] sm:$0xf0] }
  0x85   : > { %1201 = vmatpush.bf16.msra.mxu2 %v1905_v56  ;;  %v1957_v56 = vor.u32 %v2186_v47, %v1954_v48  ;;  %v2142_v23 = vld [vmem:[%s2577_s30 + $0x18c] sm:$0xf]  ;;  %v1778_v25 = vld [vmem:[%s2577_s30 + $0x198] sm:$0xf0] }
  0x86   : > { %1214 = vmatpush.bf16.msra.mxu3 %v2033_v60  ;;  %v2085_v60 = vor.u32 %v2218_v51, %v2082_v52  ;;  %v2174_v26 = vld [vmem:[%s2577_s30 + $0x28c] sm:$0xf]  ;;  %v1906_v27 = vld [vmem:[%s2577_s30 + $0x298] sm:$0xf0]  ;;  %v1781_v31 = vor.u32 %v2142_v23, %v1778_v25 }
  0x87   : > { %1176 = vmatpush.bf16.msra.mxu0 %v1633_v2  ;;  %v1685_v2 = vor.u32 %v2118_v57, %v1682_v58  ;;  %v2206_v28 = vld [vmem:[%s2577_s30 + $0x38c] sm:$0xf]  ;;  %v2034_v29 = vld [vmem:[%s2577_s30 + $0x398] sm:$0xf0]  ;;  %v1909_v32 = vor.u32 %v2174_v26, %v1906_v27 }
  0x88   : > { %1189 = vmatpush.bf16.msra.mxu1 %v1761_v3  ;;  %v1813_v3 = vor.u32 %v2150_v59, %v1810_v61  ;;  %v2138_v35 = vld [vmem:[%s2577_s30 + $0x16c] sm:$0xf]  ;;  %v2037_v36 = vor.u32 %v2206_v28, %v2034_v29  ;;  %v1762_v37 = vld [vmem:[%s2577_s30 + $0x178] sm:$0xf0] }
  0x89   : > { %1202 = vmatpush.bf16.msra.mxu2 %v1889_v4  ;;  %v1941_v4 = vor.u32 %v2182_v62, %v1938_v63  ;;  %v1890_v39 = vld [vmem:[%s2577_s30 + $0x278] sm:$0xf0]  ;;  %v2202_v40 = vld [vmem:[%s2577_s30 + $0x36c] sm:$0xf]  ;;  %v1765_v43 = vor.u32 %v2138_v35, %v1762_v37 }
  0x8a   : > { %1215 = vmatpush.bf16.msra.mxu3 %v2017_v8  ;;  %v2069_v8 = vor.u32 %v2214_v0, %v2066_v1  ;;  %v2018_v41 = vld [vmem:[%s2577_s30 + $0x378] sm:$0xf0]  ;;  %v2134_v47 = vld [vmem:[%s2577_s30 + $0x14c] sm:$0xf] }
  0x8b   : > { %1177 = vmatpush.bf16.msra.mxu0 %v1617_v16  ;;  %v1669_v16 = vor.u32 %v2114_v5, %v1666_v6  ;;  %v1618_v46 = vld [vmem:[%s2577_s30 + $0x58] sm:$0xf0]  ;;  %v2021_v48 = vor.u32 %v2202_v40, %v2018_v41  ;;  %v2198_v52 = vld [vmem:[%s2577_s30 + $0x34c] sm:$0xf] }
  0x8c   : > { %1190 = vmatpush.bf16.msra.mxu1 %v1745_v19  ;;  %v1797_v19 = vor.u32 %v2146_v7, %v1794_v9  ;;  %v1874_v51 = vld [vmem:[%s2577_s30 + $0x258] sm:$0xf0]  ;;  %v2098_v57 = vld [vmem:[%s2577_s30 + $0x2c] sm:$0xf] }
  0x8d   : > { %1203 = vmatpush.bf16.msra.mxu2 %v1873_v20  ;;  %v1925_v20 = vor.u32 %v2178_v10, %v1922_v11  ;;  %v1602_v58 = vld [vmem:[%s2577_s30 + $0x38] sm:$0xf0]  ;;  %v2130_v59 = vld [vmem:[%s2577_s30 + $0x12c] sm:$0xf] }
  0x8e   : > { %1216 = vmatpush.bf16.msra.mxu3 %v2001_v24  ;;  %v2053_v24 = vor.u32 %v2210_v12, %v2050_v13  ;;  %v1730_v61 = vld [vmem:[%s2577_s30 + $0x138] sm:$0xf0]  ;;  %v2162_v62 = vld [vmem:[%s2577_s30 + $0x22c] sm:$0xf] }
  0x8f   : > { %1178 = vmatpush.bf16.msra.mxu0 %v1601_v30  ;;  %v1653_v30 = vor.u32 %v2110_v21, %v1650_v22  ;;  %v1858_v63 = vld [vmem:[%s2577_s30 + $0x238] sm:$0xf0]  ;;  %v2194_v0 = vld [vmem:[%s2577_s30 + $0x32c] sm:$0xf] }
  0x90   : > { %1191 = vmatpush.bf16.msra.mxu1 %v1729_v33  ;;  %v2106_v33 = vld [vmem:[%s2577_s30 + $0x6c] sm:$0xf]  ;;  %v1986_v1 = vld [vmem:[%s2577_s30 + $0x338] sm:$0xf0] }
  0x91   : > { %1204 = vmatpush.bf16.msra.mxu2 %v1857_v34  ;;  %v1634_v34 = vld [vmem:[%s2577_s30 + $0x78] sm:$0xf0]  ;;  %v2094_v5 = vld [vmem:[%s2577_s30 + $0xc] sm:$0xf] }
  0x92   : > { %1217 = vmatpush.bf16.msra.mxu3 %v1985_v38  ;;  %v2170_v38 = vld [vmem:[%s2577_s30 + $0x26c] sm:$0xf]  ;;  %v1637_v42 = vor.u32 %v2106_v33, %v1634_v34  ;;  %v1586_v6 = vld [vmem:[%s2577_s30 + $0x18] sm:$0xf0] }
  0x93   : > { %1179 = vmatpush.bf16.msra.mxu0 %v1585_v45  ;;  %v1893_v44 = vor.u32 %v2170_v38, %v1890_v39  ;;  %v2102_v45 = vld [vmem:[%s2577_s30 + $0x4c] sm:$0xf]  ;;  %v1714_v9 = vld [vmem:[%s2577_s30 + $0x118] sm:$0xf0] }
  0x94   : > { %1192 = vmatpush.bf16.msra.mxu1 %v1713_v49  ;;  %v1746_v49 = vld [vmem:[%s2577_s30 + $0x158] sm:$0xf0]  ;;  %v2126_v7 = vld [vmem:[%s2577_s30 + $0x10c] sm:$0xf] }
  0x95   : > { %1205 = vmatpush.bf16.msra.mxu2 %v1841_v50  ;;  %v2166_v50 = vld [vmem:[%s2577_s30 + $0x24c] sm:$0xf]  ;;  %v1842_v11 = vld [vmem:[%s2577_s30 + $0x218] sm:$0xf0] }
  0x96   : > { %1218 = vmatpush.bf16.msra.mxu3 %v1969_v53  ;;  %1180 = vmatmul.bf16.vlgmr.msra.gmra.mxu0 %v2699_v15  ;;  %v2002_v53 = vld [vmem:[%s2577_s30 + $0x358] sm:$0xf0]  ;;  %v2158_v10 = vld [vmem:[%s2577_s30 + $0x20c] sm:$0xf] }
  0x97   : > { %1224 = vmatpush.bf16.msrb.mxu0 %v1701_v54  ;;  %1193 = vmatmul.bf16.vlgmr.msra.gmra.mxu1 %v2704_v18  ;;  %v1621_v54 = vor.u32 %v2102_v45, %v1618_v46  ;;  %v2190_v12 = vld [vmem:[%s2577_s30 + $0x30c] sm:$0xf]  ;;  %v1970_v13 = vld [vmem:[%s2577_s30 + $0x318] sm:$0xf0] }
  0x98   : > { %1237 = vmatpush.bf16.msrb.mxu1 %v1829_v55  ;;  %1206 = vmatmul.bf16.vlgmr.msra.gmra.mxu2 %v2697_v14  ;;  %v1749_v55 = vor.u32 %v2134_v47, %v1746_v49  ;;  %v1973_v21 = vor.u32 %v2190_v12, %v1970_v13 }
  0x99   : > { %1250 = vmatpush.bf16.msrb.mxu2 %v1957_v56  ;;  %1219 = vmatmul.bf16.vlgmr.msra.gmra.mxu3 %v2702_v17  ;;  %v1877_v56 = vor.u32 %v2166_v50, %v1874_v51 }
  0x9a   : > { %1263 = vmatpush.bf16.msrb.mxu3 %v2085_v60  ;;  %v2005_v60 = vor.u32 %v2198_v52, %v2002_v53 }
  0x9b   : > { %1225 = vmatpush.bf16.msrb.mxu0 %v1685_v2  ;;  %v1605_v2 = vor.u32 %v2098_v57, %v1602_v58 }
  0x9c   : > { %1238 = vmatpush.bf16.msrb.mxu1 %v1813_v3  ;;  %v1733_v3 = vor.u32 %v2130_v59, %v1730_v61 }
  0x9d   : > { %1251 = vmatpush.bf16.msrb.mxu2 %v1941_v4  ;;  %v1861_v4 = vor.u32 %v2162_v62, %v1858_v63  ;;  %v288_v63 = vld [vmem:[#allocation2] sm:$0xff] }
  0x9e   : > { %1264 = vmatpush.bf16.msrb.mxu3 %v2069_v8  ;;  %v1989_v8 = vor.u32 %v2194_v0, %v1986_v1 }
  0x9f   : > { %1226 = vmatpush.bf16.msrb.mxu0 %v1669_v16  ;;  %v1589_v16 = vor.u32 %v2094_v5, %v1586_v6 }
  0xa0   : > { %1239 = vmatpush.bf16.msrb.mxu1 %v1797_v19  ;;  %v1717_v19 = vor.u32 %v2126_v7, %v1714_v9 }
  0xa1   : > { %1252 = vmatpush.bf16.msrb.mxu2 %v1925_v20  ;;  %v1845_v20 = vor.u32 %v2158_v10, %v1842_v11 }
  0xa2   : > { %1265 = vmatpush.bf16.msrb.mxu3 %v2053_v24 }
  0xa3   : > { %1227 = vmatpush.bf16.msrb.mxu0 %v1653_v30 }
  0xa4   : > { %1240 = vmatpush.bf16.msrb.mxu1 %v1781_v31 }
  0xa5   : > { %1253 = vmatpush.bf16.msrb.mxu2 %v1909_v32 }
  0xa6   : > { %1266 = vmatpush.bf16.msrb.mxu3 %v2037_v36 }
  0xa7   : > { %1228 = vmatpush.bf16.msrb.mxu0 %v1637_v42 }
  0xa8   : > { %1241 = vmatpush.bf16.msrb.mxu1 %v1765_v43 }
  0xa9   : > { %1254 = vmatpush.bf16.msrb.mxu2 %v1893_v44 }
  0xaa   : > { %1267 = vmatpush.bf16.msrb.mxu3 %v2021_v48 }
  0xab   : > { %1229 = vmatpush.bf16.msrb.mxu0 %v1621_v54 }
  0xac   : > { %1242 = vmatpush.bf16.msrb.mxu1 %v1749_v55 }
  0xad   : > { %1255 = vmatpush.bf16.msrb.mxu2 %v1877_v56 }
  0xae   : > { %1268 = vmatpush.bf16.msrb.mxu3 %v2005_v60 }
  0xaf   : > { %1230 = vmatpush.bf16.msrb.mxu0 %v1605_v2 }
  0xb0   : > { %1243 = vmatpush.bf16.msrb.mxu1 %v1733_v3 }
  0xb1   : > { %1256 = vmatpush.bf16.msrb.mxu2 %v1861_v4 }
  0xb2   : > { %1269 = vmatpush.bf16.msrb.mxu3 %v1989_v8 }
  0xb3   : > { %1231 = vmatpush.bf16.msrb.mxu0 %v1589_v16 }
  0xb4   : > { %1244 = vmatpush.bf16.msrb.mxu1 %v1717_v19 }
  0xb5   : > { %1257 = vmatpush.bf16.msrb.mxu2 %v1845_v20 }
  0xb6   : > { %1270 = vmatpush.bf16.msrb.mxu3 %v1973_v21  ;;  %1232 = vmatmul.bf16.vlgmr.msrb.gmra.mxu0 %v2699_v15 }
  0xb7   : > { %1245 = vmatmul.bf16.vlgmr.msrb.gmra.mxu1 %v2704_v18 }
  0xb8   : > { %1258 = vmatmul.bf16.vlgmr.msrb.gmra.mxu2 %v2697_v14 }
  0xb9   : > { %1271 = vmatmul.bf16.vlgmr.msrb.gmra.mxu3 %v2702_v17 }
  0xda   : > { %v1077_v22 = vpop.f32.mrf.mxu0 }
  0xde   : > { %v1090_v23 = vpop.f32.mrf.mxu1 }
  0xdf   : > { %v1091_v24 = vadd.f32 %v1090_v23, %v1077_v22 }
  0xe1   : > { %v1103_v25 = vpop.f32.mrf.mxu2 }
  0xe2   : > { %v1104_v26 = vadd.f32 %v1103_v25, %v1091_v24  ;;  %v1116_v27 = vpop.f32.mrf.mxu3  ;;  %v1079_v29 = vpop.f32.mrf.mxu0 }
  0xe4   : > { %v1117_v28 = vadd.f32 %v1116_v27, %v1104_v26 }
  0xe6   : > { %v1092_v30 = vpop.f32.mrf.mxu1 }
  0xe9   : > { %v1105_v31 = vpop.f32.mrf.mxu2 }
  0xea   : > { %v1118_v32 = vpop.f32.mrf.mxu3 }
  0xf3   : > { %v1129_v33 = vpop.f32.mrf.mxu0 }
  0xf4   : > { %v1142_v34 = vpop.f32.mrf.mxu1 }
  0xf5   : > { %v1143_v45 = vadd.f32 %v1142_v34, %v1129_v33 }
  0xfb   : > { %v1155_v15 = vpop.f32.mrf.mxu2  ;;  %v1131_v18 = vpop.f32.mrf.mxu0 }
  0xfc   : > { %v1168_v35 = vpop.f32.mrf.mxu3  ;;  %v1144_v36 = vpop.f32.mrf.mxu1  ;;  %v1156_v49 = vadd.f32 %v1155_v15, %v1143_v45 }
  0xfe   : > { %v1169_v52 = vadd.f32 %v1168_v35, %v1156_v49 }
 0x100   : > { %v1280_v59 = vrot.slane %v1169_v52, 6 }
 0x102   : > { %v1284_v0 = vsel %vm1283_vm0, %v1117_v28, %v1280_v59 }
 0x103   : > { %v1157_v14 = vpop.f32.mrf.mxu2 }
 0x104   : > { %v1170_v37 = vpop.f32.mrf.mxu3 }
 0x113   : > { %v1181_v17 = vpop.f32.mrf.mxu0 }
 0x114   : > { %v1194_v38 = vpop.f32.mrf.mxu1 }
 0x115   : > { %v1195_v46 = vadd.f32 %v1194_v38, %v1181_v17 }
 0x11b   : > { %v1207_v39 = vpop.f32.mrf.mxu2  ;;  %v1183_v41 = vpop.f32.mrf.mxu0 }
 0x11c   : > { %v1220_v40 = vpop.f32.mrf.mxu3  ;;  %v1196_v42 = vpop.f32.mrf.mxu1  ;;  %v1208_v50 = vadd.f32 %v1207_v39, %v1195_v46 }
 0x11e   : > { %v1221_v54 = vadd.f32 %v1220_v40, %v1208_v50 }
 0x120   : > { %v1281_v61 = vrot.slane %v1221_v54, 4 }
 0x123   : > { %v1209_v43 = vpop.f32.mrf.mxu2 }
 0x124   : > { %v1222_v44 = vpop.f32.mrf.mxu3 }
 0x133   : > { %v1233_v47 = vpop.f32.mrf.mxu0 }
 0x134   : > { %v1246_v48 = vpop.f32.mrf.mxu1 }
 0x135   : > { %v1247_v51 = vadd.f32 %v1246_v48, %v1233_v47 }
 0x13b   : > { %v1259_v53 = vpop.f32.mrf.mxu2  ;;  %v1235_v57 = vpop.f32.mrf.mxu0 }
 0x13c   : > { %v1260_v55 = vadd.f32 %v1259_v53, %v1247_v51  ;;  %v1272_v56 = vpop.f32.mrf.mxu3  ;;  %v1248_v58 = vpop.f32.mrf.mxu1 }
 0x13e   : > { %v1273_v60 = vadd.f32 %v1272_v56, %v1260_v55 }
 0x140   : > { %v1282_v62 = vrot.slane %v1273_v60, 2 }
 0x142   : > { %v1286_v1 = vsel %vm1285_vm1, %v1281_v61, %v1282_v62  ;;  %1295 = sbr.rel (%p2086_p5) target bundleno = 498 (0x1f2), region = 60 }
 0x143   : > { %v1288_v2 = vsel %vm1287_vm2, %v1284_v0, %v1286_v1  ;;  %v1261_v3 = vpop.f32.mrf.mxu2 }
 0x144   : > { %v1290_v4 = vadd.f32 %v1288_v2, %v288_v63  ;;  %v1274_v5 = vpop.f32.mrf.mxu3 }
 0x146   : > { %1291 = vst [vmem:[#allocation2] sm:$0xff] %v1290_v4 }
 0x147   : > { %v1359_v6 = vld [vmem:[%s3100_s3 + $0x178] sm:$0xff]  ;;  %v1358_v8 = vld [vmem:[%s3100_s3 + $0x170] sm:$0xff]  ;;  %v1357_v12 = vld [vmem:[%s3100_s3 + $0x168] sm:$0xff]  ;;  %vm1470_vm3 = vcmask 74752  }
 0x148   : > { %v1327_v7 = vld [vmem:[%s3100_s3 + $0x78] sm:$0xff]  ;;  %1430 = vmatpush.msra.mxu2 %v1359_v6  ;;  %v1326_v10 = vld [vmem:[%s3100_s3 + $0x70] sm:$0xff]  ;;  %v1325_v16 = vld [vmem:[%s3100_s3 + $0x68] sm:$0xff] }
 0x149   : > { %1390 = vmatpush.msra.mxu0 %v1327_v7  ;;  %v1375_v9 = vld [vmem:[%s3100_s3 + $0x1f8] sm:$0xff]  ;;  %v1374_v13 = vld [vmem:[%s3100_s3 + $0x1f0] sm:$0xff]  ;;  %v1373_v20 = vld [vmem:[%s3100_s3 + $0x1e8] sm:$0xff] }
 0x14a   : > { %v1343_v11 = vld [vmem:[%s3100_s3 + $0xf8] sm:$0xff]  ;;  %1450 = vmatpush.msra.mxu3 %v1375_v9  ;;  %1431 = vmatpush.msra.mxu2 %v1358_v8  ;;  %v1342_v19 = vld [vmem:[%s3100_s3 + $0xf0] sm:$0xff]  ;;  %v1356_v21 = vld [vmem:[%s3100_s3 + $0x160] sm:$0xff] }
 0x14b   : > { %1410 = vmatpush.msra.mxu1 %v1343_v11  ;;  %1391 = vmatpush.msra.mxu0 %v1326_v10  ;;  %v1324_v22 = vld [vmem:[%s3100_s3 + $0x60] sm:$0xff]  ;;  %v1341_v23 = vld [vmem:[%s3100_s3 + $0xe8] sm:$0xff]  ;;  %v1355_v26 = vld [vmem:[%s3100_s3 + $0x158] sm:$0xff] }
 0x14c   : > { %1451 = vmatpush.msra.mxu3 %v1374_v13  ;;  %1432 = vmatpush.msra.mxu2 %v1357_v12  ;;  %v1372_v24 = vld [vmem:[%s3100_s3 + $0x1e0] sm:$0xff]  ;;  %v1323_v27 = vld [vmem:[%s3100_s3 + $0x58] sm:$0xff]  ;;  %v1354_v30 = vld [vmem:[%s3100_s3 + $0x150] sm:$0xff] }
 0x14d   : > { %1411 = vmatpush.msra.mxu1 %v1342_v19  ;;  %1392 = vmatpush.msra.mxu0 %v1325_v16  ;;  %v1340_v25 = vld [vmem:[%s3100_s3 + $0xe0] sm:$0xff]  ;;  %v1371_v28 = vld [vmem:[%s3100_s3 + $0x1d8] sm:$0xff]  ;;  %v1322_v31 = vld [vmem:[%s3100_s3 + $0x50] sm:$0xff] }
 0x14e   : > { %1452 = vmatpush.msra.mxu3 %v1373_v20  ;;  %1433 = vmatpush.msra.mxu2 %v1356_v21  ;;  %v1339_v29 = vld [vmem:[%s3100_s3 + $0xd8] sm:$0xff]  ;;  %v1370_v32 = vld [vmem:[%s3100_s3 + $0x1d0] sm:$0xff]  ;;  %v1353_v34 = vld [vmem:[%s3100_s3 + $0x148] sm:$0xff] }
 0x14f   : > { %1412 = vmatpush.msra.mxu1 %v1341_v23  ;;  %1393 = vmatpush.msra.mxu0 %v1324_v22  ;;  %v1338_v33 = vld [vmem:[%s3100_s3 + $0xd0] sm:$0xff]  ;;  %v1321_v15 = vld [vmem:[%s3100_s3 + $0x48] sm:$0xff]  ;;  %v1352_v36 = vld [vmem:[%s3100_s3 + $0x140] sm:$0xff] }
 0x150   : > { %1453 = vmatpush.msra.mxu3 %v1372_v24  ;;  %1434 = vmatpush.msra.mxu2 %v1355_v26  ;;  %v1369_v35 = vld [vmem:[%s3100_s3 + $0x1c8] sm:$0xff]  ;;  %v1320_v14 = vld [vmem:[%s3100_s3 + $0x40] sm:$0xff]  ;;  %v1351_v38 = vld [vmem:[%s3100_s3 + $0x138] sm:$0xff] }
 0x151   : > { %1413 = vmatpush.msra.mxu1 %v1340_v25  ;;  %1394 = vmatpush.msra.mxu0 %v1323_v27  ;;  %v1337_v18 = vld [vmem:[%s3100_s3 + $0xc8] sm:$0xff]  ;;  %v1368_v37 = vld [vmem:[%s3100_s3 + $0x1c0] sm:$0xff]  ;;  %v1319_v39 = vld [vmem:[%s3100_s3 + $0x38] sm:$0xff] }
 0x152   : > { %1454 = vmatpush.msra.mxu3 %v1371_v28  ;;  %1435 = vmatpush.msra.mxu2 %v1354_v30  ;;  %v1336_v17 = vld [vmem:[%s3100_s3 + $0xc0] sm:$0xff]  ;;  %v1367_v40 = vld [vmem:[%s3100_s3 + $0x1b8] sm:$0xff]  ;;  %v1350_v42 = vld [vmem:[%s3100_s3 + $0x130] sm:$0xff] }
 0x153   : > { %1414 = vmatpush.msra.mxu1 %v1339_v29  ;;  %1395 = vmatpush.msra.mxu0 %v1322_v31  ;;  %v1335_v41 = vld [vmem:[%s3100_s3 + $0xb8] sm:$0xff]  ;;  %v1318_v43 = vld [vmem:[%s3100_s3 + $0x30] sm:$0xff]  ;;  %v1349_v46 = vld [vmem:[%s3100_s3 + $0x128] sm:$0xff] }
 0x154   : > { %1455 = vmatpush.msra.mxu3 %v1370_v32  ;;  %1436 = vmatpush.msra.mxu2 %v1353_v34  ;;  %v1366_v44 = vld [vmem:[%s3100_s3 + $0x1b0] sm:$0xff]  ;;  %v1317_v47 = vld [vmem:[%s3100_s3 + $0x28] sm:$0xff]  ;;  %v1348_v50 = vld [vmem:[%s3100_s3 + $0x120] sm:$0xff] }
 0x155   : > { %1415 = vmatpush.msra.mxu1 %v1338_v33  ;;  %1396 = vmatpush.msra.mxu0 %v1321_v15  ;;  %v1334_v45 = vld [vmem:[%s3100_s3 + $0xb0] sm:$0xff]  ;;  %v1365_v48 = vld [vmem:[%s3100_s3 + $0x1a8] sm:$0xff]  ;;  %v1316_v51 = vld [vmem:[%s3100_s3 + $0x20] sm:$0xff] }
 0x156   : > { %1456 = vmatpush.msra.mxu3 %v1369_v35  ;;  %1437 = vmatpush.msra.mxu2 %v1352_v36  ;;  %v1333_v49 = vld [vmem:[%s3100_s3 + $0xa8] sm:$0xff]  ;;  %v1297_v52 = vld [vmem:[#allocation6] sm:$0xf]  ;;  %v1364_v53 = vld [vmem:[%s3100_s3 + $0x1a0] sm:$0xff] }
 0x157   : > { %1416 = vmatpush.msra.mxu1 %v1337_v18  ;;  %1397 = vmatpush.msra.mxu0 %v1320_v14  ;;  %v1332_v54 = vld [vmem:[%s3100_s3 + $0xa0] sm:$0xff]  ;;  %v1299_v55 = vperm.slane %v1297_v52, 0  ;;  %v1300_v56 = vperm.slane %v1297_v52, 1  ;;  %v1301_v57 = vperm.slane %v1297_v52, 2  ;;  %v1302_v58 = vperm.slane %v1297_v52, 3  ;;  %v1347_v59 = vld [vmem:[%s3100_s3 + $0x118] sm:$0xff] }
 0x158   : > { %1457 = vmatpush.msra.mxu3 %v1368_v37  ;;  %1438 = vmatpush.msra.mxu2 %v1351_v38  ;;  %v1315_v60 = vld [vmem:[%s3100_s3 + $0x18] sm:$0xff]  ;;  %v1346_v2 = vld [vmem:[%s3100_s3 + $0x110] sm:$0xff]  ;;  %v1296_v4 = vld [vmem:[#allocation2] sm:$0xff] }
 0x159   : > { %1417 = vmatpush.msra.mxu1 %v1336_v17  ;;  %1398 = vmatpush.msra.mxu0 %v1319_v39  ;;  %v1363_v61 = vld [vmem:[%s3100_s3 + $0x198] sm:$0xff]  ;;  %v1303_v63 = vrot.slane %v1300_v56, 6  ;;  %v1304_v0 = vrot.slane %v1301_v57, 4  ;;  %v1305_v1 = vrot.slane %v1302_v58, 2  ;;  %v1314_v3 = vld [vmem:[%s3100_s3 + $0x10] sm:$0xff]  ;;  %v1345_v9 = vld [vmem:[%s3100_s3 + $0x108] sm:$0xff] }
 0x15a   : > { %1458 = vmatpush.msra.mxu3 %v1367_v40  ;;  %1439 = vmatpush.msra.mxu2 %v1350_v42  ;;  %v1331_v62 = vld [vmem:[%s3100_s3 + $0x98] sm:$0xff]  ;;  %v1362_v5 = vld [vmem:[%s3100_s3 + $0x190] sm:$0xff]  ;;  %v1313_v10 = vld [vmem:[%s3100_s3 + $0x8] sm:$0xff] }
 0x15b   : > { %1418 = vmatpush.msra.mxu1 %v1335_v41  ;;  %1399 = vmatpush.msra.mxu0 %v1318_v43  ;;  %v1330_v6 = vld [vmem:[%s3100_s3 + $0x90] sm:$0xff]  ;;  %v1306_v7 = vsel %vm1283_vm0, %v1299_v55, %v1303_v63  ;;  %v1307_v8 = vsel %vm1285_vm1, %v1304_v0, %v1305_v1  ;;  %v1361_v12 = vld [vmem:[%s3100_s3 + $0x188] sm:$0xff]  ;;  %v1344_v19 = vld [vmem:[%s3100_s3 + $0x100] sm:$0xff] }
 0x15c   : > { %1459 = vmatpush.msra.mxu3 %v1366_v44  ;;  %1440 = vmatpush.msra.mxu2 %v1349_v46  ;;  %v1308_v11 = vsel %vm1287_vm2, %v1306_v7, %v1307_v8  ;;  %v1329_v16 = vld [vmem:[%s3100_s3 + $0x88] sm:$0xff]  ;;  %v1312_v20 = vld [vmem:[%s3100_s3] sm:$0xff]  ;;  %v2291_v28 = vld [vmem:[#allocation8] ss:$0 sm:$0xff] }
 0x15d   : > { %1419 = vmatpush.msra.mxu1 %v1334_v45  ;;  %1400 = vmatpush.msra.mxu0 %v1317_v47  ;;  %v1310_v13 = vadd.f32 %v1308_v11, %v1296_v4  ;;  %v1360_v22 = vld [vmem:[%s3100_s3 + $0x180] sm:$0xff] }
 0x15e   : > { %1460 = vmatpush.msra.mxu3 %v1365_v48  ;;  %1441 = vmatpush.msra.mxu2 %v1348_v50  ;;  %v1328_v23 = vld [vmem:[%s3100_s3 + $0x80] sm:$0xff] }
 0x15f   : > { %1420 = vmatpush.msra.mxu1 %v1333_v49  ;;  %1401 = vmatpush.msra.mxu0 %v1316_v51  ;;  %v1311_v21 = vmax.f32 %v1310_v13, 0.0 }
 0x160   : > { %1461 = vmatpush.msra.mxu3 %v1364_v53  ;;  %1442 = vmatpush.msra.mxu2 %v1347_v59 }
 0x161   : > { %1421 = vmatpush.msra.mxu1 %v1332_v54  ;;  %1402 = vmatpush.msra.mxu0 %v1315_v60  ;;  %1381 = vst [vmem:[#allocation1] ss:$4 sm:$0xff] %v1311_v21 }
 0x162   : > { %1462 = vmatpush.msra.mxu3 %v1363_v61  ;;  %1443 = vmatpush.msra.mxu2 %v1346_v2 }
 0x163   : > { %1422 = vmatpush.msra.mxu1 %v1331_v62  ;;  %1403 = vmatpush.msra.mxu0 %v1314_v3 }
 0x164   : > { %1463 = vmatpush.msra.mxu3 %v1362_v5  ;;  %1444 = vmatpush.msra.mxu2 %v1345_v9 }
 0x165   : > { %1423 = vmatpush.msra.mxu1 %v1330_v6  ;;  %1404 = vmatpush.msra.mxu0 %v1313_v10 }
 0x166   : > { %1464 = vmatpush.msra.mxu3 %v1361_v12  ;;  %1445 = vmatpush.msra.mxu2 %v1344_v19 }
 0x167   : > { %1424 = vmatpush.msra.mxu1 %v1329_v16  ;;  %1405 = vmatpush.msra.mxu0 %v1312_v20 }
 0x168   : > { %1465 = vmatpush.msra.mxu3 %v1360_v22  ;;  %v1384_v24 = vld.sshfl [vmem:[#allocation1 + $0x10] sm:$0xff pattern:$0x73625140]  ;;  %v1382_v25 = vld.sshfl [vmem:[#allocation1] sm:$0xff pattern:$0x73625140] }
 0x169   : > { %1425 = vmatpush.msra.mxu1 %v1328_v23  ;;  %1446 = vmatmul.f32.vlgmr.msra.gmra.mxu2 %v1384_v24  ;;  %v1385_v26 = vld.sshfl [vmem:[#allocation1 + $0x18] sm:$0xff pattern:$0x73625140]  ;;  %v1383_v27 = vld.sshfl [vmem:[#allocation1 + $0x8] sm:$0xff pattern:$0x73625140] }
 0x16a   : > { %1406 = vmatmul.f32.vlgmr.msra.gmra.mxu0 %v1382_v25  ;;  %1466 = vmatmul.f32.vlgmr.msra.gmra.mxu3 %v1385_v26 }
 0x16b   : > { %1426 = vmatmul.f32.vlgmr.msra.gmra.mxu1 %v1383_v27 }
 0x1e7   : > { %v1407_v29 = vpop.f32.mrf.mxu0 }
 0x1e8   : > { %v1408_v30 = vadd.f32 %v2291_v28, %v1407_v29  ;;  %v1427_v31 = vpop.f32.mrf.mxu1 }
 0x1ea   : > { %v1428_v32 = vadd.f32 %v1427_v31, %v1408_v30 }
 0x1ec   : > { %v1447_v33 = vpop.f32.mrf.mxu2 }
 0x1ed   : > { %v1448_v34 = vadd.f32 %v1447_v33, %v1428_v32  ;;  %v1467_v15 = vpop.f32.mrf.mxu3 }
 0x1ef   : > { %v1468_v35 = vadd.f32 %v1467_v15, %v1448_v34 }
 0x1f1   : > { %1471 = vst.msk [vmem:[#allocation9] sm:$0x3] %vm1470_vm3, %v1468_v35 }
 0x1f2 PF: > { %p2251_p8 = scmp.eq.s32.totalorder %s2509_s22, 7  ;;  %s2459_s16 = smov [#allocation9]  }
 0x1f3   : > { %s1478_s17 = sshll.u32 %s2459_s16, 4  ;;  %s1480_s25 = sshll.u32 %s3102_s5, 4  ;;  %s1479_s17 = int_to_ptr.vmem [resolvable:$true] %s1478_s17  ;;  %s1481_s25 = int_to_ptr.hbm [resolvable:$true] %s1480_s25 }
 0x1f4   : > { %2232 = dma.vmem_to_hbm [thread:$0]  (%p2251_p8), %s1479_s17, 32, %s1481_s25, [#allocation5]  }
 0x1f5   : > { %2435 = dma.done.wait (%p2251_p8), [#allocation5], 32  }
 0x1f6   : > { %2437 = vsyncadd (%p2251_p8), [#allocation5], 4294967264 }
 0x1f7 PF: > { %p17_p9 = scmp.ge.s32.totalorder %s2512_s23, 10   ;;  %s3107_s18 = smov %s2444_s19 }
 0x1f8   : > { %s3108_s19 = smov %s2448_s20  ;;  %s3109_s20 = smov %s2522_s26 }
 0x1f9   : > { %s3110_s21 = smov %s2512_s23  ;;  %19 = sbr.rel (!%p17_p9) target bundleno = 5 (0x5), region = 96 }
 0x1fe   :  { %1494 = vsyncpa [#allocation4], 1 }
 0x1ff   :  { %1496 = vsyncpa [#allocation4 + $0x1], 1 }
 0x200   :  { %1497 = vsyncpa [#allocation7], 1 }
 0x201   :  { %1498 = vsyncpa [#allocation5], 1 }
 0x202   :  { %1500 = vsyncpa [#allocation5 + $0x1], 1 }

// kernel: simple_cnn_forward.2
= control target key start
LH: loop header
LB: loop body
LE: loop exit
PB: predicated region body
PF: predicated region fallthrough
CT: control target
= control target key end

     0   :  { %10 = vsyncpa [#allocation8], 0  ;;  %s9837_s0 = inlined_call_operand.vmem [shape: bf16[2,1024,32], index: 0, kind: input, shape index: {}]   ;;  %s9838_s1 = inlined_call_operand.hbm [shape: bf16[32,128], index: 1, kind: input, shape index: {}]   ;;  %s9839_s2 = inlined_call_operand.hbm [shape: f32[1,128], index: 2, kind: input, shape index: {}]   ;;  %s9840_s3 = inlined_call_operand.hbm [shape: bf16[9,128,128], index: 3, kind: input, shape index: {}]   ;;  %s9841_s4 = inlined_call_operand.hbm [shape: f32[1,128], index: 4, kind: input, shape index: {}]   ;;  %s9842_s5 = inlined_call_operand.vmem [shape: bf16[2,64,64], index: 5, kind: output, shape index: {}]  }
   0x1   :  { %11 = vsyncpa [#allocation10], 0 }
   0x2   :  { %12 = vsyncpa [#allocation13], 0  ;;  %s8492_s18 = smov 0  }
   0x3 LB: > { %s185_s21 = sshll.u32 %s9839_s2, 4  ;;  %s8501_s22 = sadd.s32 4294967295, %s8453_s18   ;;  %s8453_s18 = sphi %s8492_s18, %s18_s18   ;;  %s186_s21 = int_to_ptr.hbm [resolvable:$true] %s185_s21 }
   0x4   : > { %p7191_p0 = scmp.ge.s32.totalorder %s8453_s18, 1  ;;  %p159_p1 = scmp.lt.s32.totalorder %s8453_s18, 3 }
   0x5   : > { %p8287_p2 = scmp.eq.s32.totalorder %s8501_s22, 0  ;;  %s8455_s24 = smov [#allocation9]  }
   0x6   : > { %p8506_p3 = pnand %p7191_p0, %p159_p1  ;;  %s187_s25 = sshll.u32 %s8455_s24, 4  ;;  %s188_s25 = int_to_ptr.vmem [resolvable:$true] %s187_s25 }
   0x7   : > { %s170_s28 = sshll.u32 %s9838_s1, 4  ;;  %s8456_s30 = smov [#allocation7]   ;;  %s171_s28 = int_to_ptr.hbm [resolvable:$true] %s170_s28 }
   0x8   : > { %p8274_p4 = pneg %p8506_p3  ;;  %s172_s6 = sshll.u32 %s8456_s30, 4  ;;  %s173_s6 = int_to_ptr.vmem [resolvable:$true] %s172_s6 }
   0x9   : > { %s196_s9 = sshll.u32 %s9840_s3, 4  ;;  %s8457_s10 = smov 64   ;;  %s197_s9 = int_to_ptr.hbm [resolvable:$true] %s196_s9 }
   0xa   : > { %p8517_p5 = pnand %p8287_p2, %p8274_p4  ;;  %s8458_s11 = smov 4  }
   0xb   : > { %s8459_s12 = smov [#allocation11]   ;;  %s211_s16 = sshll.u32 %s9841_s4, 4  ;;  %s212_s16 = int_to_ptr.hbm [resolvable:$true] %s211_s16 }
   0xc   : > { %8280 = dma.hbm_to_vmem [thread:$0]  (!%p8517_p5), %s186_s21, 16, %s188_s25, [#allocation10]  }
   0xd   : > { %8277 = dma.hbm_to_vmem [thread:$0]  (!%p8517_p5), %s171_s28, 256, %s173_s6, [#allocation8], %s8457_s10, %s8457_s10, %s8458_s11  }
   0xe   : > { %s198_s13 = sshll.u32 %s8459_s12, 4  ;;  %s8460_s17 = smov [#allocation12]   ;;  %s199_s13 = int_to_ptr.vmem [resolvable:$true] %s198_s13 }
   0xf   : > { %8283 = dma.hbm_to_vmem [thread:$0]  (!%p8517_p5), %s197_s9, 9216, %s199_s13, [#allocation10], %s8457_s10, %s8457_s10, %s8458_s11  }
  0x10   : > { %s213_s19 = sshll.u32 %s8460_s17, 4  ;;  %234 = sbr.rel (%p8506_p3) target bundleno = 1730 (0x6c2), region = 40  ;;  %s214_s19 = int_to_ptr.vmem [resolvable:$true] %s213_s19 }
  0x11   : > { %8286 = dma.hbm_to_vmem [thread:$0]  (!%p8517_p5), %s212_s16, 16, %s214_s19, [#allocation13]  }
  0x15   : > { %8440 = dma.done.wait (%p8287_p2), [#allocation8], 256  }
  0x16   : > { %8442 = vsyncadd (%p8287_p2), [#allocation8], 4294967040 }
  0x17   : > { %8444 = dma.done.wait (%p8287_p2), [#allocation10], 9232  }
  0x18   : > { %8446 = vsyncadd (%p8287_p2), [#allocation10], 4294958064 }
  0x19   : > { %8448 = dma.done.wait (%p8287_p2), [#allocation13], 16  }
  0x1a   : > { %8450 = vsyncadd (%p8287_p2), [#allocation13], 4294967280  ;;  %p278_p6 = scmp.lt.s32.totalorder %s8501_s22, 1  ;;  %v8131_v0 = vld [vmem:[#allocation7 + $0x8] sm:$0xff]  ;;  %v8130_v1 = vld [vmem:[#allocation7] sm:$0xff]  ;;  %vm757_vm0 = vcmask 261120  }
  0x1b   : > { %956 = vmatpush.bf16.msra.mxu0 %v8131_v0  ;;  %8252 = vmatpush.bf16.msra.mxu1 %v8131_v0  ;;  %v8163_v18 = vld [vmem:[#allocation11 + $0x78] sm:$0xff]  ;;  %v8162_v19 = vld [vmem:[#allocation11 + $0x70] sm:$0xff]  ;;  %v8161_v21 = vld [vmem:[#allocation11 + $0x68] sm:$0xff]  ;;  %v8461_v39 = vmov 0   ;;  %vm2136_vm1 = vsmask.f32 256 }
  0x1c   : > { %s9906_s22 = smov (!%p278_p6, %s8501_s22), 1  ;;  %8254 = vmatpush.bf16.msra.mxu3 %v8131_v0  ;;  %8253 = vmatpush.bf16.msra.mxu2 %v8131_v0  ;;  %v8155_v23 = vld [vmem:[#allocation11 + $0x38] sm:$0xff]  ;;  %v8160_v27 = vld [vmem:[#allocation11 + $0x60] sm:$0xff]  ;;  %v8154_v29 = vld [vmem:[#allocation11 + $0x30] sm:$0xff]  ;;  %1952 = vst [vmem:[#allocation4 + $0x4] sm:$0xf] %v8461_v39 }
  0x1d   : > { %s8064_s20 = sshll.u32 %s9906_s22, 9  ;;  %v8171_v26 = vld [vmem:[#allocation11 + $0xb8] sm:$0xff]  ;;  %v8170_v31 = vld [vmem:[#allocation11 + $0xb0] sm:$0xff]  ;;  %v8153_v33 = vld [vmem:[#allocation11 + $0x28] sm:$0xff]  ;;  %1953 = vst [vmem:[#allocation4 + $0x8] sm:$0xf] %v8461_v39 }
  0x1e   : > { %s8557_s24 = scalar_lea.vmem %s9837_s0, %s8064_s20  ;;  %v8159_v32 = vld [vmem:[#allocation11 + $0x58] sm:$0xff]  ;;  %v8169_v34 = vld [vmem:[#allocation11 + $0xa8] sm:$0xff]  ;;  %v8158_v35 = vld [vmem:[#allocation11 + $0x50] sm:$0xff]  ;;  %1951 = vst [vmem:[#allocation4] sm:$0xf] %v8461_v39  ;;  %s8065_s25 = sshll.u32 %s9906_s22, 5 }
  0x1f   : > { %v8066_v2 = vld [vmem:[%s8557_s24] sm:$0xff]  ;;  %957 = vmatpush.bf16.msra.mxu0 %v8130_v1  ;;  %8255 = vmatpush.bf16.msra.mxu1 %v8130_v1  ;;  %v8067_v3 = vld [vmem:[%s8557_s24 + $0x8] sm:$0xff]  ;;  %v8068_v4 = vld [vmem:[%s8557_s24 + $0x10] sm:$0xff]  ;;  %1954 = vst [vmem:[#allocation4 + $0xc] sm:$0xf] %v8461_v39  ;;  %s9722_s27 = scalar_lea.vmem %s9842_s5, %s8065_s25  ;;  %vm7084_vm7 = vcmask 519168  }
  0x20   : > { %8257 = vmatpush.bf16.msra.mxu3 %v8130_v1  ;;  %8256 = vmatpush.bf16.msra.mxu2 %v8130_v1  ;;  %v8069_v5 = vld [vmem:[%s8557_s24 + $0x18] sm:$0xff]  ;;  %v8070_v6 = vld [vmem:[%s8557_s24 + $0x20] sm:$0xff]  ;;  %v8071_v7 = vld [vmem:[%s8557_s24 + $0x28] sm:$0xff]  ;;  %1955 = vst [vmem:[#allocation4 + $0x10] sm:$0xf] %v8461_v39 }
  0x21   : > { %v8119_v8 = vld [vmem:[%s8557_s24 + $0x1a8] sm:$0xff]  ;;  %v8072_v9 = vld [vmem:[%s8557_s24 + $0x30] sm:$0xff]  ;;  %v8126_v11 = vld [vmem:[%s8557_s24 + $0x1e0] sm:$0xff]  ;;  %1956 = vst [vmem:[#allocation4 + $0x14] sm:$0xf] %v8461_v39 }
  0x22   : > { %7470 = vmatmul.msk.bf16.vlgmr.msra.gmra.mxu0 %vm757_vm0, %v8066_v2  ;;  %7523 = vmatmul.msk.bf16.vlgmr.msra.gmra.mxu1 %vm757_vm0, %v8119_v8  ;;  %v8120_v10 = vld [vmem:[%s8557_s24 + $0x1b0] sm:$0xff]  ;;  %v8073_v12 = vld [vmem:[%s8557_s24 + $0x38] sm:$0xff]  ;;  %v8127_v14 = vld [vmem:[%s8557_s24 + $0x1e8] sm:$0xff]  ;;  %1957 = vst [vmem:[#allocation4 + $0x18] sm:$0xf] %v8461_v39 }
  0x23   : > { %7530 = vmatmul.msk.bf16.vlgmr.msra.gmra.mxu3 %vm757_vm0, %v8126_v11  ;;  %v8121_v13 = vld [vmem:[%s8557_s24 + $0x1b8] sm:$0xff]  ;;  %v8074_v15 = vld [vmem:[%s8557_s24 + $0x40] sm:$0xff]  ;;  %2668 = vmatpush.bf16.msrb.mxu1 %v8163_v18  ;;  %v8124_v22 = vld [vmem:[%s8557_s24 + $0x1d0] sm:$0xff]  ;;  %1958 = vst [vmem:[#allocation4 + $0x1c] sm:$0xf] %v8461_v39 }
  0x24   : > { %v8122_v17 = vld [vmem:[%s8557_s24 + $0x1c0] sm:$0xff]  ;;  %7528 = vmatmul.msk.bf16.vlgmr.msra.gmra.mxu2 %vm757_vm0, %v8124_v22  ;;  %v8128_v24 = vld [vmem:[%s8557_s24 + $0x1f0] sm:$0xff]  ;;  %v8075_v25 = vld [vmem:[%s8557_s24 + $0x48] sm:$0xff]  ;;  %3522 = vmatpush.bf16.msrb.mxu3 %v8171_v26  ;;  %1959 = vst [vmem:[#allocation4 + $0x20] sm:$0xf] %v8461_v39 }
  0x25   : > { %2869 = vmatpush.bf16.msrb.mxu2 %v8155_v23  ;;  %v8123_v30 = vld [vmem:[%s8557_s24 + $0x1c8] sm:$0xff]  ;;  %v8152_v37 = vld [vmem:[#allocation11 + $0x20] sm:$0xff]  ;;  %v8603_v38 = vld [vmem:[#allocation9] ss:$0 sm:$0xff]  ;;  %1960 = vst [vmem:[#allocation4 + $0x24] sm:$0xf] %v8461_v39 }
  0x26   : > { %v8168_v40 = vld [vmem:[#allocation11 + $0xa0] sm:$0xff]  ;;  %v8157_v41 = vld [vmem:[#allocation11 + $0x48] sm:$0xff]  ;;  %v8151_v43 = vld [vmem:[#allocation11 + $0x18] sm:$0xff]  ;;  %1961 = vst [vmem:[#allocation4 + $0x28] sm:$0xf] %v8461_v39 }
  0x27   : > { %2669 = vmatpush.bf16.msrb.mxu1 %v8162_v19  ;;  %v8125_v42 = vld [vmem:[%s8557_s24 + $0x1d8] sm:$0xff]  ;;  %v8076_v46 = vld [vmem:[%s8557_s24 + $0x50] sm:$0xff]  ;;  %v8150_v51 = vld [vmem:[#allocation11 + $0x10] sm:$0xff]  ;;  %1962 = vst [vmem:[#allocation4 + $0x2c] sm:$0xf] %v8461_v39 }
  0x28   : > { %3523 = vmatpush.bf16.msrb.mxu3 %v8170_v31  ;;  %v8129_v45 = vld [vmem:[%s8557_s24 + $0x1f8] sm:$0xff]  ;;  %v8167_v47 = vld [vmem:[#allocation11 + $0x98] sm:$0xff]  ;;  %v2089_v54 = vld [vmem:[#allocation4 + $0x4] sm:$0xf]  ;;  %1963 = vst [vmem:[#allocation4 + $0x30] sm:$0xf] %v8461_v39 }
  0x29   : > { %2870 = vmatpush.bf16.msrb.mxu2 %v8154_v29  ;;  %v8156_v48 = vld [vmem:[#allocation11 + $0x40] sm:$0xff]  ;;  %v8132_v53 = vld [vmem:[#allocation4 + $0x4] sm:$0xff]  ;;  %v2088_v58 = vld [vmem:[#allocation4] sm:$0x8]  ;;  %v2145_v59 = vshrl.u32 %v2089_v54, 16  ;;  %v2148_v0 = vshll.u32 %v2089_v54, 16 }
  0x2a   : > { %v8166_v56 = vld [vmem:[#allocation11 + $0x90] sm:$0xff]  ;;  %v8149_v62 = vld [vmem:[#allocation11 + $0x8] sm:$0xff]  ;;  %v2140_v63 = vshrl.u32 %v2088_v58, 16  ;;  %vm2137_vm2 = vsmask.f32 4368  ;;  %v8164_v22 = vld [vmem:[#allocation11 + $0x80] sm:$0xff] }
  0x2b   : > { %2670 = vmatpush.bf16.msrb.mxu1 %v8161_v21  ;;  %v2090_v57 = vld [vmem:[#allocation4 + $0x8] sm:$0xf]  ;;  %1964 = vst [vmem:[#allocation4 + $0x34] sm:$0xf] %v8461_v39  ;;  %vm8629_vm3 = vmor %vm2136_vm1, %vm2137_vm2  ;;  %vm3006_vm4 = vsmask.f32 3328 }
  0x2c   : > { %3524 = vmatpush.bf16.msrb.mxu3 %v8169_v34  ;;  %v2154_v60 = vshrl.u32 %v2090_v57, 16  ;;  %v2157_v1 = vshll.u32 %v2090_v57, 16  ;;  %1965 = vst [vmem:[#allocation4 + $0x38] sm:$0xf] %v8461_v39  ;;  %vm3007_vm5 = vsmask.f32 7440 }
  0x2d   : > { %2871 = vmatpush.bf16.msrb.mxu2 %v8153_v33  ;;  %1966 = vst [vmem:[#allocation4 + $0x3c] sm:$0xf] %v8461_v39  ;;  %vm8652_vm6 = vmor %vm3006_vm4, %vm3007_vm5 }
  0x2e   : > { %1967 = vst [vmem:[#allocation4 + $0x40] sm:$0xf] %v8461_v39 }
  0x2f   : > { %2671 = vmatpush.bf16.msrb.mxu1 %v8160_v27  ;;  %1968 = vst [vmem:[#allocation4 + $0x44] sm:$0xf] %v8461_v39 }
  0x30   : > { %3525 = vmatpush.bf16.msrb.mxu3 %v8168_v40  ;;  %1969 = vst [vmem:[#allocation4 + $0x48] sm:$0xf] %v8461_v39  ;;  %v8077_v40 = vld [vmem:[%s8557_s24 + $0x58] sm:$0xff] }
  0x31   : > { %2872 = vmatpush.bf16.msrb.mxu2 %v8152_v37  ;;  %1970 = vst [vmem:[#allocation4 + $0x4c] sm:$0xf] %v8461_v39 }
  0x32   : > { %7471 = vmatmul.msk.bf16.gmra.mxu0 %vm757_vm0, %v8067_v3  ;;  %7524 = vmatmul.msk.bf16.gmra.mxu1 %vm757_vm0, %v8120_v10  ;;  %v2147_v3 = vrot.slane %v2145_v59, 7  ;;  %1971 = vst [vmem:[#allocation4 + $0x50] sm:$0xf] %v8461_v39 }
  0x33   : > { %7531 = vmatmul.msk.bf16.gmra.mxu3 %vm757_vm0, %v8127_v14  ;;  %2672 = vmatpush.bf16.msrb.mxu1 %v8159_v32  ;;  %1972 = vst [vmem:[#allocation4 + $0x54] sm:$0xf] %v8461_v39 }
  0x34   : > { %7529 = vmatmul.msk.bf16.gmra.mxu2 %vm757_vm0, %v8125_v42  ;;  %3526 = vmatpush.bf16.msrb.mxu3 %v8167_v47  ;;  %v2150_v10 = vor.u32 %v2148_v0, %v2147_v3  ;;  %v2152_v11 = vrot.slane %v2147_v3, 4  ;;  %1973 = vst [vmem:[#allocation4 + $0x58] sm:$0xf] %v8461_v39  ;;  %v8079_v0 = vld [vmem:[%s8557_s24 + $0x68] sm:$0xff] }
  0x35   : > { %2873 = vmatpush.bf16.msrb.mxu2 %v8151_v43  ;;  %1974 = vst [vmem:[#allocation4 + $0x5c] sm:$0xf] %v8461_v39 }
  0x36   : > { %1975 = vst [vmem:[#allocation4 + $0x60] sm:$0xf] %v8461_v39 }
  0x37   : > { %2673 = vmatpush.bf16.msrb.mxu1 %v8158_v35  ;;  %1976 = vst [vmem:[#allocation4 + $0x64] sm:$0xf] %v8461_v39 }
  0x38   : > { %3527 = vmatpush.bf16.msrb.mxu3 %v8166_v56  ;;  %1977 = vst [vmem:[#allocation4 + $0x68] sm:$0xf] %v8461_v39 }
  0x39   : > { %2874 = vmatpush.bf16.msrb.mxu2 %v8150_v51  ;;  %1978 = vst [vmem:[#allocation4 + $0x6c] sm:$0xf] %v8461_v39 }
  0x3a   : > { %1979 = vst [vmem:[#allocation4 + $0x70] sm:$0xf] %v8461_v39 }
  0x3b   : > { %2674 = vmatpush.bf16.msrb.mxu1 %v8157_v41  ;;  %1980 = vst [vmem:[#allocation4 + $0x74] sm:$0xf] %v8461_v39 }
  0x3c   : > { %1981 = vst [vmem:[#allocation4 + $0x78] sm:$0xf] %v8461_v39 }
  0x3d   : > { %2875 = vmatpush.bf16.msrb.mxu2 %v8149_v62  ;;  %1982 = vst [vmem:[#allocation4 + $0x7c] sm:$0xf] %v8461_v39 }
  0x3e   : > { %1983 = vst [vmem:[#allocation4 + $0x80] sm:$0xf] %v8461_v39 }
  0x3f   : > { %2675 = vmatpush.bf16.msrb.mxu1 %v8156_v48  ;;  %1984 = vst [vmem:[#allocation4 + $0x84] sm:$0xf] %v8461_v39 }
  0x40   : > { %1985 = vst [vmem:[#allocation4 + $0x88] sm:$0xf] %v8461_v39 }
  0x41   : > { %1986 = vst [vmem:[#allocation4 + $0x8c] sm:$0xf] %v8461_v39 }
  0x42   : > { %7472 = vmatmul.msk.bf16.gmra.mxu0 %vm757_vm0, %v8068_v4  ;;  %7525 = vmatmul.msk.bf16.gmra.mxu1 %vm757_vm0, %v8121_v13  ;;  %v2156_v4 = vrot.slane %v2154_v60, 7  ;;  %v2959_v13 = vld [vmem:[#allocation4 + $0x8] sm:$0xf]  ;;  %1987 = vst [vmem:[#allocation4 + $0x90] sm:$0xf] %v8461_v39 }
  0x43   : > { %7532 = vmatmul.msk.bf16.gmra.mxu3 %vm757_vm0, %v8128_v24  ;;  %v3019_v27 = vshll.u32 %v2959_v13, 16  ;;  %v3023_v29 = vshrl.u32 %v2959_v13, 16  ;;  %1988 = vst [vmem:[#allocation4 + $0x94] sm:$0xf] %v8461_v39 }
  0x44   : > { %1989 = vst [vmem:[#allocation4 + $0x98] sm:$0xf] %v8461_v39 }
  0x45   : > { %v3021_v34 = vrot.slane %v3019_v27, 5  ;;  %v3025_v35 = vrot.slane %v3023_v29, 4  ;;  %1990 = vst [vmem:[#allocation4 + $0x9c] sm:$0xf] %v8461_v39 }
  0x46   : > { %1991 = vst [vmem:[#allocation4 + $0xa0] sm:$0xf] %v8461_v39 }
  0x47   : > { %v3026_v43 = vor.u32 %v3025_v35, %v3021_v34  ;;  %1992 = vst [vmem:[#allocation4 + $0xa4] sm:$0xf] %v8461_v39 }
  0x48   : > { %1993 = vst [vmem:[#allocation4 + $0xa8] sm:$0xf] %v8461_v39 }
  0x49   : > { %v3027_v47 = vrot.slane %v3026_v43, 4  ;;  %1994 = vst [vmem:[#allocation4 + $0xac] sm:$0xf] %v8461_v39 }
  0x4a   : > { %1995 = vst [vmem:[#allocation4 + $0xb0] sm:$0xf] %v8461_v39 }
  0x4b   : > { %1996 = vst [vmem:[#allocation4 + $0xb4] sm:$0xf] %v8461_v39 }
  0x4c   : > { %1997 = vst [vmem:[#allocation4 + $0xb8] sm:$0xf] %v8461_v39 }
  0x4d   : > { %1998 = vst [vmem:[#allocation4 + $0xbc] sm:$0xf] %v8461_v39 }
  0x4e   : > { %1999 = vst [vmem:[#allocation4 + $0xc0] sm:$0xf] %v8461_v39 }
  0x4f   : > { %2000 = vst [vmem:[#allocation4 + $0xc4] sm:$0xf] %v8461_v39 }
  0x50   : > { %2001 = vst [vmem:[#allocation4 + $0xc8] sm:$0xf] %v8461_v39 }
  0x51   : > { %2002 = vst [vmem:[#allocation4 + $0xcc] sm:$0xf] %v8461_v39 }
  0x52   : > { %7473 = vmatmul.msk.bf16.gmra.mxu0 %vm757_vm0, %v8069_v5  ;;  %7526 = vmatmul.msk.bf16.gmra.mxu1 %vm757_vm0, %v8122_v17  ;;  %v2958_v5 = vld [vmem:[#allocation4 + $0x4] sm:$0xf]  ;;  %2003 = vst [vmem:[#allocation4 + $0xd0] sm:$0xf] %v8461_v39 }
  0x53   : > { %7533 = vmatmul.msk.bf16.gmra.mxu3 %vm757_vm0, %v8129_v45  ;;  %v3010_v17 = vshrl.u32 %v2958_v5, 16  ;;  %v3013_v26 = vshll.u32 %v2958_v5, 16  ;;  %2004 = vst [vmem:[#allocation4 + $0xd4] sm:$0xf] %v8461_v39 }
  0x54   : > { %2005 = vst [vmem:[#allocation4 + $0xd8] sm:$0xf] %v8461_v39 }
  0x55   : > { %v3015_v33 = vrot.slane %v3013_v26, 5  ;;  %2006 = vst [vmem:[#allocation4 + $0xdc] sm:$0xf] %v8461_v39  ;;  %v2963_v26 = vld [vmem:[#allocation4 + $0x1c] sm:$0x1] }
  0x56   : > { %2007 = vst [vmem:[#allocation4 + $0xe0] sm:$0xf] %v8461_v39 }
  0x57   : > { %2008 = vst [vmem:[#allocation4 + $0xe4] sm:$0xf] %v8461_v39 }
  0x58   : > { %2009 = vst [vmem:[#allocation4 + $0xe8] sm:$0xf] %v8461_v39 }
  0x59   : > { %2010 = vst [vmem:[#allocation4 + $0xec] sm:$0xf] %v8461_v39 }
  0x5a   : > { %2011 = vst [vmem:[#allocation4 + $0xf0] sm:$0xf] %v8461_v39 }
  0x5b   : > { %2012 = vst [vmem:[#allocation4 + $0xf4] sm:$0xf] %v8461_v39 }
  0x5c   : > { %2013 = vst [vmem:[#allocation4 + $0xf8] sm:$0xf] %v8461_v39 }
  0x5d   : > { %2014 = vst [vmem:[#allocation4 + $0xfc] sm:$0xf] %v8461_v39 }
  0x5e   : > { %2015 = vst [vmem:[#allocation4 + $0x100] sm:$0xf] %v8461_v39 }
  0x5f   : > { %2016 = vst [vmem:[#allocation4 + $0x104] sm:$0xf] %v8461_v39 }
  0x60   : > { %2017 = vst [vmem:[#allocation4 + $0x108] sm:$0xf] %v8461_v39 }
  0x61   : > { %2018 = vst [vmem:[#allocation4 + $0x10c] sm:$0xf] %v8461_v39 }
  0x62   : > { %7474 = vmatmul.msk.bf16.gmra.mxu0 %vm757_vm0, %v8070_v6  ;;  %7527 = vmatmul.msk.bf16.gmra.mxu1 %vm757_vm0, %v8123_v30  ;;  %v8165_v6 = vld [vmem:[#allocation11 + $0x88] sm:$0xff]  ;;  %2019 = vst [vmem:[#allocation4 + $0x110] sm:$0xf] %v8461_v39 }
  0x63   : > { %3528 = vmatpush.bf16.msrb.mxu3 %v8165_v6  ;;  %2020 = vst [vmem:[#allocation4 + $0x114] sm:$0xf] %v8461_v39 }
  0x64   : > { %2021 = vst [vmem:[#allocation4 + $0x118] sm:$0xf] %v8461_v39 }
  0x65   : > { %2022 = vst [vmem:[#allocation4 + $0x11c] sm:$0xf] %v8461_v39 }
  0x67   : > { %3529 = vmatpush.bf16.msrb.mxu3 %v8164_v22 }
  0x72   : > { %7475 = vmatmul.msk.bf16.gmra.mxu0 %vm757_vm0, %v8071_v7  ;;  %2676 = vmatmul.bf16.vlgmr.msrb.gmra.mxu1 %v8132_v53 }
  0x82   : > { %7476 = vmatmul.msk.bf16.gmra.mxu0 %vm757_vm0, %v8072_v9  ;;  %v7534_v9 = vrot.slane %v2140_v63, 11 }
  0x84   : > { %v2151_v19 = vsel %vm8629_vm3, %v7534_v9, %v2150_v10 }
  0x85   : > { %v2757_v23 = vunpack.c.l.b16 %v2151_v19 }
  0x92   : > { %7477 = vmatmul.msk.bf16.gmra.mxu0 %vm757_vm0, %v8073_v12  ;;  %v2159_v12 = vor.u32 %v2157_v1, %v2156_v4 }
  0x9f   : > { %v959_v16 = vpop.f32.mrf.mxu0 }
  0xa0   : > { %v960_v44 = vadd.f32 %v8603_v38, %v959_v16  ;;  %v2960_v16 = vld [vmem:[#allocation4 + $0xc] sm:$0x1] }
  0xa1   : > { %v3029_v30 = vshll.u32 %v2960_v16, 16 }
  0xa2   : > { %7478 = vmatmul.msk.bf16.gmra.mxu0 %vm757_vm0, %v8074_v15  ;;  %v1279_v52 = vmax.f32 %v960_v44, 0.0  ;;  %v8148_v15 = vld [vmem:[#allocation11] sm:$0xff] }
  0xa3   : > { %2876 = vmatpush.bf16.msrb.mxu2 %v8148_v15  ;;  %v3031_v44 = vrot.slane %v3029_v30, 5 }
  0xa5   : > { %v3032_v51 = vsel %vm8652_vm6, %v3027_v47, %v3031_v44 }
  0xa6   : > { %v3411_v54 = vunpack.c.l.b16 %v3032_v51 }
  0xa7   : > { %v8589_v20 = vpop.f32.mrf.mxu0 }
  0xa8   : > { %v962_v2 = vadd.f32 %v8603_v38, %v8589_v20  ;;  %v2160_v20 = vsel %vm8629_vm3, %v2152_v11, %v2159_v12  ;;  %v8080_v12 = vld [vmem:[%s8557_s24 + $0x70] sm:$0xff] }
  0xa9   : > { %v2758_v24 = vunpack.c.l.b16 %v2160_v20  ;;  %v2091_v20 = vld [vmem:[#allocation4 + $0x10] sm:$0x8] }
  0xaa   : > { %v1280_v18 = vmax.f32 %v962_v2, 0.0 }
  0xab   : > { %v2789_v32 = vpack.c.b16 %v2758_v24, %v2757_v23  ;;  %v2162_v24 = vshrl.u32 %v2091_v20, 16 }
  0xad   : > { %2877 = vmatmul.bf16.vlgmr.msrb.gmra.mxu2 %v2789_v32  ;;  %v3053_v32 = vshll.u32 %v2963_v26, 16 }
  0xaf   : > { %v8595_v28 = vpop.f32.mrf.mxu0 }
  0xb0   : > { %v965_v37 = vadd.f32 %v8603_v38, %v8595_v28 }
  0xb2   : > { %7479 = vmatmul.msk.bf16.gmra.mxu0 %vm757_vm0, %v8075_v25  ;;  %v3012_v25 = vrot.slane %v3010_v17, 4  ;;  %v1281_v48 = vmax.f32 %v965_v37, 0.0 }
  0xb4   : > { %v3016_v42 = vor.u32 %v3015_v33, %v3012_v25 }
  0xb6   : > { %v3017_v28 = vrot.slane %v3016_v42, 4  ;;  %v8081_v42 = vld [vmem:[%s8557_s24 + $0x78] sm:$0xff] }
  0xb7   : > { %v8601_v36 = vpop.f32.mrf.mxu0 }
  0xbf   : > { %v969_v49 = vpop.f32.mrf.mxu0 }
  0xc0   : > { %v970_v50 = vadd.f32 %v8603_v38, %v969_v49 }
  0xc2   : > { %v1283_v55 = vmax.f32 %v970_v50, 0.0  ;;  %7480 = vmatmul.msk.bf16.gmra.mxu0 %vm757_vm0, %v8076_v46  ;;  %v3022_v50 = vsel %vm8652_vm6, %v3017_v28, %v3021_v34 }
  0xc3   : > { %v3410_v53 = vunpack.c.l.b16 %v3022_v50 }
  0xc4   : > { %v1664_v61 = vmax.f32 %v1279_v52, %v1283_v55  ;;  %v967_v55 = vadd.f32 %v8603_v38, %v8601_v36 }
  0xc5   : > { %v3442_v56 = vpack.c.b16 %v3411_v54, %v3410_v53 }
  0xc6   : > { %1728 = vst [vmem:[#allocation3] sm:$0xff] %v1664_v61  ;;  %v1282_v59 = vmax.f32 %v967_v55, 0.0  ;;  %v8078_v61 = vld [vmem:[%s8557_s24 + $0x60] sm:$0xff] }
  0xc7   : > { %v971_v7 = vpop.f32.mrf.mxu0  ;;  %3530 = vmatmul.bf16.vlgmr.msrb.gmra.mxu3 %v3442_v56 }
  0xc8   : > { %v972_v14 = vadd.f32 %v8603_v38, %v971_v7  ;;  %v8712_v7 = vpop.f32.mrf.mxu1 }
  0xca   : > { %v1284_v21 = vmax.f32 %v972_v14, 0.0 }
  0xcc   : > { %v1665_v31 = vmax.f32 %v1280_v18, %v1284_v21 }
  0xce   : > { %1729 = vst [vmem:[#allocation3 + $0x8] sm:$0xff] %v1665_v31  ;;  %v7535_v31 = vrot.slane %v2162_v24, 11 }
  0xcf   : > { %v974_v41 = vpop.f32.mrf.mxu0 }
  0xd0   : > { %v975_v45 = vadd.f32 %v8603_v38, %v974_v41  ;;  %v8727_v22 = vpop.f32.mrf.mxu1 }
  0xd2   : > { %v1285_v49 = vmax.f32 %v975_v45, 0.0  ;;  %7481 = vmatmul.msk.bf16.gmra.mxu0 %vm757_vm0, %v8077_v40 }
  0xd4   : > { %v1666_v52 = vmax.f32 %v1281_v48, %v1285_v49 }
  0xd5   : > { %v1792_v3 = vld [vmem:[#allocation3] ss:$2 sm:$0xff]  ;;  %v1856_v4 = vld [vmem:[#allocation3 + $0x1] ss:$2 sm:$0xff] }
  0xd6   : > { %1730 = vst [vmem:[#allocation3 + $0x10] sm:$0xff] %v1666_v52  ;;  %v1919_v9 = vmax.f32 %v1792_v3, %v1856_v4  ;;  %v3055_v3 = vrot.slane %v3053_v32, 5 }
  0xd7   : > { %v976_v57 = vpop.f32.mrf.mxu0 }
  0xd8   : > { %v977_v58 = vadd.f32 %v8603_v38, %v976_v57  ;;  %v2023_v15 = vpack.c.bf16 %v1919_v9, %v1919_v9  ;;  %v8732_v47 = vpop.f32.mrf.mxu1 }
  0xda   : > { %v1286_v60 = vmax.f32 %v977_v58, 0.0  ;;  %2056 = vst [vmem:[#allocation4 + $0x14] sm:$0xf] %v2023_v15 }
  0xdc   : > { %v1667_v36 = vmax.f32 %v1282_v59, %v1286_v60 }
  0xde   : > { %1731 = vst [vmem:[#allocation3 + $0x18] sm:$0xff] %v1667_v36 }
  0xdf   : > { %v979_v62 = vpop.f32.mrf.mxu0 }
  0xe0   : > { %v980_v11 = vadd.f32 %v8603_v38, %v979_v62 }
  0xe1   : > { %v2092_v30 = vld [vmem:[#allocation4 + $0x14] sm:$0xf] }
  0xe2   : > { %7482 = vmatmul.msk.bf16.gmra.mxu0 %vm757_vm0, %v8078_v61  ;;  %v1287_v16 = vmax.f32 %v980_v11, 0.0  ;;  %v2961_v39 = vld [vmem:[#allocation4 + $0x14] sm:$0xf]  ;;  %v2167_v40 = vshrl.u32 %v2092_v30, 16  ;;  %v2170_v43 = vshll.u32 %v2092_v30, 16  ;;  %v1225_v30 = vadd.f32 %v8603_v38, %v8712_v7 }
  0xe3   : > { %v3034_v41 = vshrl.u32 %v2961_v39, 16  ;;  %v3037_v28 = vshll.u32 %v2961_v39, 16  ;;  %v8082_v39 = vld [vmem:[%s8557_s24 + $0x80] sm:$0xff] }
  0xe4   : > { %v2169_v48 = vrot.slane %v2167_v40, 7 }
  0xe5   : > { %v1794_v5 = vld [vmem:[#allocation3 + $0x10] ss:$2 sm:$0xff]  ;;  %v1858_v6 = vld [vmem:[#allocation3 + $0x11] ss:$2 sm:$0xff]  ;;  %v3036_v49 = vrot.slane %v3034_v41, 4  ;;  %v3039_v55 = vrot.slane %v3037_v28, 5  ;;  %v1227_v41 = vadd.f32 %v8603_v38, %v8727_v22 }
  0xe6   : > { %v1920_v10 = vmax.f32 %v1794_v5, %v1858_v6  ;;  %v2172_v58 = vor.u32 %v2170_v43, %v2169_v48  ;;  %v2174_v36 = vrot.slane %v2169_v48, 4  ;;  %v2094_v22 = vld [vmem:[#allocation4 + $0x20] sm:$0x8] }
  0xe7   : > { %v981_v63 = vpop.f32.mrf.mxu0  ;;  %v3040_v62 = vor.u32 %v3039_v55, %v3036_v49  ;;  %v1386_v28 = vmax.f32 %v1227_v41, 0.0 }
  0xe8   : > { %v2024_v17 = vpack.c.bf16 %v1920_v10, %v1920_v10  ;;  %v982_v21 = vadd.f32 %v8603_v38, %v981_v63 }
  0xe9   : > { %v3041_v5 = vrot.slane %v3040_v62, 4 }
  0xea   : > { %2057 = vst [vmem:[#allocation4 + $0x18] sm:$0xf] %v2024_v17  ;;  %v1288_v27 = vmax.f32 %v982_v21, 0.0  ;;  %v8744_v17 = vpop.f32.mrf.mxu1 }
  0xef   : > { %v984_v1 = vpop.f32.mrf.mxu0 }
  0xf0   : > { %v985_v34 = vadd.f32 %v8603_v38, %v984_v1 }
  0xf1   : > { %v8133_v35 = vld [vmem:[#allocation4 + $0x14] sm:$0xff] }
  0xf2   : > { %7483 = vmatmul.msk.bf16.gmra.mxu0 %vm757_vm0, %v8079_v0  ;;  %v2093_v37 = vld [vmem:[#allocation4 + $0x18] sm:$0xf]  ;;  %2681 = vmatmul.bf16.gmra.mxu1 %v8133_v35  ;;  %v1289_v57 = vmax.f32 %v985_v34, 0.0  ;;  %v2173_v0 = vsel %vm8629_vm3, %v7535_v31, %v2172_v58  ;;  %v1234_v32 = vpop.f32.mrf.mxu1 }
  0xf3   : > { %v2176_v44 = vshrl.u32 %v2093_v37, 16  ;;  %v2962_v45 = vld [vmem:[#allocation4 + $0x18] sm:$0xf]  ;;  %v2179_v54 = vshll.u32 %v2093_v37, 16  ;;  %v2759_v9 = vunpack.c.l.b16 %v2173_v0  ;;  %v1235_v35 = vadd.f32 %v8603_v38, %v1234_v32 }
  0xf4   : > { %v3043_v50 = vshll.u32 %v2962_v45, 16  ;;  %v3047_v51 = vshrl.u32 %v2962_v45, 16 }
  0xf5   : > { %v2178_v53 = vrot.slane %v2176_v44, 7  ;;  %v1389_v37 = vmax.f32 %v1235_v35, 0.0 }
  0xf6   : > { %v3045_v59 = vrot.slane %v3043_v50, 5  ;;  %v3049_v60 = vrot.slane %v3047_v51, 4 }
  0xf7   : > { %v8705_v2 = vpop.f32.mrf.mxu0  ;;  %v2181_v61 = vor.u32 %v2179_v54, %v2178_v53 }
  0xf8   : > { %v3050_v1 = vor.u32 %v3049_v60, %v3045_v59  ;;  %v3046_v15 = vsel %vm8652_vm6, %v3041_v5, %v3045_v59  ;;  %v8083_v59 = vld [vmem:[%s8557_s24 + $0x88] sm:$0xff]  ;;  %v2184_v60 = vshrl.u32 %v2094_v22, 16 }
  0xf9   : > { %v2182_v4 = vsel %vm8629_vm3, %v2174_v36, %v2181_v61  ;;  %v3412_v21 = vunpack.c.l.b16 %v3046_v15 }
  0xfa   : > { %v2760_v10 = vunpack.c.l.b16 %v2182_v4  ;;  %v3051_v11 = vrot.slane %v3050_v1, 4  ;;  %v1236_v45 = vpop.f32.mrf.mxu1  ;;  %v2966_v1 = vld [vmem:[#allocation4 + $0x2c] sm:$0x1] }
  0xfb   : > { %v1237_v49 = vadd.f32 %v8603_v38, %v1236_v45  ;;  %v3077_v15 = vshll.u32 %v2966_v1, 16 }
  0xfd   : > { %v1390_v53 = vmax.f32 %v1237_v49, 0.0  ;;  %v3079_v35 = vrot.slane %v3077_v15, 5 }
  0xff   : > { %v989_v13 = vpop.f32.mrf.mxu0  ;;  %v1719_v55 = vmax.f32 %v1386_v28, %v1390_v53 }
 0x100   : > { %v990_v14 = vadd.f32 %v8603_v38, %v989_v13 }
 0x101   : > { %1783 = vst [vmem:[#allocation3 + $0x1b8] sm:$0xff] %v1719_v55 }
 0x102   : > { %v1291_v18 = vmax.f32 %v990_v14, 0.0  ;;  %7484 = vmatmul.msk.bf16.gmra.mxu0 %vm757_vm0, %v8080_v12  ;;  %v987_v14 = vadd.f32 %v8603_v38, %v8705_v2 }
 0x104   : > { %v1668_v19 = vmax.f32 %v1287_v16, %v1291_v18  ;;  %v2790_v18 = vpack.c.b16 %v2760_v10, %v2759_v9  ;;  %v1290_v26 = vmax.f32 %v987_v14, 0.0 }
 0x106   : > { %1732 = vst [vmem:[#allocation3 + $0x20] sm:$0xff] %v1668_v19  ;;  %v3056_v19 = vsel %vm8652_vm6, %v3051_v11, %v3055_v3  ;;  %2882 = vmatmul.bf16.gmra.mxu2 %v2790_v18 }
 0x107   : > { %v991_v23 = vpop.f32.mrf.mxu0 }
 0x108   : > { %v992_v25 = vadd.f32 %v8603_v38, %v991_v23  ;;  %v3413_v23 = vunpack.c.l.b16 %v3056_v19 }
 0x10a   : > { %v1292_v29 = vmax.f32 %v992_v25, 0.0  ;;  %v8749_v25 = vpop.f32.mrf.mxu3 }
 0x10c   : > { %v1669_v33 = vmax.f32 %v1288_v27, %v1292_v29  ;;  %v3443_v27 = vpack.c.b16 %v3413_v23, %v3412_v21 }
 0x10e   : > { %1733 = vst [vmem:[#allocation3 + $0x28] sm:$0xff] %v1669_v33  ;;  %3535 = vmatmul.bf16.gmra.mxu3 %v3443_v27  ;;  %v1385_v33 = vmax.f32 %v1225_v30, 0.0 }
 0x10f   : > { %v994_v52 = vpop.f32.mrf.mxu0 }
 0x110   : > { %v995_v56 = vadd.f32 %v8603_v38, %v994_v52 }
 0x112   : > { %v1293_v63 = vmax.f32 %v995_v56, 0.0  ;;  %7485 = vmatmul.msk.bf16.gmra.mxu0 %vm757_vm0, %v8081_v42  ;;  %v8758_v40 = vpop.f32.mrf.mxu3  ;;  %v1718_v42 = vmax.f32 %v1385_v33, %v1389_v37  ;;  %v1249_v37 = vpop.f32.mrf.mxu2 }
 0x114   : > { %v1670_v6 = vmax.f32 %v1289_v57, %v1293_v63  ;;  %1782 = vst [vmem:[#allocation3 + $0x1b0] sm:$0xff] %v1718_v42 }
 0x115   : > { %v1796_v12 = vld [vmem:[#allocation3 + $0x20] ss:$2 sm:$0xff]  ;;  %v1860_v13 = vld [vmem:[#allocation3 + $0x21] ss:$2 sm:$0xff] }
 0x116   : > { %v1921_v16 = vmax.f32 %v1796_v12, %v1860_v13  ;;  %1734 = vst [vmem:[#allocation3 + $0x30] sm:$0xff] %v1670_v6  ;;  %v7536_v6 = vrot.slane %v2184_v60, 11 }
 0x117   : > { %v996_v20 = vpop.f32.mrf.mxu0 }
 0x118   : > { %v997_v24 = vadd.f32 %v8603_v38, %v996_v20  ;;  %v2025_v2 = vpack.c.bf16 %v1921_v16, %v1921_v16  ;;  %v1239_v16 = vpop.f32.mrf.mxu1 }
 0x119   : > { %v1240_v23 = vadd.f32 %v8603_v38, %v1239_v16 }
 0x11a   : > { %v1294_v29 = vmax.f32 %v997_v24, 0.0  ;;  %2058 = vst [vmem:[#allocation4 + $0x24] sm:$0xf] %v2025_v2  ;;  %v8765_v58 = vpop.f32.mrf.mxu3 }
 0x11b   : > { %v1846_v18 = vld [vmem:[#allocation3 + $0x1b0] ss:$2 sm:$0xff]  ;;  %v1910_v19 = vld [vmem:[#allocation3 + $0x1b1] ss:$2 sm:$0xff]  ;;  %v1391_v42 = vmax.f32 %v1240_v23, 0.0 }
 0x11c   : > { %v1671_v31 = vmax.f32 %v1290_v26, %v1294_v29  ;;  %v1946_v24 = vmax.f32 %v1846_v18, %v1910_v19 }
 0x11e   : > { %1735 = vst [vmem:[#allocation3 + $0x38] sm:$0xff] %v1671_v31 }
 0x11f   : > { %v8754_v34 = vpop.f32.mrf.mxu0 }
 0x120   : > { %v1000_v22 = vadd.f32 %v8603_v38, %v8754_v34 }
 0x121   : > { %v2095_v50 = vld [vmem:[#allocation4 + $0x24] sm:$0xf] }
 0x122   : > { %7486 = vmatmul.msk.bf16.gmra.mxu0 %vm757_vm0, %v8082_v39  ;;  %v2964_v52 = vld [vmem:[#allocation4 + $0x24] sm:$0xf]  ;;  %v2189_v54 = vshrl.u32 %v2095_v50, 16  ;;  %v2192_v0 = vshll.u32 %v2095_v50, 16  ;;  %v8774_v30 = vpop.f32.mrf.mxu3  ;;  %v2050_v39 = vpack.c.bf16 %v1946_v24, %v1946_v24  ;;  %v1260_v50 = vadd.f32 %v8603_v38, %v8749_v25 }
 0x123   : > { %v3058_v56 = vshrl.u32 %v2964_v52, 16  ;;  %v3061_v57 = vshll.u32 %v2964_v52, 16  ;;  %v1295_v1 = vmax.f32 %v1000_v22, 0.0 }
 0x124   : > { %v2191_v36 = vrot.slane %v2189_v54, 7  ;;  %2083 = vst [vmem:[#allocation4 + $0xe8] sm:$0xf] %v2050_v39  ;;  %v8085_v39 = vld [vmem:[%s8557_s24 + $0x98] sm:$0xff] }
 0x125   : > { %v1798_v7 = vld [vmem:[#allocation3 + $0x30] ss:$2 sm:$0xff]  ;;  %v1862_v43 = vld [vmem:[#allocation3 + $0x31] ss:$2 sm:$0xff]  ;;  %v3060_v62 = vrot.slane %v3058_v56, 4  ;;  %v3063_v63 = vrot.slane %v3061_v57, 5 }
 0x126   : > { %v1922_v44 = vmax.f32 %v1798_v7, %v1862_v43  ;;  %v2194_v9 = vor.u32 %v2192_v0, %v2191_v36  ;;  %v2196_v27 = vrot.slane %v2191_v36, 4  ;;  %v1250_v7 = vadd.f32 %v8603_v38, %v1249_v37  ;;  %v8084_v57 = vld [vmem:[%s8557_s24 + $0x90] sm:$0xff] }
 0x127   : > { %v8762_v48 = vpop.f32.mrf.mxu0  ;;  %v3064_v13 = vor.u32 %v3063_v63, %v3060_v62  ;;  %v1399_v36 = vmax.f32 %v1260_v50, 0.0 }
 0x128   : > { %v2026_v51 = vpack.c.bf16 %v1922_v44, %v1922_v44  ;;  %v2195_v26 = vsel %vm8629_vm3, %v7536_v6, %v2194_v9  ;;  %v1395_v49 = vmax.f32 %v1250_v7, 0.0  ;;  %v1002_v9 = vadd.f32 %v8603_v38, %v8762_v48 }
 0x129   : > { %v3065_v32 = vrot.slane %v3064_v13, 4  ;;  %v2761_v43 = vunpack.c.l.b16 %v2195_v26 }
 0x12a   : > { %2059 = vst [vmem:[#allocation4 + $0x28] sm:$0xf] %v2026_v51  ;;  %v1720_v55 = vmax.f32 %v1391_v42, %v1395_v49  ;;  %v1269_v60 = vpop.f32.mrf.mxu3 }
 0x12b   : > { %v1270_v25 = vadd.f32 %v8603_v38, %v1269_v60 }
 0x12c   : > { %1784 = vst [vmem:[#allocation3 + $0x1c0] sm:$0xff] %v1720_v55 }
 0x12d   : > { %v1403_v0 = vmax.f32 %v1270_v25, 0.0 }
 0x12f   : > { %v8768_v61 = vpop.f32.mrf.mxu0  ;;  %v1724_v34 = vmax.f32 %v1399_v36, %v1403_v0 }
 0x131   : > { %v8134_v3 = vld [vmem:[#allocation4 + $0x24] sm:$0xff]  ;;  %1788 = vst [vmem:[#allocation3 + $0x1e0] sm:$0xff] %v1724_v34 }
 0x132   : > { %v2096_v4 = vld [vmem:[#allocation4 + $0x28] sm:$0xf]  ;;  %7487 = vmatmul.msk.bf16.gmra.mxu0 %vm757_vm0, %v8083_v59  ;;  %2686 = vmatmul.bf16.gmra.mxu1 %v8134_v3  ;;  %v1241_v59 = vpop.f32.mrf.mxu1 }
 0x133   : > { %v2965_v5 = vld [vmem:[#allocation4 + $0x28] sm:$0xf]  ;;  %v2198_v10 = vshrl.u32 %v2096_v4, 16  ;;  %v2201_v12 = vshll.u32 %v2096_v4, 16  ;;  %v1242_v4 = vadd.f32 %v8603_v38, %v1241_v59 }
 0x134   : > { %v3067_v11 = vshll.u32 %v2965_v5, 16  ;;  %v3071_v14 = vshrl.u32 %v2965_v5, 16  ;;  %v1262_v5 = vadd.f32 %v8603_v38, %v8758_v40 }
 0x135   : > { %v2200_v20 = vrot.slane %v2198_v10, 7  ;;  %v1251_v10 = vpop.f32.mrf.mxu2 }
 0x136   : > { %v3069_v21 = vrot.slane %v3067_v11, 5  ;;  %v3073_v2 = vrot.slane %v3071_v14, 4  ;;  %v1252_v13 = vadd.f32 %v8603_v38, %v1251_v10  ;;  %v1271_v14 = vpop.f32.mrf.mxu3  ;;  %v1400_v15 = vmax.f32 %v1262_v5, 0.0 }
 0x137   : > { %v2203_v29 = vor.u32 %v2201_v12, %v2200_v20  ;;  %v8776_v31 = vpop.f32.mrf.mxu0  ;;  %v1392_v12 = vmax.f32 %v1242_v4, 0.0  ;;  %v1272_v19 = vadd.f32 %v8603_v38, %v1271_v14  ;;  %v1296_v20 = vmax.f32 %v1002_v9, 0.0 }
 0x138   : > { %v3074_v33 = vor.u32 %v3073_v2, %v3069_v21  ;;  %v3070_v45 = vsel %vm8652_vm6, %v3065_v32, %v3069_v21  ;;  %v1396_v40 = vmax.f32 %v1252_v13, 0.0  ;;  %v1265_v2 = vadd.f32 %v8603_v38, %v8765_v58 }
 0x139   : > { %v2204_v41 = vsel %vm8629_vm3, %v2196_v27, %v2203_v29  ;;  %v3414_v53 = vunpack.c.l.b16 %v3070_v45  ;;  %v1404_v23 = vmax.f32 %v1272_v19, 0.0  ;;  %v1005_v29 = vadd.f32 %v8603_v38, %v8768_v61 }
 0x13a   : > { %v2762_v44 = vunpack.c.l.b16 %v2204_v41  ;;  %v3075_v28 = vrot.slane %v3074_v33, 4  ;;  %v1244_v18 = vpop.f32.mrf.mxu1  ;;  %v1721_v24 = vmax.f32 %v1392_v12, %v1396_v40  ;;  %v1401_v42 = vmax.f32 %v1265_v2, 0.0 }
 0x13b   : > { %v1245_v48 = vadd.f32 %v8603_v38, %v1244_v18  ;;  %v1725_v27 = vmax.f32 %v1400_v15, %v1404_v23 }
 0x13c   : > { %v2791_v51 = vpack.c.b16 %v2762_v44, %v2761_v43  ;;  %v3080_v52 = vsel %vm8652_vm6, %v3075_v28, %v3079_v35  ;;  %1785 = vst [vmem:[#allocation3 + $0x1c8] sm:$0xff] %v1721_v24  ;;  %v1297_v44 = vmax.f32 %v1005_v29, 0.0 }
 0x13d   : > { %v3415_v54 = vunpack.c.l.b16 %v3080_v52  ;;  %v1254_v32 = vpop.f32.mrf.mxu2  ;;  %v1393_v35 = vmax.f32 %v1245_v48, 0.0  ;;  %1789 = vst [vmem:[#allocation3 + $0x1e8] sm:$0xff] %v1725_v27 }
 0x13e   : > { %2887 = vmatmul.bf16.gmra.mxu2 %v2791_v51  ;;  %v1255_v37 = vadd.f32 %v8603_v38, %v1254_v32  ;;  %v1274_v41 = vpop.f32.mrf.mxu3  ;;  %v1267_v51 = vadd.f32 %v8603_v38, %v8774_v30 }
 0x13f   : > { %v3444_v56 = vpack.c.b16 %v3415_v54, %v3414_v53  ;;  %v1009_v62 = vpop.f32.mrf.mxu0  ;;  %v1275_v58 = vadd.f32 %v8603_v38, %v1274_v41 }
 0x140   : > { %v1010_v63 = vadd.f32 %v8603_v38, %v1009_v62  ;;  %v1397_v43 = vmax.f32 %v1255_v37, 0.0 }
 0x141   : > { %3540 = vmatmul.bf16.gmra.mxu3 %v3444_v56  ;;  %v1405_v28 = vmax.f32 %v1275_v58, 0.0  ;;  %v1007_v56 = vadd.f32 %v8603_v38, %v8776_v31 }
 0x142   : > { %v1299_v3 = vmax.f32 %v1010_v63, 0.0  ;;  %7488 = vmatmul.msk.bf16.gmra.mxu0 %vm757_vm0, %v8084_v57  ;;  %v1246_v61 = vpop.f32.mrf.mxu1  ;;  %v1722_v50 = vmax.f32 %v1393_v35, %v1397_v43  ;;  %v8087_v43 = vld [vmem:[%s8557_s24 + $0xa8] sm:$0xff] }
 0x143   : > { %v1247_v49 = vadd.f32 %v8603_v38, %v1246_v61  ;;  %v1848_v53 = vld [vmem:[#allocation3 + $0x1c0] ss:$2 sm:$0xff]  ;;  %v1912_v54 = vld [vmem:[#allocation3 + $0x1c1] ss:$2 sm:$0xff]  ;;  %v1726_v55 = vmax.f32 %v1401_v42, %v1405_v28  ;;  %v1298_v5 = vmax.f32 %v1007_v56, 0.0 }
 0x144   : > { %v1672_v6 = vmax.f32 %v1295_v1, %v1299_v3  ;;  %v1947_v22 = vmax.f32 %v1848_v53, %v1912_v54  ;;  %1786 = vst [vmem:[#allocation3 + $0x1d0] sm:$0xff] %v1722_v50  ;;  %v1852_v57 = vld [vmem:[#allocation3 + $0x1e0] ss:$2 sm:$0xff]  ;;  %v1916_v59 = vld [vmem:[#allocation3 + $0x1e1] ss:$2 sm:$0xff]  ;;  %v1402_v1 = vmax.f32 %v1267_v51, 0.0 }
 0x145   : > { %v1256_v60 = vpop.f32.mrf.mxu2  ;;  %v1394_v25 = vmax.f32 %v1247_v49, 0.0  ;;  %v1949_v63 = vmax.f32 %v1852_v57, %v1916_v59  ;;  %1790 = vst [vmem:[#allocation3 + $0x1f0] sm:$0xff] %v1726_v55  ;;  %v2097_v49 = vld [vmem:[#allocation4 + $0x30] sm:$0x8]  ;;  %v2969_v55 = vld [vmem:[#allocation4 + $0x3c] sm:$0x1] }
 0x146   : > { %1736 = vst [vmem:[#allocation3 + $0x40] sm:$0xff] %v1672_v6  ;;  %v2051_v62 = vpack.c.bf16 %v1947_v22, %v1947_v22  ;;  %v1257_v30 = vadd.f32 %v8603_v38, %v1256_v60  ;;  %v1276_v0 = vpop.f32.mrf.mxu3  ;;  %v2206_v50 = vshrl.u32 %v2097_v49, 16 }
 0x147   : > { %v1011_v11 = vpop.f32.mrf.mxu0  ;;  %v1277_v4 = vadd.f32 %v8603_v38, %v1276_v0  ;;  %v2053_v31 = vpack.c.bf16 %v1949_v63, %v1949_v63  ;;  %v3101_v0 = vshll.u32 %v2969_v55, 16 }
 0x148   : > { %v1012_v16 = vadd.f32 %v8603_v38, %v1011_v11  ;;  %2084 = vst [vmem:[#allocation4 + $0xf4] sm:$0xf] %v2051_v62  ;;  %v1398_v34 = vmax.f32 %v1257_v30, 0.0  ;;  %v7537_v57 = vrot.slane %v2206_v50, 11 }
 0x149   : > { %v1406_v9 = vmax.f32 %v1277_v4, 0.0  ;;  %2086 = vst [vmem:[#allocation4 + $0x104] sm:$0xf] %v2053_v31 }
 0x14a   : > { %v1300_v21 = vmax.f32 %v1012_v16, 0.0  ;;  %v1723_v10 = vmax.f32 %v1394_v25, %v1398_v34  ;;  %v2677_v15 = vpop.f32.mrf.mxu1  ;;  %v8086_v16 = vld [vmem:[%s8557_s24 + $0xa0] sm:$0xff] }
 0x14b   : > { %v1727_v12 = vmax.f32 %v1402_v1, %v1406_v9 }
 0x14c   : > { %v1673_v26 = vmax.f32 %v1296_v20, %v1300_v21  ;;  %1787 = vst [vmem:[#allocation3 + $0x1d8] sm:$0xff] %v1723_v10 }
 0x14d   : > { %v2878_v18 = vpop.f32.mrf.mxu2  ;;  %1791 = vst [vmem:[#allocation3 + $0x1f8] sm:$0xff] %v1727_v12 }
 0x14e   : > { %1737 = vst [vmem:[#allocation3 + $0x48] sm:$0xff] %v1673_v26  ;;  %v3531_v37 = vpop.f32.mrf.mxu3 }
 0x14f   : > { %v1014_v33 = vpop.f32.mrf.mxu0 }
 0x150   : > { %v1015_v7 = vadd.f32 %v8603_v38, %v1014_v33 }
 0x152   : > { %v1301_v45 = vmax.f32 %v1015_v7, 0.0  ;;  %7489 = vmatmul.msk.bf16.gmra.mxu0 %vm757_vm0, %v8085_v39 }
 0x153   : > { %v1850_v20 = vld [vmem:[#allocation3 + $0x1d0] ss:$2 sm:$0xff]  ;;  %v1914_v21 = vld [vmem:[#allocation3 + $0x1d1] ss:$2 sm:$0xff] }
 0x154   : > { %v1674_v52 = vmax.f32 %v1297_v44, %v1301_v45  ;;  %v1948_v2 = vmax.f32 %v1850_v20, %v1914_v21  ;;  %v1854_v26 = vld [vmem:[#allocation3 + $0x1f0] ss:$2 sm:$0xff]  ;;  %v1918_v27 = vld [vmem:[#allocation3 + $0x1f1] ss:$2 sm:$0xff] }
 0x155   : > { %v1800_v13 = vld [vmem:[#allocation3 + $0x40] ss:$2 sm:$0xff]  ;;  %v1864_v14 = vld [vmem:[#allocation3 + $0x41] ss:$2 sm:$0xff]  ;;  %v1950_v32 = vmax.f32 %v1854_v26, %v1918_v27  ;;  %v8088_v20 = vld [vmem:[%s8557_s24 + $0xb0] sm:$0xff]  ;;  %v8852_v50 = vpop.f32.mrf.mxu2 }
 0x156   : > { %1738 = vst [vmem:[#allocation3 + $0x50] sm:$0xff] %v1674_v52  ;;  %v1923_v40 = vmax.f32 %v1800_v13, %v1864_v14  ;;  %v2052_v39 = vpack.c.bf16 %v1948_v2, %v1948_v2 }
 0x157   : > { %v1016_v36 = vpop.f32.mrf.mxu0  ;;  %v2054_v35 = vpack.c.bf16 %v1950_v32, %v1950_v32 }
 0x158   : > { %v1017_v3 = vadd.f32 %v8603_v38, %v1016_v36  ;;  %v2879_v38 = vadd.f32 %v2878_v18, %v2677_v15  ;;  %v2027_v23 = vpack.c.bf16 %v1923_v40, %v1923_v40  ;;  %2085 = vst [vmem:[#allocation4 + $0xf8] sm:$0xf] %v2052_v39  ;;  %v8835_v18 = vld [vmem:[#allocation9] ss:$0 sm:$0xff] }
 0x159   : > { %2087 = vst [vmem:[#allocation4 + $0x108] sm:$0xf] %v2054_v35 }
 0x15a   : > { %v1302_v6 = vmax.f32 %v1017_v3, 0.0  ;;  %2060 = vst [vmem:[#allocation4 + $0x34] sm:$0xf] %v2027_v23  ;;  %v8825_v42 = vadd.f32 %v3531_v37, %v2879_v38 }
 0x15c   : > { %v1675_v11 = vmax.f32 %v1298_v5, %v1302_v6 }
 0x15e   : > { %1739 = vst [vmem:[#allocation3 + $0x58] sm:$0xff] %v1675_v11  ;;  %v3103_v11 = vrot.slane %v3101_v0, 5  ;;  %v8090_v0 = vld [vmem:[%s8557_s24 + $0xc0] sm:$0xff] }
 0x15f   : > { %v8820_v19 = vpop.f32.mrf.mxu0 }
 0x160   : > { %v1020_v38 = vadd.f32 %v8835_v18, %v8820_v19 }
 0x161   : > { %v2098_v7 = vld [vmem:[#allocation4 + $0x34] sm:$0xf] }
 0x162   : > { %7490 = vmatmul.msk.bf16.gmra.mxu0 %vm757_vm0, %v8086_v16  ;;  %v2967_v58 = vld [vmem:[#allocation4 + $0x34] sm:$0xf]  ;;  %v2211_v44 = vshrl.u32 %v2098_v7, 16  ;;  %v2214_v54 = vshll.u32 %v2098_v7, 16  ;;  %v1303_v27 = vmax.f32 %v1020_v38, 0.0 }
 0x163   : > { %v3082_v45 = vshrl.u32 %v2967_v58, 16  ;;  %v3085_v61 = vshll.u32 %v2967_v58, 16 }
 0x164   : > { %v2213_v51 = vrot.slane %v2211_v44, 7 }
 0x165   : > { %v1802_v48 = vld [vmem:[#allocation3 + $0x50] ss:$2 sm:$0xff]  ;;  %v1866_v24 = vld [vmem:[#allocation3 + $0x51] ss:$2 sm:$0xff]  ;;  %v3084_v52 = vrot.slane %v3082_v45, 4  ;;  %v3087_v53 = vrot.slane %v3085_v61, 5  ;;  %v8850_v61 = vpop.f32.mrf.mxu1 }
 0x166   : > { %v1924_v33 = vmax.f32 %v1802_v48, %v1866_v24  ;;  %v2216_v59 = vor.u32 %v2214_v54, %v2213_v51  ;;  %v2218_v5 = vrot.slane %v2213_v51, 4 }
 0x167   : > { %v8823_v29 = vpop.f32.mrf.mxu0  ;;  %v3088_v62 = vor.u32 %v3087_v53, %v3084_v52  ;;  %v8855_v52 = vpop.f32.mrf.mxu3 }
 0x168   : > { %v2028_v41 = vpack.c.bf16 %v1924_v33, %v1924_v33  ;;  %v2217_v34 = vsel %vm8629_vm3, %v7537_v57, %v2216_v59  ;;  %v1022_v19 = vadd.f32 %v8835_v18, %v8823_v29 }
 0x169   : > { %v3089_v9 = vrot.slane %v3088_v62, 4  ;;  %v2763_v15 = vunpack.c.l.b16 %v2217_v34 }
 0x16a   : > { %2061 = vst [vmem:[#allocation4 + $0x38] sm:$0xf] %v2028_v41  ;;  %v1304_v37 = vmax.f32 %v1022_v19, 0.0 }
 0x16f   : > { %v1024_v28 = vpop.f32.mrf.mxu0 }
 0x170   : > { %v1025_v58 = vadd.f32 %v8835_v18, %v1024_v28 }
 0x171   : > { %v8135_v22 = vld [vmem:[#allocation4 + $0x34] sm:$0xff] }
 0x172   : > { %7491 = vmatmul.msk.bf16.gmra.mxu0 %vm757_vm0, %v8087_v43  ;;  %v2099_v56 = vld [vmem:[#allocation4 + $0x38] sm:$0xf]  ;;  %2691 = vmatmul.bf16.gmra.mxu1 %v8135_v22  ;;  %v1305_v49 = vmax.f32 %v1025_v58, 0.0 }
 0x173   : > { %v2968_v60 = vld [vmem:[#allocation4 + $0x38] sm:$0xf]  ;;  %v2220_v36 = vshrl.u32 %v2099_v56, 16  ;;  %v2223_v3 = vshll.u32 %v2099_v56, 16 }
 0x174   : > { %v3091_v25 = vshll.u32 %v2968_v60, 16  ;;  %v3095_v63 = vshrl.u32 %v2968_v60, 16  ;;  %v8089_v43 = vld [vmem:[%s8557_s24 + $0xb8] sm:$0xff] }
 0x175   : > { %v2222_v1 = vrot.slane %v2220_v36, 7  ;;  %v2682_v36 = vpop.f32.mrf.mxu1 }
 0x176   : > { %v3093_v4 = vrot.slane %v3091_v25, 5  ;;  %v3097_v31 = vrot.slane %v3095_v63, 4 }
 0x177   : > { %v1026_v30 = vpop.f32.mrf.mxu0  ;;  %v2225_v6 = vor.u32 %v2223_v3, %v2222_v1 }
 0x178   : > { %v3098_v10 = vor.u32 %v3097_v31, %v3093_v4  ;;  %v3094_v13 = vsel %vm8652_vm6, %v3089_v9, %v3093_v4  ;;  %v1027_v28 = vadd.f32 %v8835_v18, %v1026_v30 }
 0x179   : > { %v2226_v12 = vsel %vm8629_vm3, %v2218_v5, %v2225_v6  ;;  %v3416_v48 = vunpack.c.l.b16 %v3094_v13 }
 0x17a   : > { %v3099_v14 = vrot.slane %v3098_v10, 4  ;;  %v2764_v16 = vunpack.c.l.b16 %v2226_v12  ;;  %v1306_v59 = vmax.f32 %v1027_v28, 0.0  ;;  %v2100_v12 = vld [vmem:[#allocation4 + $0x40] sm:$0x8] }
 0x17c   : > { %v3104_v40 = vsel %vm8652_vm6, %v3099_v14, %v3103_v11  ;;  %v2792_v21 = vpack.c.b16 %v2764_v16, %v2763_v15  ;;  %v8091_v15 = vld [vmem:[%s8557_s24 + $0xc8] sm:$0xff]  ;;  %v2228_v16 = vshrl.u32 %v2100_v12, 16 }
 0x17d   : > { %v3417_v24 = vunpack.c.l.b16 %v3104_v40  ;;  %v8871_v28 = vpop.f32.mrf.mxu1 }
 0x17e   : > { %2892 = vmatmul.bf16.gmra.mxu2 %v2792_v21 }
 0x17f   : > { %v1029_v23 = vpop.f32.mrf.mxu0  ;;  %v3445_v26 = vpack.c.b16 %v3417_v24, %v3416_v48  ;;  %v2972_v48 = vld [vmem:[#allocation4 + $0x4c] sm:$0x1] }
 0x180   : > { %v1030_v2 = vadd.f32 %v8835_v18, %v1029_v23 }
 0x181   : > { %3545 = vmatmul.bf16.gmra.mxu3 %v3445_v26 }
 0x182   : > { %v1307_v39 = vmax.f32 %v1030_v2, 0.0  ;;  %7492 = vmatmul.msk.bf16.gmra.mxu0 %vm757_vm0, %v8088_v20 }
 0x184   : > { %v1676_v32 = vmax.f32 %v1303_v27, %v1307_v39  ;;  %v7538_v27 = vrot.slane %v2228_v16, 11 }
 0x186   : > { %1740 = vst [vmem:[#allocation3 + $0x60] sm:$0xff] %v1676_v32 }
 0x187   : > { %v1031_v33 = vpop.f32.mrf.mxu0 }
 0x188   : > { %v1032_v35 = vadd.f32 %v8835_v18, %v1031_v33 }
 0x189   : > { %v2883_v62 = vpop.f32.mrf.mxu2 }
 0x18a   : > { %v1308_v41 = vmax.f32 %v1032_v35, 0.0  ;;  %v2884_v63 = vadd.f32 %v2883_v62, %v2682_v36 }
 0x18c   : > { %v1677_v7 = vmax.f32 %v1304_v37, %v1308_v41  ;;  %v3125_v37 = vshll.u32 %v2972_v48, 16 }
 0x18e   : > { %1741 = vst [vmem:[#allocation3 + $0x68] sm:$0xff] %v1677_v7 }
 0x18f   : > { %v1034_v44 = vpop.f32.mrf.mxu0 }
 0x190   : > { %v1035_v45 = vadd.f32 %v8835_v18, %v1034_v44 }
 0x191   : > { %v3536_v1 = vpop.f32.mrf.mxu3 }
 0x192   : > { %v1309_v29 = vmax.f32 %v1035_v45, 0.0  ;;  %7493 = vmatmul.msk.bf16.gmra.mxu0 %vm757_vm0, %v8089_v43  ;;  %v8860_v4 = vadd.f32 %v3536_v1, %v2884_v63 }
 0x194   : > { %v1678_v51 = vmax.f32 %v1305_v49, %v1309_v29 }
 0x195   : > { %v1804_v53 = vld [vmem:[#allocation3 + $0x60] ss:$2 sm:$0xff]  ;;  %v1868_v54 = vld [vmem:[#allocation3 + $0x61] ss:$2 sm:$0xff] }
 0x196   : > { %v1925_v55 = vmax.f32 %v1804_v53, %v1868_v54  ;;  %1742 = vst [vmem:[#allocation3 + $0x70] sm:$0xff] %v1678_v51  ;;  %v3127_v54 = vrot.slane %v3125_v37, 5 }
 0x197   : > { %v1036_v22 = vpop.f32.mrf.mxu0 }
 0x198   : > { %v1037_v56 = vadd.f32 %v8835_v18, %v1036_v22  ;;  %v2029_v57 = vpack.c.bf16 %v1925_v55, %v1925_v55  ;;  %v8873_v55 = vpop.f32.mrf.mxu2 }
 0x199   : > { %v8879_v36 = vpop.f32.mrf.mxu3 }
 0x19a   : > { %v1310_v60 = vmax.f32 %v1037_v56, 0.0  ;;  %2062 = vst [vmem:[#allocation4 + $0x44] sm:$0xf] %v2029_v57 }
 0x19c   : > { %v1679_v25 = vmax.f32 %v1306_v59, %v1310_v60 }
 0x19e   : > { %1743 = vst [vmem:[#allocation3 + $0x78] sm:$0xff] %v1679_v25 }
 0x19f   : > { %v1039_v3 = vpop.f32.mrf.mxu0 }
 0x1a0   : > { %v1040_v1 = vadd.f32 %v8835_v18, %v1039_v3 }
 0x1a1   : > { %v2101_v6 = vld [vmem:[#allocation4 + $0x44] sm:$0xf] }
 0x1a2   : > { %7494 = vmatmul.msk.bf16.gmra.mxu0 %vm757_vm0, %v8090_v0  ;;  %v2970_v10 = vld [vmem:[#allocation4 + $0x44] sm:$0xf]  ;;  %v2233_v11 = vshrl.u32 %v2101_v6, 16  ;;  %v2236_v23 = vshll.u32 %v2101_v6, 16  ;;  %v1311_v12 = vmax.f32 %v1040_v1, 0.0 }
 0x1a3   : > { %v3106_v13 = vshrl.u32 %v2970_v10, 16  ;;  %v3109_v14 = vshll.u32 %v2970_v10, 16 }
 0x1a4   : > { %v2235_v38 = vrot.slane %v2233_v11, 7 }
 0x1a5   : > { %v1806_v30 = vld [vmem:[#allocation3 + $0x70] ss:$2 sm:$0xff]  ;;  %v1870_v31 = vld [vmem:[#allocation3 + $0x71] ss:$2 sm:$0xff]  ;;  %v3108_v20 = vrot.slane %v3106_v13, 4  ;;  %v3111_v21 = vrot.slane %v3109_v14, 5 }
 0x1a6   : > { %v1926_v34 = vmax.f32 %v1806_v30, %v1870_v31  ;;  %v2238_v39 = vor.u32 %v2236_v23, %v2235_v38  ;;  %v2240_v45 = vrot.slane %v2235_v38, 4  ;;  %v8092_v31 = vld [vmem:[%s8557_s24 + $0xd0] sm:$0xff] }
 0x1a7   : > { %v8863_v5 = vpop.f32.mrf.mxu0  ;;  %v3112_v33 = vor.u32 %v3111_v21, %v3108_v20 }
 0x1a8   : > { %v2030_v9 = vpack.c.bf16 %v1926_v34, %v1926_v34  ;;  %v2239_v44 = vsel %vm8629_vm3, %v7538_v27, %v2238_v39  ;;  %v1042_v3 = vadd.f32 %v8835_v18, %v8863_v5 }
 0x1a9   : > { %v3113_v51 = vrot.slane %v3112_v33, 4  ;;  %v2765_v56 = vunpack.c.l.b16 %v2239_v44 }
 0x1aa   : > { %2063 = vst [vmem:[#allocation4 + $0x48] sm:$0xf] %v2030_v9  ;;  %v1312_v21 = vmax.f32 %v1042_v3, 0.0 }
 0x1af   : > { %v8866_v40 = vpop.f32.mrf.mxu0  ;;  %v2687_v6 = vpop.f32.mrf.mxu1 }
 0x1b1   : > { %v8136_v24 = vld [vmem:[#allocation4 + $0x44] sm:$0xff] }
 0x1b2   : > { %v2102_v2 = vld [vmem:[#allocation4 + $0x48] sm:$0xf]  ;;  %7495 = vmatmul.msk.bf16.gmra.mxu0 %vm757_vm0, %v8091_v15  ;;  %2696 = vmatmul.bf16.gmra.mxu1 %v8136_v24  ;;  %v1045_v24 = vadd.f32 %v8835_v18, %v8866_v40 }
 0x1b3   : > { %v2971_v26 = vld [vmem:[#allocation4 + $0x48] sm:$0xf]  ;;  %v2242_v32 = vshrl.u32 %v2102_v2, 16  ;;  %v2245_v7 = vshll.u32 %v2102_v2, 16  ;;  %v8093_v2 = vld [vmem:[%s8557_s24 + $0xd8] sm:$0xff] }
 0x1b4   : > { %v3115_v19 = vshll.u32 %v2971_v26, 16  ;;  %v3119_v35 = vshrl.u32 %v2971_v26, 16  ;;  %v1313_v39 = vmax.f32 %v1045_v24, 0.0 }
 0x1b5   : > { %v2244_v41 = vrot.slane %v2242_v32, 7 }
 0x1b6   : > { %v3117_v58 = vrot.slane %v3115_v19, 5  ;;  %v3121_v43 = vrot.slane %v3119_v35, 4 }
 0x1b7   : > { %v2247_v49 = vor.u32 %v2245_v7, %v2244_v41  ;;  %v1046_v29 = vpop.f32.mrf.mxu0 }
 0x1b8   : > { %v3122_v53 = vor.u32 %v3121_v43, %v3117_v58  ;;  %v3118_v59 = vsel %vm8652_vm6, %v3113_v51, %v3117_v58  ;;  %v1047_v35 = vadd.f32 %v8835_v18, %v1046_v29 }
 0x1b9   : > { %v2248_v22 = vsel %vm8629_vm3, %v2240_v45, %v2247_v49  ;;  %v3418_v63 = vunpack.c.l.b16 %v3118_v59  ;;  %v8094_v45 = vld [vmem:[%s8557_s24 + $0xe0] sm:$0xff] }
 0x1ba   : > { %v2766_v57 = vunpack.c.l.b16 %v2248_v22  ;;  %v3123_v60 = vrot.slane %v3122_v53, 4  ;;  %v1314_v58 = vmax.f32 %v1047_v35, 0.0 }
 0x1bc   : > { %v2793_v62 = vpack.c.b16 %v2766_v57, %v2765_v56  ;;  %v3128_v25 = vsel %vm8652_vm6, %v3123_v60, %v3127_v54  ;;  %v2103_v60 = vld [vmem:[#allocation4 + $0x50] sm:$0x8] }
 0x1bd   : > { %v3419_v0 = vunpack.c.l.b16 %v3128_v25 }
 0x1be   : > { %2897 = vmatmul.bf16.gmra.mxu2 %v2793_v62 }
 0x1bf   : > { %v3446_v30 = vpack.c.b16 %v3419_v0, %v3418_v63  ;;  %v1049_v34 = vpop.f32.mrf.mxu0  ;;  %v8095_v63 = vld [vmem:[%s8557_s24 + $0xe8] sm:$0xff]  ;;  %v2250_v0 = vshrl.u32 %v2103_v60, 16 }
 0x1c0   : > { %v1050_v9 = vadd.f32 %v8835_v18, %v1049_v34 }
 0x1c1   : > { %3550 = vmatmul.bf16.gmra.mxu3 %v3446_v30  ;;  %v2888_v10 = vpop.f32.mrf.mxu2 }
 0x1c2   : > { %v2889_v11 = vadd.f32 %v2888_v10, %v2687_v6  ;;  %v1315_v13 = vmax.f32 %v1050_v9, 0.0  ;;  %7496 = vmatmul.msk.bf16.gmra.mxu0 %vm757_vm0, %v8092_v31  ;;  %v2975_v9 = vld [vmem:[#allocation4 + $0x5c] sm:$0x1] }
 0x1c4   : > { %v3541_v14 = vpop.f32.mrf.mxu3  ;;  %v1680_v15 = vmax.f32 %v1311_v12, %v1315_v13  ;;  %v7539_v13 = vrot.slane %v2250_v0, 11 }
 0x1c5   : > { %v8887_v16 = vadd.f32 %v3541_v14, %v2889_v11 }
 0x1c6   : > { %1744 = vst [vmem:[#allocation3 + $0x80] sm:$0xff] %v1680_v15 }
 0x1c7   : > { %v1051_v38 = vpop.f32.mrf.mxu0 }
 0x1c8   : > { %v1052_v20 = vadd.f32 %v8835_v18, %v1051_v38 }
 0x1ca   : > { %v1316_v23 = vmax.f32 %v1052_v20, 0.0 }
 0x1cc   : > { %v1681_v48 = vmax.f32 %v1312_v21, %v1316_v23  ;;  %v3149_v21 = vshll.u32 %v2975_v9, 16 }
 0x1ce   : > { %1745 = vst [vmem:[#allocation3 + $0x88] sm:$0xff] %v1681_v48 }
 0x1cf   : > { %v1054_v26 = vpop.f32.mrf.mxu0 }
 0x1d0   : > { %v1055_v27 = vadd.f32 %v8835_v18, %v1054_v26 }
 0x1d2   : > { %v1317_v32 = vmax.f32 %v1055_v27, 0.0  ;;  %7497 = vmatmul.msk.bf16.gmra.mxu0 %vm757_vm0, %v8093_v2 }
 0x1d4   : > { %v1682_v5 = vmax.f32 %v1313_v39, %v1317_v32 }
 0x1d5   : > { %v1808_v19 = vld [vmem:[#allocation3 + $0x80] ss:$2 sm:$0xff]  ;;  %v1872_v33 = vld [vmem:[#allocation3 + $0x81] ss:$2 sm:$0xff] }
 0x1d6   : > { %v1927_v37 = vmax.f32 %v1808_v19, %v1872_v33  ;;  %1746 = vst [vmem:[#allocation3 + $0x90] sm:$0xff] %v1682_v5  ;;  %v3151_v33 = vrot.slane %v3149_v21, 5 }
 0x1d7   : > { %v1056_v41 = vpop.f32.mrf.mxu0 }
 0x1d8   : > { %v1057_v40 = vadd.f32 %v8835_v18, %v1056_v41  ;;  %v2031_v7 = vpack.c.bf16 %v1927_v37, %v1927_v37 }
 0x1da   : > { %v1318_v43 = vmax.f32 %v1057_v40, 0.0  ;;  %2064 = vst [vmem:[#allocation4 + $0x54] sm:$0xf] %v2031_v7 }
 0x1dc   : > { %v1683_v44 = vmax.f32 %v1314_v58, %v1318_v43 }
 0x1de   : > { %1747 = vst [vmem:[#allocation3 + $0x98] sm:$0xff] %v1683_v44  ;;  %v8915_v44 = vpop.f32.mrf.mxu1 }
 0x1df   : > { %v1059_v49 = vpop.f32.mrf.mxu0 }
 0x1e1   : > { %v2104_v22 = vld [vmem:[#allocation4 + $0x54] sm:$0xf] }
 0x1e2   : > { %7498 = vmatmul.msk.bf16.gmra.mxu0 %vm757_vm0, %v8094_v45  ;;  %v2973_v57 = vld [vmem:[#allocation4 + $0x54] sm:$0xf]  ;;  %v2255_v59 = vshrl.u32 %v2104_v22, 16  ;;  %v2258_v6 = vshll.u32 %v2104_v22, 16  ;;  %v8917_v45 = vpop.f32.mrf.mxu2  ;;  %v1060_v22 = vadd.f32 %v8835_v18, %v1059_v49 }
 0x1e3   : > { %v3130_v62 = vshrl.u32 %v2973_v57, 16  ;;  %v3133_v25 = vshll.u32 %v2973_v57, 16  ;;  %v8096_v57 = vld [vmem:[%s8557_s24 + $0xf0] sm:$0xff] }
 0x1e4   : > { %v2257_v1 = vrot.slane %v2255_v59, 7 }
 0x1e5   : > { %v1810_v51 = vld [vmem:[#allocation3 + $0x90] ss:$2 sm:$0xff]  ;;  %v1874_v53 = vld [vmem:[#allocation3 + $0x91] ss:$2 sm:$0xff]  ;;  %v3132_v31 = vrot.slane %v3130_v62, 4  ;;  %v3135_v34 = vrot.slane %v3133_v25, 5 }
 0x1e6   : > { %v1928_v54 = vmax.f32 %v1810_v51, %v1874_v53  ;;  %v2260_v14 = vor.u32 %v2258_v6, %v2257_v1  ;;  %v2262_v27 = vrot.slane %v2257_v1, 4  ;;  %v1319_v62 = vmax.f32 %v1060_v22, 0.0 }
 0x1e7   : > { %v8901_v29 = vpop.f32.mrf.mxu0  ;;  %v3136_v38 = vor.u32 %v3135_v34, %v3132_v31 }
 0x1e8   : > { %v2032_v56 = vpack.c.bf16 %v1928_v54, %v1928_v54  ;;  %v2261_v26 = vsel %vm8629_vm3, %v7539_v13, %v2260_v14  ;;  %v8919_v54 = vpop.f32.mrf.mxu3  ;;  %v1062_v34 = vadd.f32 %v8835_v18, %v8901_v29 }
 0x1e9   : > { %v3137_v5 = vrot.slane %v3136_v38, 4  ;;  %v2767_v37 = vunpack.c.l.b16 %v2261_v26 }
 0x1ea   : > { %2065 = vst [vmem:[#allocation4 + $0x58] sm:$0xf] %v2032_v56 }
 0x1ef   : > { %v8904_v30 = vpop.f32.mrf.mxu0 }
 0x1f0   : > { %v1065_v14 = vadd.f32 %v8835_v18, %v8904_v30 }
 0x1f1   : > { %v8137_v10 = vld [vmem:[#allocation4 + $0x54] sm:$0xff] }
 0x1f2   : > { %v2105_v11 = vld [vmem:[#allocation4 + $0x58] sm:$0xf]  ;;  %7499 = vmatmul.msk.bf16.gmra.mxu0 %vm757_vm0, %v8095_v63  ;;  %2701 = vmatmul.bf16.gmra.mxu1 %v8137_v10  ;;  %v2692_v63 = vpop.f32.mrf.mxu1 }
 0x1f3   : > { %v2974_v12 = vld [vmem:[#allocation4 + $0x58] sm:$0xf]  ;;  %v2264_v15 = vshrl.u32 %v2105_v11, 16  ;;  %v2267_v48 = vshll.u32 %v2105_v11, 16  ;;  %v1320_v11 = vmax.f32 %v1062_v34, 0.0 }
 0x1f4   : > { %v3139_v3 = vshll.u32 %v2974_v12, 16  ;;  %v3143_v20 = vshrl.u32 %v2974_v12, 16 }
 0x1f5   : > { %v2266_v23 = vrot.slane %v2264_v15, 7  ;;  %v8097_v15 = vld [vmem:[%s8557_s24 + $0xf8] sm:$0xff] }
 0x1f6   : > { %v3141_v24 = vrot.slane %v3139_v3, 5  ;;  %v3145_v2 = vrot.slane %v3143_v20, 4  ;;  %v1321_v20 = vmax.f32 %v1065_v14, 0.0 }
 0x1f7   : > { %v2269_v39 = vor.u32 %v2267_v48, %v2266_v23  ;;  %v1066_v32 = vpop.f32.mrf.mxu0 }
 0x1f8   : > { %v3146_v19 = vor.u32 %v3145_v2, %v3141_v24  ;;  %v3142_v40 = vsel %vm8652_vm6, %v3137_v5, %v3141_v24  ;;  %v1067_v24 = vadd.f32 %v8835_v18, %v1066_v32 }
 0x1f9   : > { %v2270_v35 = vsel %vm8629_vm3, %v2262_v27, %v2269_v39  ;;  %v3420_v51 = vunpack.c.l.b16 %v3142_v40 }
 0x1fa   : > { %v2768_v41 = vunpack.c.l.b16 %v2270_v35  ;;  %v3147_v7 = vrot.slane %v3146_v19, 4  ;;  %v1322_v39 = vmax.f32 %v1067_v24, 0.0 }
 0x1fc   : > { %v2794_v58 = vpack.c.b16 %v2768_v41, %v2767_v37  ;;  %v3152_v43 = vsel %vm8652_vm6, %v3147_v7, %v3151_v33  ;;  %v8098_v33 = vld [vmem:[%s8557_s24 + $0x100] sm:$0xff] }
 0x1fd   : > { %v3421_v53 = vunpack.c.l.b16 %v3152_v43 }
 0x1fe   : > { %2902 = vmatmul.bf16.gmra.mxu2 %v2794_v58 }
 0x1ff   : > { %v3447_v56 = vpack.c.b16 %v3421_v53, %v3420_v51  ;;  %v1069_v59 = vpop.f32.mrf.mxu0  ;;  %v2106_v53 = vld [vmem:[#allocation4 + $0x60] sm:$0x8] }
 0x200   : > { %v1070_v60 = vadd.f32 %v8835_v18, %v1069_v59  ;;  %v2272_v59 = vshrl.u32 %v2106_v53, 16 }
 0x201   : > { %3555 = vmatmul.bf16.gmra.mxu3 %v3447_v56  ;;  %v2893_v1 = vpop.f32.mrf.mxu2 }
 0x202   : > { %v1323_v25 = vmax.f32 %v1070_v60, 0.0  ;;  %7500 = vmatmul.msk.bf16.gmra.mxu0 %vm757_vm0, %v8096_v57  ;;  %v2894_v31 = vadd.f32 %v2893_v1, %v2692_v63  ;;  %v8099_v57 = vld [vmem:[%s8557_s24 + $0x108] sm:$0xff] }
 0x203   : > { %v2978_v1 = vld [vmem:[#allocation4 + $0x6c] sm:$0x1] }
 0x204   : > { %v1684_v0 = vmax.f32 %v1319_v62, %v1323_v25  ;;  %v3546_v49 = vpop.f32.mrf.mxu3 }
 0x205   : > { %v8927_v6 = vadd.f32 %v3546_v49, %v2894_v31 }
 0x206   : > { %1748 = vst [vmem:[#allocation3 + $0xa0] sm:$0xff] %v1684_v0 }
 0x207   : > { %v1071_v9 = vpop.f32.mrf.mxu0 }
 0x208   : > { %v1072_v10 = vadd.f32 %v8835_v18, %v1071_v9  ;;  %v7540_v9 = vrot.slane %v2272_v59, 11 }
 0x20a   : > { %v1324_v12 = vmax.f32 %v1072_v10, 0.0 }
 0x20c   : > { %v1685_v13 = vmax.f32 %v1320_v11, %v1324_v12 }
 0x20e   : > { %1749 = vst [vmem:[#allocation3 + $0xa8] sm:$0xff] %v1685_v13 }
 0x20f   : > { %v1074_v3 = vpop.f32.mrf.mxu0 }
 0x210   : > { %v1075_v38 = vadd.f32 %v8835_v18, %v1074_v3 }
 0x212   : > { %v1325_v29 = vmax.f32 %v1075_v38, 0.0  ;;  %7501 = vmatmul.msk.bf16.gmra.mxu0 %vm757_vm0, %v8097_v15  ;;  %v3173_v15 = vshll.u32 %v2978_v1, 16 }
 0x214   : > { %v1686_v21 = vmax.f32 %v1321_v20, %v1325_v29 }
 0x215   : > { %v1812_v23 = vld [vmem:[#allocation3 + $0xa0] ss:$2 sm:$0xff]  ;;  %v1876_v48 = vld [vmem:[#allocation3 + $0xa1] ss:$2 sm:$0xff] }
 0x216   : > { %v1929_v2 = vmax.f32 %v1812_v23, %v1876_v48  ;;  %1750 = vst [vmem:[#allocation3 + $0xb0] sm:$0xff] %v1686_v21 }
 0x217   : > { %v1076_v26 = vpop.f32.mrf.mxu0 }
 0x218   : > { %v1077_v30 = vadd.f32 %v8835_v18, %v1076_v26  ;;  %v2033_v27 = vpack.c.bf16 %v1929_v2, %v1929_v2 }
 0x21a   : > { %v1326_v5 = vmax.f32 %v1077_v30, 0.0  ;;  %2066 = vst [vmem:[#allocation4 + $0x64] sm:$0xf] %v2033_v27  ;;  %v3175_v30 = vrot.slane %v3173_v15, 5  ;;  %v8947_v27 = vpop.f32.mrf.mxu1  ;;  %v8101_v15 = vld [vmem:[%s8557_s24 + $0x118] sm:$0xff] }
 0x21c   : > { %v1687_v19 = vmax.f32 %v1322_v39, %v1326_v5  ;;  %v8949_v39 = vpop.f32.mrf.mxu2 }
 0x21e   : > { %1751 = vst [vmem:[#allocation3 + $0xb8] sm:$0xff] %v1687_v19 }
 0x21f   : > { %v1079_v35 = vpop.f32.mrf.mxu0 }
 0x220   : > { %v1080_v53 = vadd.f32 %v8835_v18, %v1079_v35 }
 0x221   : > { %v2107_v7 = vld [vmem:[#allocation4 + $0x64] sm:$0xf] }
 0x222   : > { %7502 = vmatmul.msk.bf16.gmra.mxu0 %vm757_vm0, %v8098_v33  ;;  %v2976_v43 = vld [vmem:[#allocation4 + $0x64] sm:$0xf]  ;;  %v2277_v51 = vshrl.u32 %v2107_v7, 16  ;;  %v2280_v0 = vshll.u32 %v2107_v7, 16 }
 0x223   : > { %v3154_v22 = vshrl.u32 %v2976_v43, 16  ;;  %v3157_v56 = vshll.u32 %v2976_v43, 16 }
 0x224   : > { %v2279_v60 = vrot.slane %v2277_v51, 7 }
 0x225   : > { %v1814_v37 = vld [vmem:[#allocation3 + $0xb0] ss:$2 sm:$0xff]  ;;  %v1878_v41 = vld [vmem:[#allocation3 + $0xb1] ss:$2 sm:$0xff]  ;;  %v3156_v25 = vrot.slane %v3154_v22, 4  ;;  %v3159_v63 = vrot.slane %v3157_v56, 5 }
 0x226   : > { %v1930_v40 = vmax.f32 %v1814_v37, %v1878_v41  ;;  %v2282_v10 = vor.u32 %v2280_v0, %v2279_v60  ;;  %v2284_v23 = vrot.slane %v2279_v60, 4  ;;  %v8100_v56 = vld [vmem:[%s8557_s24 + $0x110] sm:$0xff]  ;;  %v1327_v0 = vmax.f32 %v1080_v53, 0.0 }
 0x227   : > { %v8939_v32 = vpop.f32.mrf.mxu0  ;;  %v3160_v13 = vor.u32 %v3159_v63, %v3156_v25 }
 0x228   : > { %v2034_v58 = vpack.c.bf16 %v1930_v40, %v1930_v40  ;;  %v2283_v21 = vsel %vm8629_vm3, %v7540_v9, %v2282_v10  ;;  %v8955_v40 = vpop.f32.mrf.mxu3  ;;  %v1082_v35 = vadd.f32 %v8835_v18, %v8939_v32 }
 0x229   : > { %v3161_v2 = vrot.slane %v3160_v13, 4  ;;  %v2769_v19 = vunpack.c.l.b16 %v2283_v21 }
 0x22a   : > { %2067 = vst [vmem:[#allocation4 + $0x68] sm:$0xf] %v2034_v58 }
 0x22f   : > { %v8942_v62 = vpop.f32.mrf.mxu0  ;;  %v2697_v59 = vpop.f32.mrf.mxu1 }
 0x231   : > { %v8138_v31 = vld [vmem:[#allocation4 + $0x64] sm:$0xff] }
 0x232   : > { %v2108_v34 = vld [vmem:[#allocation4 + $0x68] sm:$0xf]  ;;  %7503 = vmatmul.msk.bf16.gmra.mxu0 %vm757_vm0, %v8099_v57  ;;  %2706 = vmatmul.bf16.gmra.mxu1 %v8138_v31 }
 0x233   : > { %v2977_v49 = vld [vmem:[#allocation4 + $0x68] sm:$0xf]  ;;  %v2286_v11 = vshrl.u32 %v2108_v34, 16  ;;  %v2289_v38 = vshll.u32 %v2108_v34, 16 }
 0x234   : > { %v3163_v12 = vshll.u32 %v2977_v49, 16  ;;  %v3167_v14 = vshrl.u32 %v2977_v49, 16 }
 0x235   : > { %v2288_v3 = vrot.slane %v2286_v11, 7  ;;  %v1328_v11 = vmax.f32 %v1082_v35, 0.0 }
 0x236   : > { %v3165_v20 = vrot.slane %v3163_v12, 5  ;;  %v3169_v29 = vrot.slane %v3167_v14, 4  ;;  %v1085_v14 = vadd.f32 %v8835_v18, %v8942_v62 }
 0x237   : > { %v2291_v48 = vor.u32 %v2289_v38, %v2288_v3  ;;  %v1086_v24 = vpop.f32.mrf.mxu0 }
 0x238   : > { %v3170_v26 = vor.u32 %v3169_v29, %v3165_v20  ;;  %v3166_v37 = vsel %vm8652_vm6, %v3161_v2, %v3165_v20  ;;  %v1329_v20 = vmax.f32 %v1085_v14, 0.0 }
 0x239   : > { %v2292_v5 = vsel %vm8629_vm3, %v2284_v23, %v2291_v48  ;;  %v3422_v43 = vunpack.c.l.b16 %v3166_v37  ;;  %v1087_v48 = vadd.f32 %v8835_v18, %v1086_v24  ;;  %v8102_v37 = vld [vmem:[%s8557_s24 + $0x120] sm:$0xff] }
 0x23a   : > { %v2770_v33 = vunpack.c.l.b16 %v2292_v5  ;;  %v3171_v41 = vrot.slane %v3170_v26, 4 }
 0x23b   : > { %v1330_v5 = vmax.f32 %v1087_v48, 0.0 }
 0x23c   : > { %v2795_v7 = vpack.c.b16 %v2770_v33, %v2769_v19  ;;  %v3176_v58 = vsel %vm8652_vm6, %v3171_v41, %v3175_v30 }
 0x23d   : > { %v3423_v51 = vunpack.c.l.b16 %v3176_v58 }
 0x23e   : > { %2907 = vmatmul.bf16.gmra.mxu2 %v2795_v7 }
 0x23f   : > { %v3448_v22 = vpack.c.b16 %v3423_v51, %v3422_v43  ;;  %v1089_v57 = vpop.f32.mrf.mxu0 }
 0x240   : > { %v1090_v60 = vadd.f32 %v8835_v18, %v1089_v57  ;;  %v2109_v57 = vld [vmem:[#allocation4 + $0x70] sm:$0x8] }
 0x241   : > { %3560 = vmatmul.bf16.gmra.mxu3 %v3448_v22  ;;  %v2898_v25 = vpop.f32.mrf.mxu2 }
 0x242   : > { %v2899_v63 = vadd.f32 %v2898_v25, %v2697_v59  ;;  %v1331_v1 = vmax.f32 %v1090_v60, 0.0  ;;  %7504 = vmatmul.msk.bf16.gmra.mxu0 %vm757_vm0, %v8100_v56  ;;  %v8103_v25 = vld [vmem:[%s8557_s24 + $0x128] sm:$0xff] }
 0x244   : > { %v3551_v31 = vpop.f32.mrf.mxu3  ;;  %v1688_v34 = vmax.f32 %v1327_v0, %v1331_v1 }
 0x245   : > { %v8963_v49 = vadd.f32 %v3551_v31, %v2899_v63  ;;  %v2294_v63 = vshrl.u32 %v2109_v57, 16 }
 0x246   : > { %1752 = vst [vmem:[#allocation3 + $0xc0] sm:$0xff] %v1688_v34 }
 0x247   : > { %v1091_v9 = vpop.f32.mrf.mxu0 }
 0x248   : > { %v1092_v10 = vadd.f32 %v8835_v18, %v1091_v9  ;;  %v2981_v9 = vld [vmem:[#allocation4 + $0x7c] sm:$0x1] }
 0x24a   : > { %v1332_v12 = vmax.f32 %v1092_v10, 0.0 }
 0x24c   : > { %v1689_v13 = vmax.f32 %v1328_v11, %v1332_v12 }
 0x24e   : > { %1753 = vst [vmem:[#allocation3 + $0xc8] sm:$0xff] %v1689_v13  ;;  %v7541_v13 = vrot.slane %v2294_v63, 11 }
 0x24f   : > { %v1094_v3 = vpop.f32.mrf.mxu0 }
 0x250   : > { %v1095_v38 = vadd.f32 %v8835_v18, %v1094_v3 }
 0x252   : > { %v1333_v29 = vmax.f32 %v1095_v38, 0.0  ;;  %7505 = vmatmul.msk.bf16.gmra.mxu0 %vm757_vm0, %v8101_v15 }
 0x254   : > { %v1690_v32 = vmax.f32 %v1329_v20, %v1333_v29  ;;  %v3197_v29 = vshll.u32 %v2981_v9, 16 }
 0x255   : > { %v1816_v21 = vld [vmem:[#allocation3 + $0xc0] ss:$2 sm:$0xff]  ;;  %v1880_v23 = vld [vmem:[#allocation3 + $0xc1] ss:$2 sm:$0xff] }
 0x256   : > { %v1931_v2 = vmax.f32 %v1816_v21, %v1880_v23  ;;  %1754 = vst [vmem:[#allocation3 + $0xd0] sm:$0xff] %v1690_v32 }
 0x257   : > { %v1096_v26 = vpop.f32.mrf.mxu0 }
 0x258   : > { %v2035_v30 = vpack.c.bf16 %v1931_v2, %v1931_v2  ;;  %v1097_v62 = vadd.f32 %v8835_v18, %v1096_v26 }
 0x25a   : > { %2068 = vst [vmem:[#allocation4 + $0x74] sm:$0xf] %v2035_v30  ;;  %v1334_v19 = vmax.f32 %v1097_v62, 0.0 }
 0x25c   : > { %v1691_v33 = vmax.f32 %v1330_v5, %v1334_v19 }
 0x25e   : > { %1755 = vst [vmem:[#allocation3 + $0xd8] sm:$0xff] %v1691_v33  ;;  %v3199_v33 = vrot.slane %v3197_v29, 5 }
 0x25f   : > { %v1099_v41 = vpop.f32.mrf.mxu0 }
 0x260   : > { %v1100_v63 = vadd.f32 %v8835_v18, %v1099_v41 }
 0x261   : > { %v2110_v51 = vld [vmem:[#allocation4 + $0x74] sm:$0xf] }
 0x262   : > { %7506 = vmatmul.msk.bf16.gmra.mxu0 %vm757_vm0, %v8102_v37  ;;  %v2979_v22 = vld [vmem:[#allocation4 + $0x74] sm:$0xf]  ;;  %v2299_v56 = vshrl.u32 %v2110_v51, 16  ;;  %v2302_v35 = vshll.u32 %v2110_v51, 16  ;;  %v8985_v37 = vpop.f32.mrf.mxu1 }
 0x263   : > { %v3178_v59 = vshrl.u32 %v2979_v22, 16  ;;  %v3181_v60 = vshll.u32 %v2979_v22, 16 }
 0x264   : > { %v2301_v0 = vrot.slane %v2299_v56, 7  ;;  %v8993_v56 = vpop.f32.mrf.mxu3 }
 0x265   : > { %v1818_v7 = vld [vmem:[#allocation3 + $0xd0] ss:$2 sm:$0xff]  ;;  %v1882_v58 = vld [vmem:[#allocation3 + $0xd1] ss:$2 sm:$0xff]  ;;  %v3180_v31 = vrot.slane %v3178_v59, 4  ;;  %v3183_v34 = vrot.slane %v3181_v60, 5 }
 0x266   : > { %v1932_v43 = vmax.f32 %v1818_v7, %v1882_v58  ;;  %v2304_v14 = vor.u32 %v2302_v35, %v2301_v0  ;;  %v2306_v26 = vrot.slane %v2301_v0, 4  ;;  %v8987_v7 = vpop.f32.mrf.mxu2 }
 0x267   : > { %v8977_v24 = vpop.f32.mrf.mxu0  ;;  %v3184_v38 = vor.u32 %v3183_v34, %v3180_v31  ;;  %v8104_v31 = vld [vmem:[%s8557_s24 + $0x130] sm:$0xff] }
 0x268   : > { %v2036_v53 = vpack.c.bf16 %v1932_v43, %v1932_v43  ;;  %v2305_v2 = vsel %vm8629_vm3, %v7541_v13, %v2304_v14  ;;  %v1102_v41 = vadd.f32 %v8835_v18, %v8977_v24 }
 0x269   : > { %v3185_v5 = vrot.slane %v3184_v38, 4  ;;  %v2771_v43 = vunpack.c.l.b16 %v2305_v2 }
 0x26a   : > { %2069 = vst [vmem:[#allocation4 + $0x78] sm:$0xf] %v2036_v53  ;;  %v1336_v29 = vmax.f32 %v1102_v41, 0.0 }
 0x26f   : > { %v8980_v1 = vpop.f32.mrf.mxu0  ;;  %v2702_v35 = vpop.f32.mrf.mxu1 }
 0x271   : > { %v8139_v10 = vld [vmem:[#allocation4 + $0x74] sm:$0xff] }
 0x272   : > { %v2111_v11 = vld [vmem:[#allocation4 + $0x78] sm:$0xf]  ;;  %7507 = vmatmul.msk.bf16.gmra.mxu0 %vm757_vm0, %v8103_v25  ;;  %2711 = vmatmul.bf16.gmra.mxu1 %v8139_v10 }
 0x273   : > { %v2980_v12 = vld [vmem:[#allocation4 + $0x78] sm:$0xf]  ;;  %v2308_v15 = vshrl.u32 %v2111_v11, 16  ;;  %v2311_v21 = vshll.u32 %v2111_v11, 16 }
 0x274   : > { %v3187_v3 = vshll.u32 %v2980_v12, 16  ;;  %v3191_v20 = vshrl.u32 %v2980_v12, 16  ;;  %v1335_v12 = vmax.f32 %v1100_v63, 0.0 }
 0x275   : > { %v2310_v32 = vrot.slane %v2308_v15, 7 }
 0x276   : > { %v3189_v23 = vrot.slane %v3187_v3, 5  ;;  %v3193_v48 = vrot.slane %v3191_v20, 4 }
 0x277   : > { %v2313_v30 = vor.u32 %v2311_v21, %v2310_v32  ;;  %v1106_v62 = vpop.f32.mrf.mxu0 }
 0x278   : > { %v3194_v19 = vor.u32 %v3193_v48, %v3189_v23  ;;  %v3190_v53 = vsel %vm8652_vm6, %v3185_v5, %v3189_v23  ;;  %v1105_v23 = vadd.f32 %v8835_v18, %v8980_v1  ;;  %v8105_v48 = vld [vmem:[%s8557_s24 + $0x138] sm:$0xff] }
 0x279   : > { %v2314_v58 = vsel %vm8629_vm3, %v2306_v26, %v2313_v30  ;;  %v3424_v60 = vunpack.c.l.b16 %v3190_v53 }
 0x27a   : > { %v2772_v51 = vunpack.c.l.b16 %v2314_v58  ;;  %v3195_v22 = vrot.slane %v3194_v19, 4  ;;  %v1337_v30 = vmax.f32 %v1105_v23, 0.0  ;;  %v1107_v58 = vadd.f32 %v8835_v18, %v1106_v62 }
 0x27c   : > { %v2796_v57 = vpack.c.b16 %v2772_v51, %v2771_v43  ;;  %v3200_v59 = vsel %vm8652_vm6, %v3195_v22, %v3199_v33  ;;  %v1338_v22 = vmax.f32 %v1107_v58, 0.0 }
 0x27d   : > { %v3425_v25 = vunpack.c.l.b16 %v3200_v59 }
 0x27e   : > { %2912 = vmatmul.bf16.gmra.mxu2 %v2796_v57 }
 0x27f   : > { %v3449_v0 = vpack.c.b16 %v3425_v25, %v3424_v60  ;;  %v1109_v34 = vpop.f32.mrf.mxu0  ;;  %v8106_v60 = vld [vmem:[%s8557_s24 + $0x140] sm:$0xff] }
 0x280   : > { %v1110_v9 = vadd.f32 %v8835_v18, %v1109_v34 }
 0x281   : > { %3565 = vmatmul.bf16.gmra.mxu3 %v3449_v0  ;;  %v2903_v10 = vpop.f32.mrf.mxu2 }
 0x282   : > { %v2904_v11 = vadd.f32 %v2903_v10, %v2702_v35  ;;  %v1339_v13 = vmax.f32 %v1110_v9, 0.0  ;;  %7508 = vmatmul.msk.bf16.gmra.mxu0 %vm757_vm0, %v8104_v31  ;;  %v2112_v10 = vld [vmem:[#allocation4 + $0x80] sm:$0x8] }
 0x284   : > { %v3556_v14 = vpop.f32.mrf.mxu3  ;;  %v1692_v15 = vmax.f32 %v1335_v12, %v1339_v13  ;;  %v8107_v13 = vld [vmem:[%s8557_s24 + $0x148] sm:$0xff] }
 0x285   : > { %v9001_v3 = vadd.f32 %v3556_v14, %v2904_v11  ;;  %v2316_v14 = vshrl.u32 %v2112_v10, 16 }
 0x286   : > { %1756 = vst [vmem:[#allocation3 + $0xe0] sm:$0xff] %v1692_v15 }
 0x287   : > { %v1111_v38 = vpop.f32.mrf.mxu0 }
 0x288   : > { %v1112_v20 = vadd.f32 %v8835_v18, %v1111_v38 }
 0x28a   : > { %v1340_v32 = vmax.f32 %v1112_v20, 0.0 }
 0x28c   : > { %v1693_v21 = vmax.f32 %v1336_v29, %v1340_v32  ;;  %v2984_v32 = vld [vmem:[#allocation4 + $0x8c] sm:$0x1] }
 0x28e   : > { %1757 = vst [vmem:[#allocation3 + $0xe8] sm:$0xff] %v1693_v21 }
 0x28f   : > { %v1114_v2 = vpop.f32.mrf.mxu0 }
 0x290   : > { %v1115_v26 = vadd.f32 %v8835_v18, %v1114_v2  ;;  %v7542_v2 = vrot.slane %v2316_v14, 11 }
 0x292   : > { %v1341_v5 = vmax.f32 %v1115_v26, 0.0  ;;  %7509 = vmatmul.msk.bf16.gmra.mxu0 %vm757_vm0, %v8105_v48 }
 0x294   : > { %v1694_v24 = vmax.f32 %v1337_v30, %v1341_v5 }
 0x295   : > { %v1820_v19 = vld [vmem:[#allocation3 + $0xe0] ss:$2 sm:$0xff]  ;;  %v1884_v33 = vld [vmem:[#allocation3 + $0xe1] ss:$2 sm:$0xff] }
 0x296   : > { %v1933_v43 = vmax.f32 %v1820_v19, %v1884_v33  ;;  %1758 = vst [vmem:[#allocation3 + $0xf0] sm:$0xff] %v1694_v24  ;;  %v3221_v33 = vshll.u32 %v2984_v32, 16 }
 0x297   : > { %v1116_v51 = vpop.f32.mrf.mxu0 }
 0x298   : > { %v2037_v53 = vpack.c.bf16 %v1933_v43, %v1933_v43  ;;  %v1117_v1 = vadd.f32 %v8835_v18, %v1116_v51 }
 0x29a   : > { %2070 = vst [vmem:[#allocation4 + $0x84] sm:$0xf] %v2037_v53  ;;  %v1342_v57 = vmax.f32 %v1117_v1, 0.0 }
 0x29c   : > { %v1695_v59 = vmax.f32 %v1338_v22, %v1342_v57 }
 0x29e   : > { %1759 = vst [vmem:[#allocation3 + $0xf8] sm:$0xff] %v1695_v59 }
 0x29f   : > { %v1119_v25 = vpop.f32.mrf.mxu0 }
 0x2a1   : > { %v2113_v34 = vld [vmem:[#allocation4 + $0x84] sm:$0xf] }
 0x2a2   : > { %7510 = vmatmul.msk.bf16.gmra.mxu0 %vm757_vm0, %v8106_v60  ;;  %v2982_v9 = vld [vmem:[#allocation4 + $0x84] sm:$0xf]  ;;  %v2321_v18 = vshrl.u32 %v2113_v34, 16  ;;  %v2324_v29 = vshll.u32 %v2113_v34, 16  ;;  %v9025_v34 = vpop.f32.mrf.mxu2 }
 0x2a3   : > { %v3202_v11 = vshrl.u32 %v2982_v9, 16  ;;  %v3205_v12 = vshll.u32 %v2982_v9, 16 }
 0x2a4   : > { %v2323_v15 = vrot.slane %v2321_v18, 7 }
 0x2a5   : > { %v1822_v63 = vld [vmem:[#allocation3 + $0xf0] ss:$2 sm:$0xff]  ;;  %v1886_v0 = vld [vmem:[#allocation3 + $0xf1] ss:$2 sm:$0xff]  ;;  %v3204_v38 = vrot.slane %v3202_v11, 4  ;;  %v3207_v20 = vrot.slane %v3205_v12, 5  ;;  %v9031_v12 = vpop.f32.mrf.mxu3 }
 0x2a6   : > { %v1934_v31 = vmax.f32 %v1822_v63, %v1886_v0  ;;  %v2326_v26 = vor.u32 %v2324_v29, %v2323_v15  ;;  %v2328_v22 = vrot.slane %v2323_v15, 4  ;;  %v3223_v0 = vrot.slane %v3221_v33, 5 }
 0x2a7   : > { %v9015_v62 = vpop.f32.mrf.mxu0  ;;  %v3208_v24 = vor.u32 %v3207_v20, %v3204_v38  ;;  %v9035_v20 = vld [vmem:[#allocation9] ss:$0 sm:$0xff] }
 0x2a8   : > { %v2038_v35 = vpack.c.bf16 %v1934_v31, %v1934_v31  ;;  %v2327_v1 = vsel %vm8629_vm3, %v7542_v2, %v2326_v26  ;;  %v9023_v31 = vpop.f32.mrf.mxu1  ;;  %v1120_v29 = vadd.f32 %v9035_v20, %v1119_v25  ;;  %v1122_v25 = vadd.f32 %v9035_v20, %v9015_v62 }
 0x2a9   : > { %v3209_v60 = vrot.slane %v3208_v24, 4  ;;  %v2773_v9 = vunpack.c.l.b16 %v2327_v1 }
 0x2aa   : > { %2071 = vst [vmem:[#allocation4 + $0x88] sm:$0xf] %v2038_v35 }
 0x2af   : > { %v9018_v41 = vpop.f32.mrf.mxu0 }
 0x2b1   : > { %v8140_v21 = vld [vmem:[#allocation4 + $0x84] sm:$0xff] }
 0x2b2   : > { %v2114_v23 = vld [vmem:[#allocation4 + $0x88] sm:$0xf]  ;;  %7511 = vmatmul.msk.bf16.gmra.mxu0 %vm757_vm0, %v8107_v13  ;;  %2716 = vmatmul.bf16.gmra.mxu1 %v8140_v21  ;;  %v8108_v21 = vld [vmem:[%s8557_s24 + $0x150] sm:$0xff] }
 0x2b3   : > { %v2983_v48 = vld [vmem:[#allocation4 + $0x88] sm:$0xf]  ;;  %v2330_v30 = vshrl.u32 %v2114_v23, 16  ;;  %v2333_v43 = vshll.u32 %v2114_v23, 16 }
 0x2b4   : > { %v3211_v5 = vshll.u32 %v2983_v48, 16  ;;  %v3215_v19 = vshrl.u32 %v2983_v48, 16  ;;  %v2707_v48 = vpop.f32.mrf.mxu1 }
 0x2b5   : > { %v2332_v58 = vrot.slane %v2330_v30, 7 }
 0x2b6   : > { %v3213_v51 = vrot.slane %v3211_v5, 5  ;;  %v3217_v53 = vrot.slane %v3215_v19, 4  ;;  %v1343_v5 = vmax.f32 %v1120_v29, 0.0 }
 0x2b7   : > { %v2335_v57 = vor.u32 %v2333_v43, %v2332_v58  ;;  %v1126_v59 = vpop.f32.mrf.mxu0 }
 0x2b8   : > { %v3218_v63 = vor.u32 %v3217_v53, %v3213_v51  ;;  %v3214_v10 = vsel %vm8652_vm6, %v3209_v60, %v3213_v51  ;;  %v1344_v53 = vmax.f32 %v1122_v25, 0.0  ;;  %v8109_v60 = vld [vmem:[%s8557_s24 + $0x158] sm:$0xff] }
 0x2b9   : > { %v2336_v35 = vsel %vm8629_vm3, %v2328_v22, %v2335_v57  ;;  %v3426_v15 = vunpack.c.l.b16 %v3214_v10  ;;  %v1125_v57 = vadd.f32 %v9035_v20, %v9018_v41 }
 0x2ba   : > { %v2774_v18 = vunpack.c.l.b16 %v2336_v35  ;;  %v3219_v11 = vrot.slane %v3218_v63, 4 }
 0x2bb   : > { %v1345_v35 = vmax.f32 %v1125_v57, 0.0 }
 0x2bc   : > { %v2797_v13 = vpack.c.b16 %v2774_v18, %v2773_v9  ;;  %v3224_v14 = vsel %vm8652_vm6, %v3219_v11, %v3223_v0  ;;  %v1127_v11 = vadd.f32 %v9035_v20, %v1126_v59 }
 0x2bd   : > { %v3427_v38 = vunpack.c.l.b16 %v3224_v14 }
 0x2be   : > { %2917 = vmatmul.bf16.gmra.mxu2 %v2797_v13 }
 0x2bf   : > { %v3450_v32 = vpack.c.b16 %v3427_v38, %v3426_v15  ;;  %v1129_v23 = vpop.f32.mrf.mxu0  ;;  %v1346_v38 = vmax.f32 %v1127_v11, 0.0 }
 0x2c0   : > { %v1130_v2 = vadd.f32 %v9035_v20, %v1129_v23 }
 0x2c1   : > { %3570 = vmatmul.bf16.gmra.mxu3 %v3450_v32  ;;  %v2908_v26 = vpop.f32.mrf.mxu2 }
 0x2c2   : > { %v2909_v30 = vadd.f32 %v2908_v26, %v2707_v48  ;;  %v1347_v24 = vmax.f32 %v1130_v2, 0.0  ;;  %7512 = vmatmul.msk.bf16.gmra.mxu0 %vm757_vm0, %v8108_v21  ;;  %v8110_v21 = vld [vmem:[%s8557_s24 + $0x160] sm:$0xff] }
 0x2c4   : > { %v3561_v19 = vpop.f32.mrf.mxu3  ;;  %v1696_v33 = vmax.f32 %v1343_v5, %v1347_v24 }
 0x2c5   : > { %v9041_v58 = vadd.f32 %v3561_v19, %v2909_v30 }
 0x2c6   : > { %1760 = vst [vmem:[#allocation3 + $0x100] sm:$0xff] %v1696_v33  ;;  %v2115_v33 = vld [vmem:[#allocation4 + $0x90] sm:$0x8] }
 0x2c7   : > { %v1131_v43 = vpop.f32.mrf.mxu0 }
 0x2c8   : > { %v1132_v51 = vadd.f32 %v9035_v20, %v1131_v43 }
 0x2ca   : > { %v1348_v1 = vmax.f32 %v1132_v51, 0.0  ;;  %v8111_v51 = vld [vmem:[%s8557_s24 + $0x168] sm:$0xff] }
 0x2cc   : > { %v1697_v22 = vmax.f32 %v1344_v53, %v1348_v1  ;;  %v2338_v53 = vshrl.u32 %v2115_v33, 16  ;;  %v9063_v33 = vpop.f32.mrf.mxu1 }
 0x2ce   : > { %1761 = vst [vmem:[#allocation3 + $0x108] sm:$0xff] %v1697_v22 }
 0x2cf   : > { %v1134_v63 = vpop.f32.mrf.mxu0 }
 0x2d0   : > { %v1135_v0 = vadd.f32 %v9035_v20, %v1134_v63 }
 0x2d2   : > { %v1349_v9 = vmax.f32 %v1135_v0, 0.0  ;;  %7513 = vmatmul.msk.bf16.gmra.mxu0 %vm757_vm0, %v8109_v60  ;;  %v2987_v0 = vld [vmem:[#allocation4 + $0x9c] sm:$0x1] }
 0x2d4   : > { %v1698_v62 = vmax.f32 %v1345_v35, %v1349_v9 }
 0x2d5   : > { %v1824_v18 = vld [vmem:[#allocation3 + $0x100] ss:$2 sm:$0xff]  ;;  %v1888_v10 = vld [vmem:[#allocation3 + $0x101] ss:$2 sm:$0xff] }
 0x2d6   : > { %v1935_v13 = vmax.f32 %v1824_v18, %v1888_v10  ;;  %1762 = vst [vmem:[#allocation3 + $0x110] sm:$0xff] %v1698_v62  ;;  %v7543_v18 = vrot.slane %v2338_v53, 11 }
 0x2d7   : > { %v1136_v14 = vpop.f32.mrf.mxu0 }
 0x2d8   : > { %v2039_v15 = vpack.c.bf16 %v1935_v13, %v1935_v13  ;;  %v1137_v41 = vadd.f32 %v9035_v20, %v1136_v14 }
 0x2da   : > { %2072 = vst [vmem:[#allocation4 + $0x94] sm:$0xf] %v2039_v15  ;;  %v1350_v29 = vmax.f32 %v1137_v41, 0.0  ;;  %v3245_v41 = vshll.u32 %v2987_v0, 16 }
 0x2dc   : > { %v1699_v32 = vmax.f32 %v1346_v38, %v1350_v29 }
 0x2de   : > { %1763 = vst [vmem:[#allocation3 + $0x118] sm:$0xff] %v1699_v32 }
 0x2df   : > { %v1139_v23 = vpop.f32.mrf.mxu0 }
 0x2e1   : > { %v2116_v30 = vld [vmem:[#allocation4 + $0x94] sm:$0xf] }
 0x2e2   : > { %7514 = vmatmul.msk.bf16.gmra.mxu0 %vm757_vm0, %v8110_v21  ;;  %v2985_v24 = vld [vmem:[#allocation4 + $0x94] sm:$0xf]  ;;  %v2343_v19 = vshrl.u32 %v2116_v30, 16  ;;  %v2346_v63 = vshll.u32 %v2116_v30, 16 }
 0x2e3   : > { %v3226_v25 = vshrl.u32 %v2985_v24, 16  ;;  %v3229_v43 = vshll.u32 %v2985_v24, 16 }
 0x2e4   : > { %v2345_v1 = vrot.slane %v2343_v19, 7  ;;  %v3247_v19 = vrot.slane %v3245_v41, 5 }
 0x2e5   : > { %v1826_v48 = vld [vmem:[#allocation3 + $0x110] ss:$2 sm:$0xff]  ;;  %v1890_v2 = vld [vmem:[#allocation3 + $0x111] ss:$2 sm:$0xff]  ;;  %v3228_v57 = vrot.slane %v3226_v25, 4  ;;  %v3231_v60 = vrot.slane %v3229_v43, 5  ;;  %v9065_v25 = vpop.f32.mrf.mxu2 }
 0x2e6   : > { %v1936_v26 = vmax.f32 %v1826_v48, %v1890_v2  ;;  %v2348_v10 = vor.u32 %v2346_v63, %v2345_v1  ;;  %v2350_v2 = vrot.slane %v2345_v1, 4  ;;  %v9071_v1 = vpop.f32.mrf.mxu3 }
 0x2e7   : > { %v9055_v59 = vpop.f32.mrf.mxu0  ;;  %v3232_v14 = vor.u32 %v3231_v60, %v3228_v57 }
 0x2e8   : > { %v2040_v5 = vpack.c.bf16 %v1936_v26, %v1936_v26  ;;  %v2349_v48 = vsel %vm8629_vm3, %v7543_v18, %v2348_v10  ;;  %v8112_v10 = vld [vmem:[%s8557_s24 + $0x170] sm:$0xff] }
 0x2ea   : > { %2073 = vst [vmem:[#allocation4 + $0x98] sm:$0xf] %v2040_v5  ;;  %v3233_v5 = vrot.slane %v3232_v14, 4 }
 0x2ef   : > { %v9058_v22 = vpop.f32.mrf.mxu0 }
 0x2f1   : > { %v8141_v35 = vld [vmem:[#allocation4 + $0x94] sm:$0xff] }
 0x2f2   : > { %v2117_v9 = vld [vmem:[#allocation4 + $0x98] sm:$0xf]  ;;  %7515 = vmatmul.msk.bf16.gmra.mxu0 %vm757_vm0, %v8111_v51  ;;  %2721 = vmatmul.bf16.gmra.mxu1 %v8141_v35  ;;  %v2775_v51 = vunpack.c.l.b16 %v2349_v48 }
 0x2f3   : > { %v2986_v62 = vld [vmem:[#allocation4 + $0x98] sm:$0xf]  ;;  %v2352_v11 = vshrl.u32 %v2117_v9, 16  ;;  %v2355_v29 = vshll.u32 %v2117_v9, 16 }
 0x2f4   : > { %v3235_v13 = vshll.u32 %v2986_v62, 16  ;;  %v3239_v15 = vshrl.u32 %v2986_v62, 16  ;;  %v1140_v62 = vadd.f32 %v9035_v20, %v1139_v23  ;;  %v1142_v23 = vadd.f32 %v9035_v20, %v9055_v59  ;;  %v8211_v59 = vld [vmem:[#allocation11 + $0x178] sm:$0xff] }
 0x2f5   : > { %v2354_v38 = vrot.slane %v2352_v11, 7  ;;  %5136 = vmatpush.bf16.msra.mxu3 %v8211_v59 }
 0x2f6   : > { %v3237_v32 = vrot.slane %v3235_v13, 5  ;;  %v3241_v21 = vrot.slane %v3239_v15, 4  ;;  %v2712_v13 = vpop.f32.mrf.mxu1 }
 0x2f7   : > { %v2357_v26 = vor.u32 %v2355_v29, %v2354_v38  ;;  %v1146_v30 = vpop.f32.mrf.mxu0  ;;  %v1351_v38 = vmax.f32 %v1140_v62, 0.0 }
 0x2f8   : > { %v3242_v24 = vor.u32 %v3241_v21, %v3237_v32  ;;  %v3238_v57 = vsel %vm8652_vm6, %v3233_v5, %v3237_v32  ;;  %v1352_v5 = vmax.f32 %v1142_v23, 0.0 }
 0x2f9   : > { %v2358_v43 = vsel %vm8629_vm3, %v2350_v2, %v2357_v26  ;;  %v3428_v35 = vunpack.c.l.b16 %v3238_v57 }
 0x2fa   : > { %v2776_v53 = vunpack.c.l.b16 %v2358_v43  ;;  %v3243_v60 = vrot.slane %v3242_v24, 4 }
 0x2fc   : > { %v2798_v63 = vpack.c.b16 %v2776_v53, %v2775_v51  ;;  %v3248_v0 = vsel %vm8652_vm6, %v3243_v60, %v3247_v19  ;;  %v8203_v19 = vld [vmem:[#allocation11 + $0x138] sm:$0xff]  ;;  %v1145_v51 = vadd.f32 %v9035_v20, %v9058_v22  ;;  %v8113_v53 = vld [vmem:[%s8557_s24 + $0x178] sm:$0xff] }
 0x2fd   : > { %v3429_v9 = vunpack.c.l.b16 %v3248_v0  ;;  %4454 = vmatpush.bf16.msra.mxu2 %v8203_v19 }
 0x2fe   : > { %2922 = vmatmul.bf16.gmra.mxu2 %v2798_v63  ;;  %v1353_v63 = vmax.f32 %v1145_v51, 0.0 }
 0x2ff   : > { %v3451_v18 = vpack.c.b16 %v3429_v9, %v3428_v35  ;;  %v1149_v11 = vpop.f32.mrf.mxu0  ;;  %v8195_v35 = vld [vmem:[#allocation11 + $0xf8] sm:$0xff] }
 0x300   : > { %v1150_v14 = vadd.f32 %v9035_v20, %v1149_v11  ;;  %4172 = vmatpush.bf16.msra.mxu1 %v8195_v35 }
 0x301   : > { %3575 = vmatmul.bf16.gmra.mxu3 %v3451_v18  ;;  %v2913_v15 = vpop.f32.mrf.mxu2 }
 0x302   : > { %v2914_v41 = vadd.f32 %v2913_v15, %v2712_v13  ;;  %v1355_v29 = vmax.f32 %v1150_v14, 0.0  ;;  %7516 = vmatmul.msk.bf16.gmra.mxu0 %vm757_vm0, %v8112_v10  ;;  %v1147_v10 = vadd.f32 %v9035_v20, %v1146_v30 }
 0x304   : > { %v3566_v32 = vpop.f32.mrf.mxu3  ;;  %v1700_v21 = vmax.f32 %v1351_v38, %v1355_v29  ;;  %v1354_v15 = vmax.f32 %v1147_v10, 0.0  ;;  %v8114_v29 = vld [vmem:[%s8557_s24 + $0x180] sm:$0xff] }
 0x305   : > { %v9079_v48 = vadd.f32 %v3566_v32, %v2914_v41 }
 0x306   : > { %1764 = vst [vmem:[#allocation3 + $0x120] sm:$0xff] %v1700_v21 }
 0x307   : > { %v1151_v2 = vpop.f32.mrf.mxu0 }
 0x308   : > { %v1152_v26 = vadd.f32 %v9035_v20, %v1151_v2 }
 0x30a   : > { %v1356_v24 = vmax.f32 %v1152_v26, 0.0 }
 0x30c   : > { %v1701_v43 = vmax.f32 %v1352_v5, %v1356_v24 }
 0x30e   : > { %1765 = vst [vmem:[#allocation3 + $0x128] sm:$0xff] %v1701_v43  ;;  %v2118_v43 = vld [vmem:[#allocation4 + $0xa0] sm:$0x8] }
 0x30f   : > { %v1154_v57 = vpop.f32.mrf.mxu0 }
 0x310   : > { %v1155_v60 = vadd.f32 %v9035_v20, %v1154_v57  ;;  %v8115_v57 = vld [vmem:[%s8557_s24 + $0x188] sm:$0xff] }
 0x312   : > { %v1357_v0 = vmax.f32 %v1155_v60, 0.0  ;;  %7517 = vmatmul.msk.bf16.gmra.mxu0 %vm757_vm0, %v8113_v53  ;;  %v2360_v60 = vshrl.u32 %v2118_v43, 16 }
 0x314   : > { %v1702_v9 = vmax.f32 %v1353_v63, %v1357_v0 }
 0x315   : > { %v1828_v62 = vld [vmem:[#allocation3 + $0x120] ss:$2 sm:$0xff]  ;;  %v1892_v18 = vld [vmem:[#allocation3 + $0x121] ss:$2 sm:$0xff] }
 0x316   : > { %v1937_v22 = vmax.f32 %v1828_v62, %v1892_v18  ;;  %1766 = vst [vmem:[#allocation3 + $0x130] sm:$0xff] %v1702_v9  ;;  %v2990_v62 = vld [vmem:[#allocation4 + $0xac] sm:$0x1] }
 0x317   : > { %v1156_v11 = vpop.f32.mrf.mxu0 }
 0x318   : > { %v2041_v13 = vpack.c.bf16 %v1937_v22, %v1937_v22  ;;  %v1157_v14 = vadd.f32 %v9035_v20, %v1156_v11  ;;  %v7544_v11 = vrot.slane %v2360_v60, 11  ;;  %v9103_v60 = vpop.f32.mrf.mxu1 }
 0x319   : > { %9849 = vst [vmem:[#allocation17_spill] sm:$0xff] %v9103_v60 }
 0x31a   : > { %2074 = vst [vmem:[#allocation4 + $0xa4] sm:$0xf] %v2041_v13  ;;  %v1358_v41 = vmax.f32 %v1157_v14, 0.0 }
 0x31c   : > { %v1703_v38 = vmax.f32 %v1354_v15, %v1358_v41 }
 0x31e   : > { %1767 = vst [vmem:[#allocation3 + $0x138] sm:$0xff] %v1703_v38 }
 0x31f   : > { %v9092_v32 = vpop.f32.mrf.mxu0 }
 0x321   : > { %v2119_v26 = vld [vmem:[#allocation4 + $0xa4] sm:$0xf] }
 0x322   : > { %7518 = vmatmul.msk.bf16.gmra.mxu0 %vm757_vm0, %v8114_v29  ;;  %v2988_v24 = vld [vmem:[#allocation4 + $0xa4] sm:$0xf]  ;;  %v2365_v19 = vshrl.u32 %v2119_v26, 16  ;;  %v2368_v9 = vshll.u32 %v2119_v26, 16  ;;  %v3269_v29 = vshll.u32 %v2990_v62, 16 }
 0x323   : > { %v3250_v51 = vshrl.u32 %v2988_v24, 16  ;;  %v3253_v53 = vshll.u32 %v2988_v24, 16 }
 0x324   : > { %v2367_v63 = vrot.slane %v2365_v19, 7 }
 0x325   : > { %v1830_v21 = vld [vmem:[#allocation3 + $0x130] ss:$2 sm:$0xff]  ;;  %v1894_v23 = vld [vmem:[#allocation3 + $0x131] ss:$2 sm:$0xff]  ;;  %v3252_v59 = vrot.slane %v3250_v51, 4  ;;  %v3255_v35 = vrot.slane %v3253_v53, 5 }
 0x326   : > { %v1938_v30 = vmax.f32 %v1830_v21, %v1894_v23  ;;  %v2370_v13 = vor.u32 %v2368_v9, %v2367_v63  ;;  %v2372_v24 = vrot.slane %v2367_v63, 4  ;;  %v9105_v9 = vpop.f32.mrf.mxu2  ;;  %v8202_v63 = vld [vmem:[#allocation11 + $0x130] sm:$0xff] }
 0x327   : > { %v9095_v2 = vpop.f32.mrf.mxu0  ;;  %v3256_v41 = vor.u32 %v3255_v35, %v3252_v59  ;;  %9850 = vst [vmem:[#allocation18_spill] sm:$0xff] %v9105_v9  ;;  %4455 = vmatpush.bf16.msra.mxu2 %v8202_v63 }
 0x328   : > { %v2042_v5 = vpack.c.bf16 %v1938_v30, %v1938_v30  ;;  %v2371_v26 = vsel %vm8629_vm3, %v7544_v11, %v2370_v13  ;;  %v8194_v11 = vld [vmem:[#allocation11 + $0xf0] sm:$0xff]  ;;  %v9111_v13 = vpop.f32.mrf.mxu3 }
 0x329   : > { %v3257_v51 = vrot.slane %v3256_v41, 4  ;;  %v2777_v35 = vunpack.c.l.b16 %v2371_v26  ;;  %9851 = vst [vmem:[#allocation19_spill] sm:$0xff] %v9111_v13  ;;  %4173 = vmatpush.bf16.msra.mxu1 %v8194_v11 }
 0x32a   : > { %2075 = vst [vmem:[#allocation4 + $0xa8] sm:$0xf] %v2042_v5 }
 0x32f   : > { %v9098_v0 = vpop.f32.mrf.mxu0 }
 0x331   : > { %v8142_v18 = vld [vmem:[#allocation4 + $0xa4] sm:$0xff] }
 0x332   : > { %v2120_v10 = vld [vmem:[#allocation4 + $0xa8] sm:$0xf]  ;;  %7519 = vmatmul.msk.bf16.gmra.mxu0 %vm757_vm0, %v8115_v57  ;;  %2726 = vmatmul.bf16.gmra.mxu1 %v8142_v18  ;;  %v3271_v57 = vrot.slane %v3269_v29, 5  ;;  %v1160_v29 = vadd.f32 %v9035_v20, %v9092_v32  ;;  %v1162_v32 = vadd.f32 %v9035_v20, %v9095_v2  ;;  %v8209_v2 = vld [vmem:[#allocation11 + $0x168] sm:$0xff] }
 0x333   : > { %v2989_v22 = vld [vmem:[#allocation4 + $0xa8] sm:$0xf]  ;;  %v2374_v14 = vshrl.u32 %v2120_v10, 16  ;;  %v2377_v23 = vshll.u32 %v2120_v10, 16 }
 0x334   : > { %v3259_v15 = vshll.u32 %v2989_v22, 16  ;;  %v3263_v38 = vshrl.u32 %v2989_v22, 16  ;;  %v8210_v22 = vld [vmem:[#allocation11 + $0x170] sm:$0xff] }
 0x335   : > { %v2376_v21 = vrot.slane %v2374_v14, 7  ;;  %5137 = vmatpush.bf16.msra.mxu3 %v8210_v22  ;;  %v8201_v22 = vld [vmem:[#allocation11 + $0x128] sm:$0xff] }
 0x336   : > { %v3261_v30 = vrot.slane %v3259_v15, 5  ;;  %v3265_v5 = vrot.slane %v3263_v38, 4  ;;  %4456 = vmatpush.bf16.msra.mxu2 %v8201_v22 }
 0x337   : > { %v2379_v19 = vor.u32 %v2377_v23, %v2376_v21  ;;  %v1166_v43 = vpop.f32.mrf.mxu0  ;;  %v8116_v23 = vld [vmem:[%s8557_s24 + $0x190] sm:$0xff] }
 0x338   : > { %v3266_v53 = vor.u32 %v3265_v5, %v3261_v30  ;;  %v3262_v18 = vsel %vm8652_vm6, %v3257_v51, %v3261_v30  ;;  %v2717_v5 = vpop.f32.mrf.mxu1  ;;  %v1359_v51 = vmax.f32 %v1160_v29, 0.0 }
 0x339   : > { %v2380_v59 = vsel %vm8629_vm3, %v2372_v24, %v2379_v19  ;;  %v3430_v41 = vunpack.c.l.b16 %v3262_v18  ;;  %5138 = vmatpush.bf16.msra.mxu3 %v8209_v2 }
 0x33a   : > { %v2778_v62 = vunpack.c.l.b16 %v2380_v59  ;;  %v3267_v10 = vrot.slane %v3266_v53, 4 }
 0x33c   : > { %v2799_v14 = vpack.c.b16 %v2778_v62, %v2777_v35  ;;  %v3272_v15 = vsel %vm8652_vm6, %v3267_v10, %v3271_v57  ;;  %v1360_v10 = vmax.f32 %v1162_v32, 0.0 }
 0x33d   : > { %v3431_v38 = vunpack.c.l.b16 %v3272_v15  ;;  %v8117_v15 = vld [vmem:[%s8557_s24 + $0x198] sm:$0xff] }
 0x33e   : > { %2927 = vmatmul.bf16.gmra.mxu2 %v2799_v14  ;;  %v1165_v14 = vadd.f32 %v9035_v20, %v9098_v0 }
 0x33f   : > { %v3452_v21 = vpack.c.b16 %v3431_v38, %v3430_v41  ;;  %v1169_v30 = vpop.f32.mrf.mxu0 }
 0x340   : > { %v1170_v26 = vadd.f32 %v9035_v20, %v1169_v30  ;;  %v1361_v29 = vmax.f32 %v1165_v14, 0.0 }
 0x341   : > { %3580 = vmatmul.bf16.gmra.mxu3 %v3452_v21  ;;  %v2918_v24 = vpop.f32.mrf.mxu2 }
 0x342   : > { %v2919_v19 = vadd.f32 %v2918_v24, %v2717_v5  ;;  %v1363_v53 = vmax.f32 %v1170_v26, 0.0  ;;  %7520 = vmatmul.msk.bf16.gmra.mxu0 %vm757_vm0, %v8116_v23  ;;  %v8193_v23 = vld [vmem:[#allocation11 + $0xe8] sm:$0xff]  ;;  %v1167_v24 = vadd.f32 %v9035_v20, %v1166_v43 }
 0x343   : > { %4174 = vmatpush.bf16.msra.mxu1 %v8193_v23 }
 0x344   : > { %v3571_v57 = vpop.f32.mrf.mxu3  ;;  %v1704_v59 = vmax.f32 %v1359_v51, %v1363_v53 }
 0x345   : > { %v9120_v35 = vadd.f32 %v3571_v57, %v2919_v19  ;;  %v1362_v57 = vmax.f32 %v1167_v24, 0.0 }
 0x346   : > { %1768 = vst [vmem:[#allocation3 + $0x140] sm:$0xff] %v1704_v59 }
 0x347   : > { %9852 = vst [vmem:[#allocation20_spill] sm:$0xff] %v9120_v35  ;;  %v1171_v62 = vpop.f32.mrf.mxu0 }
 0x348   : > { %v1172_v18 = vadd.f32 %v9035_v20, %v1171_v62  ;;  %v8118_v62 = vld [vmem:[%s8557_s24 + $0x1a0] sm:$0xff] }
 0x349   : > { %v9142_v60 = vpop.f32.mrf.mxu2 }
 0x34a   : > { %v1364_v63 = vmax.f32 %v1172_v18, 0.0  ;;  %9854 = vst [vmem:[#allocation22_spill] sm:$0xff] %v9142_v60 }
 0x34c   : > { %v1705_v11 = vmax.f32 %v1360_v10, %v1364_v63 }
 0x34e   : > { %1769 = vst [vmem:[#allocation3 + $0x148] sm:$0xff] %v1705_v11 }
 0x34f   : > { %v1174_v41 = vpop.f32.mrf.mxu0 }
 0x350   : > { %v1175_v38 = vadd.f32 %v9035_v20, %v1174_v41 }
 0x352   : > { %v1365_v21 = vmax.f32 %v1175_v38, 0.0  ;;  %7521 = vmatmul.msk.bf16.gmra.mxu0 %vm757_vm0, %v8117_v15  ;;  %v2121_v38 = vld [vmem:[#allocation4 + $0xb0] sm:$0x8] }
 0x353   : > { %v2382_v2 = vshrl.u32 %v2121_v38, 16 }
 0x354   : > { %v1706_v30 = vmax.f32 %v1361_v29, %v1365_v21 }
 0x355   : > { %v1832_v5 = vld [vmem:[#allocation3 + $0x140] ss:$2 sm:$0xff]  ;;  %v1896_v26 = vld [vmem:[#allocation3 + $0x141] ss:$2 sm:$0xff] }
 0x356   : > { %v1939_v0 = vmax.f32 %v1832_v5, %v1896_v26  ;;  %1770 = vst [vmem:[#allocation3 + $0x150] sm:$0xff] %v1706_v30 }
 0x357   : > { %v1176_v19 = vpop.f32.mrf.mxu0 }
 0x358   : > { %v2043_v51 = vpack.c.bf16 %v1939_v0, %v1939_v0  ;;  %v1177_v53 = vadd.f32 %v9035_v20, %v1176_v19  ;;  %v2993_v0 = vld [vmem:[#allocation4 + $0xbc] sm:$0x1] }
 0x35a   : > { %2076 = vst [vmem:[#allocation4 + $0xb4] sm:$0xf] %v2043_v51  ;;  %v1366_v59 = vmax.f32 %v1177_v53, 0.0 }
 0x35c   : > { %v1707_v32 = vmax.f32 %v1362_v57, %v1366_v59  ;;  %v7545_v57 = vrot.slane %v2382_v2, 11 }
 0x35e   : > { %1771 = vst [vmem:[#allocation3 + $0x158] sm:$0xff] %v1707_v32 }
 0x35f   : > { %v1179_v18 = vpop.f32.mrf.mxu0 }
 0x361   : > { %v2122_v43 = vld [vmem:[#allocation4 + $0xb4] sm:$0xf] }
 0x362   : > { %7522 = vmatmul.msk.bf16.gmra.mxu0 %vm757_vm0, %v8118_v62  ;;  %v2991_v15 = vld [vmem:[#allocation4 + $0xb4] sm:$0xf]  ;;  %v2387_v41 = vshrl.u32 %v2122_v43, 16  ;;  %v2390_v24 = vshll.u32 %v2122_v43, 16 }
 0x363   : > { %v3274_v29 = vshrl.u32 %v2991_v15, 16  ;;  %v3277_v21 = vshll.u32 %v2991_v15, 16 }
 0x364   : > { %v2389_v23 = vrot.slane %v2387_v41, 7 }
 0x365   : > { %v1834_v10 = vld [vmem:[#allocation3 + $0x150] ss:$2 sm:$0xff]  ;;  %v1898_v63 = vld [vmem:[#allocation3 + $0x151] ss:$2 sm:$0xff]  ;;  %v3276_v5 = vrot.slane %v3274_v29, 4  ;;  %v3279_v26 = vrot.slane %v3277_v21, 5 }
 0x366   : > { %v1940_v22 = vmax.f32 %v1834_v10, %v1898_v63  ;;  %v2392_v59 = vor.u32 %v2390_v24, %v2389_v23  ;;  %v2394_v43 = vrot.slane %v2389_v23, 4  ;;  %v9140_v24 = vpop.f32.mrf.mxu1  ;;  %v8208_v23 = vld [vmem:[#allocation11 + $0x160] sm:$0xff] }
 0x367   : > { %v9134_v11 = vpop.f32.mrf.mxu0  ;;  %v3280_v10 = vor.u32 %v3279_v26, %v3276_v5  ;;  %9853 = vst [vmem:[#allocation21_spill] sm:$0xff] %v9140_v24  ;;  %5139 = vmatpush.bf16.msra.mxu3 %v8208_v23 }
 0x368   : > { %v2044_v14 = vpack.c.bf16 %v1940_v22, %v1940_v22  ;;  %v3293_v22 = vshll.u32 %v2993_v0, 16  ;;  %v2393_v29 = vsel %vm8629_vm3, %v7545_v57, %v2392_v59  ;;  %v8192_v57 = vld [vmem:[#allocation11 + $0xe0] sm:$0xff]  ;;  %v9148_v59 = vpop.f32.mrf.mxu3 }
 0x369   : > { %v3281_v35 = vrot.slane %v3280_v10, 4  ;;  %v2779_v26 = vunpack.c.l.b16 %v2393_v29  ;;  %9855 = vst [vmem:[#allocation23_spill] sm:$0xff] %v9148_v59  ;;  %4175 = vmatpush.bf16.msra.mxu1 %v8192_v57 }
 0x36a   : > { %2077 = vst [vmem:[#allocation4 + $0xb8] sm:$0xf] %v2044_v14  ;;  %v3295_v2 = vrot.slane %v3293_v22, 5  ;;  %v1180_v22 = vadd.f32 %v9035_v20, %v1179_v18 }
 0x36c   : > { %v1367_v29 = vmax.f32 %v1180_v22, 0.0  ;;  %v8207_v22 = vld [vmem:[#allocation11 + $0x158] sm:$0xff] }
 0x36d   : > { %5140 = vmatpush.bf16.msra.mxu3 %v8207_v22 }
 0x36f   : > { %v9136_v30 = vpop.f32.mrf.mxu0 }
 0x370   : > { %v1185_v57 = vadd.f32 %v9035_v20, %v9136_v30 }
 0x371   : > { %v8143_v19 = vld [vmem:[#allocation4 + $0xb4] sm:$0xff] }
 0x372   : > { %v2123_v51 = vld [vmem:[#allocation4 + $0xb8] sm:$0xf]  ;;  %2731 = vmatmul.bf16.gmra.mxu1 %v8143_v19 }
 0x373   : > { %v2992_v53 = vld [vmem:[#allocation4 + $0xb8] sm:$0xf]  ;;  %v2396_v32 = vshrl.u32 %v2123_v51, 16  ;;  %v2399_v15 = vshll.u32 %v2123_v51, 16 }
 0x374   : > { %v3283_v62 = vshll.u32 %v2992_v53, 16  ;;  %v3287_v63 = vshrl.u32 %v2992_v53, 16  ;;  %v8200_v53 = vld [vmem:[#allocation11 + $0x120] sm:$0xff] }
 0x375   : > { %v2398_v14 = vrot.slane %v2396_v32, 7  ;;  %4457 = vmatpush.bf16.msra.mxu2 %v8200_v53  ;;  %v8199_v53 = vld [vmem:[#allocation11 + $0x118] sm:$0xff] }
 0x376   : > { %v3285_v41 = vrot.slane %v3283_v62, 5  ;;  %v3289_v38 = vrot.slane %v3287_v63, 4 }
 0x377   : > { %v2401_v21 = vor.u32 %v2399_v15, %v2398_v14  ;;  %v1186_v13 = vpop.f32.mrf.mxu0 }
 0x378   : > { %v3290_v9 = vor.u32 %v3289_v38, %v3285_v41  ;;  %v3286_v19 = vsel %vm8652_vm6, %v3281_v35, %v3285_v41 }
 0x379   : > { %v2402_v5 = vsel %vm8629_vm3, %v2394_v43, %v2401_v21  ;;  %v3432_v10 = vunpack.c.l.b16 %v3286_v19  ;;  %4458 = vmatpush.bf16.msra.mxu2 %v8199_v53 }
 0x37a   : > { %v2780_v0 = vunpack.c.l.b16 %v2402_v5  ;;  %v3291_v51 = vrot.slane %v3290_v9, 4  ;;  %v2722_v9 = vpop.f32.mrf.mxu1 }
 0x37c   : > { %v2800_v32 = vpack.c.b16 %v2780_v0, %v2779_v26  ;;  %v3296_v62 = vsel %vm8652_vm6, %v3291_v51, %v3295_v2  ;;  %v1182_v26 = vadd.f32 %v9035_v20, %v9134_v11  ;;  %v8191_v11 = vld [vmem:[#allocation11 + $0xd8] sm:$0xff] }
 0x37d   : > { %v3433_v63 = vunpack.c.l.b16 %v3296_v62  ;;  %4176 = vmatpush.bf16.msra.mxu1 %v8191_v11 }
 0x37e   : > { %2932 = vmatmul.bf16.gmra.mxu2 %v2800_v32  ;;  %v1368_v19 = vmax.f32 %v1182_v26, 0.0 }
 0x37f   : > { %v3453_v14 = vpack.c.b16 %v3433_v63, %v3432_v10  ;;  %v1189_v35 = vpop.f32.mrf.mxu0  ;;  %v1369_v10 = vmax.f32 %v1185_v57, 0.0 }
 0x380   : > { %v1190_v15 = vadd.f32 %v9035_v20, %v1189_v35 }
 0x381   : > { %3585 = vmatmul.bf16.gmra.mxu3 %v3453_v14  ;;  %v2923_v41 = vpop.f32.mrf.mxu2 }
 0x382   : > { %v2924_v38 = vadd.f32 %v2923_v41, %v2722_v9  ;;  %v1371_v43 = vmax.f32 %v1190_v15, 0.0  ;;  %v1187_v15 = vadd.f32 %v9035_v20, %v1186_v13 }
 0x384   : > { %v3576_v21 = vpop.f32.mrf.mxu3  ;;  %v1708_v2 = vmax.f32 %v1367_v29, %v1371_v43  ;;  %v1370_v43 = vmax.f32 %v1187_v15, 0.0  ;;  %v2996_v15 = vld [vmem:[#allocation4 + $0xcc] sm:$0x1] }
 0x385   : > { %v9154_v5 = vadd.f32 %v3576_v21, %v2924_v38 }
 0x386   : > { %1772 = vst [vmem:[#allocation3 + $0x160] sm:$0xff] %v1708_v2 }
 0x387   : > { %9856 = vst [vmem:[#allocation24_spill] sm:$0xff] %v9154_v5  ;;  %v1191_v0 = vpop.f32.mrf.mxu0 }
 0x388   : > { %v1192_v18 = vadd.f32 %v9035_v20, %v1191_v0 }
 0x389   : > { %v9172_v24 = vpop.f32.mrf.mxu2 }
 0x38a   : > { %v1372_v51 = vmax.f32 %v1192_v18, 0.0  ;;  %9858 = vst [vmem:[#allocation26_spill] sm:$0xff] %v9172_v24 }
 0x38c   : > { %v1709_v23 = vmax.f32 %v1368_v19, %v1372_v51 }
 0x38e   : > { %1773 = vst [vmem:[#allocation3 + $0x168] sm:$0xff] %v1709_v23 }
 0x38f   : > { %v1194_v32 = vpop.f32.mrf.mxu0 }
 0x390   : > { %v1195_v62 = vadd.f32 %v9035_v20, %v1194_v32  ;;  %v2124_v32 = vld [vmem:[#allocation4 + $0xc0] sm:$0x8] }
 0x392   : > { %v1373_v63 = vmax.f32 %v1195_v62, 0.0 }
 0x394   : > { %v1710_v14 = vmax.f32 %v1369_v10, %v1373_v63  ;;  %v2404_v63 = vshrl.u32 %v2124_v32, 16 }
 0x395   : > { %v1836_v35 = vld [vmem:[#allocation3 + $0x160] ss:$2 sm:$0xff]  ;;  %v1900_v9 = vld [vmem:[#allocation3 + $0x161] ss:$2 sm:$0xff] }
 0x396   : > { %v1941_v41 = vmax.f32 %v1836_v35, %v1900_v9  ;;  %1774 = vst [vmem:[#allocation3 + $0x170] sm:$0xff] %v1710_v14 }
 0x397   : > { %v1196_v38 = vpop.f32.mrf.mxu0 }
 0x398   : > { %v2045_v29 = vpack.c.bf16 %v1941_v41, %v1941_v41  ;;  %v1197_v30 = vadd.f32 %v9035_v20, %v1196_v38 }
 0x39a   : > { %2078 = vst [vmem:[#allocation4 + $0xc4] sm:$0xf] %v2045_v29  ;;  %v1374_v21 = vmax.f32 %v1197_v30, 0.0  ;;  %v7546_v30 = vrot.slane %v2404_v63, 11 }
 0x39c   : > { %v1711_v2 = vmax.f32 %v1370_v43, %v1374_v21 }
 0x39e   : > { %1775 = vst [vmem:[#allocation3 + $0x178] sm:$0xff] %v1711_v2 }
 0x39f   : > { %v1199_v26 = vpop.f32.mrf.mxu0 }
 0x3a1   : > { %v2125_v53 = vld [vmem:[#allocation4 + $0xc4] sm:$0xf] }
 0x3a2   : > { %v2994_v13 = vld [vmem:[#allocation4 + $0xc4] sm:$0xf]  ;;  %v2409_v57 = vshrl.u32 %v2125_v53, 16  ;;  %v2412_v9 = vshll.u32 %v2125_v53, 16 }
 0x3a3   : > { %v3298_v62 = vshrl.u32 %v2994_v13, 16  ;;  %v3301_v10 = vshll.u32 %v2994_v13, 16 }
 0x3a4   : > { %v2411_v22 = vrot.slane %v2409_v57, 7 }
 0x3a5   : > { %v1838_v0 = vld [vmem:[#allocation3 + $0x170] ss:$2 sm:$0xff]  ;;  %v1902_v18 = vld [vmem:[#allocation3 + $0x171] ss:$2 sm:$0xff]  ;;  %v3300_v14 = vrot.slane %v3298_v62, 4  ;;  %v3303_v35 = vrot.slane %v3301_v10, 5 }
 0x3a6   : > { %v1942_v19 = vmax.f32 %v1838_v0, %v1902_v18  ;;  %v2414_v43 = vor.u32 %v2412_v9, %v2411_v22  ;;  %v2416_v53 = vrot.slane %v2411_v22, 4  ;;  %v9170_v9 = vpop.f32.mrf.mxu1  ;;  %v8206_v22 = vld [vmem:[#allocation11 + $0x150] sm:$0xff] }
 0x3a7   : > { %v9164_v51 = vpop.f32.mrf.mxu0  ;;  %v3304_v0 = vor.u32 %v3303_v35, %v3300_v14  ;;  %9857 = vst [vmem:[#allocation25_spill] sm:$0xff] %v9170_v9  ;;  %5141 = vmatpush.bf16.msra.mxu3 %v8206_v22 }
 0x3a8   : > { %v2046_v23 = vpack.c.bf16 %v1942_v19, %v1942_v19  ;;  %v3317_v19 = vshll.u32 %v2996_v15, 16  ;;  %v2415_v62 = vsel %vm8629_vm3, %v7546_v30, %v2414_v43  ;;  %v8190_v30 = vld [vmem:[#allocation11 + $0xd0] sm:$0xff]  ;;  %v9178_v43 = vpop.f32.mrf.mxu3 }
 0x3a9   : > { %v3305_v5 = vrot.slane %v3304_v0, 4  ;;  %v2781_v35 = vunpack.c.l.b16 %v2415_v62  ;;  %9859 = vst [vmem:[#allocation27_spill] sm:$0xff] %v9178_v43  ;;  %4177 = vmatpush.bf16.msra.mxu1 %v8190_v30 }
 0x3aa   : > { %2079 = vst [vmem:[#allocation4 + $0xc8] sm:$0xf] %v2046_v23  ;;  %v3319_v63 = vrot.slane %v3317_v19, 5  ;;  %v1200_v19 = vadd.f32 %v9035_v20, %v1199_v26 }
 0x3ac   : > { %v1375_v62 = vmax.f32 %v1200_v19, 0.0 }
 0x3af   : > { %v9166_v11 = vpop.f32.mrf.mxu0 }
 0x3b0   : > { %v1205_v22 = vadd.f32 %v9035_v20, %v9166_v11 }
 0x3b1   : > { %v8144_v41 = vld [vmem:[#allocation4 + $0xc4] sm:$0xff] }
 0x3b2   : > { %v2126_v38 = vld [vmem:[#allocation4 + $0xc8] sm:$0xf]  ;;  %2736 = vmatmul.bf16.gmra.mxu1 %v8144_v41 }
 0x3b3   : > { %v2995_v29 = vld [vmem:[#allocation4 + $0xc8] sm:$0xf]  ;;  %v2418_v21 = vshrl.u32 %v2126_v38, 16  ;;  %v2421_v13 = vshll.u32 %v2126_v38, 16 }
 0x3b4   : > { %v3307_v2 = vshll.u32 %v2995_v29, 16  ;;  %v3311_v18 = vshrl.u32 %v2995_v29, 16  ;;  %v8198_v29 = vld [vmem:[#allocation11 + $0x110] sm:$0xff] }
 0x3b5   : > { %v2420_v23 = vrot.slane %v2418_v21, 7  ;;  %4459 = vmatpush.bf16.msra.mxu2 %v8198_v29 }
 0x3b6   : > { %v3309_v57 = vrot.slane %v3307_v2, 5  ;;  %v3313_v32 = vrot.slane %v3311_v18, 4 }
 0x3b7   : > { %v2423_v10 = vor.u32 %v2421_v13, %v2420_v23  ;;  %v1206_v59 = vpop.f32.mrf.mxu0 }
 0x3b8   : > { %v3314_v60 = vor.u32 %v3313_v32, %v3309_v57  ;;  %v3310_v41 = vsel %vm8652_vm6, %v3305_v5, %v3309_v57  ;;  %v1207_v19 = vadd.f32 %v9035_v20, %v1206_v59  ;;  %v1230_v59 = vadd.f32 %v9035_v20, %v8732_v47 }
 0x3b9   : > { %v2424_v14 = vsel %vm8629_vm3, %v2416_v53, %v2423_v10  ;;  %v3434_v0 = vunpack.c.l.b16 %v3310_v41 }
 0x3ba   : > { %v2782_v15 = vunpack.c.l.b16 %v2424_v14  ;;  %v3315_v38 = vrot.slane %v3314_v60, 4  ;;  %v2727_v60 = vpop.f32.mrf.mxu1 }
 0x3bc   : > { %v2801_v21 = vpack.c.b16 %v2782_v15, %v2781_v35  ;;  %v3320_v2 = vsel %vm8652_vm6, %v3315_v38, %v3319_v63  ;;  %v1202_v35 = vadd.f32 %v9035_v20, %v9164_v51 }
 0x3bd   : > { %v3435_v18 = vunpack.c.l.b16 %v3320_v2  ;;  %v1377_v2 = vmax.f32 %v1205_v22, 0.0 }
 0x3be   : > { %2937 = vmatmul.bf16.gmra.mxu2 %v2801_v21  ;;  %v1376_v41 = vmax.f32 %v1202_v35, 0.0 }
 0x3bf   : > { %v3454_v23 = vpack.c.b16 %v3435_v18, %v3434_v0  ;;  %v1209_v5 = vpop.f32.mrf.mxu0 }
 0x3c0   : > { %v1210_v13 = vadd.f32 %v9035_v20, %v1209_v5 }
 0x3c1   : > { %3590 = vmatmul.bf16.gmra.mxu3 %v3454_v23  ;;  %v2928_v57 = vpop.f32.mrf.mxu2 }
 0x3c2   : > { %v2929_v32 = vadd.f32 %v2928_v57, %v2727_v60  ;;  %v1379_v53 = vmax.f32 %v1210_v13, 0.0 }
 0x3c4   : > { %v3581_v10 = vpop.f32.mrf.mxu3  ;;  %v1712_v63 = vmax.f32 %v1375_v62, %v1379_v53  ;;  %v8197_v62 = vld [vmem:[#allocation11 + $0x108] sm:$0xff] }
 0x3c5   : > { %v9184_v14 = vadd.f32 %v3581_v10, %v2929_v32  ;;  %v1378_v32 = vmax.f32 %v1207_v19, 0.0  ;;  %v8205_v53 = vld [vmem:[#allocation11 + $0x148] sm:$0xff]  ;;  %4460 = vmatpush.bf16.msra.mxu2 %v8197_v62 }
 0x3c6   : > { %1776 = vst [vmem:[#allocation3 + $0x180] sm:$0xff] %v1712_v63  ;;  %v8189_v10 = vld [vmem:[#allocation11 + $0xc8] sm:$0xff]  ;;  %5142 = vmatpush.bf16.msra.mxu3 %v8205_v53  ;;  %v8196_v53 = vld [vmem:[#allocation11 + $0x100] sm:$0xff] }
 0x3c7   : > { %9860 = vst [vmem:[#allocation28_spill] sm:$0xff] %v9184_v14  ;;  %v1211_v15 = vpop.f32.mrf.mxu0  ;;  %4178 = vmatpush.bf16.msra.mxu1 %v8189_v10 }
 0x3c8   : > { %v1212_v26 = vadd.f32 %v9035_v20, %v1211_v15 }
 0x3c9   : > { %4461 = vmatpush.bf16.msra.mxu2 %v8196_v53 }
 0x3ca   : > { %v1380_v38 = vmax.f32 %v1212_v26, 0.0  ;;  %v1387_v26 = vmax.f32 %v1230_v59, 0.0 }
 0x3cc   : > { %v1713_v29 = vmax.f32 %v1376_v41, %v1380_v38 }
 0x3ce   : > { %1777 = vst [vmem:[#allocation3 + $0x188] sm:$0xff] %v1713_v29 }
 0x3cf   : > { %v1214_v30 = vpop.f32.mrf.mxu0 }
 0x3d0   : > { %v1215_v21 = vadd.f32 %v9035_v20, %v1214_v30  ;;  %v1232_v30 = vadd.f32 %v9035_v20, %v8744_v17  ;;  %v2999_v17 = vld [vmem:[#allocation4 + $0xdc] sm:$0x1] }
 0x3d2   : > { %v1381_v0 = vmax.f32 %v1215_v21, 0.0 }
 0x3d4   : > { %v1714_v18 = vmax.f32 %v1377_v2, %v1381_v0 }
 0x3d5   : > { %v1840_v51 = vld [vmem:[#allocation3 + $0x180] ss:$2 sm:$0xff]  ;;  %v1904_v23 = vld [vmem:[#allocation3 + $0x181] ss:$2 sm:$0xff] }
 0x3d6   : > { %v1943_v5 = vmax.f32 %v1840_v51, %v1904_v23  ;;  %1778 = vst [vmem:[#allocation3 + $0x190] sm:$0xff] %v1714_v18  ;;  %v2127_v51 = vld [vmem:[#allocation4 + $0xd0] sm:$0x8] }
 0x3d7   : > { %v1216_v60 = vpop.f32.mrf.mxu0 }
 0x3d8   : > { %v2047_v13 = vpack.c.bf16 %v1943_v5, %v1943_v5  ;;  %v1217_v57 = vadd.f32 %v9035_v20, %v1216_v60  ;;  %v1388_v5 = vmax.f32 %v1232_v30, 0.0  ;;  %v3341_v30 = vshll.u32 %v2999_v17, 16 }
 0x3da   : > { %2080 = vst [vmem:[#allocation4 + $0xd4] sm:$0xf] %v2047_v13  ;;  %v1382_v11 = vmax.f32 %v1217_v57, 0.0 }
 0x3dc   : > { %v1715_v63 = vmax.f32 %v1378_v32, %v1382_v11  ;;  %v2426_v11 = vshrl.u32 %v2127_v51, 16 }
 0x3de   : > { %1779 = vst [vmem:[#allocation3 + $0x198] sm:$0xff] %v1715_v63 }
 0x3df   : > { %v1219_v35 = vpop.f32.mrf.mxu0 }
 0x3e0   : > { %v1220_v15 = vadd.f32 %v9035_v20, %v1219_v35  ;;  %v8204_v35 = vld [vmem:[#allocation11 + $0x140] sm:$0xff] }
 0x3e1   : > { %v2128_v2 = vld [vmem:[#allocation4 + $0xd4] sm:$0xf]  ;;  %5143 = vmatpush.bf16.msra.mxu3 %v8204_v35 }
 0x3e2   : > { %v1383_v41 = vmax.f32 %v1220_v15, 0.0  ;;  %v2997_v18 = vld [vmem:[#allocation4 + $0xd4] sm:$0xf]  ;;  %v2431_v23 = vshrl.u32 %v2128_v2, 16  ;;  %v2434_v59 = vshll.u32 %v2128_v2, 16 }
 0x3e3   : > { %v3322_v13 = vshrl.u32 %v2997_v18, 16  ;;  %v3325_v57 = vshll.u32 %v2997_v18, 16  ;;  %v8188_v15 = vld [vmem:[#allocation11 + $0xc0] sm:$0xff] }
 0x3e4   : > { %v1716_v38 = vmax.f32 %v1383_v41, %v1387_v26  ;;  %v2433_v62 = vrot.slane %v2431_v23, 7  ;;  %v3001_v26 = vld [vmem:[#allocation4 + $0xe8] sm:$0xf]  ;;  %4179 = vmatpush.bf16.msra.mxu1 %v8188_v15  ;;  %v9204_v15 = vpop.f32.mrf.mxu2 }
 0x3e5   : > { %v1842_v29 = vld [vmem:[#allocation3 + $0x190] ss:$2 sm:$0xff]  ;;  %v1906_v22 = vld [vmem:[#allocation3 + $0x191] ss:$2 sm:$0xff]  ;;  %v3324_v10 = vrot.slane %v3322_v13, 4  ;;  %v3327_v63 = vrot.slane %v3325_v57, 5 }
 0x3e6   : > { %v1944_v21 = vmax.f32 %v1842_v29, %v1906_v22  ;;  %1780 = vst [vmem:[#allocation3 + $0x1a0] sm:$0xff] %v1716_v38  ;;  %v2436_v29 = vor.u32 %v2434_v59, %v2433_v62 }
 0x3e7   : > { %v1221_v0 = vpop.f32.mrf.mxu0  ;;  %9862 = vst [vmem:[#allocation30_spill] sm:$0xff] %v9204_v15  ;;  %v2135_v15 = vld [vmem:[#allocation4 + $0xf8] sm:$0xf] }
 0x3e8   : > { %v2048_v19 = vpack.c.bf16 %v1944_v21, %v1944_v21  ;;  %v1222_v47 = vadd.f32 %v9035_v20, %v1221_v0  ;;  %v7547_v20 = vrot.slane %v2426_v11, 11  ;;  %v3328_v0 = vor.u32 %v3327_v63, %v3324_v10  ;;  %v9202_v63 = vpop.f32.mrf.mxu1 }
 0x3e9   : > { %v3343_v11 = vrot.slane %v3341_v30, 5  ;;  %v3359_v10 = vshrl.u32 %v3001_v26, 16  ;;  %9861 = vst [vmem:[#allocation29_spill] sm:$0xff] %v9202_v63 }
 0x3ea   : > { %2081 = vst [vmem:[#allocation4 + $0xd8] sm:$0xf] %v2048_v19  ;;  %v1384_v60 = vmax.f32 %v1222_v47, 0.0  ;;  %v3355_v47 = vshll.u32 %v3001_v26, 16  ;;  %v2437_v57 = vsel %vm8629_vm3, %v7547_v20, %v2436_v29  ;;  %v3329_v59 = vrot.slane %v3328_v0, 4  ;;  %v9214_v0 = vpop.f32.mrf.mxu3 }
 0x3eb   : > { %v2783_v20 = vunpack.c.l.b16 %v2437_v57  ;;  %v2132_v29 = vld [vmem:[#allocation4 + $0xe8] sm:$0xf]  ;;  %9863 = vst [vmem:[#allocation31_spill] sm:$0xff] %v9214_v0 }
 0x3ec   : > { %v1717_v32 = vmax.f32 %v1384_v60, %v1388_v5  ;;  %v9212_v26 = vrot.slane %v3355_v47, 5 }
 0x3ee   : > { %1781 = vst [vmem:[#allocation3 + $0x1a8] sm:$0xff] %v1717_v32  ;;  %v2438_v32 = vrot.slane %v2433_v62, 4 }
 0x3f1   : > { %v8145_v41 = vld [vmem:[#allocation4 + $0xd4] sm:$0xff] }
 0x3f2   : > { %v2129_v38 = vld [vmem:[#allocation4 + $0xd8] sm:$0xf]  ;;  %2741 = vmatmul.bf16.gmra.mxu1 %v8145_v41 }
 0x3f3   : > { %v2998_v22 = vld [vmem:[#allocation4 + $0xd8] sm:$0xf]  ;;  %v2440_v21 = vshrl.u32 %v2129_v38, 16  ;;  %v2443_v2 = vshll.u32 %v2129_v38, 16 }
 0x3f4   : > { %v3331_v18 = vshll.u32 %v2998_v22, 16  ;;  %v3335_v19 = vshrl.u32 %v2998_v22, 16 }
 0x3f5   : > { %v2442_v51 = vrot.slane %v2440_v21, 7  ;;  %v1844_v60 = vld [vmem:[#allocation3 + $0x1a0] ss:$2 sm:$0xff]  ;;  %v1908_v13 = vld [vmem:[#allocation3 + $0x1a1] ss:$2 sm:$0xff] }
 0x3f6   : > { %v3333_v23 = vrot.slane %v3331_v18, 5  ;;  %v3337_v5 = vrot.slane %v3335_v19, 4  ;;  %v1945_v53 = vmax.f32 %v1844_v60, %v1908_v13  ;;  %v2462_v60 = vshrl.u32 %v2132_v29, 16  ;;  %v3002_v13 = vld [vmem:[#allocation4 + $0xec] sm:$0x1] }
 0x3f7   : > { %v2445_v17 = vor.u32 %v2443_v2, %v2442_v51  ;;  %v3361_v2 = vrot.slane %v3359_v10, 4 }
 0x3f8   : > { %v3338_v35 = vor.u32 %v3337_v5, %v3333_v23  ;;  %v2049_v41 = vpack.c.bf16 %v1945_v53, %v1945_v53  ;;  %v3334_v22 = vsel %vm8652_vm6, %v3329_v59, %v3333_v23  ;;  %v2130_v5 = vld [vmem:[#allocation4 + $0xe0] sm:$0x8]  ;;  %v3365_v53 = vshll.u32 %v3002_v13, 16  ;;  %v3003_v59 = vld [vmem:[#allocation4 + $0xf4] sm:$0xf] }
 0x3f9   : > { %v2446_v38 = vsel %vm8629_vm3, %v2438_v32, %v2445_v17  ;;  %v3436_v19 = vunpack.c.l.b16 %v3334_v22  ;;  %v2448_v57 = vshrl.u32 %v2130_v5, 16  ;;  %v3362_v32 = vor.u32 %v3361_v2, %v9212_v26  ;;  %v2732_v17 = vpop.f32.mrf.mxu1 }
 0x3fa   : > { %v3339_v21 = vrot.slane %v3338_v35, 4  ;;  %v2784_v62 = vunpack.c.l.b16 %v2446_v38  ;;  %2082 = vst [vmem:[#allocation4 + $0xe4] sm:$0xf] %v2049_v41  ;;  %v2464_v47 = vrot.slane %v2462_v60, 7  ;;  %v2465_v22 = vshll.u32 %v2132_v29, 16 }
 0x3fb   : > { %v3363_v5 = vrot.slane %v3362_v32, 4  ;;  %v3367_v2 = vrot.slane %v3365_v53, 5  ;;  %v3370_v29 = vshrl.u32 %v3003_v59, 16  ;;  %v3373_v63 = vshll.u32 %v3003_v59, 16 }
 0x3fc   : > { %v3344_v30 = vsel %vm8652_vm6, %v3339_v21, %v3343_v11  ;;  %v2802_v18 = vpack.c.b16 %v2784_v62, %v2783_v20 }
 0x3fd   : > { %v3437_v51 = vunpack.c.l.b16 %v3344_v30  ;;  %v3004_v30 = vld [vmem:[#allocation4 + $0xf8] sm:$0xf] }
 0x3fe   : > { %2942 = vmatmul.bf16.gmra.mxu2 %v2802_v18  ;;  %v3379_v43 = vshll.u32 %v3004_v30, 16  ;;  %v3383_v9 = vshrl.u32 %v3004_v30, 16 }
 0x3ff   : > { %v3455_v23 = vpack.c.b16 %v3437_v51, %v3436_v19  ;;  %v7548_v19 = vrot.slane %v2448_v57, 11  ;;  %v3368_v57 = vsel %vm8652_vm6, %v3363_v5, %v3367_v2  ;;  %v3645_v2 = vld [vmem:[#allocation4 + $0x18] sm:$0xf] }
 0x400   : > { %v3385_v30 = vrot.slane %v3383_v9, 4  ;;  %v3439_v5 = vunpack.c.l.b16 %v3368_v57 }
 0x401   : > { %3595 = vmatmul.bf16.gmra.mxu3 %v3455_v23  ;;  %v2933_v11 = vpop.f32.mrf.mxu2  ;;  %v8146_v41 = vld [vmem:[#allocation4 + $0xe4] sm:$0xff] }
 0x402   : > { %v2934_v35 = vadd.f32 %v2933_v11, %v2732_v17  ;;  %v2131_v38 = vld [vmem:[#allocation4 + $0xe4] sm:$0xf]  ;;  %2746 = vmatmul.bf16.gmra.mxu1 %v8146_v41  ;;  %v2134_v17 = vld [vmem:[#allocation4 + $0xf4] sm:$0xf]  ;;  %v2467_v11 = vor.u32 %v2465_v22, %v2464_v47  ;;  %v2133_v47 = vld [vmem:[#allocation4 + $0xf0] sm:$0x8] }
 0x403   : > { %v3000_v21 = vld [vmem:[#allocation4 + $0xe4] sm:$0xf]  ;;  %v2453_v10 = vshrl.u32 %v2131_v38, 16  ;;  %v2456_v51 = vshll.u32 %v2131_v38, 16  ;;  %v2475_v32 = vshrl.u32 %v2134_v17, 16  ;;  %v2484_v38 = vshrl.u32 %v2135_v15, 16 }
 0x404   : > { %v3346_v20 = vshrl.u32 %v3000_v21, 16  ;;  %v3349_v62 = vshll.u32 %v3000_v21, 16  ;;  %v3586_v18 = vpop.f32.mrf.mxu3 }
 0x405   : > { %v9217_v13 = vadd.f32 %v3586_v18, %v2934_v35  ;;  %v2455_v23 = vrot.slane %v2453_v10, 7  ;;  %v3372_v10 = vrot.slane %v3370_v29, 4 }
 0x406   : > { %v3348_v60 = vrot.slane %v3346_v20, 4  ;;  %v3351_v0 = vrot.slane %v3349_v62, 5  ;;  %v3375_v20 = vrot.slane %v3373_v63, 5  ;;  %v3381_v62 = vrot.slane %v3379_v43, 5  ;;  %v8251_v43 = vld [vmem:[#allocation11 + $0x238] sm:$0xff] }
 0x407   : > { %9864 = vst [vmem:[#allocation32_spill] sm:$0xff] %v9217_v13  ;;  %v2458_v14 = vor.u32 %v2456_v51, %v2455_v23  ;;  %v2460_v21 = vrot.slane %v2455_v23, 4  ;;  %v2477_v23 = vrot.slane %v2475_v32, 7  ;;  %v3706_v63 = vshrl.u32 %v3645_v2, 16  ;;  %v3643_v32 = vld [vmem:[#allocation4 + $0x10] sm:$0x8]  ;;  %6751 = vmatpush.bf16.msrb.mxu3 %v8251_v43 }
 0x408   : > { %v3352_v24 = vor.u32 %v3351_v0, %v3348_v60  ;;  %v2486_v60 = vrot.slane %v2484_v38, 7  ;;  %v3386_v13 = vor.u32 %v3385_v30, %v3381_v62  ;;  %v8147_v38 = vld [vmem:[#allocation4 + $0xf4] sm:$0xff] }
 0x409   : > { %v2459_v53 = vsel %vm8629_vm3, %v7548_v19, %v2458_v14  ;;  %v2468_v35 = vsel %vm8629_vm3, %v2460_v21, %v2467_v11  ;;  %v2470_v14 = vshrl.u32 %v2133_v47, 16  ;;  %v3005_v19 = vld [vmem:[#allocation4 + $0xfc] sm:$0x1]  ;;  %v2487_v11 = vshll.u32 %v2135_v15, 16  ;;  %v3644_v21 = vld [vmem:[#allocation4 + $0x14] sm:$0xf] }
 0x40a   : > { %v3353_v41 = vrot.slane %v3352_v24, 4  ;;  %v2785_v22 = vunpack.c.l.b16 %v2459_v53  ;;  %v2786_v59 = vunpack.c.l.b16 %v2468_v35  ;;  %v2478_v24 = vshll.u32 %v2134_v17, 16  ;;  %v8243_v53 = vld [vmem:[#allocation11 + $0x1f8] sm:$0xff]  ;;  %v4576_v15 = vld [vmem:[#allocation4 + $0x18] sm:$0xf] }
 0x40b   : > { %v3376_v35 = vor.u32 %v3375_v20, %v3372_v10  ;;  %v3697_v9 = vshrl.u32 %v3644_v21, 16  ;;  %6069 = vmatpush.bf16.msrb.mxu2 %v8243_v53  ;;  %v7549_v57 = vrot.slane %v2470_v14, 11  ;;  %v2482_v47 = vrot.slane %v2477_v23, 4  ;;  %v8235_v17 = vld [vmem:[#allocation11 + $0x1b8] sm:$0xff] }
 0x40c   : > { %v3358_v0 = vsel %vm8652_vm6, %v3353_v41, %v9212_v26  ;;  %v2803_v18 = vpack.c.b16 %v2786_v59, %v2785_v22  ;;  %v3389_v26 = vshll.u32 %v3005_v19, 16  ;;  %v2480_v41 = vor.u32 %v2478_v24, %v2477_v23  ;;  %5787 = vmatpush.bf16.msrb.mxu1 %v8235_v17 }
 0x40d   : > { %v3438_v51 = vunpack.c.l.b16 %v3358_v0  ;;  %v2489_v22 = vor.u32 %v2487_v11, %v2486_v60  ;;  %v3377_v59 = vrot.slane %v3376_v35, 4  ;;  %v3387_v0 = vrot.slane %v3386_v13, 4 }
 0x40e   : > { %2947 = vmatmul.bf16.gmra.mxu2 %v2803_v18  ;;  %v3391_v18 = vrot.slane %v3389_v26, 5  ;;  %v3708_v10 = vrot.slane %v3706_v63, 7  ;;  %v3692_v20 = vshrl.u32 %v3643_v32, 16  ;;  %v3699_v30 = vrot.slane %v3697_v9, 7 }
 0x40f   : > { %v3456_v29 = vpack.c.b16 %v3439_v5, %v3438_v51  ;;  %v3709_v51 = vshll.u32 %v3645_v2, 16  ;;  %v2481_v5 = vsel %vm8629_vm3, %v7549_v57, %v2480_v41  ;;  %v2490_v14 = vsel %vm8629_vm3, %v2482_v47, %v2489_v22  ;;  %v4577_v47 = vld [vmem:[#allocation4 + $0x1c] sm:$0x1] }
 0x410   : > { %v4633_v19 = vshll.u32 %v4576_v15, 16  ;;  %v4637_v23 = vshrl.u32 %v4576_v15, 16  ;;  %v3382_v24 = vsel %vm8652_vm6, %v3377_v59, %v3381_v62  ;;  %v3392_v13 = vsel %vm8652_vm6, %v3387_v0, %v3391_v18 }
 0x411   : > { %3600 = vmatmul.bf16.gmra.mxu3 %v3456_v29  ;;  %v3700_v60 = vshll.u32 %v3644_v21, 16  ;;  %v3711_v11 = vor.u32 %v3709_v51, %v3708_v10  ;;  %v4575_v29 = vld [vmem:[#allocation4 + $0x14] sm:$0xf]  ;;  %v2787_v53 = vunpack.c.l.b16 %v2481_v5  ;;  %v2788_v35 = vunpack.c.l.b16 %v2490_v14 }
 0x412   : > { %2751 = vmatmul.bf16.gmra.mxu1 %v8147_v38  ;;  %v7710_v2 = vrot.slane %v3692_v20, 11  ;;  %v3704_v63 = vrot.slane %v3699_v30, 4  ;;  %v4635_v9 = vrot.slane %v4633_v19, 5  ;;  %v4639_v43 = vrot.slane %v4637_v23, 4  ;;  %v3648_v38 = vld [vmem:[#allocation4 + $0x28] sm:$0xf] }
 0x413   : > { %v3702_v26 = vor.u32 %v3700_v60, %v3699_v30  ;;  %v3440_v57 = vunpack.c.l.b16 %v3382_v24  ;;  %v3441_v41 = vunpack.c.l.b16 %v3392_v13  ;;  %v4624_v22 = vshrl.u32 %v4575_v29, 16  ;;  %v3647_v30 = vld [vmem:[#allocation4 + $0x24] sm:$0xf]  ;;  %v3646_v60 = vld [vmem:[#allocation4 + $0x20] sm:$0x8] }
 0x414   : > { %v4627_v32 = vshll.u32 %v4575_v29, 16  ;;  %v3712_v62 = vsel %vm8629_vm3, %v3704_v63, %v3711_v11  ;;  %v2804_v17 = vpack.c.b16 %v2788_v35, %v2787_v53  ;;  %v4640_v15 = vor.u32 %v4639_v43, %v4635_v9  ;;  %v4579_v29 = vld [vmem:[#allocation4 + $0x28] sm:$0xf]  ;;  %v4578_v43 = vld [vmem:[#allocation4 + $0x24] sm:$0xf] }
 0x415   : > { %v3703_v21 = vsel %vm8629_vm3, %v7710_v2, %v3702_v26  ;;  %v4643_v59 = vshll.u32 %v4577_v47, 16  ;;  %v3457_v0 = vpack.c.b16 %v3441_v41, %v3440_v57  ;;  %v4061_v18 = vunpack.c.l.b16 %v3712_v62 }
 0x416   : > { %v4626_v10 = vrot.slane %v4624_v22, 4  ;;  %v4629_v20 = vrot.slane %v4627_v32, 5  ;;  %v3728_v51 = vshrl.u32 %v3648_v38, 16  ;;  %v4060_v5 = vunpack.c.l.b16 %v3703_v21 }
 0x417   : > { %v4641_v14 = vrot.slane %v4640_v15, 4  ;;  %v4645_v19 = vrot.slane %v4643_v59, 5  ;;  %v3719_v23 = vshrl.u32 %v3647_v30, 16  ;;  %v3714_v35 = vshrl.u32 %v3646_v60, 16 }
 0x418   : > { %v4092_v24 = vpack.c.b16 %v4061_v18, %v4060_v5  ;;  %v4630_v13 = vor.u32 %v4629_v20, %v4626_v10  ;;  %v3730_v11 = vrot.slane %v3728_v51, 7  ;;  %v3731_v26 = vshll.u32 %v3648_v38, 16  ;;  %v4580_v51 = vld [vmem:[#allocation4 + $0x2c] sm:$0x1]  ;;  %v8172_v5 = vld [vmem:[#allocation4 + $0x14] sm:$0xff] }
 0x419   : > { %v4646_v53 = vsel %vm8652_vm6, %v4641_v14, %v4645_v19  ;;  %v3721_v2 = vrot.slane %v3719_v23, 7  ;;  %v4657_v57 = vshll.u32 %v4579_v29, 16  ;;  %v4661_v41 = vshrl.u32 %v4579_v29, 16  ;;  %v3651_v14 = vld [vmem:[#allocation4 + $0x38] sm:$0xf]  ;;  %v8242_v29 = vld [vmem:[#allocation11 + $0x1f0] sm:$0xff] }
 0x41a   : > { %v4631_v63 = vrot.slane %v4630_v13, 4  ;;  %v3722_v47 = vshll.u32 %v3647_v30, 16  ;;  %v3733_v22 = vor.u32 %v3731_v26, %v3730_v11  ;;  %v5025_v62 = vunpack.c.l.b16 %v4646_v53  ;;  %v3650_v11 = vld [vmem:[#allocation4 + $0x34] sm:$0xf]  ;;  %6070 = vmatpush.bf16.msrb.mxu2 %v8242_v29  ;;  %v8234_v26 = vld [vmem:[#allocation11 + $0x1b0] sm:$0xff] }
 0x41b   : > { %v3726_v15 = vrot.slane %v3721_v2, 4  ;;  %v4648_v59 = vshrl.u32 %v4578_v43, 16  ;;  %v4659_v18 = vrot.slane %v4657_v57, 5  ;;  %v4663_v10 = vrot.slane %v4661_v41, 4  ;;  %5788 = vmatpush.bf16.msrb.mxu1 %v8234_v26  ;;  %v8173_v26 = vld [vmem:[#allocation4 + $0x24] sm:$0xff] }
 0x41c   : > { %v4636_v32 = vsel %vm8652_vm6, %v4631_v63, %v4635_v9  ;;  %v3724_v21 = vor.u32 %v3722_v47, %v3721_v2  ;;  %v4667_v60 = vshll.u32 %v4580_v51, 16  ;;  %v3750_v53 = vshrl.u32 %v3651_v14, 16  ;;  %v8250_v2 = vld [vmem:[#allocation11 + $0x230] sm:$0xff] }
 0x41d   : > { %v5024_v20 = vunpack.c.l.b16 %v4636_v32  ;;  %v3734_v38 = vsel %vm8629_vm3, %v3726_v15, %v3733_v22  ;;  %v4650_v9 = vrot.slane %v4648_v59, 4  ;;  %v4664_v13 = vor.u32 %v4663_v10, %v4659_v18  ;;  %v3649_v22 = vld [vmem:[#allocation4 + $0x30] sm:$0x8]  ;;  %6752 = vmatpush.bf16.msrb.mxu3 %v8250_v2  ;;  %v9258_v2 = vpop.f32.mrf.mxu3 }
 0x41e   : > { %2952 = vmatmul.bf16.gmra.mxu2 %v2804_v17  ;;  %v7711_v17 = vrot.slane %v3714_v35, 11  ;;  %v4063_v23 = vunpack.c.l.b16 %v3734_v38  ;;  %v3741_v63 = vshrl.u32 %v3650_v11, 16  ;;  %v4669_v47 = vrot.slane %v4667_v60, 5  ;;  %v4581_v38 = vld [vmem:[#allocation4 + $0x34] sm:$0xf]  ;;  %9867 = vst [vmem:[#allocation35_spill] sm:$0xff] %v9258_v2 }
 0x41f   : > { %v5056_v30 = vpack.c.b16 %v5025_v62, %v5024_v20  ;;  %v4665_v41 = vrot.slane %v4664_v13, 4  ;;  %v3752_v32 = vrot.slane %v3750_v53, 7  ;;  %v4582_v62 = vld [vmem:[#allocation4 + $0x38] sm:$0xf]  ;;  %v3753_v15 = vshll.u32 %v3651_v14, 16 }
 0x420   : > { %v3725_v19 = vsel %vm8629_vm3, %v7711_v17, %v3724_v21  ;;  %v3736_v17 = vshrl.u32 %v3649_v22, 16  ;;  %v3743_v21 = vrot.slane %v3741_v63, 7  ;;  %v3744_v10 = vshll.u32 %v3650_v11, 16 }
 0x421   : > { %3605 = vmatmul.bf16.gmra.mxu3 %v3457_v0  ;;  %v4651_v0 = vshll.u32 %v4578_v43, 16  ;;  %v4062_v35 = vunpack.c.l.b16 %v3725_v19  ;;  %v3755_v20 = vor.u32 %v3753_v15, %v3752_v32  ;;  %v4681_v51 = vshll.u32 %v4582_v62, 16  ;;  %v9252_v19 = vpop.f32.mrf.mxu2 }
 0x422   : > { %4180 = vmatmul.bf16.vlgmr.msra.gmra.mxu1 %v4092_v24  ;;  %9866 = vst [vmem:[#allocation34_spill] sm:$0xff] %v9252_v19  ;;  %v3748_v13 = vrot.slane %v3743_v21, 4  ;;  %v4672_v60 = vshrl.u32 %v4581_v38, 16  ;;  %v4675_v29 = vshll.u32 %v4581_v38, 16  ;;  %v3652_v38 = vld [vmem:[#allocation4 + $0x40] sm:$0x8] }
 0x423   : > { %v4653_v24 = vrot.slane %v4651_v0, 5  ;;  %v4093_v43 = vpack.c.b16 %v4063_v23, %v4062_v35  ;;  %v4670_v0 = vsel %vm8652_vm6, %v4665_v41, %v4669_v47  ;;  %v7712_v23 = vrot.slane %v3736_v17, 11  ;;  %v3653_v41 = vld [vmem:[#allocation4 + $0x44] sm:$0xf] }
 0x424   : > { %v5027_v14 = vunpack.c.l.b16 %v4670_v0  ;;  %v3756_v11 = vsel %vm8629_vm3, %v3748_v13, %v3755_v20  ;;  %v4683_v53 = vrot.slane %v4681_v51, 5  ;;  %v4674_v32 = vrot.slane %v4672_v60, 4  ;;  %v4585_v13 = vld [vmem:[#allocation4 + $0x48] sm:$0xf] }
 0x425   : > { %v4654_v57 = vor.u32 %v4653_v24, %v4650_v9  ;;  %v3746_v24 = vor.u32 %v3744_v10, %v3743_v21  ;;  %v4065_v22 = vunpack.c.l.b16 %v3756_v11  ;;  %v3763_v0 = vshrl.u32 %v3653_v41, 16 }
 0x426   : > { %v3758_v60 = vshrl.u32 %v3652_v38, 16  ;;  %v4586_v38 = vld [vmem:[#allocation4 + $0x4c] sm:$0x1] }
 0x427   : > { %v4655_v59 = vrot.slane %v4654_v57, 4  ;;  %v3654_v57 = vld [vmem:[#allocation4 + $0x48] sm:$0xf] }
 0x428   : > { %v3772_v15 = vshrl.u32 %v3654_v57, 16 }
 0x429   : > { %v4660_v9 = vsel %vm8652_vm6, %v4655_v59, %v4659_v18  ;;  %v3747_v18 = vsel %vm8629_vm3, %v7712_v23, %v3746_v24 }
 0x42a   : > { %v5026_v63 = vunpack.c.l.b16 %v4660_v9  ;;  %v4064_v59 = vunpack.c.l.b16 %v3747_v18 }
 0x42c   : > { %v5057_v47 = vpack.c.b16 %v5027_v14, %v5026_v63  ;;  %v4705_v63 = vshll.u32 %v4585_v13, 16 }
 0x42e   : > { %4462 = vmatmul.bf16.vlgmr.msra.gmra.mxu2 %v8172_v5  ;;  %v4685_v5 = vshrl.u32 %v4582_v62, 16  ;;  %v4677_v62 = vrot.slane %v4675_v29, 5  ;;  %v3765_v29 = vrot.slane %v3763_v0, 7 }
 0x430   : > { %v4687_v35 = vrot.slane %v4685_v5, 4  ;;  %v4094_v5 = vpack.c.b16 %v4065_v22, %v4064_v59  ;;  %v4678_v9 = vor.u32 %v4677_v62, %v4674_v32  ;;  %v4584_v32 = vld [vmem:[#allocation4 + $0x44] sm:$0xf]  ;;  %v4707_v59 = vrot.slane %v4705_v63, 5  ;;  %v8241_v63 = vld [vmem:[#allocation11 + $0x1e8] sm:$0xff] }
 0x431   : > { %5144 = vmatmul.bf16.vlgmr.msra.gmra.mxu3 %v5056_v30  ;;  %v9250_v30 = vpop.f32.mrf.mxu1  ;;  %6071 = vmatpush.bf16.msrb.mxu2 %v8241_v63 }
 0x432   : > { %4185 = vmatmul.bf16.gmra.mxu1 %v4093_v43  ;;  %9865 = vst [vmem:[#allocation33_spill] sm:$0xff] %v9250_v30  ;;  %v4583_v43 = vld [vmem:[#allocation4 + $0x3c] sm:$0x1]  ;;  %v4688_v17 = vor.u32 %v4687_v35, %v4683_v53  ;;  %v3775_v35 = vshll.u32 %v3654_v57, 16  ;;  %v4679_v18 = vrot.slane %v4678_v9, 4  ;;  %v4696_v57 = vshrl.u32 %v4584_v32, 16 }
 0x433   : > { %v4691_v21 = vshll.u32 %v4583_v43, 16  ;;  %v4709_v43 = vshrl.u32 %v4585_v13, 16  ;;  %v8174_v9 = vld [vmem:[#allocation4 + $0x34] sm:$0xff] }
 0x434   : > { %v4689_v23 = vrot.slane %v4688_v17, 4  ;;  %v4684_v62 = vsel %vm8652_vm6, %v4679_v18, %v4683_v53  ;;  %v7713_v17 = vrot.slane %v3758_v60, 11  ;;  %v4715_v53 = vshll.u32 %v4586_v38, 16 }
 0x435   : > { %v4693_v24 = vrot.slane %v4691_v21, 5  ;;  %v4711_v0 = vrot.slane %v4709_v43, 4  ;;  %v5028_v13 = vunpack.c.l.b16 %v4684_v62  ;;  %v4698_v60 = vrot.slane %v4696_v57, 4  ;;  %v8233_v62 = vld [vmem:[#allocation11 + $0x1a8] sm:$0xff] }
 0x436   : > { %5789 = vmatpush.bf16.msrb.mxu1 %v8233_v62 }
 0x439   : > { %v2737_v10 = vpop.f32.mrf.mxu1 }
 0x43e   : > { %4467 = vmatmul.bf16.gmra.mxu2 %v8173_v26  ;;  %v3774_v26 = vrot.slane %v3772_v15, 7  ;;  %v3770_v15 = vrot.slane %v3765_v29, 4 }
 0x440   : > { %v3777_v22 = vor.u32 %v3775_v35, %v3774_v26  ;;  %v3656_v35 = vld [vmem:[#allocation4 + $0x54] sm:$0xf] }
 0x441   : > { %5149 = vmatmul.bf16.gmra.mxu3 %v5057_v47  ;;  %v2938_v20 = vpop.f32.mrf.mxu2  ;;  %v4694_v47 = vsel %vm8652_vm6, %v4689_v23, %v4693_v24  ;;  %v4712_v24 = vor.u32 %v4711_v0, %v4707_v59 }
 0x442   : > { %v2939_v51 = vadd.f32 %v2938_v20, %v2737_v10  ;;  %4190 = vmatmul.bf16.gmra.mxu1 %v4094_v5  ;;  %v3766_v10 = vshll.u32 %v3653_v41, 16  ;;  %v5029_v20 = vunpack.c.l.b16 %v4694_v47  ;;  %v3778_v5 = vsel %vm8629_vm3, %v3770_v15, %v3777_v22  ;;  %v3657_v41 = vld [vmem:[#allocation4 + $0x58] sm:$0xf] }
 0x443   : > { %v3794_v43 = vshrl.u32 %v3657_v41, 16  ;;  %v8249_v47 = vld [vmem:[#allocation11 + $0x228] sm:$0xff]  ;;  %v4717_v22 = vrot.slane %v4715_v53, 5  ;;  %v3788_v53 = vshll.u32 %v3656_v35, 16 }
 0x444   : > { %v3591_v14 = vpop.f32.mrf.mxu3  ;;  %v3768_v21 = vor.u32 %v3766_v10, %v3765_v29  ;;  %v5058_v26 = vpack.c.b16 %v5029_v20, %v5028_v13  ;;  %v4713_v10 = vrot.slane %v4712_v24, 4  ;;  %6753 = vmatpush.bf16.msrb.mxu3 %v8249_v47  ;;  %v4588_v20 = vld [vmem:[#allocation4 + $0x58] sm:$0xf]  ;;  %v4587_v13 = vld [vmem:[#allocation4 + $0x54] sm:$0xf] }
 0x445   : > { %v9262_v11 = vadd.f32 %v3591_v14, %v2939_v51  ;;  %v4699_v51 = vshll.u32 %v4584_v32, 16  ;;  %v4067_v14 = vunpack.c.l.b16 %v3778_v5  ;;  %v3785_v32 = vshrl.u32 %v3656_v35, 16 }
 0x446   : > { %v3769_v23 = vsel %vm8629_vm3, %v7713_v17, %v3768_v21  ;;  %v3655_v21 = vld [vmem:[#allocation4 + $0x50] sm:$0x8]  ;;  %v3796_v0 = vrot.slane %v3794_v43, 7  ;;  %v4718_v38 = vsel %vm8652_vm6, %v4713_v10, %v4717_v22  ;;  %v3797_v5 = vshll.u32 %v3657_v41, 16 }
 0x447   : > { %9868 = vst [vmem:[#allocation36_spill] sm:$0xff] %v9262_v11  ;;  %v4701_v29 = vrot.slane %v4699_v51, 5  ;;  %v4066_v18 = vunpack.c.l.b16 %v3769_v23  ;;  %v3780_v57 = vshrl.u32 %v3655_v21, 16  ;;  %v3787_v51 = vrot.slane %v3785_v32, 7  ;;  %v4589_v32 = vld [vmem:[#allocation4 + $0x5c] sm:$0x1] }
 0x448   : > { %v4729_v23 = vshll.u32 %v4588_v20, 16  ;;  %v4733_v24 = vshrl.u32 %v4588_v20, 16  ;;  %v4723_v47 = vshll.u32 %v4587_v13, 16 }
 0x449   : > { %v4095_v15 = vpack.c.b16 %v4067_v14, %v4066_v18  ;;  %v4702_v17 = vor.u32 %v4701_v29, %v4698_v60  ;;  %v5031_v60 = vunpack.c.l.b16 %v4718_v38  ;;  %v7714_v29 = vrot.slane %v3780_v57, 11 }
 0x44a   : > { %v3790_v63 = vor.u32 %v3788_v53, %v3787_v51  ;;  %v3792_v43 = vrot.slane %v3787_v51, 4  ;;  %v4720_v18 = vshrl.u32 %v4587_v13, 16  ;;  %v4731_v62 = vrot.slane %v4729_v23, 5  ;;  %v3659_v51 = vld [vmem:[#allocation4 + $0x64] sm:$0xf] }
 0x44b   : > { %v4735_v10 = vrot.slane %v4733_v24, 4  ;;  %v4725_v20 = vrot.slane %v4723_v47, 5  ;;  %v4739_v57 = vshll.u32 %v4589_v32, 16  ;;  %v3807_v13 = vshrl.u32 %v3659_v51, 16  ;;  %v4590_v32 = vld [vmem:[#allocation4 + $0x64] sm:$0xf] }
 0x44c   : > { %v3791_v21 = vsel %vm8629_vm3, %v7714_v29, %v3790_v63 }
 0x44d   : > { %v4736_v38 = vor.u32 %v4735_v10, %v4731_v62  ;;  %v3809_v63 = vrot.slane %v3807_v13, 7  ;;  %v3810_v10 = vshll.u32 %v3659_v51, 16 }
 0x44e   : > { %4472 = vmatmul.bf16.gmra.mxu2 %v8174_v9  ;;  %v4703_v9 = vrot.slane %v4702_v17, 4  ;;  %v3660_v17 = vld [vmem:[#allocation4 + $0x68] sm:$0xf] }
 0x44f   : > { %v4737_v53 = vrot.slane %v4736_v38, 4  ;;  %v3814_v38 = vrot.slane %v3809_v63, 4 }
 0x450   : > { %v4708_v14 = vsel %vm8652_vm6, %v4703_v9, %v4707_v59  ;;  %v4722_v59 = vrot.slane %v4720_v18, 4  ;;  %v4068_v9 = vunpack.c.l.b16 %v3791_v21  ;;  %v3819_v18 = vshll.u32 %v3660_v17, 16  ;;  %v9282_v21 = vpop.f32.mrf.mxu1 }
 0x451   : > { %5154 = vmatmul.bf16.gmra.mxu3 %v5058_v26  ;;  %v3799_v26 = vor.u32 %v3797_v5, %v3796_v0  ;;  %v5030_v22 = vunpack.c.l.b16 %v4708_v14  ;;  %v3816_v5 = vshrl.u32 %v3660_v17, 16  ;;  %v3658_v14 = vld [vmem:[#allocation4 + $0x60] sm:$0x8]  ;;  %9869 = vst [vmem:[#allocation37_spill] sm:$0xff] %v9282_v21  ;;  %v4747_v17 = vshll.u32 %v4590_v32, 16 }
 0x452   : > { %4195 = vmatmul.bf16.gmra.mxu1 %v4095_v15  ;;  %v8175_v15 = vld [vmem:[#allocation4 + $0x44] sm:$0xff]  ;;  %v4726_v24 = vor.u32 %v4725_v20, %v4722_v59  ;;  %v3802_v29 = vshrl.u32 %v3658_v14, 16  ;;  %v3812_v20 = vor.u32 %v3810_v10, %v3809_v63  ;;  %v3662_v63 = vld [vmem:[#allocation4 + $0x74] sm:$0xf]  ;;  %v3661_v21 = vld [vmem:[#allocation4 + $0x70] sm:$0x8] }
 0x453   : > { %v3800_v41 = vsel %vm8629_vm3, %v3792_v43, %v3799_v26  ;;  %v5059_v35 = vpack.c.b16 %v5031_v60, %v5030_v22  ;;  %v4741_v26 = vrot.slane %v4739_v57, 5  ;;  %v3818_v60 = vrot.slane %v3816_v5, 7  ;;  %v4591_v43 = vld [vmem:[#allocation4 + $0x68] sm:$0xf] }
 0x454   : > { %v4069_v0 = vunpack.c.l.b16 %v3800_v41  ;;  %v4727_v22 = vrot.slane %v4726_v24, 4  ;;  %v4744_v5 = vshrl.u32 %v4590_v32, 16  ;;  %v8248_v32 = vld [vmem:[#allocation11 + $0x220] sm:$0xff] }
 0x455   : > { %v4742_v47 = vsel %vm8652_vm6, %v4737_v53, %v4741_v26  ;;  %v3821_v41 = vor.u32 %v3819_v18, %v3818_v60  ;;  %v4592_v53 = vld [vmem:[#allocation4 + $0x6c] sm:$0x1]  ;;  %v3663_v26 = vld [vmem:[#allocation4 + $0x78] sm:$0xf]  ;;  %6754 = vmatpush.bf16.msrb.mxu3 %v8248_v32 }
 0x456   : > { %v4096_v23 = vpack.c.b16 %v4069_v0, %v4068_v9  ;;  %v4732_v59 = vsel %vm8652_vm6, %v4727_v22, %v4731_v62  ;;  %v7715_v0 = vrot.slane %v3802_v29, 11  ;;  %v5033_v57 = vunpack.c.l.b16 %v4742_v47  ;;  %v8240_v18 = vld [vmem:[#allocation11 + $0x1e0] sm:$0xff] }
 0x457   : > { %v3822_v9 = vsel %vm8629_vm3, %v3814_v38, %v3821_v41  ;;  %v5032_v24 = vunpack.c.l.b16 %v4732_v59  ;;  %v4749_v29 = vrot.slane %v4747_v17, 5  ;;  %v4763_v47 = vshll.u32 %v4592_v53, 16  ;;  %6072 = vmatpush.bf16.msrb.mxu2 %v8240_v18  ;;  %v4594_v17 = vld [vmem:[#allocation4 + $0x78] sm:$0xf] }
 0x458   : > { %v3813_v14 = vsel %vm8629_vm3, %v7715_v0, %v3812_v20  ;;  %v4071_v60 = vunpack.c.l.b16 %v3822_v9  ;;  %v3838_v10 = vshrl.u32 %v3663_v26, 16  ;;  %v8232_v0 = vld [vmem:[#allocation11 + $0x1a0] sm:$0xff]  ;;  %v3824_v9 = vshrl.u32 %v3661_v21, 16 }
 0x459   : > { %v5060_v62 = vpack.c.b16 %v5033_v57, %v5032_v24  ;;  %v4070_v41 = vunpack.c.l.b16 %v3813_v14  ;;  %v4765_v57 = vrot.slane %v4763_v47, 5  ;;  %v4593_v24 = vld [vmem:[#allocation4 + $0x74] sm:$0xf]  ;;  %5790 = vmatpush.bf16.msrb.mxu1 %v8232_v0  ;;  %v4777_v14 = vshll.u32 %v4594_v17, 16  ;;  %v9294_v47 = vpop.f32.mrf.mxu2  ;;  %v9296_v0 = vpop.f32.mrf.mxu3 }
 0x45a   : > { %9870 = vst [vmem:[#allocation38_spill] sm:$0xff] %v9294_v47  ;;  %v7716_v21 = vrot.slane %v3824_v9, 11  ;;  %v4771_v32 = vshll.u32 %v4593_v24, 16 }
 0x45b   : > { %v4097_v59 = vpack.c.b16 %v4071_v60, %v4070_v41  ;;  %9871 = vst [vmem:[#allocation39_spill] sm:$0xff] %v9296_v0 }
 0x45c   : > { %v4773_v9 = vrot.slane %v4771_v32, 5 }
 0x45e   : > { %4477 = vmatmul.bf16.gmra.mxu2 %v8175_v15  ;;  %v4753_v15 = vshll.u32 %v4591_v43, 16 }
 0x460   : > { %v4755_v13 = vrot.slane %v4753_v15, 5 }
 0x461   : > { %5159 = vmatmul.bf16.gmra.mxu3 %v5059_v35  ;;  %v4757_v35 = vshrl.u32 %v4591_v43, 16  ;;  %v4746_v43 = vrot.slane %v4744_v5, 4  ;;  %v3840_v5 = vrot.slane %v3838_v10, 7 }
 0x462   : > { %4200 = vmatmul.bf16.gmra.mxu1 %v4096_v23  ;;  %v8176_v23 = vld [vmem:[#allocation4 + $0x54] sm:$0xff] }
 0x463   : > { %v4759_v51 = vrot.slane %v4757_v35, 4  ;;  %v3829_v35 = vshrl.u32 %v3662_v63, 16  ;;  %v4750_v38 = vor.u32 %v4749_v29, %v4746_v43  ;;  %v3832_v43 = vshll.u32 %v3662_v63, 16 }
 0x465   : > { %v4760_v22 = vor.u32 %v4759_v51, %v4755_v13  ;;  %v3831_v51 = vrot.slane %v3829_v35, 7  ;;  %v4751_v53 = vrot.slane %v4750_v38, 4 }
 0x467   : > { %v4761_v20 = vrot.slane %v4760_v22, 4  ;;  %v4756_v18 = vsel %vm8652_vm6, %v4751_v53, %v4755_v13  ;;  %v4768_v22 = vshrl.u32 %v4593_v24, 16  ;;  %v3834_v41 = vor.u32 %v3832_v43, %v3831_v51  ;;  %v3666_v13 = vld [vmem:[#allocation4 + $0x88] sm:$0xf] }
 0x469   : > { %v4766_v60 = vsel %vm8652_vm6, %v4761_v20, %v4765_v57  ;;  %v4595_v20 = vld [vmem:[#allocation4 + $0x7c] sm:$0x1]  ;;  %v8177_v57 = vld [vmem:[#allocation4 + $0x64] sm:$0xff] }
 0x46a   : > { %v5035_v35 = vunpack.c.l.b16 %v4766_v60  ;;  %v3860_v60 = vshrl.u32 %v3666_v13, 16 }
 0x46e   : > { %4482 = vmatmul.bf16.gmra.mxu2 %v8176_v23  ;;  %v3841_v23 = vshll.u32 %v3663_v26, 16  ;;  %v3836_v26 = vrot.slane %v3831_v51, 4 }
 0x46f   : > { %v2742_v15 = vpop.f32.mrf.mxu1 }
 0x470   : > { %v3843_v29 = vor.u32 %v3841_v23, %v3840_v5  ;;  %v5034_v5 = vunpack.c.l.b16 %v4756_v18  ;;  %v4770_v23 = vrot.slane %v4768_v22, 4 }
 0x471   : > { %5164 = vmatmul.bf16.gmra.mxu3 %v5060_v62  ;;  %v4781_v62 = vshrl.u32 %v4594_v17, 16  ;;  %v3835_v17 = vsel %vm8629_vm3, %v7716_v21, %v3834_v41  ;;  %v3664_v21 = vld [vmem:[#allocation4 + $0x80] sm:$0x8]  ;;  %v3862_v41 = vrot.slane %v3860_v60, 7 }
 0x472   : > { %4205 = vmatmul.bf16.gmra.mxu1 %v4097_v59  ;;  %v4779_v59 = vrot.slane %v4777_v14, 5  ;;  %v3844_v63 = vsel %vm8629_vm3, %v3836_v26, %v3843_v29  ;;  %v5061_v51 = vpack.c.b16 %v5035_v35, %v5034_v5  ;;  %v4787_v14 = vshll.u32 %v4595_v20, 16  ;;  %v4597_v35 = vld [vmem:[#allocation4 + $0x88] sm:$0xf] }
 0x473   : > { %v4783_v38 = vrot.slane %v4781_v62, 4  ;;  %v4073_v24 = vunpack.c.l.b16 %v3844_v63  ;;  %v3665_v62 = vld [vmem:[#allocation4 + $0x84] sm:$0xf]  ;;  %v4072_v43 = vunpack.c.l.b16 %v3835_v17  ;;  %v4774_v26 = vor.u32 %v4773_v9, %v4770_v23 }
 0x474   : > { %v3851_v47 = vshrl.u32 %v3665_v62, 16  ;;  %v4789_v19 = vrot.slane %v4787_v14, 5  ;;  %v3863_v20 = vshll.u32 %v3666_v13, 16  ;;  %v3854_v17 = vshll.u32 %v3665_v62, 16 }
 0x475   : > { %v4784_v53 = vor.u32 %v4783_v38, %v4779_v59  ;;  %v4098_v2 = vpack.c.b16 %v4073_v24, %v4072_v43  ;;  %v3846_v38 = vshrl.u32 %v3664_v21, 16  ;;  %v4805_v9 = vshrl.u32 %v4597_v35, 16 }
 0x476   : > { %v3853_v63 = vrot.slane %v3851_v47, 7  ;;  %v3865_v23 = vor.u32 %v3863_v20, %v3862_v41 }
 0x477   : > { %v2744_v10 = vpop.f32.mrf.mxu1  ;;  %v4785_v11 = vrot.slane %v4784_v53, 4  ;;  %v4807_v62 = vrot.slane %v4805_v9, 4 }
 0x478   : > { %v3856_v14 = vor.u32 %v3854_v17, %v3853_v63  ;;  %v3858_v60 = vrot.slane %v3853_v63, 4  ;;  %v8239_v17 = vld [vmem:[#allocation11 + $0x1d8] sm:$0xff] }
 0x479   : > { %v4790_v5 = vsel %vm8652_vm6, %v4785_v11, %v4789_v19  ;;  %6073 = vmatpush.bf16.msrb.mxu2 %v8239_v17 }
 0x47a   : > { %v5037_v13 = vunpack.c.l.b16 %v4790_v5  ;;  %v3866_v19 = vsel %vm8629_vm3, %v3858_v60, %v3865_v23  ;;  %v3668_v5 = vld [vmem:[#allocation4 + $0x94] sm:$0xf] }
 0x47b   : > { %v4075_v63 = vunpack.c.l.b16 %v3866_v19  ;;  %v4600_v19 = vld [vmem:[#allocation4 + $0x98] sm:$0xf] }
 0x47c   : > { %v4829_v30 = vshrl.u32 %v4600_v19, 16 }
 0x47e   : > { %4487 = vmatmul.bf16.gmra.mxu2 %v8177_v57  ;;  %v4775_v57 = vrot.slane %v4774_v26, 4 }
 0x47f   : > { %v2747_v29 = vpop.f32.mrf.mxu1 }
 0x480   : > { %v4780_v53 = vsel %vm8652_vm6, %v4775_v57, %v4779_v59  ;;  %v3669_v59 = vld [vmem:[#allocation4 + $0x98] sm:$0xf] }
 0x481   : > { %5169 = vmatmul.bf16.gmra.mxu3 %v5061_v51  ;;  %v2943_v0 = vpop.f32.mrf.mxu2  ;;  %v5036_v41 = vunpack.c.l.b16 %v4780_v53  ;;  %v3885_v17 = vshll.u32 %v3669_v59, 16 }
 0x482   : > { %v2944_v18 = vadd.f32 %v2943_v0, %v2742_v15  ;;  %4210 = vmatmul.bf16.gmra.mxu1 %v4098_v2  ;;  %v4596_v15 = vld [vmem:[#allocation4 + $0x84] sm:$0xf]  ;;  %v4801_v0 = vshll.u32 %v4597_v35, 16  ;;  %v7717_v2 = vrot.slane %v3846_v38, 11  ;;  %v4598_v35 = vld [vmem:[#allocation4 + $0x8c] sm:$0x1] }
 0x483   : > { %v4792_v43 = vshrl.u32 %v4596_v15, 16  ;;  %v4795_v26 = vshll.u32 %v4596_v15, 16  ;;  %v4811_v15 = vshll.u32 %v4598_v35, 16 }
 0x484   : > { %v3596_v22 = vpop.f32.mrf.mxu3  ;;  %v9312_v11 = vrot.slane %v4801_v0, 5  ;;  %v3857_v38 = vsel %vm8629_vm3, %v7717_v2, %v3856_v14  ;;  %v3882_v0 = vshrl.u32 %v3669_v59, 16 }
 0x485   : > { %v9302_v32 = vadd.f32 %v3596_v22, %v2944_v18  ;;  %v8178_v22 = vld [vmem:[#allocation4 + $0x74] sm:$0xff]  ;;  %v4794_v20 = vrot.slane %v4792_v43, 4  ;;  %v4797_v57 = vrot.slane %v4795_v26, 5  ;;  %v4074_v9 = vunpack.c.l.b16 %v3857_v38  ;;  %v8231_v43 = vld [vmem:[#allocation11 + $0x198] sm:$0xff] }
 0x486   : > { %v4808_v23 = vor.u32 %v4807_v62, %v9312_v11  ;;  %v3884_v62 = vrot.slane %v3882_v0, 7  ;;  %5791 = vmatpush.bf16.msrb.mxu1 %v8231_v43  ;;  %v4601_v43 = vld [vmem:[#allocation4 + $0x9c] sm:$0x1] }
 0x487   : > { %9872 = vst [vmem:[#allocation40_spill] sm:$0xff] %v9302_v32  ;;  %v9306_v24 = vpop.f32.mrf.mxu1  ;;  %v4099_v14 = vpack.c.b16 %v4075_v63, %v4074_v9  ;;  %v4825_v32 = vshll.u32 %v4600_v19, 16 }
 0x489   : > { %v2945_v51 = vpop.f32.mrf.mxu2 }
 0x48a   : > { %v2946_v47 = vadd.f32 %v2945_v51, %v2744_v10  ;;  %v5062_v10 = vpack.c.b16 %v5037_v13, %v5036_v41  ;;  %v8247_v51 = vld [vmem:[#allocation11 + $0x218] sm:$0xff]  ;;  %v4798_v13 = vor.u32 %v4797_v57, %v4794_v20  ;;  %v4813_v41 = vrot.slane %v4811_v15, 5 }
 0x48b   : > { %6755 = vmatpush.bf16.msrb.mxu3 %v8247_v51  ;;  %v3876_v20 = vshll.u32 %v3668_v5, 16  ;;  %v3887_v57 = vor.u32 %v3885_v17, %v3884_v62  ;;  %v3671_v17 = vld [vmem:[#allocation4 + $0xa4] sm:$0xf] }
 0x48c   : > { %v3598_v18 = vpop.f32.mrf.mxu3 }
 0x48d   : > { %v9314_v21 = vadd.f32 %v3598_v18, %v2946_v47  ;;  %v3667_v47 = vld [vmem:[#allocation4 + $0x90] sm:$0x8]  ;;  %v3873_v18 = vshrl.u32 %v3668_v5, 16 }
 0x48e   : > { %4492 = vmatmul.bf16.gmra.mxu2 %v8178_v22  ;;  %v4809_v22 = vrot.slane %v4808_v23, 4  ;;  %v3868_v38 = vshrl.u32 %v3667_v47, 16 }
 0x48f   : > { %9873 = vst [vmem:[#allocation41_spill] sm:$0xff] %v9314_v21  ;;  %v2752_v60 = vpop.f32.mrf.mxu1  ;;  %v4599_v21 = vld [vmem:[#allocation4 + $0x94] sm:$0xf] }
 0x490   : > { %v4814_v63 = vsel %vm8652_vm6, %v4809_v22, %v4813_v41  ;;  %v7718_v15 = vrot.slane %v3868_v38, 11  ;;  %v4816_v0 = vshrl.u32 %v4599_v21, 16  ;;  %v4819_v9 = vshll.u32 %v4599_v21, 16  ;;  %v3672_v21 = vld [vmem:[#allocation4 + $0xa8] sm:$0xf] }
 0x491   : > { %5174 = vmatmul.bf16.gmra.mxu3 %v5062_v10  ;;  %v2948_v53 = vpop.f32.mrf.mxu2  ;;  %v3875_v10 = vrot.slane %v3873_v18, 7  ;;  %v9326_v18 = vrot.slane %v4825_v32, 5 }
 0x492   : > { %v2949_v2 = vadd.f32 %v2948_v53, %v2747_v29  ;;  %4215 = vmatmul.bf16.gmra.mxu1 %v4099_v14  ;;  %v4799_v29 = vrot.slane %v4798_v13, 4  ;;  %v5039_v13 = vunpack.c.l.b16 %v4814_v63  ;;  %v4818_v62 = vrot.slane %v4816_v0, 4 }
 0x493   : > { %v3878_v59 = vor.u32 %v3876_v20, %v3875_v10  ;;  %v3880_v47 = vrot.slane %v3875_v10, 4  ;;  %v4821_v32 = vrot.slane %v4819_v9, 5  ;;  %v4835_v10 = vshll.u32 %v4601_v43, 16 }
 0x494   : > { %v3601_v26 = vpop.f32.mrf.mxu3  ;;  %v4804_v23 = vsel %vm8652_vm6, %v4799_v29, %v9312_v11  ;;  %v8179_v11 = vld [vmem:[#allocation4 + $0x84] sm:$0xff]  ;;  %v3904_v29 = vshrl.u32 %v3672_v21, 16 }
 0x495   : > { %v9319_v35 = vadd.f32 %v3601_v26, %v2949_v2  ;;  %v4831_v2 = vrot.slane %v4829_v30, 4  ;;  %v3888_v5 = vsel %vm8629_vm3, %v3880_v47, %v3887_v57  ;;  %v5038_v22 = vunpack.c.l.b16 %v4804_v23 }
 0x496   : > { %v3879_v41 = vsel %vm8629_vm3, %v7718_v15, %v3878_v59  ;;  %v4077_v38 = vunpack.c.l.b16 %v3888_v5  ;;  %v3895_v47 = vshrl.u32 %v3671_v17, 16  ;;  %v4837_v9 = vrot.slane %v4835_v10, 5  ;;  %v3670_v59 = vld [vmem:[#allocation4 + $0xa0] sm:$0x8]  ;;  %v4603_v5 = vld [vmem:[#allocation4 + $0xa8] sm:$0xf] }
 0x497   : > { %v2754_v53 = vpop.f32.mrf.mxu1  ;;  %v4832_v30 = vor.u32 %v4831_v2, %v9326_v18  ;;  %v4076_v63 = vunpack.c.l.b16 %v3879_v41  ;;  %v3890_v43 = vshrl.u32 %v3670_v59, 16 }
 0x499   : > { %v2950_v51 = vpop.f32.mrf.mxu2  ;;  %v4833_v23 = vrot.slane %v4832_v30, 4  ;;  %v4100_v0 = vpack.c.b16 %v4077_v38, %v4076_v63  ;;  %v4602_v30 = vld [vmem:[#allocation4 + $0xa4] sm:$0xf]  ;;  %v7719_v63 = vrot.slane %v3890_v43, 11 }
 0x49a   : > { %v2951_v14 = vadd.f32 %v2950_v51, %v9306_v24  ;;  %v5063_v24 = vpack.c.b16 %v5039_v13, %v5038_v22  ;;  %v4822_v51 = vor.u32 %v4821_v32, %v4818_v62  ;;  %v3907_v22 = vshll.u32 %v3672_v21, 16 }
 0x49b   : > { %v4838_v62 = vsel %vm8652_vm6, %v4833_v23, %v4837_v9  ;;  %v3898_v32 = vshll.u32 %v3671_v17, 16 }
 0x49c   : > { %v3603_v19 = vpop.f32.mrf.mxu3  ;;  %v4823_v41 = vrot.slane %v4822_v51, 4  ;;  %v5041_v51 = vunpack.c.l.b16 %v4838_v62  ;;  %v3674_v62 = vld [vmem:[#allocation4 + $0xb4] sm:$0xf] }
 0x49d   : > { %v9331_v26 = vadd.f32 %v3603_v19, %v2951_v14  ;;  %v3906_v19 = vrot.slane %v3904_v29, 7 }
 0x49e   : > { %4497 = vmatmul.bf16.gmra.mxu2 %v8179_v11  ;;  %v3897_v11 = vrot.slane %v3895_v47, 7  ;;  %v4828_v29 = vsel %vm8652_vm6, %v4823_v41, %v9326_v18  ;;  %v4840_v47 = vshrl.u32 %v4602_v30, 16  ;;  %v3675_v18 = vld [vmem:[#allocation4 + $0xb8] sm:$0xf] }
 0x49f   : > { %v4181_v57 = vpop.f32.mrf.mxu1 }
 0x4a0   : > { %v4261_v15 = vadd.f32 %v4181_v57, %v8825_v42  ;;  %v4849_v42 = vshll.u32 %v4603_v5, 16  ;;  %v3902_v57 = vrot.slane %v3897_v11, 4 }
 0x4a1   : > { %5179 = vmatmul.bf16.gmra.mxu3 %v5063_v24  ;;  %v2953_v20 = vpop.f32.mrf.mxu2  ;;  %v4853_v24 = vshrl.u32 %v4603_v5, 16  ;;  %v4604_v5 = vld [vmem:[#allocation4 + $0xac] sm:$0x1] }
 0x4a2   : > { %v2954_v14 = vadd.f32 %v2953_v20, %v2752_v60  ;;  %4220 = vmatmul.bf16.gmra.mxu1 %v4100_v0  ;;  %v3909_v60 = vor.u32 %v3907_v22, %v3906_v19  ;;  %v3900_v20 = vor.u32 %v3898_v32, %v3897_v11  ;;  %v9348_v0 = vrot.slane %v4849_v42, 5  ;;  %v8238_v32 = vld [vmem:[#allocation11 + $0x1d0] sm:$0xff] }
 0x4a3   : > { %v4855_v9 = vrot.slane %v4853_v24, 4  ;;  %v5040_v19 = vunpack.c.l.b16 %v4828_v29  ;;  %v4842_v22 = vrot.slane %v4840_v47, 4  ;;  %v3926_v42 = vshrl.u32 %v3675_v18, 16  ;;  %6074 = vmatpush.bf16.msrb.mxu2 %v8238_v32 }
 0x4a4   : > { %v3606_v2 = vpop.f32.mrf.mxu3  ;;  %v3910_v17 = vsel %vm8629_vm3, %v3902_v57, %v3909_v60  ;;  %v3901_v43 = vsel %vm8629_vm3, %v7719_v63, %v3900_v20  ;;  %v2881_v29 = vadd.f32 %v8852_v50, %v8850_v61  ;;  %v3917_v20 = vshrl.u32 %v3674_v62, 16 }
 0x4a5   : > { %v9337_v13 = vadd.f32 %v3606_v2, %v2954_v14  ;;  %v4843_v14 = vshll.u32 %v4602_v30, 16  ;;  %v8180_v2 = vld [vmem:[#allocation4 + $0x94] sm:$0xff]  ;;  %v4079_v11 = vunpack.c.l.b16 %v3910_v17  ;;  %v4856_v60 = vor.u32 %v4855_v9, %v9348_v0  ;;  %v8230_v17 = vld [vmem:[#allocation11 + $0x190] sm:$0xff] }
 0x4a6   : > { %v4859_v30 = vshll.u32 %v4604_v5, 16  ;;  %v4078_v24 = vunpack.c.l.b16 %v3901_v43  ;;  %v3928_v5 = vrot.slane %v3926_v42, 7  ;;  %v4606_v43 = vld [vmem:[#allocation4 + $0xb8] sm:$0xf]  ;;  %v3919_v50 = vrot.slane %v3917_v20, 7  ;;  %5792 = vmatpush.bf16.msrb.mxu1 %v8230_v17 }
 0x4a7   : > { %v9341_v10 = vpop.f32.mrf.mxu1  ;;  %v4845_v41 = vrot.slane %v4843_v14, 5  ;;  %v3929_v32 = vshll.u32 %v3675_v18, 16 }
 0x4a8   : > { %v4101_v47 = vpack.c.b16 %v4079_v11, %v4078_v24 }
 0x4a9   : > { %v2955_v38 = vpop.f32.mrf.mxu2  ;;  %v4846_v14 = vor.u32 %v4845_v41, %v4842_v22  ;;  %v4873_v22 = vshll.u32 %v4606_v43, 16  ;;  %v4877_v41 = vshrl.u32 %v4606_v43, 16 }
 0x4aa   : > { %v2956_v21 = vadd.f32 %v2955_v38, %v2754_v53  ;;  %v5064_v53 = vpack.c.b16 %v5041_v51, %v5040_v19  ;;  %v8246_v38 = vld [vmem:[#allocation11 + $0x210] sm:$0xff]  ;;  %v4861_v19 = vrot.slane %v4859_v30, 5  ;;  %v3931_v30 = vor.u32 %v3929_v32, %v3928_v5 }
 0x4ab   : > { %6756 = vmatpush.bf16.msrb.mxu3 %v8246_v38  ;;  %v4847_v11 = vrot.slane %v4846_v14, 4  ;;  %v9369_v17 = vrot.slane %v4873_v22, 5  ;;  %v3678_v5 = vld [vmem:[#allocation4 + $0xc8] sm:$0xf]  ;;  %v3677_v22 = vld [vmem:[#allocation4 + $0xc4] sm:$0xf] }
 0x4ac   : > { %v3608_v23 = vpop.f32.mrf.mxu3 }
 0x4ad   : > { %v9350_v59 = vadd.f32 %v3608_v23, %v2956_v21  ;;  %v3673_v23 = vld [vmem:[#allocation4 + $0xb0] sm:$0x8]  ;;  %v4852_v38 = vsel %vm8652_vm6, %v4847_v11, %v9348_v0  ;;  %v8181_v0 = vld [vmem:[#allocation4 + $0xa4] sm:$0xff] }
 0x4ae   : > { %4502 = vmatmul.bf16.gmra.mxu2 %v8180_v2  ;;  %v4857_v2 = vrot.slane %v4856_v60, 4  ;;  %v3912_v61 = vshrl.u32 %v3673_v23, 16  ;;  %v3920_v60 = vshll.u32 %v3674_v62, 16  ;;  %v4607_v23 = vld [vmem:[#allocation4 + $0xbc] sm:$0x1]  ;;  %v4879_v62 = vrot.slane %v4877_v41, 4 }
 0x4af   : > { %v4186_v63 = vpop.f32.mrf.mxu1  ;;  %v4883_v32 = vshll.u32 %v4607_v23, 16  ;;  %v3948_v41 = vshrl.u32 %v3678_v5, 16 }
 0x4b0   : > { %v9358_v51 = vadd.f32 %v4186_v63, %v8860_v4  ;;  %v3612_v4 = vadd.f32 %v8855_v52, %v2881_v29  ;;  %v4862_v24 = vsel %vm8652_vm6, %v4857_v2, %v4861_v19  ;;  %v7720_v20 = vrot.slane %v3912_v61, 11 }
 0x4b1   : > { %5184 = vmatmul.bf16.gmra.mxu3 %v5064_v53  ;;  %v4463_v57 = vpop.f32.mrf.mxu2  ;;  %v3924_v52 = vrot.slane %v3919_v50, 4  ;;  %v5043_v14 = vunpack.c.l.b16 %v4862_v24  ;;  %v5042_v19 = vunpack.c.l.b16 %v4852_v38  ;;  %v4880_v11 = vor.u32 %v4879_v62, %v9369_v17 }
 0x4b2   : > { %v4543_v21 = vadd.f32 %v4463_v57, %v4261_v15  ;;  %4225 = vmatmul.bf16.gmra.mxu1 %v4101_v47  ;;  %v4605_v15 = vld [vmem:[#allocation4 + $0xb4] sm:$0xf]  ;;  %v4262_v42 = vadd.f32 %v9341_v10, %v3612_v4  ;;  %v3950_v23 = vrot.slane %v3948_v41, 7 }
 0x4b3   : > { %v4864_v57 = vshrl.u32 %v4605_v15, 16  ;;  %v4867_v29 = vshll.u32 %v4605_v15, 16  ;;  %v3932_v10 = vsel %vm8629_vm3, %v3924_v52, %v3931_v30  ;;  %v5065_v15 = vpack.c.b16 %v5043_v14, %v5042_v19 }
 0x4b4   : > { %v5145_v9 = vpop.f32.mrf.mxu3  ;;  %v4081_v4 = vunpack.c.l.b16 %v3932_v10 }
 0x4b5   : > { %v9360_v53 = vadd.f32 %v5145_v9, %v4543_v21  ;;  %v3922_v21 = vor.u32 %v3920_v60, %v3919_v50  ;;  %v4866_v61 = vrot.slane %v4864_v57, 4  ;;  %v4869_v50 = vrot.slane %v4867_v29, 5 }
 0x4b6   : > { %v2886_v60 = vadd.f32 %v8873_v55, %v8871_v28  ;;  %v4881_v29 = vrot.slane %v4880_v11, 4  ;;  %v3951_v55 = vshll.u32 %v3678_v5, 16 }
 0x4b7   : > { %v4188_v63 = vpop.f32.mrf.mxu1  ;;  %v3923_v43 = vsel %vm8629_vm3, %v7720_v20, %v3922_v21  ;;  %v4870_v38 = vor.u32 %v4869_v50, %v4866_v61  ;;  %v3939_v20 = vshrl.u32 %v3677_v22, 16  ;;  %v4608_v61 = vld [vmem:[#allocation4 + $0xc4] sm:$0xf] }
 0x4b8   : > { %v4080_v24 = vunpack.c.l.b16 %v3923_v43  ;;  %v3942_v43 = vshll.u32 %v3677_v22, 16 }
 0x4b9   : > { %v4465_v18 = vpop.f32.mrf.mxu2  ;;  %v3941_v28 = vrot.slane %v3939_v20, 7  ;;  %v4871_v19 = vrot.slane %v4870_v38, 4  ;;  %v4891_v38 = vshll.u32 %v4608_v61, 16 }
 0x4ba   : > { %v4544_v47 = vadd.f32 %v4465_v18, %v4262_v42  ;;  %v4885_v18 = vrot.slane %v4883_v32, 5  ;;  %v4102_v52 = vpack.c.b16 %v4081_v4, %v4080_v24 }
 0x4bb   : > { %v4876_v41 = vsel %vm8652_vm6, %v4871_v19, %v9369_v17  ;;  %v3944_v24 = vor.u32 %v3942_v43, %v3941_v28  ;;  %v3681_v17 = vld [vmem:[#allocation4 + $0xd8] sm:$0xf] }
 0x4bc   : > { %v5147_v9 = vpop.f32.mrf.mxu3  ;;  %v3970_v43 = vshrl.u32 %v3681_v17, 16 }
 0x4bd   : > { %v9373_v2 = vadd.f32 %v5147_v9, %v4544_v47  ;;  %v3676_v47 = vld [vmem:[#allocation4 + $0xc0] sm:$0x8]  ;;  %v4609_v9 = vld [vmem:[#allocation4 + $0xc8] sm:$0xf] }
 0x4be   : > { %4507 = vmatmul.bf16.gmra.mxu2 %v8181_v0  ;;  %v3934_v10 = vshrl.u32 %v3676_v47, 16  ;;  %v3614_v0 = vadd.f32 %v8879_v36, %v2886_v60  ;;  %v4897_v50 = vshll.u32 %v4609_v9, 16  ;;  %v4901_v32 = vshrl.u32 %v4609_v9, 16  ;;  %v4610_v47 = vld [vmem:[#allocation4 + $0xcc] sm:$0x1] }
 0x4bf   : > { %v4191_v42 = vpop.f32.mrf.mxu1  ;;  %v3946_v36 = vrot.slane %v3941_v28, 4  ;;  %v4893_v28 = vrot.slane %v4891_v38, 5 }
 0x4c0   : > { %v4265_v21 = vadd.f32 %v4191_v42, %v8887_v16  ;;  %v3953_v16 = vor.u32 %v3951_v55, %v3950_v23  ;;  %v7721_v5 = vrot.slane %v3934_v10, 11  ;;  %v4888_v42 = vshrl.u32 %v4608_v61, 16  ;;  %v3680_v55 = vld [vmem:[#allocation4 + $0xd4] sm:$0xf]  ;;  %v8245_v61 = vld [vmem:[#allocation11 + $0x208] sm:$0xff] }
 0x4c1   : > { %5189 = vmatmul.bf16.gmra.mxu3 %v5065_v15  ;;  %v4468_v30 = vpop.f32.mrf.mxu2  ;;  %v4264_v15 = vadd.f32 %v4188_v63, %v3614_v0  ;;  %v9394_v20 = vrot.slane %v4897_v50, 5  ;;  %v4903_v63 = vrot.slane %v4901_v32, 4  ;;  %v8237_v0 = vld [vmem:[#allocation11 + $0x1c8] sm:$0xff]  ;;  %v2891_v50 = vadd.f32 %v8917_v45, %v8915_v44 }
 0x4c2   : > { %v4545_v57 = vadd.f32 %v4468_v30, %v9358_v51  ;;  %4230 = vmatmul.bf16.gmra.mxu1 %v4102_v52  ;;  %v4886_v51 = vsel %vm8652_vm6, %v4881_v29, %v4885_v18  ;;  %v3954_v18 = vsel %vm8629_vm3, %v3946_v36, %v3953_v16  ;;  %v8182_v52 = vld [vmem:[#allocation4 + $0xb4] sm:$0xff]  ;;  %v5044_v29 = vunpack.c.l.b16 %v4876_v41  ;;  %6075 = vmatpush.bf16.msrb.mxu2 %v8237_v0 }
 0x4c3   : > { %v5045_v30 = vunpack.c.l.b16 %v4886_v51  ;;  %v4083_v9 = vunpack.c.l.b16 %v3954_v18  ;;  %v4890_v10 = vrot.slane %v4888_v42, 4  ;;  %v4904_v19 = vor.u32 %v4903_v63, %v9394_v20  ;;  %6757 = vmatpush.bf16.msrb.mxu3 %v8245_v61  ;;  %v4612_v63 = vld [vmem:[#allocation4 + $0xd8] sm:$0xf] }
 0x4c4   : > { %v5150_v14 = vpop.f32.mrf.mxu3  ;;  %v4907_v51 = vshll.u32 %v4610_v47, 16  ;;  %v3972_v18 = vrot.slane %v3970_v43, 7 }
 0x4c5   : > { %v9382_v62 = vadd.f32 %v5150_v14, %v4545_v57  ;;  %v3945_v14 = vsel %vm8629_vm3, %v7721_v5, %v3944_v24  ;;  %v5066_v23 = vpack.c.b16 %v5045_v30, %v5044_v29  ;;  %v4894_v36 = vor.u32 %v4893_v28, %v4890_v10  ;;  %v8229_v30 = vld [vmem:[#allocation11 + $0x188] sm:$0xff] }
 0x4c6   : > { %v4082_v16 = vunpack.c.l.b16 %v3945_v14  ;;  %v4905_v38 = vrot.slane %v4904_v19, 4  ;;  %v3973_v29 = vshll.u32 %v3681_v17, 16  ;;  %5793 = vmatpush.bf16.msrb.mxu1 %v8229_v30  ;;  %v4921_v14 = vshll.u32 %v4612_v63, 16  ;;  %v3683_v30 = vld [vmem:[#allocation4 + $0xe4] sm:$0xf] }
 0x4c7   : > { %v9387_v11 = vpop.f32.mrf.mxu1  ;;  %v4895_v47 = vrot.slane %v4894_v36, 4  ;;  %v3964_v10 = vshll.u32 %v3680_v55, 16 }
 0x4c8   : > { %v4103_v24 = vpack.c.b16 %v4083_v9, %v4082_v16  ;;  %v3975_v28 = vor.u32 %v3973_v29, %v3972_v18  ;;  %v3684_v29 = vld [vmem:[#allocation4 + $0xe8] sm:$0xf] }
 0x4c9   : > { %v4470_v4 = vpop.f32.mrf.mxu2  ;;  %v4900_v19 = vsel %vm8652_vm6, %v4895_v47, %v9394_v20  ;;  %v8183_v20 = vld [vmem:[#allocation4 + $0xc4] sm:$0xff]  ;;  %v3682_v47 = vld [vmem:[#allocation4 + $0xe0] sm:$0x8] }
 0x4ca   : > { %v4546_v60 = vadd.f32 %v4470_v4, %v4264_v15  ;;  %v3961_v4 = vshrl.u32 %v3680_v55, 16 }
 0x4cc   : > { %v5152_v22 = vpop.f32.mrf.mxu3  ;;  %v3963_v45 = vrot.slane %v3961_v4, 7  ;;  %v4613_v4 = vld [vmem:[#allocation4 + $0xdc] sm:$0x1] }
 0x4cd   : > { %v9396_v57 = vadd.f32 %v5152_v22, %v4546_v60  ;;  %v3679_v60 = vld [vmem:[#allocation4 + $0xd0] sm:$0x8]  ;;  %v4909_v22 = vrot.slane %v4907_v51, 5  ;;  %v4931_v18 = vshll.u32 %v4613_v4, 16  ;;  %v3986_v4 = vshll.u32 %v3683_v30, 16 }
 0x4ce   : > { %4512 = vmatmul.bf16.gmra.mxu2 %v8182_v52  ;;  %v3956_v44 = vshrl.u32 %v3679_v60, 16  ;;  %v3966_v61 = vor.u32 %v3964_v10, %v3963_v45  ;;  %v5046_v60 = vunpack.c.l.b16 %v4900_v19 }
 0x4cf   : > { %v4196_v15 = vpop.f32.mrf.mxu1  ;;  %v4910_v9 = vsel %vm8652_vm6, %v4905_v38, %v4909_v22 }
 0x4d0   : > { %v9404_v5 = vadd.f32 %v4196_v15, %v8927_v6  ;;  %v3616_v6 = vadd.f32 %v8919_v54, %v2891_v50  ;;  %v7722_v16 = vrot.slane %v3956_v44, 11  ;;  %v3968_v54 = vrot.slane %v3963_v45, 4 }
 0x4d1   : > { %5194 = vmatmul.bf16.gmra.mxu3 %v5066_v23  ;;  %v4473_v32 = vpop.f32.mrf.mxu2  ;;  %v4925_v23 = vshrl.u32 %v4612_v63, 16  ;;  %v5047_v15 = vunpack.c.l.b16 %v4910_v9 }
 0x4d2   : > { %v4547_v41 = vadd.f32 %v4473_v32, %v4265_v21  ;;  %4235 = vmatmul.bf16.gmra.mxu1 %v4103_v24  ;;  %v4611_v21 = vld [vmem:[#allocation4 + $0xd4] sm:$0xf]  ;;  %v4266_v0 = vadd.f32 %v9387_v11, %v3616_v6  ;;  %v3976_v11 = vsel %vm8629_vm3, %v3968_v54, %v3975_v28  ;;  %v4933_v28 = vrot.slane %v4931_v18, 5 }
 0x4d3   : > { %v4912_v51 = vshrl.u32 %v4611_v21, 16  ;;  %v4915_v50 = vshll.u32 %v4611_v21, 16  ;;  %v4927_v55 = vrot.slane %v4925_v23, 4  ;;  %v5067_v63 = vpack.c.b16 %v5047_v15, %v5046_v60 }
 0x4d4   : > { %v5155_v42 = vpop.f32.mrf.mxu3  ;;  %v4085_v44 = vunpack.c.l.b16 %v3976_v11  ;;  %v3983_v21 = vshrl.u32 %v3683_v30, 16  ;;  %v3978_v54 = vshrl.u32 %v3682_v47, 16  ;;  %v4615_v11 = vld [vmem:[#allocation4 + $0xe8] sm:$0xf] }
 0x4d5   : > { %v9406_v52 = vadd.f32 %v5155_v42, %v4547_v41  ;;  %v9415_v41 = vrot.slane %v4921_v14, 5  ;;  %v3967_v42 = vsel %vm8629_vm3, %v7722_v16, %v3966_v61  ;;  %v4914_v38 = vrot.slane %v4912_v51, 4 }
 0x4d6   : > { %v4917_v22 = vrot.slane %v4915_v50, 5  ;;  %v4084_v6 = vunpack.c.l.b16 %v3967_v42  ;;  %v2896_v14 = vadd.f32 %v8949_v39, %v8947_v27  ;;  %v3985_v50 = vrot.slane %v3983_v21, 7 }
 0x4d7   : > { %v4198_v43 = vpop.f32.mrf.mxu1  ;;  %v4928_v45 = vor.u32 %v4927_v55, %v9415_v41  ;;  %v3995_v39 = vshll.u32 %v3684_v29, 16 }
 0x4d8   : > { %v4918_v10 = vor.u32 %v4917_v22, %v4914_v38  ;;  %v3618_v55 = vadd.f32 %v8955_v40, %v2896_v14  ;;  %v3988_v60 = vor.u32 %v3986_v4, %v3985_v50  ;;  %v3990_v42 = vrot.slane %v3985_v50, 4  ;;  %v3685_v4 = vld [vmem:[#allocation4 + $0xf0] sm:$0x8] }
 0x4d9   : > { %v4475_v17 = vpop.f32.mrf.mxu2  ;;  %v4929_v16 = vrot.slane %v4928_v45, 4  ;;  %v4945_v40 = vshll.u32 %v4615_v11, 16  ;;  %v4949_v45 = vshrl.u32 %v4615_v11, 16 }
 0x4da   : > { %v4548_v32 = vadd.f32 %v4475_v17, %v4266_v0  ;;  %v3992_v0 = vshrl.u32 %v3684_v29, 16  ;;  %v4104_v17 = vpack.c.b16 %v4085_v44, %v4084_v6  ;;  %v4268_v22 = vadd.f32 %v4198_v43, %v3618_v55  ;;  %v3686_v6 = vld [vmem:[#allocation4 + $0xf4] sm:$0xf] }
 0x4dc   : > { %v5157_v24 = vpop.f32.mrf.mxu3  ;;  %v3994_v27 = vrot.slane %v3992_v0, 7 }
 0x4dd   : > { %v9419_v36 = vadd.f32 %v5157_v24, %v4548_v32  ;;  %v4614_v32 = vld [vmem:[#allocation4 + $0xe4] sm:$0xf]  ;;  %v4919_v24 = vrot.slane %v4918_v10, 4 }
 0x4de   : > { %4517 = vmatmul.bf16.gmra.mxu2 %v8183_v20  ;;  %v7723_v20 = vrot.slane %v3978_v54, 11  ;;  %v4939_v38 = vshll.u32 %v4614_v32, 16  ;;  %v3997_v44 = vor.u32 %v3995_v39, %v3994_v27  ;;  %v8236_v27 = vld [vmem:[#allocation11 + $0x1c0] sm:$0xff] }
 0x4df   : > { %v4201_v9 = vpop.f32.mrf.mxu1  ;;  %v4924_v30 = vsel %vm8652_vm6, %v4919_v24, %v9415_v41  ;;  %v3687_v41 = vld [vmem:[#allocation4 + $0xf8] sm:$0xf]  ;;  %v2901_v24 = vadd.f32 %v8987_v7, %v8985_v37  ;;  %6076 = vmatpush.bf16.msrb.mxu2 %v8236_v27 }
 0x4e0   : > { %v4269_v51 = vadd.f32 %v4201_v9, %v8963_v49  ;;  %v4936_v49 = vshrl.u32 %v4614_v32, 16  ;;  %v3989_v14 = vsel %vm8629_vm3, %v7723_v20, %v3988_v60  ;;  %v3998_v43 = vsel %vm8629_vm3, %v3990_v42, %v3997_v44  ;;  %v4616_v32 = vld [vmem:[#allocation4 + $0xec] sm:$0x1] }
 0x4e1   : > { %5199 = vmatmul.bf16.gmra.mxu3 %v5067_v63  ;;  %v4478_v23 = vpop.f32.mrf.mxu2  ;;  %v4941_v9 = vrot.slane %v4939_v38, 5  ;;  %v5048_v0 = vunpack.c.l.b16 %v4924_v30  ;;  %v4086_v54 = vunpack.c.l.b16 %v3989_v14  ;;  %v4087_v50 = vunpack.c.l.b16 %v3998_v43  ;;  %v4618_v14 = vld [vmem:[#allocation4 + $0xf8] sm:$0xf] }
 0x4e2   : > { %v4549_v19 = vadd.f32 %v4478_v23, %v9404_v5  ;;  %4240 = vmatmul.bf16.gmra.mxu1 %v4104_v17  ;;  %v4934_v5 = vsel %vm8652_vm6, %v4929_v16, %v4933_v28  ;;  %v4938_v23 = vrot.slane %v4936_v49, 4  ;;  %v8184_v28 = vld [vmem:[#allocation4 + $0xd4] sm:$0xff]  ;;  %v4951_v17 = vrot.slane %v4949_v45, 4 }
 0x4e3   : > { %v5049_v21 = vunpack.c.l.b16 %v4934_v5  ;;  %v4005_v16 = vshrl.u32 %v3686_v6, 16  ;;  %v4014_v55 = vshrl.u32 %v3687_v41, 16  ;;  %v8244_v5 = vld [vmem:[#allocation11 + $0x200] sm:$0xff]  ;;  %v4955_v60 = vshll.u32 %v4616_v32, 16 }
 0x4e4   : > { %v5160_v61 = vpop.f32.mrf.mxu3  ;;  %v4942_v39 = vor.u32 %v4941_v9, %v4938_v23  ;;  %v4000_v42 = vshrl.u32 %v3685_v4, 16  ;;  %v4105_v30 = vpack.c.b16 %v4087_v50, %v4086_v54  ;;  %v4008_v44 = vshll.u32 %v3686_v6, 16  ;;  %6758 = vmatpush.bf16.msrb.mxu3 %v8244_v5  ;;  %v8228_v45 = vld [vmem:[#allocation11 + $0x180] sm:$0xff] }
 0x4e5   : > { %v9428_v15 = vadd.f32 %v5160_v61, %v4549_v19  ;;  %v4947_v19 = vrot.slane %v4945_v40, 5  ;;  %v5068_v61 = vpack.c.b16 %v5049_v21, %v5048_v0  ;;  %v4007_v38 = vrot.slane %v4005_v16, 7  ;;  %v4617_v40 = vld [vmem:[#allocation4 + $0xf4] sm:$0xf]  ;;  %5794 = vmatpush.bf16.msrb.mxu1 %v8228_v45 }
 0x4e6   : > { %v4943_v21 = vrot.slane %v4942_v39, 4  ;;  %v4016_v37 = vrot.slane %v4014_v55, 7  ;;  %v4017_v7 = vshll.u32 %v3687_v41, 16  ;;  %v3620_v43 = vadd.f32 %v8993_v56, %v2901_v24  ;;  %v3689_v24 = vld [vmem:[#allocation4 + $0x104] sm:$0xf] }
 0x4e7   : > { %v9433_v63 = vpop.f32.mrf.mxu1  ;;  %v4952_v20 = vor.u32 %v4951_v17, %v4947_v19  ;;  %v4957_v9 = vrot.slane %v4955_v60, 5  ;;  %v4012_v6 = vrot.slane %v4007_v38, 4  ;;  %v4963_v0 = vshll.u32 %v4617_v40, 16  ;;  %v8185_v60 = vld [vmem:[#allocation4 + $0xe4] sm:$0xff] }
 0x4e8   : > { %v4948_v17 = vsel %vm8652_vm6, %v4943_v21, %v4947_v19  ;;  %v4019_v16 = vor.u32 %v4017_v7, %v4016_v37  ;;  %v4973_v41 = vshrl.u32 %v4618_v14, 16  ;;  %v4270_v54 = vadd.f32 %v9433_v63, %v3620_v43 }
 0x4e9   : > { %v4480_v18 = vpop.f32.mrf.mxu2  ;;  %v4953_v23 = vrot.slane %v4952_v20, 4  ;;  %v5050_v27 = vunpack.c.l.b16 %v4948_v17  ;;  %v2906_v43 = vadd.f32 %v9025_v34, %v9023_v31 }
 0x4ea   : > { %v4550_v29 = vadd.f32 %v4480_v18, %v4268_v22  ;;  %v4020_v19 = vsel %vm8629_vm3, %v4012_v6, %v4019_v16  ;;  %v4975_v20 = vrot.slane %v4973_v41, 4 }
 0x4eb   : > { %v4958_v56 = vsel %vm8652_vm6, %v4953_v23, %v4957_v9  ;;  %v4089_v45 = vunpack.c.l.b16 %v4020_v19  ;;  %v3622_v31 = vadd.f32 %v9031_v12, %v2906_v43  ;;  %v8186_v43 = vld [vmem:[#allocation4 + $0xf4] sm:$0xff] }
 0x4ec   : > { %v5162_v47 = vpop.f32.mrf.mxu3 }
 0x4ed   : > { %v9442_v10 = vadd.f32 %v5162_v47, %v4550_v29 }
 0x4ee   : > { %4522 = vmatmul.bf16.gmra.mxu2 %v8184_v28  ;;  %v4010_v28 = vor.u32 %v4008_v44, %v4007_v38  ;;  %v4619_v38 = vld [vmem:[#allocation4 + $0xfc] sm:$0x1] }
 0x4ef   : > { %v4206_v49 = vpop.f32.mrf.mxu1  ;;  %v4979_v7 = vshll.u32 %v4619_v38, 16 }
 0x4f0   : > { %v4271_v18 = vadd.f32 %v4206_v49, %v9001_v3  ;;  %v7724_v3 = vrot.slane %v4000_v42, 11  ;;  %v5051_v42 = vunpack.c.l.b16 %v4958_v56 }
 0x4f1   : > { %5204 = vmatmul.bf16.gmra.mxu3 %v5068_v61  ;;  %v4483_v11 = vpop.f32.mrf.mxu2  ;;  %v4969_v61 = vshll.u32 %v4618_v14, 16  ;;  %v4981_v56 = vrot.slane %v4979_v7, 5 }
 0x4f2   : > { %v4551_v22 = vadd.f32 %v4483_v11, %v4269_v51  ;;  %4245 = vmatmul.bf16.gmra.mxu1 %v4105_v30  ;;  %v4960_v51 = vshrl.u32 %v4617_v40, 16  ;;  %v4011_v39 = vsel %vm8629_vm3, %v7724_v3, %v4010_v28  ;;  %v4965_v11 = vrot.slane %v4963_v0, 5 }
 0x4f3   : > { %v4971_v49 = vrot.slane %v4969_v61, 5  ;;  %v4027_v30 = vshrl.u32 %v3689_v24, 16  ;;  %v5069_v44 = vpack.c.b16 %v5051_v42, %v5050_v27  ;;  %v4088_v40 = vunpack.c.l.b16 %v4011_v39  ;;  %v4620_v61 = vld [vmem:[#allocation4 + $0x104] sm:$0xf]  ;;  %v4621_v27 = vld [vmem:[#allocation4 + $0x108] sm:$0xf] }
 0x4f4   : > { %v5165_v29 = vpop.f32.mrf.mxu3  ;;  %v4962_v55 = vrot.slane %v4960_v51, 4  ;;  %v4030_v28 = vshll.u32 %v3689_v24, 16 }
 0x4f5   : > { %v9447_v47 = vadd.f32 %v5165_v29, %v4551_v22  ;;  %v3690_v22 = vld [vmem:[#allocation4 + $0x108] sm:$0xf]  ;;  %v3688_v29 = vld [vmem:[#allocation4 + $0x100] sm:$0x8]  ;;  %v4976_v37 = vor.u32 %v4975_v20, %v4971_v49  ;;  %v4029_v3 = vrot.slane %v4027_v30, 7  ;;  %v4106_v17 = vpack.c.b16 %v4089_v45, %v4088_v40 }
 0x4f6   : > { %v4966_v21 = vor.u32 %v4965_v11, %v4962_v55  ;;  %v4036_v14 = vshrl.u32 %v3690_v22, 16  ;;  %v4022_v51 = vshrl.u32 %v3688_v29, 16  ;;  %v4039_v16 = vshll.u32 %v3690_v22, 16 }
 0x4f7   : > { %v4208_v32 = vpop.f32.mrf.mxu1  ;;  %v4984_v55 = vshrl.u32 %v4620_v61, 16  ;;  %v4032_v24 = vor.u32 %v4030_v28, %v4029_v3  ;;  %v5259_v28 = vld [vmem:[#allocation4 + $0x24] sm:$0xf] }
 0x4f8   : > { %v7725_v34 = vrot.slane %v4022_v51, 11  ;;  %v4272_v42 = vadd.f32 %v4208_v32, %v3622_v31  ;;  %v4622_v32 = vld [vmem:[#allocation4 + $0x10c] sm:$0x1] }
 0x4f9   : > { %v4485_v50 = vpop.f32.mrf.mxu2  ;;  %v4986_v30 = vrot.slane %v4984_v55, 4  ;;  %v6190_v55 = vld [vmem:[#allocation4 + $0x24] sm:$0xf] }
 0x4fa   : > { %v4552_v4 = vadd.f32 %v4485_v50, %v4270_v54  ;;  %v4967_v54 = vrot.slane %v4966_v21, 4  ;;  %v4977_v50 = vrot.slane %v4976_v37, 4  ;;  %v4033_v45 = vsel %vm8629_vm3, %v7725_v34, %v4032_v24  ;;  %v5258_v34 = vld [vmem:[#allocation4 + $0x20] sm:$0x8] }
 0x4fb   : > { %v4090_v51 = vunpack.c.l.b16 %v4033_v45 }
 0x4fc   : > { %v5167_v5 = vpop.f32.mrf.mxu3  ;;  %v4972_v19 = vsel %vm8652_vm6, %v4967_v54, %v4971_v49  ;;  %v4982_v11 = vsel %vm8652_vm6, %v4977_v50, %v4981_v56  ;;  %v5312_v50 = vshrl.u32 %v5259_v28, 16  ;;  %v2911_v56 = vadd.f32 %v9065_v25, %v9063_v33 }
 0x4fd   : > { %v9459_v63 = vadd.f32 %v5167_v5, %v4552_v4  ;;  %v4038_v4 = vrot.slane %v4036_v14, 7  ;;  %v4987_v5 = vshll.u32 %v4620_v61, 16  ;;  %v5052_v12 = vunpack.c.l.b16 %v4972_v19 }
 0x4fe   : > { %4527 = vmatmul.bf16.gmra.mxu2 %v8185_v60  ;;  %v4997_v60 = vshrl.u32 %v4621_v27, 16  ;;  %v5053_v40 = vunpack.c.l.b16 %v4982_v11  ;;  %v6191_v11 = vld [vmem:[#allocation4 + $0x28] sm:$0xf]  ;;  %v3624_v33 = vadd.f32 %v9071_v1, %v2911_v56  ;;  %v5315_v25 = vshll.u32 %v5259_v28, 16 }
 0x4ff   : > { %v4211_v9 = vpop.f32.mrf.mxu1  ;;  %v4041_v20 = vor.u32 %v4039_v16, %v4038_v4  ;;  %v4989_v49 = vrot.slane %v4987_v5, 5  ;;  %v5003_v16 = vshll.u32 %v4622_v32, 16 }
 0x500   : > { %v4273_v0 = vadd.f32 %v4211_v9, %v9041_v58  ;;  %v4993_v58 = vshll.u32 %v4621_v27, 16  ;;  %v4999_v7 = vrot.slane %v4997_v60, 4  ;;  %v5070_v9 = vpack.c.b16 %v5053_v40, %v5052_v12 }
 0x501   : > { %5209 = vmatmul.bf16.gmra.mxu3 %v5069_v44  ;;  %v4488_v23 = vpop.f32.mrf.mxu2  ;;  %v5307_v60 = vshrl.u32 %v5258_v34, 16  ;;  %v6252_v40 = vshrl.u32 %v6191_v11, 16 }
 0x502   : > { %v4553_v6 = vadd.f32 %v4488_v23, %v4271_v18  ;;  %4250 = vmatmul.bf16.gmra.mxu1 %v4106_v17  ;;  %v4034_v18 = vrot.slane %v4029_v3, 4  ;;  %v4995_v37 = vrot.slane %v4993_v58, 5  ;;  %v5260_v23 = vld [vmem:[#allocation4 + $0x28] sm:$0xf]  ;;  %v5005_v58 = vrot.slane %v5003_v16, 5 }
 0x503   : > { %v5321_v61 = vshrl.u32 %v5260_v23, 16  ;;  %v8187_v16 = vld [vmem:[#allocation4 + $0x104] sm:$0xff] }
 0x504   : > { %v5170_v41 = vpop.f32.mrf.mxu3  ;;  %v4042_v21 = vsel %vm8629_vm3, %v4034_v18, %v4041_v20  ;;  %v5000_v17 = vor.u32 %v4999_v7, %v4995_v37  ;;  %v7886_v7 = vrot.slane %v5307_v60, 11  ;;  %v9874_v60 = vld [vmem:[#allocation17_spill] sm:$0xff] }
 0x505   : > { %v9464_v39 = vadd.f32 %v5170_v41, %v4553_v6  ;;  %v4091_v3 = vunpack.c.l.b16 %v4042_v21  ;;  %v4990_v6 = vor.u32 %v4989_v49, %v4986_v30  ;;  %v5323_v19 = vrot.slane %v5321_v61, 7 }
 0x506   : > { %v5001_v5 = vrot.slane %v5000_v17, 4 }
 0x507   : > { %v4213_v22 = vpop.f32.mrf.mxu1  ;;  %v4107_v31 = vpack.c.b16 %v4091_v3, %v4090_v51  ;;  %v4991_v18 = vrot.slane %v4990_v6, 4  ;;  %v6254_v6 = vrot.slane %v6252_v40, 4 }
 0x508   : > { %v4274_v45 = vadd.f32 %v4213_v22, %v3624_v33  ;;  %v6192_v22 = vld [vmem:[#allocation4 + $0x2c] sm:$0x1] }
 0x509   : > { %v4490_v38 = vpop.f32.mrf.mxu2  ;;  %v4996_v30 = vsel %vm8652_vm6, %v4991_v18, %v4995_v37  ;;  %v6258_v34 = vshll.u32 %v6192_v22, 16 }
 0x50a   : > { %v4554_v44 = vadd.f32 %v4490_v38, %v4272_v42  ;;  %v5314_v42 = vrot.slane %v5312_v50, 7  ;;  %v5324_v38 = vshll.u32 %v5260_v23, 16  ;;  %v5054_v1 = vunpack.c.l.b16 %v4996_v30  ;;  %v6194_v30 = vld [vmem:[#allocation4 + $0x38] sm:$0xf] }
 0x50b   : > { %v6260_v40 = vrot.slane %v6258_v34, 5 }
 0x50c   : > { %v5172_v29 = vpop.f32.mrf.mxu3  ;;  %v5326_v12 = vor.u32 %v5324_v38, %v5323_v19  ;;  %v5319_v32 = vrot.slane %v5314_v42, 4  ;;  %v5261_v19 = vld [vmem:[#allocation4 + $0x30] sm:$0x8] }
 0x50d   : > { %v9475_v14 = vadd.f32 %v5172_v29, %v4554_v44  ;;  %v5006_v44 = vsel %vm8652_vm6, %v5001_v5, %v5005_v58  ;;  %v6242_v29 = vshll.u32 %v6190_v55, 16 }
 0x50e   : > { %4532 = vmatmul.bf16.gmra.mxu2 %v8186_v43  ;;  %v5317_v43 = vor.u32 %v5315_v25, %v5314_v42  ;;  %v5327_v3 = vsel %vm8629_vm3, %v5319_v32, %v5326_v12  ;;  %v9875_v42 = vld [vmem:[#allocation18_spill] sm:$0xff]  ;;  %v9876_v25 = vld [vmem:[#allocation20_spill] sm:$0xff] }
 0x50f   : > { %v4216_v54 = vpop.f32.mrf.mxu1  ;;  %v6244_v61 = vrot.slane %v6242_v29, 5  ;;  %v5676_v56 = vunpack.c.l.b16 %v5327_v3  ;;  %v2916_v38 = vadd.f32 %v9875_v42, %v9874_v60  ;;  %v5266_v42 = vld [vmem:[#allocation4 + $0x48] sm:$0xf] }
 0x510   : > { %v4275_v27 = vadd.f32 %v4216_v54, %v9079_v48  ;;  %v6248_v48 = vshll.u32 %v6191_v11, 16  ;;  %v5318_v54 = vsel %vm8629_vm3, %v7886_v7, %v5317_v43  ;;  %v5329_v7 = vshrl.u32 %v5261_v19, 16 }
 0x511   : > { %5214 = vmatmul.bf16.gmra.mxu3 %v5070_v9  ;;  %v4493_v41 = vpop.f32.mrf.mxu2  ;;  %v5055_v9 = vunpack.c.l.b16 %v5006_v44 }
 0x512   : > { %v4555_v4 = vadd.f32 %v4493_v41, %v4273_v0  ;;  %4255 = vmatmul.bf16.gmra.mxu1 %v4107_v31  ;;  %v6239_v0 = vshrl.u32 %v6190_v55, 16  ;;  %v6250_v28 = vrot.slane %v6248_v48, 5  ;;  %v5263_v41 = vld [vmem:[#allocation4 + $0x38] sm:$0xf] }
 0x513   : > { %v5071_v50 = vpack.c.b16 %v5055_v9, %v5054_v1  ;;  %v5343_v55 = vshrl.u32 %v5263_v41, 16  ;;  %v5346_v32 = vshll.u32 %v5263_v41, 16  ;;  %v6272_v1 = vshll.u32 %v6194_v30, 16 }
 0x514   : > { %v5175_v24 = vpop.f32.mrf.mxu3  ;;  %v6241_v37 = vrot.slane %v6239_v0, 4  ;;  %v6255_v31 = vor.u32 %v6254_v6, %v6250_v28  ;;  %v6276_v9 = vshrl.u32 %v6194_v30, 16 }
 0x515   : > { %v9480_v20 = vadd.f32 %v5175_v24, %v4555_v4  ;;  %v5262_v4 = vld [vmem:[#allocation4 + $0x34] sm:$0xf]  ;;  %v5675_v24 = vunpack.c.l.b16 %v5318_v54 }
 0x516   : > { %v6245_v18 = vor.u32 %v6244_v61, %v6241_v37  ;;  %v5334_v11 = vshrl.u32 %v5262_v4, 16  ;;  %v6256_v12 = vrot.slane %v6255_v31, 4  ;;  %v5337_v6 = vshll.u32 %v5262_v4, 16 }
 0x517   : > { %v4218_v49 = vpop.f32.mrf.mxu1  ;;  %v5707_v48 = vpack.c.b16 %v5676_v56, %v5675_v24  ;;  %v7887_v61 = vrot.slane %v5329_v7, 11  ;;  %v6278_v24 = vrot.slane %v6276_v9, 4  ;;  %v9878_v9 = vld [vmem:[#allocation21_spill] sm:$0xff] }
 0x518   : > { %v5336_v43 = vrot.slane %v5334_v11, 7  ;;  %v6261_v37 = vsel %vm8652_vm6, %v6256_v12, %v6260_v40  ;;  %v5265_v12 = vld [vmem:[#allocation4 + $0x44] sm:$0xf]  ;;  %v5365_v40 = vshrl.u32 %v5266_v42, 16 }
 0x519   : > { %v4495_v21 = vpop.f32.mrf.mxu2 }
 0x51a   : > { %v4556_v23 = vadd.f32 %v4495_v21, %v4274_v45  ;;  %v5345_v45 = vrot.slane %v5343_v55, 7  ;;  %v6246_v21 = vrot.slane %v6245_v18, 4  ;;  %v5339_v41 = vor.u32 %v5337_v6, %v5336_v43 }
 0x51b   : > { %v5341_v34 = vrot.slane %v5336_v43, 4  ;;  %v9503_v55 = vrot.slane %v6272_v1, 5  ;;  %v5356_v1 = vshrl.u32 %v5265_v12, 16 }
 0x51c   : > { %v5177_v51 = vpop.f32.mrf.mxu3  ;;  %v6251_v3 = vsel %vm8652_vm6, %v6246_v21, %v6250_v28 }
 0x51d   : > { %v9489_v17 = vadd.f32 %v5177_v51, %v4556_v23  ;;  %v6193_v23 = vld [vmem:[#allocation4 + $0x34] sm:$0xf]  ;;  %v9877_v51 = vld [vmem:[#allocation19_spill] sm:$0xff]  ;;  %v6639_v11 = vunpack.c.l.b16 %v6251_v3 }
 0x51e   : > { %4537 = vmatmul.bf16.gmra.mxu2 %v8187_v16  ;;  %v5348_v16 = vor.u32 %v5346_v32, %v5345_v45  ;;  %v6263_v54 = vshrl.u32 %v6193_v23, 16 }
 0x51f   : > { %v4221_v58 = vpop.f32.mrf.mxu1 }
 0x520   : > { %v4277_v0 = vadd.f32 %v4221_v58, %v9876_v25  ;;  %v6195_v58 = vld [vmem:[#allocation4 + $0x3c] sm:$0x1]  ;;  %v5349_v19 = vsel %vm8629_vm3, %v5341_v34, %v5348_v16  ;;  %v6265_v60 = vrot.slane %v6263_v54, 4  ;;  %v6279_v25 = vor.u32 %v6278_v24, %v9503_v55 }
 0x521   : > { %5219 = vmatmul.bf16.gmra.mxu3 %v5071_v50  ;;  %v4498_v5 = vpop.f32.mrf.mxu2  ;;  %v6266_v50 = vshll.u32 %v6193_v23, 16  ;;  %v5367_v54 = vrot.slane %v5365_v40, 7  ;;  %v5358_v34 = vrot.slane %v5356_v1, 7  ;;  %v5368_v24 = vshll.u32 %v5266_v42, 16 }
 0x522   : > { %v4557_v33 = vadd.f32 %v4498_v5, %v4275_v27  ;;  %5795 = vmatmul.bf16.vlgmr.msrb.gmra.mxu1 %v5707_v48  ;;  %v3626_v27 = vadd.f32 %v9877_v51, %v2916_v38  ;;  %v6640_v5 = vunpack.c.l.b16 %v6261_v37  ;;  %v5340_v38 = vsel %vm8629_vm3, %v7887_v61, %v5339_v41  ;;  %v9879_v51 = vld [vmem:[#allocation22_spill] sm:$0xff]  ;;  %v9880_v37 = vld [vmem:[#allocation24_spill] sm:$0xff] }
 0x523   : > { %v6282_v48 = vshll.u32 %v6195_v58, 16  ;;  %v5677_v45 = vunpack.c.l.b16 %v5340_v38  ;;  %v6280_v32 = vrot.slane %v6279_v25, 4 }
 0x524   : > { %v5180_v44 = vpop.f32.mrf.mxu3  ;;  %v4276_v22 = vadd.f32 %v4218_v49, %v3626_v27  ;;  %v8212_v49 = vld [vmem:[#allocation4 + $0x24] sm:$0xff]  ;;  %v6671_v30 = vpack.c.b16 %v6640_v5, %v6639_v11  ;;  %v2921_v27 = vadd.f32 %v9879_v51, %v9878_v9  ;;  %v6198_v51 = vld [vmem:[#allocation4 + $0x4c] sm:$0x1] }
 0x525   : > { %v9496_v29 = vadd.f32 %v5180_v44, %v4557_v33  ;;  %v6268_v33 = vrot.slane %v6266_v50, 5  ;;  %v5678_v44 = vunpack.c.l.b16 %v5349_v19  ;;  %v6284_v23 = vrot.slane %v6282_v48, 5  ;;  %v9881_v5 = vld [vmem:[#allocation23_spill] sm:$0xff] }
 0x526   : > { %v3628_v58 = vadd.f32 %v9881_v5, %v2921_v27  ;;  %v5359_v19 = vshll.u32 %v5265_v12, 16 }
 0x527   : > { %v4223_v31 = vpop.f32.mrf.mxu1  ;;  %v6269_v43 = vor.u32 %v6268_v33, %v6265_v60  ;;  %v5708_v16 = vpack.c.b16 %v5678_v44, %v5677_v45  ;;  %v5363_v45 = vrot.slane %v5358_v34, 4 }
 0x528   : > { %v4278_v38 = vadd.f32 %v4223_v31, %v3628_v58  ;;  %v5361_v40 = vor.u32 %v5359_v19, %v5358_v34  ;;  %v5267_v58 = vld [vmem:[#allocation4 + $0x50] sm:$0x8]  ;;  %v9883_v19 = vld [vmem:[#allocation26_spill] sm:$0xff] }
 0x529   : > { %v4500_v56 = vpop.f32.mrf.mxu2 }
 0x52a   : > { %v4558_v18 = vadd.f32 %v4500_v56, %v4276_v22  ;;  %v5264_v22 = vld [vmem:[#allocation4 + $0x40] sm:$0x8]  ;;  %v6197_v56 = vld [vmem:[#allocation4 + $0x48] sm:$0xf] }
 0x52b   : > { %v5351_v41 = vshrl.u32 %v5264_v22, 16  ;;  %v6296_v11 = vshll.u32 %v6197_v56, 16  ;;  %v6300_v60 = vshrl.u32 %v6197_v56, 16  ;;  %v6306_v56 = vshll.u32 %v6198_v51, 16  ;;  %v9885_v51 = vld [vmem:[#allocation27_spill] sm:$0xff] }
 0x52c   : > { %v5182_v28 = vpop.f32.mrf.mxu3 }
 0x52d   : > { %v9507_v4 = vadd.f32 %v5182_v28, %v4558_v18  ;;  %v6196_v18 = vld [vmem:[#allocation4 + $0x44] sm:$0xf]  ;;  %v6270_v28 = vrot.slane %v6269_v43, 4  ;;  %v7888_v44 = vrot.slane %v5351_v41, 11  ;;  %v6302_v31 = vrot.slane %v6300_v60, 4  ;;  %v9884_v60 = vld [vmem:[#allocation28_spill] sm:$0xff] }
 0x52e   : > { %6077 = vmatmul.bf16.vlgmr.msrb.gmra.mxu2 %v8212_v49  ;;  %v5370_v49 = vor.u32 %v5368_v24, %v5367_v54  ;;  %v6287_v33 = vshrl.u32 %v6196_v18, 16  ;;  %v6290_v25 = vshll.u32 %v6196_v18, 16 }
 0x52f   : > { %v4226_v7 = vpop.f32.mrf.mxu1  ;;  %v6275_v42 = vsel %vm8652_vm6, %v6270_v28, %v9503_v55  ;;  %v5269_v55 = vld [vmem:[#allocation4 + $0x58] sm:$0xf] }
 0x530   : > { %v4279_v6 = vadd.f32 %v4226_v7, %v9880_v37  ;;  %v5371_v12 = vsel %vm8629_vm3, %v5363_v45, %v5370_v49  ;;  %v6641_v9 = vunpack.c.l.b16 %v6275_v42  ;;  %v6289_v27 = vrot.slane %v6287_v33, 4 }
 0x531   : > { %6759 = vmatmul.bf16.vlgmr.msrb.gmra.mxu3 %v6671_v30  ;;  %v4503_v21 = vpop.f32.mrf.mxu2  ;;  %v5362_v37 = vsel %vm8629_vm3, %v7888_v44, %v5361_v40  ;;  %v5680_v22 = vunpack.c.l.b16 %v5371_v12  ;;  %v5387_v41 = vshrl.u32 %v5269_v55, 16  ;;  %v6308_v44 = vrot.slane %v6306_v56, 5  ;;  %v6199_v12 = vld [vmem:[#allocation4 + $0x54] sm:$0xf] }
 0x532   : > { %v4559_v3 = vadd.f32 %v4503_v21, %v4277_v0  ;;  %5800 = vmatmul.bf16.gmra.mxu1 %v5708_v16  ;;  %v6285_v0 = vsel %vm8652_vm6, %v6280_v32, %v6284_v23  ;;  %v8213_v32 = vld [vmem:[#allocation4 + $0x34] sm:$0xff]  ;;  %v9525_v23 = vrot.slane %v6296_v11, 5  ;;  %v5679_v34 = vunpack.c.l.b16 %v5362_v37 }
 0x533   : > { %v6642_v7 = vunpack.c.l.b16 %v6285_v0  ;;  %v9882_v0 = vld [vmem:[#allocation25_spill] sm:$0xff]  ;;  %v5389_v40 = vrot.slane %v5387_v41, 7  ;;  %v6311_v56 = vshrl.u32 %v6199_v12, 16  ;;  %v6314_v41 = vshll.u32 %v6199_v12, 16 }
 0x534   : > { %v5185_v61 = vpop.f32.mrf.mxu3  ;;  %v6303_v54 = vor.u32 %v6302_v31, %v9525_v23  ;;  %v2926_v49 = vadd.f32 %v9883_v19, %v9882_v0  ;;  %v5709_v33 = vpack.c.b16 %v5680_v22, %v5679_v34  ;;  %v6201_v19 = vld [vmem:[#allocation4 + $0x5c] sm:$0x1] }
 0x535   : > { %v9515_v50 = vadd.f32 %v5185_v61, %v4559_v3  ;;  %v6292_v3 = vrot.slane %v6290_v25, 5  ;;  %v6672_v16 = vpack.c.b16 %v6642_v7, %v6641_v9  ;;  %v5268_v61 = vld [vmem:[#allocation4 + $0x54] sm:$0xf]  ;;  %v6200_v25 = vld [vmem:[#allocation4 + $0x58] sm:$0xf]  ;;  %v5373_v7 = vshrl.u32 %v5267_v58, 16 }
 0x536   : > { %v5378_v28 = vshrl.u32 %v5268_v61, 16  ;;  %v6304_v42 = vrot.slane %v6303_v54, 4  ;;  %v6320_v31 = vshll.u32 %v6200_v25, 16  ;;  %v6324_v9 = vshrl.u32 %v6200_v25, 16 }
 0x537   : > { %v4228_v30 = vpop.f32.mrf.mxu1  ;;  %v6293_v24 = vor.u32 %v6292_v3, %v6289_v27  ;;  %v5381_v37 = vshll.u32 %v5268_v61, 16  ;;  %v7889_v54 = vrot.slane %v5373_v7, 11  ;;  %v5271_v7 = vld [vmem:[#allocation4 + $0x64] sm:$0xf] }
 0x538   : > { %v6309_v3 = vsel %vm8652_vm6, %v6304_v42, %v6308_v44  ;;  %v6326_v58 = vrot.slane %v6324_v9, 4  ;;  %v6330_v44 = vshll.u32 %v6201_v19, 16 }
 0x539   : > { %v4505_v48 = vpop.f32.mrf.mxu2  ;;  %v6644_v0 = vunpack.c.l.b16 %v6309_v3  ;;  %v9886_v3 = vld [vmem:[#allocation29_spill] sm:$0xff] }
 0x53a   : > { %v4560_v21 = vadd.f32 %v4505_v48, %v4278_v38 }
 0x53c   : > { %v5187_v43 = vpop.f32.mrf.mxu3 }
 0x53d   : > { %v9527_v1 = vadd.f32 %v5187_v43, %v4560_v21  ;;  %v6294_v21 = vrot.slane %v6293_v24, 4  ;;  %v5380_v43 = vrot.slane %v5378_v28, 7 }
 0x53e   : > { %6082 = vmatmul.bf16.gmra.mxu2 %v8213_v32  ;;  %v5390_v32 = vshll.u32 %v5269_v55, 16 }
 0x53f   : > { %v4231_v5 = vpop.f32.mrf.mxu1  ;;  %v6299_v27 = vsel %vm8652_vm6, %v6294_v21, %v9525_v23  ;;  %v5383_v24 = vor.u32 %v5381_v37, %v5380_v43  ;;  %v9887_v37 = vld [vmem:[#allocation30_spill] sm:$0xff] }
 0x540   : > { %v4281_v38 = vadd.f32 %v4231_v5, %v9884_v60  ;;  %v9543_v5 = vrot.slane %v6320_v31, 5  ;;  %v6313_v60 = vrot.slane %v6311_v56, 4 }
 0x541   : > { %6764 = vmatmul.bf16.gmra.mxu3 %v6672_v16  ;;  %v4508_v18 = vpop.f32.mrf.mxu2  ;;  %v5392_v16 = vor.u32 %v5390_v32, %v5389_v40  ;;  %v5384_v25 = vsel %vm8629_vm3, %v7889_v54, %v5383_v24  ;;  %v9888_v54 = vld [vmem:[#allocation32_spill] sm:$0xff] }
 0x542   : > { %v4561_v11 = vadd.f32 %v4508_v18, %v4279_v6  ;;  %5805 = vmatmul.bf16.gmra.mxu1 %v5709_v33  ;;  %v3630_v6 = vadd.f32 %v9885_v51, %v2926_v49  ;;  %v5385_v18 = vrot.slane %v5380_v43, 4  ;;  %v5272_v33 = vld [vmem:[#allocation4 + $0x68] sm:$0xf]  ;;  %v6327_v42 = vor.u32 %v6326_v58, %v9543_v5 }
 0x543   : > { %v5409_v43 = vshrl.u32 %v5272_v33, 16  ;;  %v5681_v32 = vunpack.c.l.b16 %v5384_v25  ;;  %v5403_v25 = vshll.u32 %v5271_v7, 16 }
 0x544   : > { %v5190_v48 = vpop.f32.mrf.mxu3  ;;  %v4280_v22 = vadd.f32 %v4228_v30, %v3630_v6  ;;  %v5393_v49 = vsel %vm8629_vm3, %v5385_v18, %v5392_v16  ;;  %v8214_v30 = vld [vmem:[#allocation4 + $0x44] sm:$0xff]  ;;  %v6328_v51 = vrot.slane %v6327_v42, 4  ;;  %v6332_v6 = vrot.slane %v6330_v44, 5 }
 0x545   : > { %v9535_v45 = vadd.f32 %v5190_v48, %v4561_v11  ;;  %v6643_v11 = vunpack.c.l.b16 %v6299_v27  ;;  %v6316_v48 = vrot.slane %v6314_v41, 5  ;;  %v5682_v21 = vunpack.c.l.b16 %v5393_v49  ;;  %v6202_v49 = vld [vmem:[#allocation4 + $0x64] sm:$0xf] }
 0x546   : > { %v5400_v27 = vshrl.u32 %v5271_v7, 16  ;;  %v2931_v16 = vadd.f32 %v9887_v37, %v9886_v3  ;;  %v5411_v18 = vrot.slane %v5409_v43, 7  ;;  %v6338_v43 = vshll.u32 %v6202_v49, 16 }
 0x547   : > { %v4233_v55 = vpop.f32.mrf.mxu1  ;;  %v6673_v40 = vpack.c.b16 %v6644_v0, %v6643_v11  ;;  %v6317_v9 = vor.u32 %v6316_v48, %v6313_v60  ;;  %v5710_v41 = vpack.c.b16 %v5682_v21, %v5681_v32  ;;  %v6335_v21 = vshrl.u32 %v6202_v49, 16 }
 0x548   : > { %v5402_v19 = vrot.slane %v5400_v27, 7 }
 0x549   : > { %v4510_v34 = vpop.f32.mrf.mxu2  ;;  %v6318_v60 = vrot.slane %v6317_v9, 4 }
 0x54a   : > { %v4562_v28 = vadd.f32 %v4510_v34, %v4280_v22  ;;  %v5270_v34 = vld [vmem:[#allocation4 + $0x60] sm:$0x8]  ;;  %v5405_v27 = vor.u32 %v5403_v25, %v5402_v19  ;;  %v5407_v3 = vrot.slane %v5402_v19, 4  ;;  %v5274_v19 = vld [vmem:[#allocation4 + $0x74] sm:$0xf] }
 0x54b   : > { %v5395_v0 = vshrl.u32 %v5270_v34, 16  ;;  %v6337_v34 = vrot.slane %v6335_v21, 4 }
 0x54c   : > { %v5192_v23 = vpop.f32.mrf.mxu3 }
 0x54d   : > { %v9547_v61 = vadd.f32 %v5192_v23, %v4562_v28  ;;  %v6203_v28 = vld [vmem:[#allocation4 + $0x68] sm:$0xf]  ;;  %v5412_v23 = vshll.u32 %v5272_v33, 16  ;;  %v6323_v33 = vsel %vm8652_vm6, %v6318_v60, %v9543_v5  ;;  %v5275_v5 = vld [vmem:[#allocation4 + $0x78] sm:$0xf] }
 0x54e   : > { %6087 = vmatmul.bf16.gmra.mxu2 %v8214_v30  ;;  %v9889_v30 = vld [vmem:[#allocation31_spill] sm:$0xff]  ;;  %v6344_v42 = vshll.u32 %v6203_v28, 16  ;;  %v6348_v44 = vshrl.u32 %v6203_v28, 16 }
 0x54f   : > { %v4236_v31 = vpop.f32.mrf.mxu1  ;;  %v3632_v11 = vadd.f32 %v9889_v30, %v2931_v16  ;;  %v5414_v48 = vor.u32 %v5412_v23, %v5411_v18  ;;  %v5431_v30 = vshrl.u32 %v5275_v5, 16 }
 0x550   : > { %v4283_v56 = vadd.f32 %v4236_v31, %v9888_v54  ;;  %v7890_v31 = vrot.slane %v5395_v0, 11  ;;  %v6645_v54 = vunpack.c.l.b16 %v6323_v33 }
 0x551   : > { %6769 = vmatmul.bf16.gmra.mxu3 %v6673_v40  ;;  %v4513_v12 = vpop.f32.mrf.mxu2  ;;  %v4282_v40 = vadd.f32 %v4233_v55, %v3632_v11  ;;  %v5415_v7 = vsel %vm8629_vm3, %v5407_v3, %v5414_v48  ;;  %v6350_v55 = vrot.slane %v6348_v44, 4  ;;  %v5273_v48 = vld [vmem:[#allocation4 + $0x70] sm:$0x8]  ;;  %v9890_v44 = vld [vmem:[#allocation33_spill] sm:$0xff] }
 0x552   : > { %v4563_v22 = vadd.f32 %v4513_v12, %v4281_v38  ;;  %5810 = vmatmul.bf16.gmra.mxu1 %v5710_v41  ;;  %v6333_v38 = vsel %vm8652_vm6, %v6328_v51, %v6332_v6  ;;  %v8215_v51 = vld [vmem:[#allocation4 + $0x54] sm:$0xff]  ;;  %v9565_v6 = vrot.slane %v6344_v42, 5  ;;  %v6204_v41 = vld [vmem:[#allocation4 + $0x6c] sm:$0x1]  ;;  %v5406_v18 = vsel %vm8629_vm3, %v7890_v31, %v5405_v27 }
 0x553   : > { %v6646_v37 = vunpack.c.l.b16 %v6333_v38  ;;  %v5684_v0 = vunpack.c.l.b16 %v5415_v7  ;;  %v6354_v49 = vshll.u32 %v6204_v41, 16  ;;  %v5683_v11 = vunpack.c.l.b16 %v5406_v18  ;;  %v6206_v27 = vld [vmem:[#allocation4 + $0x78] sm:$0xf] }
 0x554   : > { %v5195_v24 = vpop.f32.mrf.mxu3  ;;  %v6351_v23 = vor.u32 %v6350_v55, %v9565_v6  ;;  %v5422_v42 = vshrl.u32 %v5274_v19, 16  ;;  %v5417_v55 = vshrl.u32 %v5273_v48, 16  ;;  %v5434_v41 = vshll.u32 %v5275_v5, 16 }
 0x555   : > { %v9555_v58 = vadd.f32 %v5195_v24, %v4563_v22  ;;  %v6340_v24 = vrot.slane %v6338_v43, 5  ;;  %v6674_v28 = vpack.c.b16 %v6646_v37, %v6645_v54  ;;  %v5711_v31 = vpack.c.b16 %v5684_v0, %v5683_v11 }
 0x556   : > { %v6356_v37 = vrot.slane %v6354_v49, 5  ;;  %v5424_v54 = vrot.slane %v5422_v42, 7  ;;  %v6372_v18 = vshrl.u32 %v6206_v27, 16  ;;  %v5425_v49 = vshll.u32 %v5274_v19, 16 }
 0x557   : > { %v4238_v12 = vpop.f32.mrf.mxu1  ;;  %v6341_v60 = vor.u32 %v6340_v24, %v6337_v34  ;;  %v6205_v34 = vld [vmem:[#allocation4 + $0x74] sm:$0xf]  ;;  %v6368_v24 = vshll.u32 %v6206_v27, 16 }
 0x558   : > { %v5427_v42 = vor.u32 %v5425_v49, %v5424_v54 }
 0x559   : > { %v4515_v32 = vpop.f32.mrf.mxu2  ;;  %v6342_v7 = vrot.slane %v6341_v60, 4  ;;  %v6359_v60 = vshrl.u32 %v6205_v34, 16 }
 0x55a   : > { %v4564_v9 = vadd.f32 %v4515_v32, %v4282_v40  ;;  %v9891_v40 = vld [vmem:[#allocation34_spill] sm:$0xff]  ;;  %v9892_v32 = vld [vmem:[#allocation36_spill] sm:$0xff] }
 0x55b   : > { %v2936_v21 = vadd.f32 %v9891_v40, %v9890_v44  ;;  %v6347_v0 = vsel %vm8652_vm6, %v6342_v7, %v9565_v6  ;;  %v5429_v44 = vrot.slane %v5424_v54, 4  ;;  %v9583_v40 = vrot.slane %v6368_v24, 5  ;;  %v5277_v24 = vld [vmem:[#allocation4 + $0x84] sm:$0xf] }
 0x55c   : > { %v5197_v16 = vpop.f32.mrf.mxu3 }
 0x55d   : > { %v9567_v22 = vadd.f32 %v5197_v16, %v4564_v9  ;;  %v6352_v9 = vrot.slane %v6351_v23, 4  ;;  %v5433_v16 = vrot.slane %v5431_v30, 7 }
 0x55e   : > { %6092 = vmatmul.bf16.gmra.mxu2 %v8215_v51 }
 0x55f   : > { %v4241_v25 = vpop.f32.mrf.mxu1  ;;  %v6357_v23 = vsel %vm8652_vm6, %v6352_v9, %v6356_v37  ;;  %v5436_v30 = vor.u32 %v5434_v41, %v5433_v16  ;;  %v6361_v9 = vrot.slane %v6359_v60, 4  ;;  %v5278_v37 = vld [vmem:[#allocation4 + $0x88] sm:$0xf] }
 0x560   : > { %v4285_v33 = vadd.f32 %v4241_v25, %v9892_v32  ;;  %v6362_v25 = vshll.u32 %v6205_v34, 16  ;;  %v6648_v32 = vunpack.c.l.b16 %v6357_v23  ;;  %v6209_v60 = vld [vmem:[#allocation4 + $0x88] sm:$0xf] }
 0x561   : > { %6774 = vmatmul.bf16.gmra.mxu3 %v6674_v28  ;;  %v4518_v38 = vpop.f32.mrf.mxu2  ;;  %v9893_v28 = vld [vmem:[#allocation35_spill] sm:$0xff]  ;;  %v5437_v27 = vsel %vm8629_vm3, %v5429_v44, %v5436_v30  ;;  %v9896_v44 = vld [vmem:[#allocation40_spill] sm:$0xff] }
 0x562   : > { %v4565_v43 = vadd.f32 %v4518_v38, %v4283_v56  ;;  %5815 = vmatmul.bf16.gmra.mxu1 %v5711_v31  ;;  %v3634_v56 = vadd.f32 %v9893_v28, %v2936_v21  ;;  %v7891_v38 = vrot.slane %v5417_v55, 11  ;;  %v6374_v21 = vrot.slane %v6372_v18, 4  ;;  %v6207_v31 = vld [vmem:[#allocation4 + $0x7c] sm:$0x1] }
 0x563   : > { %v6364_v7 = vrot.slane %v6362_v25, 5  ;;  %v6378_v54 = vshll.u32 %v6207_v31, 16  ;;  %v5686_v34 = vunpack.c.l.b16 %v5437_v27  ;;  %v5453_v18 = vshrl.u32 %v5278_v37, 16 }
 0x564   : > { %v5200_v3 = vpop.f32.mrf.mxu3  ;;  %v4284_v11 = vadd.f32 %v4238_v12, %v3634_v56  ;;  %v8216_v12 = vld [vmem:[#allocation4 + $0x64] sm:$0xff]  ;;  %v5428_v16 = vsel %vm8629_vm3, %v7891_v38, %v5427_v42  ;;  %v6375_v55 = vor.u32 %v6374_v21, %v9583_v40  ;;  %v9895_v38 = vld [vmem:[#allocation38_spill] sm:$0xff] }
 0x565   : > { %v9575_v51 = vadd.f32 %v5200_v3, %v4565_v43  ;;  %v6647_v3 = vunpack.c.l.b16 %v6347_v0  ;;  %v5685_v28 = vunpack.c.l.b16 %v5428_v16  ;;  %v6365_v49 = vor.u32 %v6364_v7, %v6361_v9 }
 0x566   : > { %v6376_v0 = vrot.slane %v6375_v55, 4  ;;  %v6380_v30 = vrot.slane %v6378_v54, 5  ;;  %v5456_v7 = vshll.u32 %v5278_v37, 16  ;;  %v9897_v55 = vld [vmem:[#allocation39_spill] sm:$0xff] }
 0x567   : > { %v4243_v5 = vpop.f32.mrf.mxu1  ;;  %v6675_v41 = vpack.c.b16 %v6648_v32, %v6647_v3  ;;  %v5276_v32 = vld [vmem:[#allocation4 + $0x80] sm:$0x8]  ;;  %v6396_v3 = vshrl.u32 %v6209_v60, 16 }
 0x568   : > { %v5439_v9 = vshrl.u32 %v5276_v32, 16 }
 0x569   : > { %v4520_v48 = vpop.f32.mrf.mxu2 }
 0x56a   : > { %v4566_v43 = vadd.f32 %v4520_v48, %v4284_v11  ;;  %v5444_v11 = vshrl.u32 %v5277_v24, 16  ;;  %v9894_v48 = vld [vmem:[#allocation37_spill] sm:$0xff] }
 0x56b   : > { %v2941_v25 = vadd.f32 %v9895_v38, %v9894_v48 }
 0x56c   : > { %v5202_v6 = vpop.f32.mrf.mxu3  ;;  %v5446_v16 = vrot.slane %v5444_v11, 7 }
 0x56d   : > { %v9587_v19 = vadd.f32 %v5202_v6, %v4566_v43  ;;  %v5712_v43 = vpack.c.b16 %v5686_v34, %v5685_v28  ;;  %v5455_v6 = vrot.slane %v5453_v18, 7  ;;  %v3636_v54 = vadd.f32 %v9897_v55, %v2941_v25  ;;  %v6208_v34 = vld [vmem:[#allocation4 + $0x84] sm:$0xf] }
 0x56e   : > { %6097 = vmatmul.bf16.gmra.mxu2 %v8216_v12  ;;  %v6392_v12 = vshll.u32 %v6209_v60, 16  ;;  %v6398_v60 = vrot.slane %v6396_v3, 4  ;;  %v6386_v32 = vshll.u32 %v6208_v34, 16 }
 0x56f   : > { %v4246_v23 = vpop.f32.mrf.mxu1  ;;  %v4286_v28 = vadd.f32 %v4243_v5, %v3636_v54 }
 0x570   : > { %v4287_v21 = vadd.f32 %v4246_v23, %v9896_v44  ;;  %v5458_v23 = vor.u32 %v5456_v7, %v5455_v6  ;;  %v9603_v48 = vrot.slane %v6392_v12, 5  ;;  %v6210_v44 = vld [vmem:[#allocation4 + $0x8c] sm:$0x1]  ;;  %v8217_v6 = vld [vmem:[#allocation4 + $0x74] sm:$0xff] }
 0x571   : > { %6779 = vmatmul.bf16.gmra.mxu3 %v6675_v41  ;;  %v4523_v56 = vpop.f32.mrf.mxu2  ;;  %v6366_v41 = vrot.slane %v6365_v49, 4  ;;  %v5451_v49 = vrot.slane %v5446_v16, 4  ;;  %v6402_v7 = vshll.u32 %v6210_v44, 16 }
 0x572   : > { %v4567_v42 = vadd.f32 %v4523_v56, %v4285_v33  ;;  %5820 = vmatmul.bf16.gmra.mxu1 %v5712_v43  ;;  %v6381_v33 = vsel %vm8652_vm6, %v6376_v0, %v6380_v30  ;;  %v5447_v56 = vshll.u32 %v5277_v24, 16  ;;  %v9898_v0 = vld [vmem:[#allocation41_spill] sm:$0xff]  ;;  %v6383_v30 = vshrl.u32 %v6208_v34, 16 }
 0x573   : > { %v6371_v18 = vsel %vm8652_vm6, %v6366_v41, %v9583_v40  ;;  %v6650_v37 = vunpack.c.l.b16 %v6381_v33  ;;  %v6399_v3 = vor.u32 %v6398_v60, %v9603_v48  ;;  %v6388_v33 = vrot.slane %v6386_v32, 5 }
 0x574   : > { %v5205_v31 = vpop.f32.mrf.mxu3  ;;  %v5449_v25 = vor.u32 %v5447_v56, %v5446_v16  ;;  %v6649_v12 = vunpack.c.l.b16 %v6371_v18  ;;  %v6385_v41 = vrot.slane %v6383_v30, 4  ;;  %v5280_v56 = vld [vmem:[#allocation4 + $0x94] sm:$0xf] }
 0x575   : > { %v9595_v27 = vadd.f32 %v5205_v31, %v4567_v42  ;;  %v7892_v42 = vrot.slane %v5439_v9, 11  ;;  %v5459_v31 = vsel %vm8629_vm3, %v5451_v49, %v5458_v23  ;;  %v5281_v9 = vld [vmem:[#allocation4 + $0x98] sm:$0xf]  ;;  %v5279_v49 = vld [vmem:[#allocation4 + $0x90] sm:$0x8]  ;;  %v5466_v60 = vshrl.u32 %v5280_v56, 16 }
 0x576   : > { %v6676_v55 = vpack.c.b16 %v6650_v37, %v6649_v12  ;;  %v5688_v54 = vunpack.c.l.b16 %v5459_v31  ;;  %v5475_v34 = vshrl.u32 %v5281_v9, 16  ;;  %v5461_v31 = vshrl.u32 %v5279_v49, 16 }
 0x577   : > { %v4248_v11 = vpop.f32.mrf.mxu1  ;;  %v5450_v16 = vsel %vm8629_vm3, %v7892_v42, %v5449_v25  ;;  %v6389_v42 = vor.u32 %v6388_v33, %v6385_v41  ;;  %v6212_v25 = vld [vmem:[#allocation4 + $0x98] sm:$0xf]  ;;  %v5478_v12 = vshll.u32 %v5281_v9, 16 }
 0x578   : > { %v4288_v24 = vadd.f32 %v4248_v11, %v9898_v0  ;;  %v5687_v23 = vunpack.c.l.b16 %v5450_v16  ;;  %v7893_v33 = vrot.slane %v5461_v31, 11 }
 0x579   : > { %v4525_v38 = vpop.f32.mrf.mxu2  ;;  %v6390_v16 = vrot.slane %v6389_v42, 4 }
 0x57a   : > { %v4568_v43 = vadd.f32 %v4525_v38, %v4286_v28  ;;  %v6400_v28 = vrot.slane %v6399_v3, 4  ;;  %v6404_v38 = vrot.slane %v6402_v7, 5  ;;  %v5713_v0 = vpack.c.b16 %v5688_v54, %v5687_v23 }
 0x57b   : > { %v6416_v3 = vshll.u32 %v6212_v25, 16  ;;  %v6420_v7 = vshrl.u32 %v6212_v25, 16  ;;  %v6395_v54 = vsel %vm8652_vm6, %v6390_v16, %v9603_v48  ;;  %v8218_v25 = vld [vmem:[#allocation4 + $0x84] sm:$0xff] }
 0x57c   : > { %v5207_v5 = vpop.f32.mrf.mxu3  ;;  %v6405_v32 = vsel %vm8652_vm6, %v6400_v28, %v6404_v38 }
 0x57d   : > { %v9608_v40 = vadd.f32 %v5207_v5, %v4568_v43  ;;  %v5477_v5 = vrot.slane %v5475_v34, 7  ;;  %v6652_v41 = vunpack.c.l.b16 %v6405_v32  ;;  %v9621_v28 = vrot.slane %v6416_v3, 5 }
 0x57e   : > { %6102 = vmatmul.bf16.gmra.mxu2 %v8217_v6  ;;  %v5468_v6 = vrot.slane %v5466_v60, 7  ;;  %v6422_v38 = vrot.slane %v6420_v7, 4  ;;  %v6213_v60 = vld [vmem:[#allocation4 + $0x9c] sm:$0x1]  ;;  %v5283_v7 = vld [vmem:[#allocation4 + $0xa4] sm:$0xf] }
 0x57f   : > { %v4251_v18 = vpop.f32.mrf.mxu1 }
 0x580   : > { %v4289_v43 = vadd.f32 %v4251_v18, %v9319_v35  ;;  %v6211_v35 = vld [vmem:[#allocation4 + $0x94] sm:$0xf]  ;;  %v5473_v18 = vrot.slane %v5468_v6, 4  ;;  %v6423_v31 = vor.u32 %v6422_v38, %v9621_v28 }
 0x581   : > { %6784 = vmatmul.bf16.gmra.mxu3 %v6676_v55  ;;  %v4528_v11 = vpop.f32.mrf.mxu2  ;;  %v5480_v55 = vor.u32 %v5478_v12, %v5477_v5  ;;  %v5284_v5 = vld [vmem:[#allocation4 + $0xa8] sm:$0xf] }
 0x582   : > { %v4569_v44 = vadd.f32 %v4528_v11, %v4287_v21  ;;  %5825 = vmatmul.bf16.gmra.mxu1 %v5713_v0  ;;  %v5469_v21 = vshll.u32 %v5280_v56, 16  ;;  %v6407_v56 = vshrl.u32 %v6211_v35, 16  ;;  %v5497_v16 = vshrl.u32 %v5284_v5, 16 }
 0x583   : > { %v5481_v42 = vsel %vm8629_vm3, %v5473_v18, %v5480_v55 }
 0x584   : > { %v5210_v37 = vpop.f32.mrf.mxu3  ;;  %v5471_v11 = vor.u32 %v5469_v21, %v5468_v6  ;;  %v5690_v6 = vunpack.c.l.b16 %v5481_v42  ;;  %v6409_v12 = vrot.slane %v6407_v56, 4 }
 0x585   : > { %v9614_v30 = vadd.f32 %v5210_v37, %v4569_v44  ;;  %v6410_v44 = vshll.u32 %v6211_v35, 16  ;;  %v6651_v37 = vunpack.c.l.b16 %v6395_v54 }
 0x586   : > { %v5472_v32 = vsel %vm8629_vm3, %v7893_v33, %v5471_v11 }
 0x587   : > { %v4253_v23 = vpop.f32.mrf.mxu1  ;;  %v6412_v3 = vrot.slane %v6410_v44, 5  ;;  %v5689_v21 = vunpack.c.l.b16 %v5472_v32  ;;  %v6214_v32 = vld [vmem:[#allocation4 + $0xa4] sm:$0xf] }
 0x588   : > { %v4290_v49 = vadd.f32 %v4253_v23, %v9331_v26  ;;  %v6677_v26 = vpack.c.b16 %v6652_v41, %v6651_v37  ;;  %v5488_v23 = vshrl.u32 %v5283_v7, 16  ;;  %v5499_v41 = vrot.slane %v5497_v16, 7 }
 0x589   : > { %v4530_v34 = vpop.f32.mrf.mxu2  ;;  %v5714_v11 = vpack.c.b16 %v5690_v6, %v5689_v21  ;;  %v6413_v38 = vor.u32 %v6412_v3, %v6409_v12  ;;  %v5500_v37 = vshll.u32 %v5284_v5, 16  ;;  %v6431_v3 = vshrl.u32 %v6214_v32, 16 }
 0x58a   : > { %v4570_v9 = vadd.f32 %v4530_v34, %v4288_v24  ;;  %v6426_v24 = vshll.u32 %v6213_v60, 16  ;;  %v6424_v34 = vrot.slane %v6423_v31, 4 }
 0x58b   : > { %v6414_v31 = vrot.slane %v6413_v38, 4 }
 0x58c   : > { %v5212_v0 = vpop.f32.mrf.mxu3  ;;  %v6428_v54 = vrot.slane %v6426_v24, 5 }
 0x58d   : > { %v9626_v48 = vadd.f32 %v5212_v0, %v4570_v9  ;;  %v5282_v9 = vld [vmem:[#allocation4 + $0xa0] sm:$0x8]  ;;  %v6215_v0 = vld [vmem:[#allocation4 + $0xa8] sm:$0xf]  ;;  %v6419_v6 = vsel %vm8652_vm6, %v6414_v31, %v9621_v28  ;;  %v5286_v31 = vld [vmem:[#allocation4 + $0xb4] sm:$0xf] }
 0x58e   : > { %6107 = vmatmul.bf16.gmra.mxu2 %v8218_v25  ;;  %v6429_v44 = vsel %vm8652_vm6, %v6424_v34, %v6428_v54  ;;  %v5483_v42 = vshrl.u32 %v5282_v9, 16  ;;  %v5490_v25 = vrot.slane %v5488_v23, 7  ;;  %v6444_v24 = vshrl.u32 %v6215_v0, 16  ;;  %v6216_v9 = vld [vmem:[#allocation4 + $0xac] sm:$0x1] }
 0x58f   : > { %v4256_v35 = vpop.f32.mrf.mxu1  ;;  %v6654_v12 = vunpack.c.l.b16 %v6429_v44  ;;  %v6434_v54 = vshll.u32 %v6214_v32, 16  ;;  %v6450_v32 = vshll.u32 %v6216_v9, 16 }
 0x590   : > { %v4291_v33 = vadd.f32 %v4256_v35, %v9337_v13  ;;  %v5491_v13 = vshll.u32 %v5283_v7, 16  ;;  %v5495_v34 = vrot.slane %v5490_v25, 4 }
 0x591   : > { %6789 = vmatmul.bf16.gmra.mxu3 %v6677_v26  ;;  %v4533_v55 = vpop.f32.mrf.mxu2  ;;  %v5502_v26 = vor.u32 %v5500_v37, %v5499_v41  ;;  %v6653_v41 = vunpack.c.l.b16 %v6419_v6 }
 0x592   : > { %v4571_v18 = vadd.f32 %v4533_v55, %v4289_v43  ;;  %5830 = vmatmul.bf16.gmra.mxu1 %v5714_v11  ;;  %v6440_v43 = vshll.u32 %v6215_v0, 16  ;;  %v7894_v55 = vrot.slane %v5483_v42, 11  ;;  %v5493_v35 = vor.u32 %v5491_v13, %v5490_v25  ;;  %v5287_v0 = vld [vmem:[#allocation4 + $0xb8] sm:$0xf] }
 0x593   : > { %v6446_v11 = vrot.slane %v6444_v24, 4  ;;  %v5503_v38 = vsel %vm8629_vm3, %v5495_v34, %v5502_v26  ;;  %v6433_v42 = vrot.slane %v6431_v3, 4  ;;  %v6452_v3 = vrot.slane %v6450_v32, 5 }
 0x594   : > { %v5215_v60 = vpop.f32.mrf.mxu3  ;;  %v5494_v44 = vsel %vm8629_vm3, %v7894_v55, %v5493_v35  ;;  %v5692_v25 = vunpack.c.l.b16 %v5503_v38  ;;  %v5285_v35 = vld [vmem:[#allocation4 + $0xb0] sm:$0x8] }
 0x595   : > { %v9632_v56 = vadd.f32 %v5215_v60, %v4571_v18  ;;  %v9640_v18 = vrot.slane %v6440_v43, 5  ;;  %v8219_v60 = vld [vmem:[#allocation4 + $0x94] sm:$0xff]  ;;  %v5519_v43 = vshrl.u32 %v5287_v0, 16  ;;  %v5691_v24 = vunpack.c.l.b16 %v5494_v44 }
 0x596   : > { %v5505_v38 = vshrl.u32 %v5285_v35, 16 }
 0x597   : > { %v4258_v21 = vpop.f32.mrf.mxu1  ;;  %v6447_v37 = vor.u32 %v6446_v11, %v9640_v18  ;;  %v5715_v34 = vpack.c.b16 %v5692_v25, %v5691_v24  ;;  %v6218_v11 = vld [vmem:[#allocation4 + $0xb8] sm:$0xf] }
 0x598   : > { %v4292_v5 = vadd.f32 %v4258_v21, %v9350_v59  ;;  %v6678_v59 = vpack.c.b16 %v6654_v12, %v6653_v41  ;;  %v5521_v12 = vrot.slane %v5519_v43, 7  ;;  %v6464_v25 = vshll.u32 %v6218_v11, 16 }
 0x599   : > { %v4535_v16 = vpop.f32.mrf.mxu2  ;;  %v6448_v55 = vrot.slane %v6447_v37, 4  ;;  %v6468_v37 = vshrl.u32 %v6218_v11, 16 }
 0x59a   : > { %v4572_v23 = vadd.f32 %v4535_v16, %v4290_v49  ;;  %v6436_v49 = vrot.slane %v6434_v54, 5  ;;  %v5510_v16 = vshrl.u32 %v5286_v31, 16  ;;  %v6466_v35 = vrot.slane %v6464_v25, 5 }
 0x59b   : > { %v6453_v44 = vsel %vm8652_vm6, %v6448_v55, %v6452_v3 }
 0x59c   : > { %v5217_v7 = vpop.f32.mrf.mxu3  ;;  %v6437_v6 = vor.u32 %v6436_v49, %v6433_v42  ;;  %v5512_v9 = vrot.slane %v5510_v16, 7  ;;  %v5513_v42 = vshll.u32 %v5286_v31, 16 }
 0x59d   : > { %v9644_v28 = vadd.f32 %v5217_v7, %v4572_v23  ;;  %v6217_v23 = vld [vmem:[#allocation4 + $0xb4] sm:$0xf] }
 0x59e   : > { %6112 = vmatmul.bf16.gmra.mxu2 %v8219_v60  ;;  %v5522_v60 = vshll.u32 %v5287_v0, 16  ;;  %v6438_v41 = vrot.slane %v6437_v6, 4  ;;  %v5515_v16 = vor.u32 %v5513_v42, %v5512_v9  ;;  %v5517_v0 = vrot.slane %v5512_v9, 4 }
 0x59f   : > { %9899 = vst [vmem:[#allocation17_spill] sm:$0xff] %v9644_v28  ;;  %v9649_v26 = vpop.f32.mrf.mxu1  ;;  %v5290_v28 = vld [vmem:[#allocation4 + $0xc8] sm:$0xf] }
 0x5a0   : > { %v5524_v49 = vor.u32 %v5522_v60, %v5521_v12  ;;  %v6443_v24 = vsel %vm8652_vm6, %v6438_v41, %v9640_v18  ;;  %v6219_v60 = vld [vmem:[#allocation4 + $0xbc] sm:$0x1] }
 0x5a1   : > { %6794 = vmatmul.bf16.gmra.mxu3 %v6678_v59  ;;  %v4538_v13 = vpop.f32.mrf.mxu2  ;;  %v6458_v59 = vshll.u32 %v6217_v23, 16  ;;  %v6655_v11 = vunpack.c.l.b16 %v6443_v24  ;;  %v6474_v42 = vshll.u32 %v6219_v60, 16  ;;  %v6221_v24 = vld [vmem:[#allocation4 + $0xc8] sm:$0xf] }
 0x5a2   : > { %v4573_v21 = vadd.f32 %v4538_v13, %v4291_v33  ;;  %5835 = vmatmul.bf16.gmra.mxu1 %v5715_v34  ;;  %v6455_v33 = vshrl.u32 %v6217_v23, 16  ;;  %v7895_v13 = vrot.slane %v5505_v38, 11  ;;  %v5525_v31 = vsel %vm8629_vm3, %v5517_v0, %v5524_v49  ;;  %v8220_v23 = vld [vmem:[#allocation4 + $0xa4] sm:$0xff] }
 0x5a3   : > { %v6460_v3 = vrot.slane %v6458_v59, 5  ;;  %v5289_v38 = vld [vmem:[#allocation4 + $0xc4] sm:$0xf]  ;;  %v5694_v9 = vunpack.c.l.b16 %v5525_v31 }
 0x5a4   : > { %v5220_v54 = vpop.f32.mrf.mxu3  ;;  %v6457_v34 = vrot.slane %v6455_v33, 4  ;;  %v5516_v18 = vsel %vm8629_vm3, %v7895_v13, %v5515_v16  ;;  %v5541_v33 = vshrl.u32 %v5290_v28, 16  ;;  %v5532_v59 = vshrl.u32 %v5289_v38, 16 }
 0x5a5   : > { %v9651_v7 = vadd.f32 %v5220_v54, %v4573_v21  ;;  %v6656_v21 = vunpack.c.l.b16 %v6453_v44  ;;  %v6470_v54 = vrot.slane %v6468_v37, 4  ;;  %v5693_v49 = vunpack.c.l.b16 %v5516_v18 }
 0x5a6   : > { %v6461_v41 = vor.u32 %v6460_v3, %v6457_v34  ;;  %v6476_v13 = vrot.slane %v6474_v42, 5  ;;  %v5543_v16 = vrot.slane %v5541_v33, 7  ;;  %v5534_v31 = vrot.slane %v5532_v59, 7  ;;  %v6220_v34 = vld [vmem:[#allocation4 + $0xc4] sm:$0xf] }
 0x5a7   : > { %9900 = vst [vmem:[#allocation18_spill] sm:$0xff] %v9651_v7  ;;  %v9655_v43 = vpop.f32.mrf.mxu1  ;;  %v6471_v44 = vor.u32 %v6470_v54, %v6466_v35  ;;  %v5716_v0 = vpack.c.b16 %v5694_v9, %v5693_v49  ;;  %v6488_v3 = vshll.u32 %v6221_v24, 16  ;;  %v6492_v54 = vshrl.u32 %v6221_v24, 16  ;;  %v6222_v24 = vld [vmem:[#allocation4 + $0xcc] sm:$0x1] }
 0x5a8   : > { %v5535_v60 = vshll.u32 %v5289_v38, 16  ;;  %v6479_v9 = vshrl.u32 %v6220_v34, 16 }
 0x5a9   : > { %v4540_v32 = vpop.f32.mrf.mxu2  ;;  %v9670_v33 = vrot.slane %v6488_v3, 5  ;;  %v6494_v49 = vrot.slane %v6492_v54, 4 }
 0x5aa   : > { %v4574_v6 = vadd.f32 %v4540_v32, %v4292_v5  ;;  %v6679_v5 = vpack.c.b16 %v6656_v21, %v6655_v11  ;;  %v5288_v32 = vld [vmem:[#allocation4 + $0xc0] sm:$0x8]  ;;  %v5537_v42 = vor.u32 %v5535_v60, %v5534_v31 }
 0x5ab   : > { %v5527_v21 = vshrl.u32 %v5288_v32, 16  ;;  %v6495_v54 = vor.u32 %v6494_v49, %v9670_v33 }
 0x5ac   : > { %v5222_v55 = vpop.f32.mrf.mxu3 }
 0x5ad   : > { %v9662_v12 = vadd.f32 %v5222_v55, %v4574_v6  ;;  %v6462_v55 = vrot.slane %v6461_v41, 4  ;;  %v6482_v41 = vshll.u32 %v6220_v34, 16  ;;  %v8221_v34 = vld [vmem:[#allocation4 + $0xb4] sm:$0xff] }
 0x5ae   : > { %6117 = vmatmul.bf16.gmra.mxu2 %v8220_v23  ;;  %v5544_v23 = vshll.u32 %v5290_v28, 16  ;;  %v5876_v28 = vadd.f32 %v9649_v26, %v9360_v53  ;;  %v5292_v26 = vld [vmem:[#allocation4 + $0xd4] sm:$0xf] }
 0x5af   : > { %9901 = vst [vmem:[#allocation20_spill] sm:$0xff] %v9662_v12  ;;  %v5801_v37 = vpop.f32.mrf.mxu1  ;;  %v6472_v12 = vrot.slane %v6471_v44, 4  ;;  %v6467_v11 = vsel %vm8652_vm6, %v6462_v55, %v6466_v35  ;;  %v7896_v44 = vrot.slane %v5527_v21, 11  ;;  %v5554_v49 = vshrl.u32 %v5292_v26, 16 }
 0x5b0   : > { %v6657_v55 = vunpack.c.l.b16 %v6467_v11 }
 0x5b1   : > { %6799 = vmatmul.bf16.gmra.mxu3 %v6679_v5  ;;  %v6078_v25 = vpop.f32.mrf.mxu2  ;;  %v6477_v18 = vsel %vm8652_vm6, %v6472_v12, %v6476_v13  ;;  %v5546_v5 = vor.u32 %v5544_v23, %v5543_v16  ;;  %v6481_v13 = vrot.slane %v6479_v9, 4  ;;  %v6484_v16 = vrot.slane %v6482_v41, 5  ;;  %v5293_v23 = vld [vmem:[#allocation4 + $0xd8] sm:$0xf]  ;;  %v9680_v41 = vld [vmem:[#allocation12] ss:$0 sm:$0xff] }
 0x5b2   : > { %5840 = vmatmul.bf16.gmra.mxu1 %v5716_v0  ;;  %v5539_v0 = vrot.slane %v5534_v31, 4  ;;  %v6658_v35 = vunpack.c.l.b16 %v6477_v18  ;;  %v6158_v21 = vadd.f32 %v6078_v25, %v5876_v28  ;;  %v5538_v3 = vsel %vm8629_vm3, %v7896_v44, %v5537_v42 }
 0x5b3   : > { %v6498_v31 = vshll.u32 %v6222_v24, 16  ;;  %v5695_v18 = vunpack.c.l.b16 %v5538_v3  ;;  %v6485_v11 = vor.u32 %v6484_v16, %v6481_v13  ;;  %v5563_v7 = vshrl.u32 %v5293_v23, 16  ;;  %v6223_v3 = vld [vmem:[#allocation4 + $0xd4] sm:$0xf] }
 0x5b4   : > { %v6760_v6 = vpop.f32.mrf.mxu3  ;;  %v5547_v12 = vsel %vm8629_vm3, %v5539_v0, %v5546_v5  ;;  %v6680_v60 = vpack.c.b16 %v6658_v35, %v6657_v55  ;;  %v5878_v5 = vadd.f32 %v5801_v37, %v9382_v62  ;;  %v6496_v25 = vrot.slane %v6495_v54, 4  ;;  %v5291_v55 = vld [vmem:[#allocation4 + $0xd0] sm:$0x8]  ;;  %v6224_v62 = vld [vmem:[#allocation4 + $0xd8] sm:$0xf] }
 0x5b5   : > { %v5696_v53 = vunpack.c.l.b16 %v5547_v12  ;;  %v6840_v9 = vadd.f32 %v6760_v6, %v6158_v21  ;;  %v6500_v0 = vrot.slane %v6498_v31, 5  ;;  %v5877_v24 = vadd.f32 %v9655_v43, %v9373_v2 }
 0x5b6   : > { %v6486_v13 = vrot.slane %v6485_v11, 4  ;;  %v5565_v16 = vrot.slane %v5563_v7, 7  ;;  %v5549_v54 = vshrl.u32 %v5291_v55, 16  ;;  %v5556_v31 = vrot.slane %v5554_v49, 7 }
 0x5b7   : > { %v5803_v32 = vpop.f32.mrf.mxu1  ;;  %v5717_v35 = vpack.c.b16 %v5696_v53, %v5695_v18  ;;  %v6876_v37 = vadd.f32 %v9680_v41, %v6840_v9  ;;  %v6512_v7 = vshll.u32 %v6224_v62, 16  ;;  %v6516_v53 = vshrl.u32 %v6224_v62, 16 }
 0x5b8   : > { %v6491_v43 = vsel %vm8652_vm6, %v6486_v13, %v9670_v33  ;;  %v5557_v11 = vshll.u32 %v5292_v26, 16  ;;  %v6506_v55 = vshll.u32 %v6223_v3, 16 }
 0x5b9   : > { %v6080_v59 = vpop.f32.mrf.mxu2  ;;  %v6908_v9 = vmax.f32 %v6876_v37, 0.0  ;;  %v9696_v13 = vrot.slane %v6512_v7, 5  ;;  %v6518_v62 = vrot.slane %v6516_v53, 4  ;;  %v5296_v53 = vld [vmem:[#allocation4 + $0xe8] sm:$0xf] }
 0x5ba   : > { %v6159_v6 = vadd.f32 %v6080_v59, %v5877_v24 }
 0x5bc   : > { %v6762_v38 = vpop.f32.mrf.mxu3 }
 0x5be   : > { %6122 = vmatmul.bf16.gmra.mxu2 %v8221_v34  ;;  %v6501_v34 = vsel %vm8652_vm6, %v6496_v25, %v6500_v0  ;;  %v6841_v25 = vadd.f32 %v6762_v38, %v6159_v6  ;;  %v8222_v6 = vld [vmem:[#allocation4 + $0xc4] sm:$0xff] }
 0x5bf   : > { %v9682_v42 = vpop.f32.mrf.mxu1  ;;  %v6660_v18 = vunpack.c.l.b16 %v6501_v34 }
 0x5c1   : > { %6804 = vmatmul.bf16.gmra.mxu3 %v6680_v60  ;;  %v6083_v44 = vpop.f32.mrf.mxu2  ;;  %v5566_v60 = vshll.u32 %v5293_v23, 16  ;;  %v7897_v23 = vrot.slane %v5549_v54, 11 }
 0x5c2   : > { %v6160_v28 = vadd.f32 %v6083_v44, %v5878_v5  ;;  %5845 = vmatmul.bf16.gmra.mxu1 %v5717_v35  ;;  %v6503_v5 = vshrl.u32 %v6223_v3, 16  ;;  %v5879_v44 = vadd.f32 %v5803_v32, %v9396_v57  ;;  %v5561_v35 = vrot.slane %v5556_v31, 4  ;;  %v6225_v57 = vld [vmem:[#allocation4 + $0xdc] sm:$0x1] }
 0x5c3   : > { %v5568_v59 = vor.u32 %v5566_v60, %v5565_v16  ;;  %v6659_v16 = vunpack.c.l.b16 %v6491_v43  ;;  %v6877_v32 = vadd.f32 %v9680_v41, %v6841_v25  ;;  %v6519_v43 = vor.u32 %v6518_v62, %v9696_v13  ;;  %v5294_v25 = vld [vmem:[#allocation4 + $0xe0] sm:$0x8]  ;;  %v6226_v62 = vld [vmem:[#allocation4 + $0xe4] sm:$0xf] }
 0x5c4   : > { %v6765_v12 = vpop.f32.mrf.mxu3  ;;  %v6505_v54 = vrot.slane %v6503_v5, 4  ;;  %v6522_v7 = vshll.u32 %v6225_v57, 16  ;;  %v5588_v57 = vshll.u32 %v5296_v53, 16 }
 0x5c5   : > { %v6842_v21 = vadd.f32 %v6765_v12, %v6160_v28  ;;  %v5559_v28 = vor.u32 %v5557_v11, %v5556_v31  ;;  %v5569_v37 = vsel %vm8629_vm3, %v5561_v35, %v5568_v59  ;;  %v6681_v34 = vpack.c.b16 %v6660_v18, %v6659_v16 }
 0x5c6   : > { %v6508_v31 = vrot.slane %v6506_v55, 5  ;;  %v6909_v59 = vmax.f32 %v6877_v32, 0.0  ;;  %v6520_v35 = vrot.slane %v6519_v43, 4  ;;  %v6524_v55 = vrot.slane %v6522_v7, 5 }
 0x5c7   : > { %v6878_v2 = vadd.f32 %v9680_v41, %v6842_v21  ;;  %v9694_v49 = vpop.f32.mrf.mxu1  ;;  %v5295_v21 = vld [vmem:[#allocation4 + $0xe4] sm:$0xf]  ;;  %v5560_v3 = vsel %vm8629_vm3, %v7897_v23, %v5559_v28  ;;  %v5585_v23 = vshrl.u32 %v5296_v53, 16 }
 0x5c8   : > { %v5576_v11 = vshrl.u32 %v5295_v21, 16  ;;  %v5579_v16 = vshll.u32 %v5295_v21, 16 }
 0x5c9   : > { %v6910_v0 = vmax.f32 %v6878_v2, 0.0  ;;  %v6085_v24 = vpop.f32.mrf.mxu2  ;;  %v5698_v2 = vunpack.c.l.b16 %v5569_v37  ;;  %v5587_v37 = vrot.slane %v5585_v23, 7 }
 0x5ca   : > { %v6161_v33 = vadd.f32 %v6085_v24, %v5879_v44  ;;  %v5697_v44 = vunpack.c.l.b16 %v5560_v3  ;;  %v6509_v24 = vor.u32 %v6508_v31, %v6505_v54 }
 0x5cb   : > { %v7005_v12 = vmax.f32 %v6908_v9, %v6910_v0  ;;  %v5590_v7 = vor.u32 %v5588_v57, %v5587_v37 }
 0x5cc   : > { %v6767_v26 = vpop.f32.mrf.mxu3  ;;  %v5718_v28 = vpack.c.b16 %v5698_v2, %v5697_v44  ;;  %v6510_v32 = vrot.slane %v6509_v24, 4  ;;  %v5298_v44 = vld [vmem:[#allocation4 + $0xf4] sm:$0xf] }
 0x5cd   : > { %7021 = vst [vmem:[#allocation6] sm:$0xff] %v7005_v12  ;;  %v6843_v38 = vadd.f32 %v6767_v26, %v6161_v33  ;;  %v5571_v33 = vshrl.u32 %v5294_v25, 16  ;;  %v5578_v26 = vrot.slane %v5576_v11, 7  ;;  %v5598_v57 = vshrl.u32 %v5298_v44, 16 }
 0x5ce   : > { %6127 = vmatmul.bf16.gmra.mxu2 %v8222_v6  ;;  %v6227_v6 = vld [vmem:[#allocation4 + $0xe8] sm:$0xf]  ;;  %v6515_v21 = vsel %vm8652_vm6, %v6510_v32, %v9696_v13 }
 0x5cf   : > { %v6879_v60 = vadd.f32 %v9680_v41, %v6843_v38  ;;  %v5811_v0 = vpop.f32.mrf.mxu1  ;;  %v6525_v38 = vsel %vm8652_vm6, %v6520_v35, %v6524_v55  ;;  %v7898_v3 = vrot.slane %v5571_v33, 11  ;;  %v5581_v54 = vor.u32 %v5579_v16, %v5578_v26  ;;  %v5299_v16 = vld [vmem:[#allocation4 + $0xf8] sm:$0xf] }
 0x5d0   : > { %v5583_v31 = vrot.slane %v5578_v26, 4  ;;  %v6536_v53 = vshll.u32 %v6227_v6, 16  ;;  %v6540_v11 = vshrl.u32 %v6227_v6, 16  ;;  %v8223_v26 = vld [vmem:[#allocation4 + $0xd4] sm:$0xff] }
 0x5d1   : > { %v6911_v9 = vmax.f32 %v6879_v60, 0.0  ;;  %6809 = vmatmul.bf16.gmra.mxu3 %v6681_v34  ;;  %v6088_v18 = vpop.f32.mrf.mxu2  ;;  %v6527_v34 = vshrl.u32 %v6226_v62, 16  ;;  %v6530_v60 = vshll.u32 %v6226_v62, 16  ;;  %v6661_v62 = vunpack.c.l.b16 %v6515_v21 }
 0x5d2   : > { %5850 = vmatmul.bf16.gmra.mxu1 %v5718_v28  ;;  %v5591_v28 = vsel %vm8629_vm3, %v5583_v31, %v5590_v7  ;;  %v6542_v37 = vrot.slane %v6540_v11, 4  ;;  %v5882_v31 = vadd.f32 %v5811_v0, %v9428_v15  ;;  %v5610_v15 = vshll.u32 %v5299_v16, 16 }
 0x5d3   : > { %v7006_v5 = vmax.f32 %v6909_v59, %v6911_v9  ;;  %v5880_v59 = vadd.f32 %v9682_v42, %v9406_v52  ;;  %v6662_v9 = vunpack.c.l.b16 %v6525_v38  ;;  %v6529_v35 = vrot.slane %v6527_v34, 4  ;;  %v6228_v52 = vld [vmem:[#allocation4 + $0xec] sm:$0x1] }
 0x5d4   : > { %v6770_v12 = vpop.f32.mrf.mxu3  ;;  %v6532_v13 = vrot.slane %v6530_v60, 5  ;;  %v6538_v42 = vrot.slane %v6536_v53, 5  ;;  %v5700_v34 = vunpack.c.l.b16 %v5591_v28  ;;  %v6546_v21 = vshll.u32 %v6228_v52, 16  ;;  %v6230_v52 = vld [vmem:[#allocation4 + $0xf8] sm:$0xf] }
 0x5d5   : > { %7022 = vst [vmem:[#allocation6 + $0x8] sm:$0xff] %v7006_v5  ;;  %v5582_v5 = vsel %vm8629_vm3, %v7898_v3, %v5581_v54  ;;  %v6162_v33 = vadd.f32 %v6088_v18, %v5880_v59  ;;  %v6682_v38 = vpack.c.b16 %v6662_v9, %v6661_v62  ;;  %v5297_v18 = vld [vmem:[#allocation4 + $0xf0] sm:$0x8]  ;;  %v5607_v54 = vshrl.u32 %v5299_v16, 16 }
 0x5d6   : > { %v5699_v6 = vunpack.c.l.b16 %v5582_v5  ;;  %v6533_v3 = vor.u32 %v6532_v13, %v6529_v35  ;;  %v6543_v53 = vor.u32 %v6542_v37, %v6538_v42  ;;  %v5593_v11 = vshrl.u32 %v5297_v18, 16  ;;  %v6229_v35 = vld [vmem:[#allocation4 + $0xf4] sm:$0xf] }
 0x5d7   : > { %v9707_v43 = vpop.f32.mrf.mxu1  ;;  %v6844_v60 = vadd.f32 %v6770_v12, %v6162_v33  ;;  %v5881_v9 = vadd.f32 %v9694_v49, %v9419_v36  ;;  %v6548_v62 = vrot.slane %v6546_v21, 5  ;;  %v6560_v16 = vshll.u32 %v6230_v52, 16 }
 0x5d8   : > { %v5719_v28 = vpack.c.b16 %v5700_v34, %v5699_v6  ;;  %v6544_v37 = vrot.slane %v6543_v53, 4  ;;  %v6564_v18 = vshrl.u32 %v6230_v52, 16 }
 0x5d9   : > { %v6090_v2 = vpop.f32.mrf.mxu2  ;;  %v6880_v0 = vadd.f32 %v9680_v41, %v6844_v60 }
 0x5da   : > { %v6163_v12 = vadd.f32 %v6090_v2, %v5881_v9  ;;  %v5883_v2 = vadd.f32 %v9707_v43, %v9442_v10  ;;  %v6231_v9 = vld [vmem:[#allocation4 + $0xfc] sm:$0x1]  ;;  %v6562_v43 = vrot.slane %v6560_v16, 5 }
 0x5dc   : > { %v7037_v25 = vld [vmem:[#allocation6] ss:$2 sm:$0xff]  ;;  %v7053_v24 = vld [vmem:[#allocation6 + $0x1] ss:$2 sm:$0xff]  ;;  %v6772_v23 = vpop.f32.mrf.mxu3 }
 0x5dd   : > { %v7068_v55 = vmax.f32 %v7037_v25, %v7053_v24  ;;  %v5600_v25 = vrot.slane %v5598_v57, 7  ;;  %v5601_v24 = vshll.u32 %v5298_v44, 16  ;;  %v7899_v57 = vrot.slane %v5593_v11, 11 }
 0x5de   : > { %6132 = vmatmul.bf16.gmra.mxu2 %v8223_v26  ;;  %v5609_v26 = vrot.slane %v5607_v54, 7  ;;  %v6845_v54 = vadd.f32 %v6772_v23, %v6163_v12  ;;  %v6566_v23 = vrot.slane %v6564_v18, 4 }
 0x5df   : > { %v7076_v32 = vpack.c.bf16 %v7068_v55, %v7068_v55  ;;  %v9727_v59 = vpop.f32.mrf.mxu1  ;;  %v6534_v55 = vrot.slane %v6533_v3, 4  ;;  %v5603_v44 = vor.u32 %v5601_v24, %v5600_v25  ;;  %v5605_v49 = vrot.slane %v5600_v25, 4 }
 0x5e0   : > { %v5612_v34 = vor.u32 %v5610_v15, %v5609_v26  ;;  %v6912_v3 = vmax.f32 %v6880_v0, 0.0  ;;  %v5301_v15 = vld [vmem:[#allocation4 + $0x104] sm:$0xf]  ;;  %v5302_v0 = vld [vmem:[#allocation4 + $0x108] sm:$0xf] }
 0x5e1   : > { %7085 = vst.msk [vmem:[%s9722_s27] sm:$0xf] %vm7084_vm7, %v7076_v32  ;;  %6814 = vmatmul.bf16.gmra.mxu3 %v6682_v38  ;;  %v6093_v7 = vpop.f32.mrf.mxu2  ;;  %v6551_v32 = vshrl.u32 %v6229_v35, 16  ;;  %v6554_v38 = vshll.u32 %v6229_v35, 16  ;;  %v6539_v6 = vsel %vm8652_vm6, %v6534_v55, %v6538_v42  ;;  %v5604_v53 = vsel %vm8629_vm3, %v7899_v57, %v5603_v44  ;;  %v8224_v55 = vld [vmem:[#allocation4 + $0xe4] sm:$0xff] }
 0x5e2   : > { %v6164_v5 = vadd.f32 %v6093_v7, %v5882_v31  ;;  %5855 = vmatmul.bf16.gmra.mxu1 %v5719_v28  ;;  %v6549_v7 = vsel %vm8652_vm6, %v6544_v37, %v6548_v62  ;;  %v6663_v24 = vunpack.c.l.b16 %v6539_v6  ;;  %v5613_v10 = vsel %vm8629_vm3, %v5605_v49, %v5612_v34  ;;  %v5300_v44 = vld [vmem:[#allocation4 + $0x100] sm:$0x8] }
 0x5e3   : > { %v6553_v11 = vrot.slane %v6551_v32, 4  ;;  %v6881_v35 = vadd.f32 %v9680_v41, %v6845_v54  ;;  %v6664_v26 = vunpack.c.l.b16 %v6549_v7  ;;  %v5701_v12 = vunpack.c.l.b16 %v5604_v53  ;;  %v6233_v54 = vld [vmem:[#allocation4 + $0x108] sm:$0xf] }
 0x5e4   : > { %v6775_v13 = vpop.f32.mrf.mxu3  ;;  %v5702_v37 = vunpack.c.l.b16 %v5613_v10  ;;  %v6567_v32 = vor.u32 %v6566_v23, %v6562_v43  ;;  %v5629_v49 = vshrl.u32 %v5302_v0, 16  ;;  %v5623_v53 = vshll.u32 %v5301_v15, 16 }
 0x5e5   : > { %v6846_v33 = vadd.f32 %v6775_v13, %v6164_v5  ;;  %v6556_v5 = vrot.slane %v6554_v38, 5  ;;  %v6683_v52 = vpack.c.b16 %v6664_v26, %v6663_v24  ;;  %v6913_v38 = vmax.f32 %v6881_v35, 0.0 }
 0x5e6   : > { %v5631_v24 = vrot.slane %v5629_v49, 7  ;;  %v6584_v10 = vshll.u32 %v6233_v54, 16  ;;  %v6588_v23 = vshrl.u32 %v6233_v54, 16 }
 0x5e7   : > { %v6882_v36 = vadd.f32 %v9680_v41, %v6846_v33  ;;  %v9737_v21 = vpop.f32.mrf.mxu1  ;;  %v6570_v33 = vshll.u32 %v6231_v9, 16  ;;  %v6557_v57 = vor.u32 %v6556_v5, %v6553_v11  ;;  %v5632_v9 = vshll.u32 %v5302_v0, 16 }
 0x5e8   : > { %v6590_v0 = vrot.slane %v6588_v23, 4 }
 0x5e9   : > { %v6914_v31 = vmax.f32 %v6882_v36, 0.0  ;;  %v6095_v60 = vpop.f32.mrf.mxu2  ;;  %v5620_v36 = vshrl.u32 %v5301_v15, 16  ;;  %v6572_v18 = vrot.slane %v6570_v33, 5  ;;  %v6558_v7 = vrot.slane %v6557_v57, 4 }
 0x5ea   : > { %v6165_v25 = vadd.f32 %v6095_v60, %v5883_v2  ;;  %v6232_v2 = vld [vmem:[#allocation4 + $0x104] sm:$0xf]  ;;  %v5720_v60 = vpack.c.b16 %v5702_v37, %v5701_v12  ;;  %v5634_v12 = vor.u32 %v5632_v9, %v5631_v24  ;;  %v5884_v37 = vadd.f32 %v9727_v59, %v9447_v47 }
 0x5eb   : > { %v7007_v42 = vmax.f32 %v6912_v3, %v6914_v31  ;;  %v5615_v3 = vshrl.u32 %v5300_v44, 16  ;;  %v5622_v11 = vrot.slane %v5620_v36, 7  ;;  %v6575_v5 = vshrl.u32 %v6232_v2, 16 }
 0x5ec   : > { %v6777_v28 = vpop.f32.mrf.mxu3  ;;  %v6563_v35 = vsel %vm8652_vm6, %v6558_v7, %v6562_v43  ;;  %v6234_v43 = vld [vmem:[#allocation4 + $0x10c] sm:$0x1] }
 0x5ed   : > { %7023 = vst [vmem:[#allocation6 + $0x10] sm:$0xff] %v7007_v42  ;;  %v6847_v13 = vadd.f32 %v6777_v28, %v6165_v25  ;;  %v6568_v25 = vrot.slane %v6567_v32, 4  ;;  %v6578_v28 = vshll.u32 %v6232_v2, 16  ;;  %v5625_v26 = vor.u32 %v5623_v53, %v5622_v11 }
 0x5ee   : > { %6137 = vmatmul.bf16.gmra.mxu2 %v8224_v55  ;;  %v5627_v15 = vrot.slane %v5622_v11, 4  ;;  %v6577_v33 = vrot.slane %v6575_v5, 4  ;;  %v6665_v32 = vunpack.c.l.b16 %v6563_v35  ;;  %v6594_v59 = vshll.u32 %v6234_v43, 16 }
 0x5ef   : > { %v6883_v62 = vadd.f32 %v9680_v41, %v6847_v13  ;;  %v5821_v16 = vpop.f32.mrf.mxu1  ;;  %v7900_v13 = vrot.slane %v5615_v3, 11  ;;  %v6573_v55 = vsel %vm8652_vm6, %v6568_v25, %v6572_v18 }
 0x5f0   : > { %v6666_v36 = vunpack.c.l.b16 %v6573_v55  ;;  %v5635_v2 = vsel %vm8629_vm3, %v5627_v15, %v5634_v12  ;;  %v5304_v55 = vld [vmem:[#allocation4 + $0x114] sm:$0xf] }
 0x5f1   : > { %v6915_v6 = vmax.f32 %v6883_v62, 0.0  ;;  %6819 = vmatmul.bf16.gmra.mxu3 %v6683_v52  ;;  %v6098_v34 = vpop.f32.mrf.mxu2  ;;  %v6580_v62 = vrot.slane %v6578_v28, 5  ;;  %v9751_v52 = vrot.slane %v6584_v10, 5  ;;  %v5626_v3 = vsel %vm8629_vm3, %v7900_v13, %v5625_v26  ;;  %v5303_v28 = vld [vmem:[#allocation4 + $0x110] sm:$0x8] }
 0x5f2   : > { %5860 = vmatmul.bf16.gmra.mxu1 %v5720_v60  ;;  %v6684_v53 = vpack.c.b16 %v6666_v36, %v6665_v32  ;;  %v5703_v25 = vunpack.c.l.b16 %v5626_v3  ;;  %v5704_v11 = vunpack.c.l.b16 %v5635_v2  ;;  %v5885_v10 = vadd.f32 %v9737_v21, %v9459_v63  ;;  %v5305_v26 = vld [vmem:[#allocation4 + $0x118] sm:$0xf] }
 0x5f3   : > { %v7008_v31 = vmax.f32 %v6913_v38, %v6915_v6  ;;  %v6166_v6 = vadd.f32 %v6098_v34, %v5884_v37  ;;  %v6581_v60 = vor.u32 %v6580_v62, %v6577_v33  ;;  %v6591_v47 = vor.u32 %v6590_v0, %v9751_v52  ;;  %v6235_v0 = vld [vmem:[#allocation4 + $0x114] sm:$0xf] }
 0x5f4   : > { %v6780_v42 = vpop.f32.mrf.mxu3  ;;  %v5886_v34 = vadd.f32 %v5821_v16, %v9464_v39  ;;  %v6596_v13 = vrot.slane %v6594_v59, 5  ;;  %v5637_v15 = vshrl.u32 %v5303_v28, 16  ;;  %v5642_v33 = vshrl.u32 %v5304_v55, 16  ;;  %v6236_v39 = vld [vmem:[#allocation4 + $0x118] sm:$0xf] }
 0x5f5   : > { %7024 = vst [vmem:[#allocation6 + $0x18] sm:$0xff] %v7008_v31  ;;  %v8225_v31 = vld [vmem:[#allocation4 + $0xf4] sm:$0xff]  ;;  %v6848_v24 = vadd.f32 %v6780_v42, %v6166_v6  ;;  %v6582_v9 = vrot.slane %v6581_v60, 4  ;;  %v6592_v5 = vrot.slane %v6591_v47, 4  ;;  %v5721_v42 = vpack.c.b16 %v5704_v11, %v5703_v25 }
 0x5f6   : > { %v5645_v62 = vshll.u32 %v5304_v55, 16  ;;  %v5651_v36 = vshrl.u32 %v5305_v26, 16  ;;  %v5654_v43 = vshll.u32 %v5305_v26, 16  ;;  %v5644_v21 = vrot.slane %v5642_v33, 7  ;;  %v8226_v33 = vld [vmem:[#allocation4 + $0x104] sm:$0xff] }
 0x5f7   : > { %v5823_v44 = vpop.f32.mrf.mxu1  ;;  %v6884_v16 = vadd.f32 %v9680_v41, %v6848_v24  ;;  %v7901_v6 = vrot.slane %v5637_v15, 11  ;;  %v6608_v2 = vshll.u32 %v6236_v39, 16  ;;  %v6587_v60 = vsel %vm8652_vm6, %v6582_v9, %v9751_v52 }
 0x5f8   : > { %v5653_v3 = vrot.slane %v5651_v36, 7  ;;  %v5647_v47 = vor.u32 %v5645_v62, %v5644_v21 }
 0x5f9   : > { %v6100_v57 = vpop.f32.mrf.mxu2  ;;  %v6916_v59 = vmax.f32 %v6884_v16, 0.0  ;;  %v6610_v9 = vrot.slane %v6608_v2, 5 }
 0x5fa   : > { %v6167_v37 = vadd.f32 %v6100_v57, %v5885_v10  ;;  %v5649_v57 = vrot.slane %v5644_v21, 4  ;;  %v5656_v25 = vor.u32 %v5654_v43, %v5653_v3  ;;  %v5648_v55 = vsel %vm8629_vm3, %v7901_v6, %v5647_v47 }
 0x5fb   : > { %v5705_v62 = vunpack.c.l.b16 %v5648_v55 }
 0x5fc   : > { %v7039_v49 = vld [vmem:[#allocation6 + $0x10] ss:$2 sm:$0xff]  ;;  %v7055_v38 = vld [vmem:[#allocation6 + $0x11] ss:$2 sm:$0xff]  ;;  %v6782_v18 = vpop.f32.mrf.mxu3  ;;  %v5657_v52 = vsel %vm8629_vm3, %v5649_v57, %v5656_v25 }
 0x5fd   : > { %v7069_v54 = vmax.f32 %v7039_v49, %v7055_v38  ;;  %v6599_v49 = vshrl.u32 %v6235_v0, 16  ;;  %v6602_v38 = vshll.u32 %v6235_v0, 16  ;;  %v6849_v11 = vadd.f32 %v6782_v18, %v6167_v37  ;;  %v8227_v25 = vld [vmem:[#allocation4 + $0x114] sm:$0xff] }
 0x5fe   : > { %6142 = vmatmul.bf16.gmra.mxu2 %v8225_v31  ;;  %v5706_v0 = vunpack.c.l.b16 %v5657_v52 }
 0x5ff   : > { %v7077_v7 = vpack.c.bf16 %v7069_v54, %v7069_v54  ;;  %v9765_v35 = vpop.f32.mrf.mxu1  ;;  %v6612_v54 = vshrl.u32 %v6236_v39, 16  ;;  %v6604_v28 = vrot.slane %v6602_v38, 5  ;;  %v6885_v18 = vadd.f32 %v9680_v41, %v6849_v11 }
 0x601   : > { %7086 = vst.msk [vmem:[%s9722_s27 + $0x4] sm:$0xf] %vm7084_vm7, %v7077_v7  ;;  %6824 = vmatmul.bf16.gmra.mxu3 %v6684_v53  ;;  %v6103_v23 = vpop.f32.mrf.mxu2  ;;  %v5887_v7 = vadd.f32 %v5823_v44, %v9475_v14  ;;  %v6597_v53 = vsel %vm8652_vm6, %v6592_v5, %v6596_v13  ;;  %v6614_v26 = vrot.slane %v6612_v54, 4  ;;  %v6667_v44 = vunpack.c.l.b16 %v6587_v60  ;;  %v6237_v5 = vld [vmem:[#allocation4 + $0x11c] sm:$0x1] }
 0x602   : > { %v6168_v12 = vadd.f32 %v6103_v23, %v5886_v34  ;;  %5865 = vmatmul.bf16.gmra.mxu1 %v5721_v42  ;;  %v6601_v34 = vrot.slane %v6599_v49, 4  ;;  %v6618_v37 = vshll.u32 %v6237_v5, 16  ;;  %v6917_v36 = vmax.f32 %v6885_v18, 0.0 }
 0x603   : > { %v6615_v16 = vor.u32 %v6614_v26, %v6610_v9 }
 0x604   : > { %v6785_v32 = vpop.f32.mrf.mxu3  ;;  %v6605_v39 = vor.u32 %v6604_v28, %v6601_v34  ;;  %v6620_v3 = vrot.slane %v6618_v37, 5 }
 0x605   : > { %v6850_v63 = vadd.f32 %v6785_v32, %v6168_v12  ;;  %v6668_v12 = vunpack.c.l.b16 %v6597_v53  ;;  %v6616_v6 = vrot.slane %v6615_v16, 4  ;;  %v5888_v53 = vadd.f32 %v9765_v35, %v9480_v20 }
 0x606   : > { %v6606_v38 = vrot.slane %v6605_v39, 4 }
 0x607   : > { %v6886_v31 = vadd.f32 %v9680_v41, %v6850_v63  ;;  %v5828_v23 = vpop.f32.mrf.mxu1  ;;  %v6685_v32 = vpack.c.b16 %v6668_v12, %v6667_v44  ;;  %v5722_v63 = vpack.c.b16 %v5706_v0, %v5705_v62  ;;  %v6621_v60 = vsel %vm8652_vm6, %v6616_v6, %v6620_v3 }
 0x608   : > { %v6670_v57 = vunpack.c.l.b16 %v6621_v60 }
 0x609   : > { %v6918_v24 = vmax.f32 %v6886_v31, 0.0  ;;  %v6105_v10 = vpop.f32.mrf.mxu2  ;;  %v6611_v31 = vsel %vm8652_vm6, %v6606_v38, %v6610_v9 }
 0x60a   : > { %v6169_v14 = vadd.f32 %v6105_v10, %v5887_v7  ;;  %v6669_v47 = vunpack.c.l.b16 %v6611_v31 }
 0x60b   : > { %v7009_v15 = vmax.f32 %v6916_v59, %v6918_v24 }
 0x60c   : > { %v6787_v13 = vpop.f32.mrf.mxu3  ;;  %v6686_v55 = vpack.c.b16 %v6670_v57, %v6669_v47 }
 0x60d   : > { %7025 = vst [vmem:[#allocation6 + $0x20] sm:$0xff] %v7009_v15  ;;  %v6851_v42 = vadd.f32 %v6787_v13, %v6169_v14  ;;  %v5889_v14 = vadd.f32 %v5828_v23, %v9489_v17 }
 0x60e   : > { %6147 = vmatmul.bf16.gmra.mxu2 %v8226_v33 }
 0x60f   : > { %v6887_v8 = vadd.f32 %v9680_v41, %v6851_v42  ;;  %v5831_v49 = vpop.f32.mrf.mxu1 }
 0x610   : > { %v5890_v46 = vadd.f32 %v5831_v49, %v9496_v29 }
 0x611   : > { %v6919_v43 = vmax.f32 %v6887_v8, 0.0  ;;  %6829 = vmatmul.bf16.gmra.mxu3 %v6685_v32  ;;  %v6108_v21 = vpop.f32.mrf.mxu2 }
 0x612   : > { %5870 = vmatmul.bf16.gmra.mxu1 %v5722_v63  ;;  %v6170_v10 = vadd.f32 %v6108_v21, %v5888_v53 }
 0x613   : > { %v7010_v2 = vmax.f32 %v6917_v36, %v6919_v43 }
 0x614   : > { %v6790_v54 = vpop.f32.mrf.mxu3 }
 0x615   : > { %7026 = vst [vmem:[#allocation6 + $0x28] sm:$0xff] %v7010_v2  ;;  %v6852_v9 = vadd.f32 %v6790_v54, %v6170_v10 }
 0x617   : > { %v5833_v7 = vpop.f32.mrf.mxu1  ;;  %v6888_v44 = vadd.f32 %v9680_v41, %v6852_v9 }
 0x618   : > { %v5891_v42 = vadd.f32 %v5833_v7, %v9507_v4 }
 0x619   : > { %v6110_v59 = vpop.f32.mrf.mxu2  ;;  %v6920_v18 = vmax.f32 %v6888_v44, 0.0 }
 0x61a   : > { %v6171_v12 = vadd.f32 %v6110_v59, %v5889_v14 }
 0x61c   : > { %v7041_v11 = vld [vmem:[#allocation6 + $0x20] ss:$2 sm:$0xff]  ;;  %v7057_v24 = vld [vmem:[#allocation6 + $0x21] ss:$2 sm:$0xff]  ;;  %v6792_v34 = vpop.f32.mrf.mxu3 }
 0x61d   : > { %v7070_v28 = vmax.f32 %v7041_v11, %v7057_v24  ;;  %v6853_v33 = vadd.f32 %v6792_v34, %v6171_v12 }
 0x61e   : > { %6152 = vmatmul.bf16.gmra.mxu2 %v8227_v25 }
 0x61f   : > { %v7078_v52 = vpack.c.bf16 %v7070_v28, %v7070_v28  ;;  %v5836_v15 = vpop.f32.mrf.mxu1  ;;  %v6889_v17 = vadd.f32 %v9680_v41, %v6853_v33 }
 0x620   : > { %v5892_v6 = vadd.f32 %v5836_v15, %v9515_v50 }
 0x621   : > { %7087 = vst.msk [vmem:[%s9722_s27 + $0x8] sm:$0xf] %vm7084_vm7, %v7078_v52  ;;  %6834 = vmatmul.bf16.gmra.mxu3 %v6686_v55  ;;  %v6113_v26 = vpop.f32.mrf.mxu2  ;;  %v6921_v32 = vmax.f32 %v6889_v17, 0.0 }
 0x622   : > { %v6172_v20 = vadd.f32 %v6113_v26, %v5890_v46 }
 0x624   : > { %v6795_v35 = vpop.f32.mrf.mxu3 }
 0x625   : > { %v6854_v5 = vadd.f32 %v6795_v35, %v6172_v20 }
 0x627   : > { %v6890_v13 = vadd.f32 %v9680_v41, %v6854_v5  ;;  %v5838_v0 = vpop.f32.mrf.mxu1 }
 0x628   : > { %v5893_v25 = vadd.f32 %v5838_v0, %v9527_v1 }
 0x629   : > { %v6922_v62 = vmax.f32 %v6890_v13, 0.0  ;;  %v6115_v29 = vpop.f32.mrf.mxu2 }
 0x62a   : > { %v6173_v16 = vadd.f32 %v6115_v29, %v5891_v42 }
 0x62b   : > { %v7011_v39 = vmax.f32 %v6920_v18, %v6922_v62 }
 0x62c   : > { %v6797_v37 = vpop.f32.mrf.mxu3 }
 0x62d   : > { %7027 = vst [vmem:[#allocation6 + $0x30] sm:$0xff] %v7011_v39  ;;  %v6855_v23 = vadd.f32 %v6797_v37, %v6173_v16 }
 0x62f   : > { %v6891_v8 = vadd.f32 %v9680_v41, %v6855_v23  ;;  %v5841_v63 = vpop.f32.mrf.mxu1 }
 0x630   : > { %v5894_v57 = vadd.f32 %v5841_v63, %v9535_v45 }
 0x631   : > { %v6923_v36 = vmax.f32 %v6891_v8, 0.0  ;;  %v6118_v43 = vpop.f32.mrf.mxu2 }
 0x632   : > { %v6174_v60 = vadd.f32 %v6118_v43, %v5892_v6 }
 0x633   : > { %v7012_v21 = vmax.f32 %v6921_v32, %v6923_v36 }
 0x634   : > { %v6800_v4 = vpop.f32.mrf.mxu3 }
 0x635   : > { %7028 = vst [vmem:[#allocation6 + $0x38] sm:$0xff] %v7012_v21  ;;  %v6856_v59 = vadd.f32 %v6800_v4, %v6174_v60 }
 0x637   : > { %v5843_v38 = vpop.f32.mrf.mxu1  ;;  %v6892_v34 = vadd.f32 %v9680_v41, %v6856_v59 }
 0x638   : > { %v5895_v52 = vadd.f32 %v5843_v38, %v9547_v61 }
 0x639   : > { %v6120_v49 = vpop.f32.mrf.mxu2  ;;  %v6924_v55 = vmax.f32 %v6892_v34, 0.0 }
 0x63a   : > { %v6175_v50 = vadd.f32 %v6120_v49, %v5893_v25 }
 0x63c   : > { %v7043_v3 = vld [vmem:[#allocation6 + $0x30] ss:$2 sm:$0xff]  ;;  %v7059_v2 = vld [vmem:[#allocation6 + $0x31] ss:$2 sm:$0xff]  ;;  %v6802_v54 = vpop.f32.mrf.mxu3 }
 0x63d   : > { %v7071_v31 = vmax.f32 %v7043_v3, %v7059_v2  ;;  %v6857_v46 = vadd.f32 %v6802_v54, %v6175_v50 }
 0x63f   : > { %v7079_v47 = vpack.c.bf16 %v7071_v31, %v7071_v31  ;;  %v5846_v53 = vpop.f32.mrf.mxu1  ;;  %v6893_v1 = vadd.f32 %v9680_v41, %v6857_v46 }
 0x640   : > { %v5896_v29 = vadd.f32 %v5846_v53, %v9555_v58 }
 0x641   : > { %7088 = vst.msk [vmem:[%s9722_s27 + $0xc] sm:$0xf] %vm7084_vm7, %v7079_v47  ;;  %v6123_v7 = vpop.f32.mrf.mxu2  ;;  %v6925_v12 = vmax.f32 %v6893_v1, 0.0 }
 0x642   : > { %v6176_v11 = vadd.f32 %v6123_v7, %v5894_v57 }
 0x644   : > { %v6805_v24 = vpop.f32.mrf.mxu3 }
 0x645   : > { %v6858_v28 = vadd.f32 %v6805_v24, %v6176_v11 }
 0x647   : > { %v6894_v10 = vadd.f32 %v9680_v41, %v6858_v28  ;;  %v5848_v45 = vpop.f32.mrf.mxu1 }
 0x648   : > { %v5897_v63 = vadd.f32 %v5848_v45, %v9567_v22 }
 0x649   : > { %v6926_v9 = vmax.f32 %v6894_v10, 0.0  ;;  %v6125_v26 = vpop.f32.mrf.mxu2 }
 0x64a   : > { %v6177_v14 = vadd.f32 %v6125_v26, %v5895_v52 }
 0x64b   : > { %v7013_v15 = vmax.f32 %v6924_v55, %v6926_v9 }
 0x64c   : > { %v6807_v20 = vpop.f32.mrf.mxu3 }
 0x64d   : > { %7029 = vst [vmem:[#allocation6 + $0x40] sm:$0xff] %v7013_v15  ;;  %v6859_v35 = vadd.f32 %v6807_v20, %v6177_v14 }
 0x64f   : > { %v6895_v44 = vadd.f32 %v9680_v41, %v6859_v35  ;;  %v5851_v18 = vpop.f32.mrf.mxu1 }
 0x650   : > { %v5898_v8 = vadd.f32 %v5851_v18, %v9575_v51 }
 0x651   : > { %v6927_v5 = vmax.f32 %v6895_v44, 0.0  ;;  %v6128_v13 = vpop.f32.mrf.mxu2 }
 0x652   : > { %v6178_v17 = vadd.f32 %v6128_v13, %v5896_v29 }
 0x653   : > { %v7014_v42 = vmax.f32 %v6925_v12, %v6927_v5 }
 0x654   : > { %v6810_v61 = vpop.f32.mrf.mxu3 }
 0x655   : > { %7030 = vst [vmem:[#allocation6 + $0x48] sm:$0xff] %v7014_v42  ;;  %v6860_v32 = vadd.f32 %v6810_v61, %v6178_v17 }
 0x657   : > { %v5853_v62 = vpop.f32.mrf.mxu1  ;;  %v6896_v49 = vadd.f32 %v9680_v41, %v6860_v32 }
 0x658   : > { %v5899_v2 = vadd.f32 %v5853_v62, %v9587_v19 }
 0x659   : > { %v6130_v33 = vpop.f32.mrf.mxu2  ;;  %v6928_v3 = vmax.f32 %v6896_v49, 0.0 }
 0x65a   : > { %v6179_v58 = vadd.f32 %v6130_v33, %v5897_v63 }
 0x65c   : > { %v7045_v0 = vld [vmem:[#allocation6 + $0x40] ss:$2 sm:$0xff]  ;;  %v7061_v39 = vld [vmem:[#allocation6 + $0x41] ss:$2 sm:$0xff]  ;;  %v6812_v16 = vpop.f32.mrf.mxu3 }
 0x65d   : > { %v7072_v37 = vmax.f32 %v7045_v0, %v7061_v39  ;;  %v6861_v54 = vadd.f32 %v6812_v16, %v6179_v58 }
 0x65f   : > { %v7080_v23 = vpack.c.bf16 %v7072_v37, %v7072_v37  ;;  %v5856_v43 = vpop.f32.mrf.mxu1  ;;  %v6897_v22 = vadd.f32 %v9680_v41, %v6861_v54 }
 0x660   : > { %v5900_v10 = vadd.f32 %v5856_v43, %v9595_v27 }
 0x661   : > { %7089 = vst.msk [vmem:[%s9722_s27 + $0x10] sm:$0xf] %vm7084_vm7, %v7080_v23  ;;  %v6133_v36 = vpop.f32.mrf.mxu2  ;;  %v6929_v25 = vmax.f32 %v6897_v22, 0.0  ;;  %v8314_v22 = vld [vmem:[#allocation12] ss:$0 sm:$0xff] }
 0x662   : > { %v6180_v21 = vadd.f32 %v6133_v36, %v5898_v8 }
 0x664   : > { %v6815_v4 = vpop.f32.mrf.mxu3 }
 0x665   : > { %v6862_v38 = vadd.f32 %v6815_v4, %v6180_v21 }
 0x667   : > { %v6898_v6 = vadd.f32 %v9680_v41, %v6862_v38  ;;  %v5858_v51 = vpop.f32.mrf.mxu1 }
 0x668   : > { %v5901_v35 = vadd.f32 %v5858_v51, %v9608_v40  ;;  %v9903_v51 = vld [vmem:[#allocation17_spill] sm:$0xff] }
 0x669   : > { %v6930_v31 = vmax.f32 %v6898_v6, 0.0  ;;  %v6135_v60 = vpop.f32.mrf.mxu2 }
 0x66a   : > { %v6181_v57 = vadd.f32 %v6135_v60, %v5899_v2 }
 0x66b   : > { %v7015_v47 = vmax.f32 %v6928_v3, %v6930_v31 }
 0x66c   : > { %v6817_v59 = vpop.f32.mrf.mxu3 }
 0x66d   : > { %7031 = vst [vmem:[#allocation6 + $0x50] sm:$0xff] %v7015_v47  ;;  %v6863_v7 = vadd.f32 %v6817_v59, %v6181_v57 }
 0x66f   : > { %v6899_v53 = vadd.f32 %v9680_v41, %v6863_v7  ;;  %v5861_v50 = vpop.f32.mrf.mxu1 }
 0x670   : > { %v5902_v14 = vadd.f32 %v5861_v50, %v9614_v30 }
 0x671   : > { %v6931_v11 = vmax.f32 %v6899_v53, 0.0  ;;  %v6138_v24 = vpop.f32.mrf.mxu2 }
 0x672   : > { %v6182_v26 = vadd.f32 %v6138_v24, %v5900_v10 }
 0x673   : > { %v7016_v34 = vmax.f32 %v6929_v25, %v6931_v11 }
 0x674   : > { %v6820_v19 = vpop.f32.mrf.mxu3 }
 0x675   : > { %7032 = vst [vmem:[#allocation6 + $0x58] sm:$0xff] %v7016_v34  ;;  %v6864_v20 = vadd.f32 %v6820_v19, %v6182_v26  ;;  %v9904_v34 = vld [vmem:[#allocation20_spill] sm:$0xff] }
 0x677   : > { %v5863_v45 = vpop.f32.mrf.mxu1  ;;  %v6900_v5 = vadd.f32 %v9680_v41, %v6864_v20 }
 0x678   : > { %v5903_v33 = vadd.f32 %v5863_v45, %v9626_v48 }
 0x679   : > { %v6140_v28 = vpop.f32.mrf.mxu2  ;;  %v6932_v61 = vmax.f32 %v6900_v5, 0.0 }
 0x67a   : > { %v6183_v27 = vadd.f32 %v6140_v28, %v5901_v35 }
 0x67c   : > { %v7047_v55 = vld [vmem:[#allocation6 + $0x50] ss:$2 sm:$0xff]  ;;  %v7063_v52 = vld [vmem:[#allocation6 + $0x51] ss:$2 sm:$0xff]  ;;  %v6822_v46 = vpop.f32.mrf.mxu3 }
 0x67d   : > { %v7073_v9 = vmax.f32 %v7047_v55, %v7063_v52  ;;  %v6865_v62 = vadd.f32 %v6822_v46, %v6183_v27 }
 0x67f   : > { %v7081_v15 = vpack.c.bf16 %v7073_v9, %v7073_v9  ;;  %v5866_v42 = vpop.f32.mrf.mxu1  ;;  %v6901_v40 = vadd.f32 %v9680_v41, %v6865_v62 }
 0x680   : > { %v5904_v21 = vadd.f32 %v5866_v42, %v9632_v56 }
 0x681   : > { %7090 = vst.msk [vmem:[%s9722_s27 + $0x14] sm:$0xf] %vm7084_vm7, %v7081_v15  ;;  %v6143_v1 = vpop.f32.mrf.mxu2  ;;  %v6933_v23 = vmax.f32 %v6901_v40, 0.0 }
 0x682   : > { %v6184_v44 = vadd.f32 %v6143_v1, %v5902_v14 }
 0x684   : > { %v6825_v12 = vpop.f32.mrf.mxu3 }
 0x685   : > { %v6866_v13 = vadd.f32 %v6825_v12, %v6184_v44 }
 0x687   : > { %v6902_v18 = vadd.f32 %v9680_v41, %v6866_v13  ;;  %v5868_v32 = vpop.f32.mrf.mxu1 }
 0x688   : > { %v5905_v47 = vadd.f32 %v5868_v32, %v9903_v51 }
 0x689   : > { %v6934_v29 = vmax.f32 %v6902_v18, 0.0  ;;  %v6145_v0 = vpop.f32.mrf.mxu2 }
 0x68a   : > { %v6185_v39 = vadd.f32 %v6145_v0, %v5903_v33 }
 0x68b   : > { %v7017_v30 = vmax.f32 %v6932_v61, %v6934_v29 }
 0x68c   : > { %v6827_v16 = vpop.f32.mrf.mxu3 }
 0x68d   : > { %7033 = vst [vmem:[#allocation6 + $0x60] sm:$0xff] %v7017_v30  ;;  %v6867_v37 = vadd.f32 %v6827_v16, %v6185_v39 }
 0x68f   : > { %v6903_v17 = vadd.f32 %v9680_v41, %v6867_v37  ;;  %v5871_v58 = vpop.f32.mrf.mxu1  ;;  %v9902_v41 = vld [vmem:[#allocation18_spill] sm:$0xff] }
 0x690   : > { %v5906_v54 = vadd.f32 %v5871_v58, %v9902_v41 }
 0x691   : > { %v6935_v8 = vmax.f32 %v6903_v17, 0.0  ;;  %v6148_v36 = vpop.f32.mrf.mxu2 }
 0x692   : > { %v6186_v3 = vadd.f32 %v6148_v36, %v5904_v21 }
 0x693   : > { %v7018_v43 = vmax.f32 %v6933_v23, %v6935_v8 }
 0x694   : > { %v6830_v63 = vpop.f32.mrf.mxu3 }
 0x695   : > { %7034 = vst [vmem:[#allocation6 + $0x68] sm:$0xff] %v7018_v43  ;;  %v6868_v31 = vadd.f32 %v6830_v63, %v6186_v3 }
 0x697   : > { %v6904_v7 = vadd.f32 %v8314_v22, %v6868_v31  ;;  %v5873_v25 = vpop.f32.mrf.mxu1 }
 0x698   : > { %v5907_v50 = vadd.f32 %v5873_v25, %v9904_v34 }
 0x699   : > { %v6150_v48 = vpop.f32.mrf.mxu2  ;;  %v6936_v24 = vmax.f32 %v6904_v7, 0.0 }
 0x69a   : > { %v6187_v56 = vadd.f32 %v6150_v48, %v5905_v47 }
 0x69c   : > { %v7049_v4 = vld [vmem:[#allocation6 + $0x60] ss:$2 sm:$0xff]  ;;  %v7065_v49 = vld [vmem:[#allocation6 + $0x61] ss:$2 sm:$0xff]  ;;  %v6832_v38 = vpop.f32.mrf.mxu3 }
 0x69d   : > { %v7074_v6 = vmax.f32 %v7049_v4, %v7065_v49  ;;  %v6869_v19 = vadd.f32 %v6832_v38, %v6187_v56 }
 0x69f   : > { %v7082_v2 = vpack.c.bf16 %v7074_v6, %v7074_v6  ;;  %v6905_v9 = vadd.f32 %v8314_v22, %v6869_v19 }
 0x6a1   : > { %7091 = vst.msk [vmem:[%s9722_s27 + $0x18] sm:$0xf] %vm7084_vm7, %v7082_v2  ;;  %v6153_v60 = vpop.f32.mrf.mxu2  ;;  %v6937_v15 = vmax.f32 %v6905_v9, 0.0 }
 0x6a2   : > { %v6188_v57 = vadd.f32 %v6153_v60, %v5906_v54 }
 0x6a4   : > { %v6835_v59 = vpop.f32.mrf.mxu3 }
 0x6a5   : > { %v6870_v53 = vadd.f32 %v6835_v59, %v6188_v57 }
 0x6a7   : > { %v6906_v11 = vadd.f32 %v8314_v22, %v6870_v53 }
 0x6a9   : > { %v6938_v28 = vmax.f32 %v6906_v11, 0.0  ;;  %v6155_v10 = vpop.f32.mrf.mxu2 }
 0x6aa   : > { %v6189_v52 = vadd.f32 %v6155_v10, %v5907_v50 }
 0x6ab   : > { %v7019_v55 = vmax.f32 %v6936_v24, %v6938_v28 }
 0x6ac   : > { %v6837_v46 = vpop.f32.mrf.mxu3 }
 0x6ad   : > { %7035 = vst [vmem:[#allocation6 + $0x70] sm:$0xff] %v7019_v55  ;;  %v6871_v26 = vadd.f32 %v6837_v46, %v6189_v52 }
 0x6af   : > { %v6907_v45 = vadd.f32 %v8314_v22, %v6871_v26 }
 0x6b1   : > { %v6939_v14 = vmax.f32 %v6907_v45, 0.0 }
 0x6b3   : > { %v7020_v20 = vmax.f32 %v6937_v15, %v6939_v14 }
 0x6b5   : > { %7036 = vst [vmem:[#allocation6 + $0x78] sm:$0xff] %v7020_v20 }
 0x6bc   : > { %v7051_v1 = vld [vmem:[#allocation6 + $0x70] ss:$2 sm:$0xff]  ;;  %v7067_v35 = vld [vmem:[#allocation6 + $0x71] ss:$2 sm:$0xff] }
 0x6bd   : > { %v7075_v44 = vmax.f32 %v7051_v1, %v7067_v35 }
 0x6bf   : > { %v7083_v12 = vpack.c.bf16 %v7075_v44, %v7075_v44 }
 0x6c1   : > { %7092 = vst.msk [vmem:[%s9722_s27 + $0x1c] sm:$0xf] %vm7084_vm7, %v7083_v12 }
 0x6c2 PF: > { %s18_s18 = sadd.s32 1, %s8453_s18  }
 0x6c3   : > { %p15_p7 = scmp.ge.s32.totalorder %s18_s18, 4  }
 0x6c5   :  { %17 = sbr.rel (!%p15_p7) target bundleno = 3 (0x3), region = 177 }
 0x6ca   :  { %7114 = vsyncpa [#allocation8], 1 }
 0x6cb   :  { %7116 = vsyncpa [#allocation8 + $0x1], 1 }
 0x6cc   :  { %7117 = vsyncpa [#allocation10], 1 }
 0x6cd   :  { %7118 = vsyncpa [#allocation13], 1 }

</bundles_post_ra>
